<compile_context>
chip_gen: v5e
topology: v5e:2x2
jax: 0.10.0
libtpu: 0.0.40
codegen_flags: <defaults>
</compile_context>

<pallas_src>
import jax
import jax.numpy as jnp
from jax.experimental import pallas as pl
from jax.experimental.pallas import tpu as pltpu


# ---------------------------------------------------------------------------
# Pallas kernel: whole MLP trunk + fused (padded) head for one batch tile.
# ---------------------------------------------------------------------------
def densenet_kernel(
    x_ref,                      # (tile_b, 512) bf16
    w1_ref, b1_ref,             # (512, 512) bf16, (1, 512) f32
    w2_ref, b2_ref,             # (512, 512) bf16, (1, 512) f32
    w3_ref, b3_ref,             # (512, 256) bf16, (1, 256) f32
    wh_ref, bh_ref,             # (256, 128) bf16, (1, 128) f32   (fused heads, padded)
    out_ref,                    # (tile_b, 128) f32
):
    def layer(h, w_ref, b_ref):
        # MXU matmul (bf16 inputs, f32 accumulate) + bias + ReLU, back to bf16.
        y = jnp.dot(h, w_ref[...], preferred_element_type=jnp.float32) + b_ref[...]
        return jnp.maximum(y, 0.0).astype(jnp.bfloat16)

    h = layer(x_ref[...], w1_ref, b1_ref)   # 512 -> 512
    h = layer(h, w2_ref, b2_ref)            # 512 -> 512
    h = layer(h, w3_ref, b3_ref)            # 512 -> 256

    # Fused classif+supervision head, lane-dense 128-wide output (f32).
    out_ref[...] = (
        jnp.dot(h, wh_ref[...], preferred_element_type=jnp.float32) + bh_ref[...]
    )


# ---------------------------------------------------------------------------
# Wrapper
# ---------------------------------------------------------------------------
def densenet_forward(x, kernel_params, n_class, n_sup=32, *, tile_b=256):
    """x: (B, 512) float32.  Returns (classif (B, n_class), supervision (B, n_sup))."""
    B, D_in = x.shape
    assert D_in == 512

    w1, b1, w2, b2, w3, b3, wh, bh = kernel_params
    n_head_pad = wh.shape[1]                      # padded to a multiple of 128

    # Pad batch to a multiple of tile_b; compute in bf16 (f32 accumulation).
    B_pad = ((B + tile_b - 1) // tile_b) * tile_b
    x_bf = x.astype(jnp.bfloat16)
    if B_pad != B:
        x_bf = jnp.pad(x_bf, ((0, B_pad - B), (0, 0)))

    grid = (B_pad // tile_b,)

    def resident(a):
        # Whole array VMEM-resident; same block every grid step.
        nd = a.ndim
        return pl.BlockSpec(a.shape, lambda i, _nd=nd: (0,) * _nd)

    in_specs = [
        pl.BlockSpec((tile_b, 512), lambda i: (i, 0)),   # x tile
        resident(w1), resident(b1),
        resident(w2), resident(b2),
        resident(w3), resident(b3),
        resident(wh), resident(bh),
    ]
    out_specs = pl.BlockSpec((tile_b, n_head_pad), lambda i: (i, 0))
    out_shape = jax.ShapeDtypeStruct((B_pad, n_head_pad), jnp.float32)

    out = pl.pallas_call(
        densenet_kernel,
        out_shape=out_shape,
        grid_spec=pltpu.PrefetchScalarGridSpec(
            num_scalar_prefetch=0,
            grid=grid,
            in_specs=in_specs,
            out_specs=out_specs,
        ),
        compiler_params=pltpu.CompilerParams(
            dimension_semantics=("parallel",),
        ),
    )(x_bf, w1, b1, w2, b2, w3, b3, wh, bh)

    classif = out[:B, :n_class]
    supervision = out[:B, n_class:n_class + n_sup]
    return classif, supervision


# ---------------------------------------------------------------------------
# Parameter construction (synthetic init mimicking the PyTorch module) and
# offline folding / fusing into the kernel's parameter layout.
# ---------------------------------------------------------------------------
def make_raw_params(key, n_class, n_sup=32):
    """PyTorch-style params: Linear (in,out) weights + BN (gamma,beta,mean,var)."""
    def linear(key, fan_in, fan_out):
        kw, kb = jax.random.split(key)
        bound = 1.0 / jnp.sqrt(fan_in)
        w = jax.random.uniform(kw, (fan_in, fan_out), jnp.float32, -bound, bound)
        b = jax.random.uniform(kb, (fan_out,), jnp.float32, -bound, bound)
        return w, b

    def bn(key, dim):
        kg, kb, km, kv = jax.random.split(key, 4)
        gamma = 1.0 + 0.1 * jax.random.normal(kg, (dim,), jnp.float32)
        beta = 0.1 * jax.random.normal(kb, (dim,), jnp.float32)
        mean = 0.1 * jax.random.normal(km, (dim,), jnp.float32)
        var = 1.0 + 0.1 * jax.random.uniform(kv, (dim,), jnp.float32)
        return gamma, beta, mean, var

    keys = jax.random.split(key, 8)
    w1, b1 = linear(keys[0], 512, 512)
    bn1 = bn(keys[1], 512)
    w2, b2 = linear(keys[2], 512, 512)
    bn2 = bn(keys[3], 512)
    w3, b3 = linear(keys[4], 512, 256)
    bn3 = bn(keys[5], 256)
    wc, bc = linear(keys[6], 256, n_class)
    ws, bs = linear(keys[7], 256, n_sup)
    return dict(w1=w1, b1=b1, bn1=bn1, w2=w2, b2=b2, bn2=bn2,
                w3=w3, b3=b3, bn3=bn3, wc=wc, bc=bc, ws=ws, bs=bs)


def prepare_kernel_params(raw, n_class, n_sup=32, eps=1e-5):
    """Fold eval-mode BN into W/b, fuse + pad the two heads, cast weights to bf16."""
    def fold(w, b, bn_p):
        gamma, beta, mean, var = bn_p
        scale = gamma / jnp.sqrt(var + eps)
        w_f = w * scale[None, :]
        b_f = b * scale + (beta - mean * scale)
        return w_f, b_f

    w1, b1 = fold(raw["w1"], raw["b1"], raw["bn1"])
    w2, b2 = fold(raw["w2"], raw["b2"], raw["bn2"])
    w3, b3 = fold(raw["w3"], raw["b3"], raw["bn3"])

    # Fuse the two heads and pad the output feature dim to a multiple of 128.
    n_head = n_class + n_sup
    n_head_pad = ((n_head + 127) // 128) * 128
    wh = jnp.concatenate([raw["wc"], raw["ws"]], axis=1)
    bh = jnp.concatenate([raw["bc"], raw["bs"]], axis=0)
    wh = jnp.pad(wh, ((0, 0), (0, n_head_pad - n_head)))
    bh = jnp.pad(bh, ((0, n_head_pad - n_head),))

    def cast_w(w):
        return w.astype(jnp.bfloat16)

    def cast_b(b):
        return b.reshape(1, -1).astype(jnp.float32)

    return (cast_w(w1), cast_b(b1),
            cast_w(w2), cast_b(b2),
            cast_w(w3), cast_b(b3),
            cast_w(wh), cast_b(bh))


# ---------------------------------------------------------------------------
# Pure-JAX references for correctness checks.
# ---------------------------------------------------------------------------
def reference_forward_f32(x, raw, eps=1e-5):
    """Exact eval-mode module semantics in f32 (dropout = identity)."""
    def layer(h, w, b, bn_p):
        gamma, beta, mean, var = bn_p
        y = h @ w + b
        y = (y - mean) / jnp.sqrt(var + eps) * gamma + beta
        return jnp.maximum(y, 0.0)

    h = layer(x, raw["w1"], raw["b1"], raw["bn1"])
    h = layer(h, raw["w2"], raw["b2"], raw["bn2"])
    h = layer(h, raw["w3"], raw["b3"], raw["bn3"])
    return h @ raw["wc"] + raw["bc"], h @ raw["ws"] + raw["bs"]


def reference_forward_bf16(x, kparams, n_class, n_sup=32):
    """Mirrors the kernel's bf16/f32 arithmetic exactly (for a tight check)."""
    w1, b1, w2, b2, w3, b3, wh, bh = kparams

    def layer(h, w, b):
        y = jnp.dot(h, w, preferred_element_type=jnp.float32) + b
        return jnp.maximum(y, 0.0).astype(jnp.bfloat16)

    h = layer(x.astype(jnp.bfloat16), w1, b1)
    h = layer(h, w2, b2)
    h = layer(h, w3, b3)
    out = jnp.dot(h, wh, preferred_element_type=jnp.float32) + bh
    return out[:, :n_class], out[:, n_class:n_class + n_sup]


if __name__ == "__main__":
    n_class = 12   # VisDA-C has 12 classes
    n_sup = 32
    B = 8          # small test batch; padded internally to the 256-row MXU tile

    key = jax.random.PRNGKey(0)
    kx, kp = jax.random.split(key)
    x = jax.random.normal(kx, (B, 512), jnp.float32)

    raw = make_raw_params(kp, n_class, n_sup)
    kparams = prepare_kernel_params(raw, n_class, n_sup)

    classif, supervision = densenet_forward(x, kparams, n_class, n_sup, tile_b=256)
    classif, supervision = jax.block_until_ready((classif, supervision))

    assert classif.shape == (B, n_class) and supervision.shape == (B, n_sup)

    # Tight check against a bf16-matched pure-JAX reference.
    ref_c_bf, ref_s_bf = reference_forward_bf16(x, kparams, n_class, n_sup)
    assert jnp.allclose(classif, ref_c_bf, atol=1e-2, rtol=1e-2)
    assert jnp.allclose(supervision, ref_s_bf, atol=1e-2, rtol=1e-2)

    # Looser check against the exact f32 eval-mode module semantics
    # (tolerance covers bf16 weight/activation quantization).
    ref_c, ref_s = reference_forward_f32(x, raw)
    assert jnp.allclose(classif, ref_c, atol=5e-2, rtol=5e-2)
    assert jnp.allclose(supervision, ref_s, atol=5e-2, rtol=5e-2)

    print("KERNEL_OK")
</pallas_src>

<mosaic_0001>
module attributes {stable_mosaic.version = 11 : i64} {
  func.func @densenet_kernel(%arg0: i32, %arg1: memref<256x512xbf16, #tpu.memory_space<vmem>>, %arg2: memref<512x512xbf16, #tpu.memory_space<vmem>>, %arg3: memref<1x512xf32, #tpu.memory_space<vmem>>, %arg4: memref<512x512xbf16, #tpu.memory_space<vmem>>, %arg5: memref<1x512xf32, #tpu.memory_space<vmem>>, %arg6: memref<512x256xbf16, #tpu.memory_space<vmem>>, %arg7: memref<1x256xf32, #tpu.memory_space<vmem>>, %arg8: memref<256x128xbf16, #tpu.memory_space<vmem>>, %arg9: memref<1x128xf32, #tpu.memory_space<vmem>>, %arg10: memref<256x128xf32, #tpu.memory_space<vmem>>) attributes {dimension_semantics = [#tpu.dimension_semantics<parallel>], iteration_bounds = array<i64: 1>, scalar_prefetch = 0 : i64, scratch_operands = 0 : i64, tpu.core_type = #tpu.core_type<tc>, window_params = [{transform_indices = @transform_0, window_bounds = array<i64: 256, 512>}, {pipeline_mode = #tpu.pipeline_mode<synchronous>, transform_indices = @transform_1, window_bounds = array<i64: 512, 512>}, {pipeline_mode = #tpu.pipeline_mode<synchronous>, transform_indices = @transform_2, window_bounds = array<i64: 1, 512>}, {pipeline_mode = #tpu.pipeline_mode<synchronous>, transform_indices = @transform_3, window_bounds = array<i64: 512, 512>}, {pipeline_mode = #tpu.pipeline_mode<synchronous>, transform_indices = @transform_4, window_bounds = array<i64: 1, 512>}, {pipeline_mode = #tpu.pipeline_mode<synchronous>, transform_indices = @transform_5, window_bounds = array<i64: 512, 256>}, {pipeline_mode = #tpu.pipeline_mode<synchronous>, transform_indices = @transform_6, window_bounds = array<i64: 1, 256>}, {pipeline_mode = #tpu.pipeline_mode<synchronous>, transform_indices = @transform_7, window_bounds = array<i64: 256, 128>}, {pipeline_mode = #tpu.pipeline_mode<synchronous>, transform_indices = @transform_8, window_bounds = array<i64: 1, 128>}, {transform_indices = @transform_9, window_bounds = array<i64: 256, 128>}]} {
    %c0 = arith.constant 0 : index
    %c0_0 = arith.constant 0 : index
    %0 = vector.load %arg1[%c0, %c0_0] : memref<256x512xbf16, #tpu.memory_space<vmem>>, vector<256x512xbf16>
    %c0_1 = arith.constant 0 : index
    %c0_2 = arith.constant 0 : index
    %1 = vector.load %arg2[%c0_1, %c0_2] : memref<512x512xbf16, #tpu.memory_space<vmem>>, vector<512x512xbf16>
    %cst = arith.constant dense<0.000000e+00> : vector<256x512xf32>
    %2 = tpu.matmul %0, %1, %cst {dimension_numbers = #tpu.dot_dimension_numbers<[1], [0], [0], [1], [0, 0, 1, 1], [], []>} : vector<256x512xbf16>, vector<512x512xbf16>, vector<256x512xf32> -> vector<256x512xf32>
    %c0_3 = arith.constant 0 : index
    %c0_4 = arith.constant 0 : index
    %3 = vector.load %arg3[%c0_3, %c0_4] : memref<1x512xf32, #tpu.memory_space<vmem>>, vector<1x512xf32>
    %4 = vector.broadcast %3 : vector<1x512xf32> to vector<256x512xf32>
    %5 = arith.addf %2, %4 : vector<256x512xf32>
    %cst_5 = arith.constant 0.000000e+00 : f32
    %6 = vector.broadcast %cst_5 : f32 to vector<256x512xf32>
    %7 = arith.maximumf %5, %6 : vector<256x512xf32>
    %8 = arith.truncf %7 : vector<256x512xf32> to vector<256x512xbf16>
    %c0_6 = arith.constant 0 : index
    %c0_7 = arith.constant 0 : index
    %9 = vector.load %arg4[%c0_6, %c0_7] : memref<512x512xbf16, #tpu.memory_space<vmem>>, vector<512x512xbf16>
    %cst_8 = arith.constant dense<0.000000e+00> : vector<256x512xf32>
    %10 = tpu.matmul %8, %9, %cst_8 {dimension_numbers = #tpu.dot_dimension_numbers<[1], [0], [0], [1], [0, 0, 1, 1], [], []>} : vector<256x512xbf16>, vector<512x512xbf16>, vector<256x512xf32> -> vector<256x512xf32>
    %c0_9 = arith.constant 0 : index
    %c0_10 = arith.constant 0 : index
    %11 = vector.load %arg5[%c0_9, %c0_10] : memref<1x512xf32, #tpu.memory_space<vmem>>, vector<1x512xf32>
    %12 = vector.broadcast %11 : vector<1x512xf32> to vector<256x512xf32>
    %13 = arith.addf %10, %12 : vector<256x512xf32>
    %cst_11 = arith.constant 0.000000e+00 : f32
    %14 = vector.broadcast %cst_11 : f32 to vector<256x512xf32>
    %15 = arith.maximumf %13, %14 : vector<256x512xf32>
    %16 = arith.truncf %15 : vector<256x512xf32> to vector<256x512xbf16>
    %c0_12 = arith.constant 0 : index
    %c0_13 = arith.constant 0 : index
    %17 = vector.load %arg6[%c0_12, %c0_13] : memref<512x256xbf16, #tpu.memory_space<vmem>>, vector<512x256xbf16>
    %cst_14 = arith.constant dense<0.000000e+00> : vector<256x256xf32>
    %18 = tpu.matmul %16, %17, %cst_14 {dimension_numbers = #tpu.dot_dimension_numbers<[1], [0], [0], [1], [0, 0, 1, 1], [], []>} : vector<256x512xbf16>, vector<512x256xbf16>, vector<256x256xf32> -> vector<256x256xf32>
    %c0_15 = arith.constant 0 : index
    %c0_16 = arith.constant 0 : index
    %19 = vector.load %arg7[%c0_15, %c0_16] : memref<1x256xf32, #tpu.memory_space<vmem>>, vector<1x256xf32>
    %20 = vector.broadcast %19 : vector<1x256xf32> to vector<256x256xf32>
    %21 = arith.addf %18, %20 : vector<256x256xf32>
    %cst_17 = arith.constant 0.000000e+00 : f32
    %22 = vector.broadcast %cst_17 : f32 to vector<256x256xf32>
    %23 = arith.maximumf %21, %22 : vector<256x256xf32>
    %24 = arith.truncf %23 : vector<256x256xf32> to vector<256x256xbf16>
    %c0_18 = arith.constant 0 : index
    %c0_19 = arith.constant 0 : index
    %25 = vector.load %arg8[%c0_18, %c0_19] : memref<256x128xbf16, #tpu.memory_space<vmem>>, vector<256x128xbf16>
    %cst_20 = arith.constant dense<0.000000e+00> : vector<256x128xf32>
    %26 = tpu.matmul %24, %25, %cst_20 {dimension_numbers = #tpu.dot_dimension_numbers<[1], [0], [0], [1], [0, 0, 1, 1], [], []>} : vector<256x256xbf16>, vector<256x128xbf16>, vector<256x128xf32> -> vector<256x128xf32>
    %c0_21 = arith.constant 0 : index
    %c0_22 = arith.constant 0 : index
    %27 = vector.load %arg9[%c0_21, %c0_22] : memref<1x128xf32, #tpu.memory_space<vmem>>, vector<1x128xf32>
    %28 = vector.broadcast %27 : vector<1x128xf32> to vector<256x128xf32>
    %29 = arith.addf %26, %28 : vector<256x128xf32>
    %c0_23 = arith.constant 0 : index
    %c0_24 = arith.constant 0 : index
    %30 = vector.load %arg10[%c0_23, %c0_24] : memref<256x128xf32, #tpu.memory_space<vmem>>, vector<256x128xf32>
    tpu.vector_store %arg10[%c0_23, %c0_24], %29 {strides = array<i32>} : memref<256x128xf32, #tpu.memory_space<vmem>>, vector<256x128xf32>,
    return
  }
  func.func @transform_0(%arg0: i32) -> (i32, i32) {
    %c0_i32 = arith.constant 0 : i32
    %c0_i32_0 = arith.constant 0 : i32
    return %arg0, %c0_i32 : i32, i32
  }
  func.func @transform_1(%arg0: i32) -> (i32, i32) {
    %c0_i32 = arith.constant 0 : i32
    %c0_i32_0 = arith.constant 0 : i32
    %c0_i32_1 = arith.constant 0 : i32
    return %c0_i32, %c0_i32_0 : i32, i32
  }
  func.func @transform_2(%arg0: i32) -> (i32, i32) {
    %c0_i32 = arith.constant 0 : i32
    %c0_i32_0 = arith.constant 0 : i32
    %c0_i32_1 = arith.constant 0 : i32
    return %c0_i32, %c0_i32_0 : i32, i32
  }
  func.func @transform_3(%arg0: i32) -> (i32, i32) {
    %c0_i32 = arith.constant 0 : i32
    %c0_i32_0 = arith.constant 0 : i32
    %c0_i32_1 = arith.constant 0 : i32
    return %c0_i32, %c0_i32_0 : i32, i32
  }
  func.func @transform_4(%arg0: i32) -> (i32, i32) {
    %c0_i32 = arith.constant 0 : i32
    %c0_i32_0 = arith.constant 0 : i32
    %c0_i32_1 = arith.constant 0 : i32
    return %c0_i32, %c0_i32_0 : i32, i32
  }
  func.func @transform_5(%arg0: i32) -> (i32, i32) {
    %c0_i32 = arith.constant 0 : i32
    %c0_i32_0 = arith.constant 0 : i32
    %c0_i32_1 = arith.constant 0 : i32
    return %c0_i32, %c0_i32_0 : i32, i32
  }
  func.func @transform_6(%arg0: i32) -> (i32, i32) {
    %c0_i32 = arith.constant 0 : i32
    %c0_i32_0 = arith.constant 0 : i32
    %c0_i32_1 = arith.constant 0 : i32
    return %c0_i32, %c0_i32_0 : i32, i32
  }
  func.func @transform_7(%arg0: i32) -> (i32, i32) {
    %c0_i32 = arith.constant 0 : i32
    %c0_i32_0 = arith.constant 0 : i32
    %c0_i32_1 = arith.constant 0 : i32
    return %c0_i32, %c0_i32_0 : i32, i32
  }
  func.func @transform_8(%arg0: i32) -> (i32, i32) {
    %c0_i32 = arith.constant 0 : i32
    %c0_i32_0 = arith.constant 0 : i32
    %c0_i32_1 = arith.constant 0 : i32
    return %c0_i32, %c0_i32_0 : i32, i32
  }
  func.func @transform_9(%arg0: i32) -> (i32, i32) {
    %c0_i32 = arith.constant 0 : i32
    %c0_i32_0 = arith.constant 0 : i32
    return %arg0, %c0_i32 : i32, i32
  }
}

</mosaic_0001>

<bundles_post_ra>
// kernel: tpu_custom_call.1
= control target key start
LH: loop header
LB: loop body
LE: loop exit
PB: predicated region body
PF: predicated region fallthrough
CT: control target
= control target key end

     0   :  { %14 = vsyncpa [#allocation3], 0  ;;  %s11702_s0 = inlined_call_operand.hbm [shape: bf16[256,512], index: 0, kind: input, shape index: {}]   ;;  %s11703_s1 = inlined_call_operand.hbm [shape: bf16[512,512], index: 1, kind: input, shape index: {}]   ;;  %s11704_s2 = inlined_call_operand.hbm [shape: f32[1,512], index: 2, kind: input, shape index: {}]   ;;  %s11705_s3 = inlined_call_operand.hbm [shape: bf16[512,512], index: 3, kind: input, shape index: {}]   ;;  %s11706_s4 = inlined_call_operand.hbm [shape: f32[1,512], index: 4, kind: input, shape index: {}]   ;;  %s11707_s5 = inlined_call_operand.hbm [shape: bf16[512,256], index: 5, kind: input, shape index: {}]   ;;  %s11708_s6 = inlined_call_operand.vmem [shape: f32[1,256], index: 6, kind: input, shape index: {}]   ;;  %s11709_s7 = inlined_call_operand.hbm [shape: bf16[256,128], index: 7, kind: input, shape index: {}]   ;;  %s11710_s8 = inlined_call_operand.vmem [shape: f32[1,128], index: 8, kind: input, shape index: {}]   ;;  %s11711_s9 = inlined_call_operand.hbm [shape: f32[256,128], index: 9, kind: output, shape index: {}]  }
   0x1   :  { %15 = vsyncpa [#allocation6], 0 }
   0x2   :  { %16 = vsyncpa [#allocation9], 0 }
   0x3   :  { %17 = vsyncpa [#allocation12], 0 }
   0x4   :  { %18 = vsyncpa [#allocation4], 0  ;;  %s36_s11 = sshll.u32 %s11703_s1, 4  ;;  %s9107_s12 = smov [#allocation5]   ;;  %s37_s11 = int_to_ptr.hbm [resolvable:$true] %s36_s11 }
   0x5   :  { %s38_s13 = sshll.u32 %s9107_s12, 4  ;;  %s60_s16 = sshll.u32 %s11705_s3, 4  ;;  %s39_s13 = int_to_ptr.vmem [resolvable:$true] %s38_s13  ;;  %s61_s16 = int_to_ptr.hbm [resolvable:$true] %s60_s16 }
   0x6   :  { %s9108_s17 = smov 256   ;;  %s9109_s18 = smov 16  }
   0x7   :  { %44 = dma.hbm_to_vmem [thread:$0]  %s37_s11, 16384, %s39_s13, [#allocation6], %s9108_s17, %s9108_s17, %s9109_s18  }
   0x8   :  { %s9110_s19 = smov [#allocation8]   ;;  %s84_s23 = sshll.u32 %s11707_s5, 4  ;;  %s85_s23 = int_to_ptr.hbm [resolvable:$true] %s84_s23 }
   0x9   :  { %s62_s20 = sshll.u32 %s9110_s19, 4  ;;  %s9111_s1 = smov [#allocation11]   ;;  %s63_s20 = int_to_ptr.vmem [resolvable:$true] %s62_s20 }
   0xa   :  { %68 = dma.hbm_to_vmem [thread:$0]  %s61_s16, 16384, %s63_s20, [#allocation9], %s9108_s17, %s9108_s17, %s9109_s18  }
   0xb   :  { %s86_s24 = sshll.u32 %s9111_s1, 4  ;;  %s23_s3 = sshll.u32 %s11702_s0, 4  ;;  %s87_s24 = int_to_ptr.vmem [resolvable:$true] %s86_s24  ;;  %s24_s3 = int_to_ptr.hbm [resolvable:$true] %s23_s3 }
   0xc   :  { %s9112_s27 = smov 128   ;;  %s9113_s28 = smov 8  }
   0xd   :  { %92 = dma.hbm_to_vmem [thread:$0]  %s85_s23, 8192, %s87_s24, [#allocation12], %s9112_s27, %s9112_s27, %s9113_s28  }
   0xe   :  { %s9114_s29 = smov [#allocation2]   ;;  %s50_s11 = sshll.u32 %s11704_s2, 4  ;;  %s51_s11 = int_to_ptr.hbm [resolvable:$true] %s50_s11 }
   0xf   :  { %s25_s30 = sshll.u32 %s9114_s29, 4  ;;  %s74_s0 = sshll.u32 %s11706_s4, 4  ;;  %s26_s30 = int_to_ptr.vmem [resolvable:$true] %s25_s30  ;;  %s75_s0 = int_to_ptr.hbm [resolvable:$true] %s74_s0 }
  0x10   :  { %31 = dma.hbm_to_vmem [thread:$0]  %s24_s3, 8192, %s26_s30, [#allocation3], %s9108_s17, %s9108_s17, %s9109_s18  }
  0x11   :  { %s9115_s14 = smov [#allocation7]   ;;  %s9116_s16 = smov [#allocation10]  }
  0x12   :  { %s52_s15 = sshll.u32 %s9115_s14, 4  ;;  %s76_s19 = sshll.u32 %s9116_s16, 4  ;;  %s53_s15 = int_to_ptr.vmem [resolvable:$true] %s52_s15  ;;  %s77_s19 = int_to_ptr.vmem [resolvable:$true] %s76_s19 }
  0x13   :  { %55 = dma.hbm_to_vmem [thread:$0]  %s51_s11, 64, %s53_s15, [#allocation6]  }
  0x14   :  { %s99_s22 = sshll.u32 %s11709_s7, 4  ;;  %s9117_s2 = smov [#allocation13]   ;;  %s100_s22 = int_to_ptr.hbm [resolvable:$true] %s99_s22 }
  0x15   :  { %79 = dma.hbm_to_vmem [thread:$0]  %s75_s0, 64, %s77_s19, [#allocation9]  }
  0x16   :  { %s101_s17 = sshll.u32 %s9117_s2, 4  ;;  %s9118_s18 = smov 64   ;;  %s102_s17 = int_to_ptr.vmem [resolvable:$true] %s101_s17 }
  0x17   :  { %s9119_s23 = smov 4  }
  0x18   :  { %107 = dma.hbm_to_vmem [thread:$0]  %s100_s22, 2048, %s102_s17, [#allocation12], %s9118_s18, %s9118_s18, %s9119_s23  }
  0x19   :  { %9097 = dma.done.wait [#allocation3], 8192  }
  0x1a   :  { %9098 = vsyncadd [#allocation3], 4294959104 }
  0x1b   :  { %9099 = dma.done.wait [#allocation6], 16448  }
  0x1c   :  { %9100 = vsyncadd [#allocation6], 4294950848 }
  0x1d   :  { %9101 = dma.done.wait [#allocation9], 16448  }
  0x1e   :  { %9102 = vsyncadd [#allocation9], 4294950848 }
  0x1f   :  { %9103 = dma.done.wait [#allocation12], 10240  }
  0x20   :  { %9104 = vsyncadd [#allocation12], 4294957056  ;;  %v7242_v0 = vld [vmem:[#allocation5 + $0xe0] sm:$0xf]  ;;  %v8566_v1 = vld [vmem:[#allocation5 + $0xec] sm:$0xf0] }
  0x21   :  { %v7370_v2 = vld [vmem:[#allocation5 + $0x1e0] sm:$0xf]  ;;  %v7243_v3 = vor.u32 %v8566_v1, %v7242_v0  ;;  %v8598_v4 = vld [vmem:[#allocation5 + $0x1ec] sm:$0xf0]  ;;  %v8472_v55 = vld [vmem:[#allocation2 + $0x4] sm:$0xf] }
  0x22   :  { %v7226_v5 = vld [vmem:[#allocation5 + $0xc0] sm:$0xf]  ;;  %v8562_v6 = vld [vmem:[#allocation5 + $0xcc] sm:$0xf0]  ;;  %v7371_v7 = vor.u32 %v8598_v4, %v7370_v2  ;;  %v6876_v57 = vld [vmem:[#allocation2 + $0x10] sm:$0xf0] }
  0x23   :  { %v7354_v8 = vld [vmem:[#allocation5 + $0x1c0] sm:$0xf]  ;;  %v8594_v9 = vld [vmem:[#allocation5 + $0x1cc] sm:$0xf0]  ;;  %1300 = vmatpush.bf16.msra.mxu0 %v7243_v3  ;;  %8872 = vmatpush.bf16.msra.mxu2 %v7243_v3  ;;  %v7227_v10 = vor.u32 %v8562_v6, %v7226_v5  ;;  %v8504_v58 = vld [vmem:[#allocation2 + $0x104] sm:$0xf]  ;;  %v9199_v4 = vor.u32 %v8472_v55, %v6876_v57 }
  0x24   :  { %1389 = vmatpush.bf16.msra.mxu1 %v7371_v7  ;;  %8880 = vmatpush.bf16.msra.mxu3 %v7371_v7  ;;  %v7355_v11 = vor.u32 %v8594_v9, %v7354_v8  ;;  %v7210_v12 = vld [vmem:[#allocation5 + $0xa0] sm:$0xf]  ;;  %v8558_v13 = vld [vmem:[#allocation5 + $0xac] sm:$0xf0]  ;;  %v7004_v59 = vld [vmem:[#allocation2 + $0x110] sm:$0xf0] }
  0x25   :  { %v7338_v14 = vld [vmem:[#allocation5 + $0x1a0] sm:$0xf]  ;;  %v8590_v15 = vld [vmem:[#allocation5 + $0x1ac] sm:$0xf0]  ;;  %v7211_v16 = vor.u32 %v8558_v13, %v7210_v12  ;;  %v9201_v5 = vor.u32 %v8504_v58, %v7004_v59  ;;  %v6924_v55 = vld [vmem:[#allocation2 + $0x70] sm:$0xf0] }
  0x26   :  { %v7339_v17 = vor.u32 %v8590_v15, %v7338_v14  ;;  %v7194_v18 = vld [vmem:[#allocation5 + $0x80] sm:$0xf]  ;;  %v8554_v19 = vld [vmem:[#allocation5 + $0x8c] sm:$0xf0]  ;;  %v7052_v57 = vld [vmem:[#allocation2 + $0x170] sm:$0xf0] }
  0x27   :  { %1301 = vmatpush.bf16.msra.mxu0 %v7227_v10  ;;  %8873 = vmatpush.bf16.msra.mxu2 %v7227_v10  ;;  %v7322_v20 = vld [vmem:[#allocation5 + $0x180] sm:$0xf]  ;;  %v8586_v21 = vld [vmem:[#allocation5 + $0x18c] sm:$0xf0]  ;;  %v7195_v22 = vor.u32 %v8554_v19, %v7194_v18  ;;  %11910 = vst [vmem:[#allocation21_spill] sm:$0xff] %v9201_v5  ;;  %s6856_s3 = sshll.u32 %s11711_s9, 4  ;;  %s6857_s3 = int_to_ptr.hbm [resolvable:$true] %s6856_s3 }
  0x28   :  { %1390 = vmatpush.bf16.msra.mxu1 %v7355_v11  ;;  %8881 = vmatpush.bf16.msra.mxu3 %v7355_v11  ;;  %v7323_v23 = vor.u32 %v8586_v21, %v7322_v20  ;;  %v7178_v24 = vld [vmem:[#allocation5 + $0x60] sm:$0xf]  ;;  %v8550_v25 = vld [vmem:[#allocation5 + $0x6c] sm:$0xf0]  ;;  %v8476_v18 = vld [vmem:[#allocation2 + $0x24] sm:$0xf] }
  0x29   :  { %v7306_v26 = vld [vmem:[#allocation5 + $0x160] sm:$0xf]  ;;  %v8582_v27 = vld [vmem:[#allocation5 + $0x16c] sm:$0xf0]  ;;  %v7179_v28 = vor.u32 %v8550_v25, %v7178_v24  ;;  %v6892_v19 = vld [vmem:[#allocation2 + $0x30] sm:$0xf0] }
  0x2a   :  { %v7307_v29 = vor.u32 %v8582_v27, %v7306_v26  ;;  %v7162_v30 = vld [vmem:[#allocation5 + $0x40] sm:$0xf]  ;;  %v8546_v31 = vld [vmem:[#allocation5 + $0x4c] sm:$0xf0]  ;;  %v8508_v20 = vld [vmem:[#allocation2 + $0x124] sm:$0xf]  ;;  %v9211_v24 = vor.u32 %v8476_v18, %v6892_v19 }
  0x2b   :  { %1302 = vmatpush.bf16.msra.mxu0 %v7211_v16  ;;  %8874 = vmatpush.bf16.msra.mxu2 %v7211_v16  ;;  %v7290_v32 = vld [vmem:[#allocation5 + $0x140] sm:$0xf]  ;;  %v8578_v33 = vld [vmem:[#allocation5 + $0x14c] sm:$0xf0]  ;;  %v7163_v34 = vor.u32 %v8546_v31, %v7162_v30  ;;  %v7020_v21 = vld [vmem:[#allocation2 + $0x130] sm:$0xf0] }
  0x2c   :  { %1391 = vmatpush.bf16.msra.mxu1 %v7339_v17  ;;  %8882 = vmatpush.bf16.msra.mxu3 %v7339_v17  ;;  %v7291_v35 = vor.u32 %v8578_v33, %v7290_v32  ;;  %v7146_v36 = vld [vmem:[#allocation5 + $0x20] sm:$0xf]  ;;  %v8542_v37 = vld [vmem:[#allocation5 + $0x2c] sm:$0xf0]  ;;  %v9213_v25 = vor.u32 %v8508_v20, %v7020_v21  ;;  %v8564_v20 = vld [vmem:[#allocation5 + $0xe4] sm:$0xf] }
  0x2d   :  { %v7274_v38 = vld [vmem:[#allocation5 + $0x120] sm:$0xf]  ;;  %v8574_v39 = vld [vmem:[#allocation5 + $0x12c] sm:$0xf0]  ;;  %v7147_v40 = vor.u32 %v8542_v37, %v7146_v36  ;;  %v8480_v36 = vld [vmem:[#allocation2 + $0x44] sm:$0xf] }
  0x2e   :  { %v7130_v41 = vld [vmem:[#allocation5] sm:$0xf]  ;;  %v7275_v42 = vor.u32 %v8574_v39, %v7274_v38  ;;  %v8538_v43 = vld [vmem:[#allocation5 + $0xc] sm:$0xf0]  ;;  %11911 = vst [vmem:[#allocation22_spill] sm:$0xff] %v9213_v25 }
  0x2f   :  { %1303 = vmatpush.bf16.msra.mxu0 %v7195_v22  ;;  %8875 = vmatpush.bf16.msra.mxu2 %v7195_v22  ;;  %v7258_v44 = vld [vmem:[#allocation5 + $0x100] sm:$0xf]  ;;  %v8570_v45 = vld [vmem:[#allocation5 + $0x10c] sm:$0xf0]  ;;  %v7131_v52 = vor.u32 %v8538_v43, %v7130_v41  ;;  %v6908_v37 = vld [vmem:[#allocation2 + $0x50] sm:$0xf0] }
  0x30   :  { %1392 = vmatpush.bf16.msra.mxu1 %v7323_v23  ;;  %8883 = vmatpush.bf16.msra.mxu3 %v7323_v23  ;;  %v6874_v46 = vld [vmem:[#allocation2] sm:$0xf]  ;;  %v8474_v47 = vld [vmem:[#allocation2 + $0xc] sm:$0xf0]  ;;  %v7259_v56 = vor.u32 %v8570_v45, %v7258_v44  ;;  %v8512_v38 = vld [vmem:[#allocation2 + $0x144] sm:$0xf] }
  0x31   :  { %v7498_v48 = vld [vmem:[#allocation5 + $0x2e0] sm:$0xf]  ;;  %v8630_v49 = vld [vmem:[#allocation5 + $0x2ec] sm:$0xf0]  ;;  %v9195_v63 = vor.u32 %v8474_v47, %v6874_v46  ;;  %v7036_v39 = vld [vmem:[#allocation2 + $0x150] sm:$0xf0] }
  0x32   :  { %v7626_v50 = vld [vmem:[#allocation5 + $0x3e0] sm:$0xf]  ;;  %v8662_v51 = vld [vmem:[#allocation5 + $0x3ec] sm:$0xf0]  ;;  %v7499_v60 = vor.u32 %v8630_v49, %v7498_v48  ;;  %v9225_v43 = vor.u32 %v8512_v38, %v7036_v39  ;;  %v7244_v21 = vld [vmem:[#allocation5 + $0xf0] sm:$0xf0] }
  0x33   :  { %1304 = vmatpush.bf16.msra.mxu0 %v7179_v28  ;;  %8876 = vmatpush.bf16.msra.mxu2 %v7179_v28  ;;  %v7002_v53 = vld [vmem:[#allocation2 + $0x100] sm:$0xf]  ;;  %v8506_v54 = vld [vmem:[#allocation2 + $0x10c] sm:$0xf0]  ;;  %v7627_v61 = vor.u32 %v8662_v51, %v7626_v50  ;;  %v8592_v38 = vld [vmem:[#allocation5 + $0x1c4] sm:$0xf] }
  0x34   :  { %1393 = vmatpush.bf16.msra.mxu1 %v7307_v29  ;;  %8884 = vmatpush.bf16.msra.mxu3 %v7307_v29  ;;  %v7482_v62 = vld [vmem:[#allocation5 + $0x2c0] sm:$0xf]  ;;  %v9197_v0 = vor.u32 %v8506_v54, %v7002_v53  ;;  %v8626_v1 = vld [vmem:[#allocation5 + $0x2cc] sm:$0xf0]  ;;  %11914 = vst [vmem:[#allocation25_spill] sm:$0xff] %v9225_v43 }
  0x35   :  { %v7610_v2 = vld [vmem:[#allocation5 + $0x3c0] sm:$0xf]  ;;  %v8658_v3 = vld [vmem:[#allocation5 + $0x3cc] sm:$0xf0]  ;;  %v7483_v6 = vor.u32 %v8626_v1, %v7482_v62  ;;  %v8484_v54 = vld [vmem:[#allocation2 + $0x64] sm:$0xf] }
  0x36   :  { %11909 = vst [vmem:[#allocation20_spill] sm:$0xff] %v9197_v0  ;;  %v7611_v7 = vor.u32 %v8658_v3, %v7610_v2  ;;  %v7466_v8 = vld [vmem:[#allocation5 + $0x2a0] sm:$0xf]  ;;  %v8622_v9 = vld [vmem:[#allocation5 + $0x2ac] sm:$0xf0] }
  0x37   :  { %1305 = vmatpush.bf16.msra.mxu0 %v7163_v34  ;;  %8877 = vmatpush.bf16.msra.mxu2 %v7163_v34  ;;  %v7594_v10 = vld [vmem:[#allocation5 + $0x3a0] sm:$0xf]  ;;  %v8654_v11 = vld [vmem:[#allocation5 + $0x3ac] sm:$0xf0]  ;;  %v7467_v12 = vor.u32 %v8622_v9, %v7466_v8  ;;  %v7356_v39 = vld [vmem:[#allocation5 + $0x1d0] sm:$0xf0] }
  0x38   :  { %1394 = vmatpush.bf16.msra.mxu1 %v7291_v35  ;;  %8885 = vmatpush.bf16.msra.mxu3 %v7291_v35  ;;  %v7595_v13 = vor.u32 %v8654_v11, %v7594_v10  ;;  %v6890_v14 = vld [vmem:[#allocation2 + $0x20] sm:$0xf]  ;;  %v8478_v15 = vld [vmem:[#allocation2 + $0x2c] sm:$0xf0] }
  0x39   :  { %v7018_v16 = vld [vmem:[#allocation2 + $0x120] sm:$0xf]  ;;  %v8510_v17 = vld [vmem:[#allocation2 + $0x12c] sm:$0xf0]  ;;  %v9207_v22 = vor.u32 %v8478_v15, %v6890_v14  ;;  %v8520_v14 = vld [vmem:[#allocation2 + $0x184] sm:$0xf] }
  0x3a   :  { %v9209_v23 = vor.u32 %v8510_v17, %v7018_v16  ;;  %v7450_v26 = vld [vmem:[#allocation5 + $0x280] sm:$0xf]  ;;  %v8618_v27 = vld [vmem:[#allocation5 + $0x28c] sm:$0xf0]  ;;  %v7068_v15 = vld [vmem:[#allocation2 + $0x190] sm:$0xf0] }
  0x3b   :  { %1306 = vmatpush.bf16.msra.mxu0 %v7147_v40  ;;  %8878 = vmatpush.bf16.msra.mxu2 %v7147_v40  ;;  %v7578_v28 = vld [vmem:[#allocation5 + $0x380] sm:$0xf]  ;;  %v7451_v29 = vor.u32 %v8618_v27, %v7450_v26  ;;  %v8650_v30 = vld [vmem:[#allocation5 + $0x38c] sm:$0xf0]  ;;  %v9249_v19 = vor.u32 %v8520_v14, %v7068_v15  ;;  %v8596_v26 = vld [vmem:[#allocation5 + $0x1e4] sm:$0xf] }
  0x3c   :  { %1395 = vmatpush.bf16.msra.mxu1 %v7275_v42  ;;  %8886 = vmatpush.bf16.msra.mxu3 %v7275_v42  ;;  %v7579_v31 = vor.u32 %v8650_v30, %v7578_v28  ;;  %v6906_v32 = vld [vmem:[#allocation2 + $0x40] sm:$0xf]  ;;  %v8482_v33 = vld [vmem:[#allocation2 + $0x4c] sm:$0xf0]  ;;  %v9223_v42 = vor.u32 %v8480_v36, %v6908_v37  ;;  %v7372_v30 = vld [vmem:[#allocation5 + $0x1f0] sm:$0xf0] }
  0x3d   :  { %v7034_v34 = vld [vmem:[#allocation2 + $0x140] sm:$0xf]  ;;  %v8514_v35 = vld [vmem:[#allocation2 + $0x14c] sm:$0xf0]  ;;  %v9219_v40 = vor.u32 %v8482_v33, %v6906_v32  ;;  %11922 = vst [vmem:[#allocation33_spill] sm:$0xff] %v9249_v19  ;;  %v7375_v32 = vor.u32 %v8596_v26, %v7372_v30 }
  0x3e   :  { %v9221_v41 = vor.u32 %v8514_v35, %v7034_v34  ;;  %11913 = vst [vmem:[#allocation24_spill] sm:$0xff] %v9223_v42  ;;  %v7434_v44 = vld [vmem:[#allocation5 + $0x260] sm:$0xf]  ;;  %v8614_v45 = vld [vmem:[#allocation5 + $0x26c] sm:$0xf0] }
  0x3f   :  { %1307 = vmatpush.bf16.msra.mxu0 %v7131_v52  ;;  %8879 = vmatpush.bf16.msra.mxu2 %v7131_v52  ;;  %11912 = vst [vmem:[#allocation23_spill] sm:$0xff] %v9219_v40  ;;  %v7562_v46 = vld [vmem:[#allocation5 + $0x360] sm:$0xf]  ;;  %v7435_v47 = vor.u32 %v8614_v45, %v7434_v44  ;;  %v8646_v48 = vld [vmem:[#allocation5 + $0x36c] sm:$0xf0]  ;;  %v7359_v45 = vor.u32 %v8592_v38, %v7356_v39 }
  0x40   :  { %1396 = vmatpush.bf16.msra.mxu1 %v7259_v56  ;;  %8887 = vmatpush.bf16.msra.mxu3 %v7259_v56  ;;  %v7563_v49 = vor.u32 %v8646_v48, %v7562_v46  ;;  %v6922_v50 = vld [vmem:[#allocation2 + $0x60] sm:$0xf]  ;;  %v8486_v51 = vld [vmem:[#allocation2 + $0x6c] sm:$0xf0]  ;;  %v8516_v56 = vld [vmem:[#allocation2 + $0x164] sm:$0xf] }
  0x41   :  { %v7050_v52 = vld [vmem:[#allocation2 + $0x160] sm:$0xf]  ;;  %v8518_v53 = vld [vmem:[#allocation2 + $0x16c] sm:$0xf0]  ;;  %v9231_v58 = vor.u32 %v8486_v51, %v6922_v50  ;;  %v8560_v35 = vld [vmem:[#allocation5 + $0xc4] sm:$0xf] }
  0x42   :  { %1308 = vmatmul.bf16.vlgmr.msra.gmra.mxu0 %v9195_v63  ;;  %1348 = vmatmul.bf16.vlgmr.msra.gmra.mxu2 %v9197_v0  ;;  %v9233_v59 = vor.u32 %v8518_v53, %v7050_v52  ;;  %v7418_v62 = vld [vmem:[#allocation5 + $0x240] sm:$0xf]  ;;  %v8610_v1 = vld [vmem:[#allocation5 + $0x24c] sm:$0xf0]  ;;  %v7228_v37 = vld [vmem:[#allocation5 + $0xd0] sm:$0xf0] }
  0x43   :  { %1478 = vmatpush.bf16.msrb.mxu2 %v7499_v60  ;;  %1397 = vmatmul.bf16.vlgmr.msra.gmra.mxu1 %v9199_v4  ;;  %11915 = vst [vmem:[#allocation26_spill] sm:$0xff] %v9231_v58  ;;  %v9235_v60 = vor.u32 %v8484_v54, %v6924_v55  ;;  %v7546_v2 = vld [vmem:[#allocation5 + $0x340] sm:$0xf]  ;;  %v7419_v3 = vor.u32 %v8610_v1, %v7418_v62  ;;  %v8490_v9 = vld [vmem:[#allocation2 + $0x8c] sm:$0xf0] }
  0x44   :  { %1567 = vmatpush.bf16.msrb.mxu3 %v7627_v61  ;;  %11916 = vst [vmem:[#allocation27_spill] sm:$0xff] %v9233_v59  ;;  %v9237_v61 = vor.u32 %v8516_v56, %v7052_v57  ;;  %v6938_v8 = vld [vmem:[#allocation2 + $0x80] sm:$0xf]  ;;  %v8522_v11 = vld [vmem:[#allocation2 + $0x18c] sm:$0xf0]  ;;  %1745 = vmatpush.bf16.msrb.mxu1 %v7375_v32  ;;  %v7231_v44 = vor.u32 %v8560_v35, %v7228_v37 }
  0x45   :  { %1437 = vmatmul.bf16.vlgmr.msra.gmra.mxu3 %v9201_v5  ;;  %11917 = vst [vmem:[#allocation28_spill] sm:$0xff] %v9235_v60  ;;  %v7066_v10 = vld [vmem:[#allocation2 + $0x180] sm:$0xf]  ;;  %v9243_v16 = vor.u32 %v8490_v9, %v6938_v8  ;;  %v8606_v28 = vld [vmem:[#allocation5 + $0x22c] sm:$0xf0] }
  0x46   :  { %11918 = vst [vmem:[#allocation29_spill] sm:$0xff] %v9237_v61  ;;  %v9245_v17 = vor.u32 %v8522_v11, %v7066_v10  ;;  %v7402_v27 = vld [vmem:[#allocation5 + $0x220] sm:$0xf]  ;;  %v8638_v34 = vld [vmem:[#allocation5 + $0x32c] sm:$0xf0] }
  0x47   :  { %1479 = vmatpush.bf16.msrb.mxu2 %v7483_v6  ;;  %v8642_v6 = vld [vmem:[#allocation5 + $0x34c] sm:$0xf0]  ;;  %11919 = vst [vmem:[#allocation30_spill] sm:$0xff] %v9243_v16  ;;  %v7530_v33 = vld [vmem:[#allocation5 + $0x320] sm:$0xf] }
  0x48   :  { %1568 = vmatpush.bf16.msrb.mxu3 %v7611_v7  ;;  %v7547_v7 = vor.u32 %v8642_v6, %v7546_v2  ;;  %11920 = vst [vmem:[#allocation31_spill] sm:$0xff] %v9245_v17  ;;  %v7531_v36 = vor.u32 %v8638_v34, %v7530_v33  ;;  %v8556_v46 = vld [vmem:[#allocation5 + $0xa4] sm:$0xf]  ;;  %v6954_v50 = vld [vmem:[#allocation2 + $0xa0] sm:$0xf]  ;;  %1746 = vmatpush.bf16.msrb.mxu1 %v7359_v45 }
  0x49   :  { %v8588_v48 = vld [vmem:[#allocation5 + $0x1a4] sm:$0xf]  ;;  %v8494_v52 = vld [vmem:[#allocation2 + $0xac] sm:$0xf0]  ;;  %v7196_v55 = vld [vmem:[#allocation5 + $0x90] sm:$0xf0] }
  0x4a   :  { %v8552_v54 = vld [vmem:[#allocation5 + $0x84] sm:$0xf]  ;;  %v7082_v56 = vld [vmem:[#allocation2 + $0x1a0] sm:$0xf]  ;;  %v8526_v57 = vld [vmem:[#allocation2 + $0x1ac] sm:$0xf0]  ;;  %v9255_v9 = vor.u32 %v8494_v52, %v6954_v50 }
  0x4b   :  { %1480 = vmatpush.bf16.msrb.mxu2 %v7467_v12  ;;  %v8488_v12 = vld [vmem:[#allocation2 + $0x84] sm:$0xf]  ;;  %v6956_v1 = vld [vmem:[#allocation2 + $0xb0] sm:$0xf0]  ;;  %v7199_v6 = vor.u32 %v8552_v54, %v7196_v55  ;;  %v9257_v10 = vor.u32 %v8526_v57, %v7082_v56  ;;  %v8602_v26 = vld [vmem:[#allocation5 + $0x20c] sm:$0xf0] }
  0x4c   :  { %1569 = vmatpush.bf16.msrb.mxu3 %v7595_v13  ;;  %v6940_v13 = vld [vmem:[#allocation2 + $0x90] sm:$0xf0]  ;;  %v8492_v62 = vld [vmem:[#allocation2 + $0xa4] sm:$0xf]  ;;  %11923 = vst [vmem:[#allocation34_spill] sm:$0xff] %v9255_v9 }
  0x4d   :  { %v9247_v18 = vor.u32 %v8488_v12, %v6940_v13  ;;  %v8524_v2 = vld [vmem:[#allocation2 + $0x1a4] sm:$0xf]  ;;  %v7324_v8 = vld [vmem:[#allocation5 + $0x190] sm:$0xf0]  ;;  %v9259_v11 = vor.u32 %v8492_v62, %v6956_v1  ;;  %v8634_v32 = vld [vmem:[#allocation5 + $0x30c] sm:$0xf0] }
  0x4e   :  { %v8548_v14 = vld [vmem:[#allocation5 + $0x64] sm:$0xf]  ;;  %v7180_v15 = vld [vmem:[#allocation5 + $0x70] sm:$0xf0]  ;;  %v8498_v50 = vld [vmem:[#allocation2 + $0xcc] sm:$0xf0] }
  0x4f   :  { %1481 = vmatpush.bf16.msrb.mxu2 %v7451_v29  ;;  %11921 = vst [vmem:[#allocation32_spill] sm:$0xff] %v9247_v18  ;;  %v7247_v29 = vor.u32 %v8564_v20, %v7244_v21  ;;  %v8580_v20 = vld [vmem:[#allocation5 + $0x164] sm:$0xf]  ;;  %v7386_v21 = vld [vmem:[#allocation5 + $0x200] sm:$0xf] }
  0x50   :  { %1570 = vmatpush.bf16.msrb.mxu3 %v7579_v31  ;;  %v7403_v31 = vor.u32 %v8606_v28, %v7402_v27  ;;  %11924 = vst [vmem:[#allocation35_spill] sm:$0xff] %v9259_v11  ;;  %v7183_v27 = vor.u32 %v8548_v14, %v7180_v15  ;;  %v7308_v28 = vld [vmem:[#allocation5 + $0x170] sm:$0xf0]  ;;  %v8544_v33 = vld [vmem:[#allocation5 + $0x44] sm:$0xf] }
  0x51   :  { %1656 = vmatpush.bf16.msrb.mxu0 %v7247_v29  ;;  %v7387_v29 = vor.u32 %v8602_v26, %v7386_v21  ;;  %v7311_v30 = vor.u32 %v8580_v20, %v7308_v28  ;;  %v7164_v35 = vld [vmem:[#allocation5 + $0x50] sm:$0xf0]  ;;  %v8540_v39 = vld [vmem:[#allocation5 + $0x24] sm:$0xf]  ;;  %v8530_v52 = vld [vmem:[#allocation2 + $0x1cc] sm:$0xf0] }
  0x52   :  { %1313 = vmatmul.bf16.gmra.mxu0 %v9207_v22  ;;  %1353 = vmatmul.bf16.gmra.mxu2 %v9209_v23  ;;  %v7292_v37 = vld [vmem:[#allocation5 + $0x150] sm:$0xf0]  ;;  %v7167_v38 = vor.u32 %v8544_v33, %v7164_v35  ;;  %v8528_v55 = vld [vmem:[#allocation2 + $0x1c4] sm:$0xf]  ;;  %v8534_v33 = vld [vmem:[#allocation2 + $0x1ec] sm:$0xf0] }
  0x53   :  { %1402 = vmatmul.bf16.gmra.mxu1 %v9211_v24  ;;  %1482 = vmatpush.bf16.msrb.mxu2 %v7435_v47  ;;  %v7212_v47 = vld [vmem:[#allocation5 + $0xb0] sm:$0xf0]  ;;  %v8536_v62 = vld [vmem:[#allocation5 + $0x4] sm:$0xf] }
  0x54   :  { %1571 = vmatpush.bf16.msrb.mxu3 %v7563_v49  ;;  %v7340_v49 = vld [vmem:[#allocation5 + $0x1b0] sm:$0xf0]  ;;  %v7215_v51 = vor.u32 %v8556_v46, %v7212_v47  ;;  %v8572_v47 = vld [vmem:[#allocation5 + $0x124] sm:$0xf] }
  0x55   :  { %1442 = vmatmul.bf16.gmra.mxu3 %v9213_v25  ;;  %1657 = vmatpush.bf16.msrb.mxu0 %v7231_v44  ;;  %v7343_v53 = vor.u32 %v8588_v48, %v7340_v49  ;;  %v7148_v44 = vld [vmem:[#allocation5 + $0x30] sm:$0xf0]  ;;  %v6970_v49 = vld [vmem:[#allocation2 + $0xc0] sm:$0xf]  ;;  %v8628_v20 = vld [vmem:[#allocation5 + $0x2e4] sm:$0xf] }
  0x56   :  { %v7151_v46 = vor.u32 %v8540_v39, %v7148_v44  ;;  %v7276_v48 = vld [vmem:[#allocation5 + $0x130] sm:$0xf0]  ;;  %v8660_v26 = vld [vmem:[#allocation5 + $0x3e4] sm:$0xf] }
  0x57   :  { %1483 = vmatpush.bf16.msrb.mxu2 %v7419_v3  ;;  %v7084_v3 = vld [vmem:[#allocation2 + $0x1b0] sm:$0xf0]  ;;  %1747 = vmatpush.bf16.msrb.mxu1 %v7343_v53  ;;  %v8496_v53 = vld [vmem:[#allocation2 + $0xc4] sm:$0xf]  ;;  %v7279_v57 = vor.u32 %v8572_v47, %v7276_v48  ;;  %v6882_v47 = vld [vmem:[#allocation2 + $0x8] sm:$0xf] }
  0x58   :  { %1572 = vmatpush.bf16.msrb.mxu3 %v7547_v7  ;;  %v8584_v7 = vld [vmem:[#allocation5 + $0x184] sm:$0xf]  ;;  %v9261_v12 = vor.u32 %v8524_v2, %v7084_v3  ;;  %v6972_v54 = vld [vmem:[#allocation2 + $0xd0] sm:$0xf0]  ;;  %v9267_v3 = vor.u32 %v8498_v50, %v6970_v49  ;;  %v8475_v48 = vld [vmem:[#allocation2 + $0x14] sm:$0xf0] }
  0x59   :  { %1658 = vmatpush.bf16.msrb.mxu0 %v7215_v51  ;;  %v7327_v13 = vor.u32 %v8584_v7, %v7324_v8  ;;  %v7098_v51 = vld [vmem:[#allocation2 + $0x1c0] sm:$0xf]  ;;  %v7100_v56 = vld [vmem:[#allocation2 + $0x1d0] sm:$0xf0]  ;;  %v8568_v2 = vld [vmem:[#allocation5 + $0x104] sm:$0xf] }
  0x5a   :  { %v7132_v1 = vld [vmem:[#allocation5 + $0x10] sm:$0xf0]  ;;  %11925 = vst [vmem:[#allocation36_spill] sm:$0xff] %v9267_v3  ;;  %v9273_v14 = vor.u32 %v8528_v55, %v7100_v56  ;;  %v8473_v49 = vld [vmem:[#allocation2 + $0xc] sm:$0xf] }
  0x5b   :  { %1484 = vmatpush.bf16.msrb.mxu2 %v7403_v31  ;;  %1748 = vmatpush.bf16.msrb.mxu1 %v7327_v13  ;;  %v7514_v31 = vld [vmem:[#allocation5 + $0x300] sm:$0xf]  ;;  %v7135_v7 = vor.u32 %v8536_v62, %v7132_v1  ;;  %v7260_v8 = vld [vmem:[#allocation5 + $0x110] sm:$0xf0]  ;;  %v9271_v13 = vor.u32 %v8496_v53, %v6972_v54  ;;  %v6884_v50 = vld [vmem:[#allocation2 + $0x18] sm:$0xf0] }
  0x5c   :  { %1573 = vmatpush.bf16.msrb.mxu3 %v7531_v36  ;;  %v7515_v34 = vor.u32 %v8634_v32, %v7514_v31  ;;  %v8576_v36 = vld [vmem:[#allocation5 + $0x144] sm:$0xf]  ;;  %v7263_v15 = vor.u32 %v8568_v2, %v7260_v8  ;;  %v7500_v21 = vld [vmem:[#allocation5 + $0x2f0] sm:$0xf0]  ;;  %v8502_v31 = vld [vmem:[#allocation2 + $0xec] sm:$0xf0]  ;;  %v9298_v54 = vor.u32 %v8473_v49, %v6884_v50 }
  0x5d   :  { %1659 = vmatpush.bf16.msrb.mxu0 %v7199_v6  ;;  %v7295_v45 = vor.u32 %v8576_v36, %v7292_v37  ;;  %v9269_v6 = vor.u32 %v8530_v52, %v7098_v51  ;;  %11926 = vst [vmem:[#allocation37_spill] sm:$0xff] %v9271_v13  ;;  %v7628_v28 = vld [vmem:[#allocation5 + $0x3f0] sm:$0xf0]  ;;  %v7114_v32 = vld [vmem:[#allocation2 + $0x1e0] sm:$0xf]  ;;  %v9296_v52 = vor.u32 %v8475_v48, %v6882_v47 }
  0x5e   :  { %v6988_v35 = vld [vmem:[#allocation2 + $0xf0] sm:$0xf0]  ;;  %v8532_v36 = vld [vmem:[#allocation2 + $0x1e4] sm:$0xf]  ;;  %v9281_v39 = vor.u32 %v8534_v33, %v7114_v32  ;;  %v6898_v32 = vld [vmem:[#allocation2 + $0x28] sm:$0xf] }
  0x5f   :  { %1485 = vmatpush.bf16.msrb.mxu2 %v7387_v29  ;;  %1749 = vmatpush.bf16.msrb.mxu1 %v7311_v30  ;;  %v7631_v29 = vor.u32 %v8660_v26, %v7628_v28  ;;  %v6986_v30 = vld [vmem:[#allocation2 + $0xe0] sm:$0xf]  ;;  %v7116_v37 = vld [vmem:[#allocation2 + $0x1f0] sm:$0xf0]  ;;  %v8624_v62 = vld [vmem:[#allocation5 + $0x2c4] sm:$0xf] }
  0x60   :  { %1574 = vmatpush.bf16.msrb.mxu3 %v7515_v34  ;;  %v8500_v34 = vld [vmem:[#allocation2 + $0xe4] sm:$0xf]  ;;  %v7484_v1 = vld [vmem:[#allocation5 + $0x2d0] sm:$0xf0]  ;;  %v8479_v33 = vld [vmem:[#allocation2 + $0x34] sm:$0xf0] }
  0x61   :  { %1660 = vmatpush.bf16.msrb.mxu0 %v7183_v27  ;;  %v7503_v27 = vor.u32 %v8628_v20, %v7500_v21  ;;  %v9283_v44 = vor.u32 %v8500_v34, %v6988_v35  ;;  %v8656_v2 = vld [vmem:[#allocation5 + $0x3c4] sm:$0xf]  ;;  %v7612_v8 = vld [vmem:[#allocation5 + $0x3d0] sm:$0xf0]  ;;  %v8477_v34 = vld [vmem:[#allocation2 + $0x2c] sm:$0xf]  ;;  %v9314_v48 = vor.u32 %v8479_v33, %v6898_v32 }
  0x62   :  { %1318 = vmatmul.bf16.gmra.mxu0 %v9219_v40  ;;  %1358 = vmatmul.bf16.gmra.mxu2 %v9221_v41  ;;  %v7615_v20 = vor.u32 %v8656_v2, %v7612_v8  ;;  %v6900_v35 = vld [vmem:[#allocation2 + $0x38] sm:$0xf0] }
  0x63   :  { %1407 = vmatmul.bf16.gmra.mxu1 %v9223_v42  ;;  %1834 = vmatpush.bf16.msra.mxu2 %v7503_v27  ;;  %11928 = vst [vmem:[#allocation39_spill] sm:$0xff] %v9283_v44  ;;  %v9316_v50 = vor.u32 %v8477_v34, %v6900_v35  ;;  %v6916_v32 = vld [vmem:[#allocation2 + $0x58] sm:$0xf0] }
  0x64   :  { %1750 = vmatpush.bf16.msrb.mxu1 %v7295_v45  ;;  %1923 = vmatpush.bf16.msra.mxu3 %v7631_v29  ;;  %v9285_v45 = vor.u32 %v8532_v36, %v7116_v37 }
  0x65   :  { %1447 = vmatmul.bf16.gmra.mxu3 %v9225_v43  ;;  %1661 = vmatpush.bf16.msrb.mxu0 %v7167_v38  ;;  %v9279_v38 = vor.u32 %v8502_v31, %v6986_v30 }
  0x67   :  { %11927 = vst [vmem:[#allocation38_spill] sm:$0xff] %v9279_v38 }
  0x68   :  { %1751 = vmatpush.bf16.msrb.mxu1 %v7279_v57  ;;  %1924 = vmatpush.bf16.msra.mxu3 %v7615_v20 }
  0x69   :  { %1662 = vmatpush.bf16.msrb.mxu0 %v7151_v46  ;;  %v9291_v46 = vld [vmem:[#allocation7] sm:$0xf] }
  0x6a   :  { %v9294_v51 = vperm.slane %v9291_v46, 0 }
  0x6c   :  { %1752 = vmatpush.bf16.msrb.mxu1 %v7263_v15 }
  0x6d   :  { %1663 = vmatpush.bf16.msrb.mxu0 %v7135_v7  ;;  %v7487_v7 = vor.u32 %v8624_v62, %v7484_v1 }
  0x6f   :  { %1835 = vmatpush.bf16.msra.mxu2 %v7487_v7 }
  0x72   :  { %1323 = vmatmul.bf16.gmra.mxu0 %v9231_v58  ;;  %1363 = vmatmul.bf16.gmra.mxu2 %v9233_v59 }
  0x73   :  { %1412 = vmatmul.bf16.gmra.mxu1 %v9235_v60 }
  0x75   :  { %1452 = vmatmul.bf16.gmra.mxu3 %v9237_v61 }
  0x82   :  { %1328 = vmatmul.bf16.gmra.mxu0 %v9243_v16  ;;  %1368 = vmatmul.bf16.gmra.mxu2 %v9245_v17 }
  0x83   :  { %1417 = vmatmul.bf16.gmra.mxu1 %v9247_v18 }
  0x85   :  { %1457 = vmatmul.bf16.gmra.mxu3 %v9249_v19 }
  0x92   :  { %1333 = vmatmul.bf16.gmra.mxu0 %v9255_v9  ;;  %1373 = vmatmul.bf16.gmra.mxu2 %v9257_v10 }
  0x93   :  { %1422 = vmatmul.bf16.gmra.mxu1 %v9259_v11 }
  0x95   :  { %1462 = vmatmul.bf16.gmra.mxu3 %v9261_v12 }
  0xa2   :  { %1338 = vmatmul.bf16.gmra.mxu0 %v9267_v3  ;;  %1378 = vmatmul.bf16.gmra.mxu2 %v9269_v6 }
  0xa3   :  { %1427 = vmatmul.bf16.gmra.mxu1 %v9271_v13 }
  0xa5   :  { %1467 = vmatmul.bf16.gmra.mxu3 %v9273_v14 }
  0xb2   :  { %1343 = vmatmul.bf16.gmra.mxu0 %v9279_v38  ;;  %1383 = vmatmul.bf16.gmra.mxu2 %v9281_v39 }
  0xb3   :  { %1432 = vmatmul.bf16.gmra.mxu1 %v9283_v44 }
  0xb5   :  { %1472 = vmatmul.bf16.gmra.mxu3 %v9285_v45 }
  0xbf   :  { %v1309_v53 = vpop.f32.mrf.mxu0 }
  0xc0   :  { %v1310_v55 = vadd.f32 %v1309_v53, %v9294_v51  ;;  %v1398_v56 = vpop.f32.mrf.mxu1 }
  0xc2   :  { %v9301_v57 = vadd.f32 %v1398_v56, %v1310_v55  ;;  %1486 = vmatmul.bf16.vlgmr.msrb.gmra.mxu2 %v9296_v52  ;;  %1664 = vmatmul.bf16.vlgmr.msrb.gmra.mxu0 %v9195_v63 }
  0xc3   :  { %1753 = vmatmul.bf16.vlgmr.msrb.gmra.mxu1 %v9199_v4 }
  0xc5   :  { %1575 = vmatmul.bf16.vlgmr.msrb.gmra.mxu3 %v9298_v54  ;;  %v1349_v15 = vpop.f32.mrf.mxu2 }
  0xc6   :  { %v1350_v21 = vadd.f32 %v1349_v15, %v9294_v51 }
  0xc7   :  { %v1311_v27 = vpop.f32.mrf.mxu0 }
  0xc8   :  { %v1438_v26 = vpop.f32.mrf.mxu3  ;;  %v1312_v29 = vadd.f32 %v1311_v27, %v9294_v51  ;;  %v1400_v30 = vpop.f32.mrf.mxu1  ;;  %v6914_v27 = vld [vmem:[#allocation2 + $0x48] sm:$0xf] }
  0xc9   :  { %v9308_v28 = vadd.f32 %v1438_v26, %v1350_v21 }
  0xca   :  { %v9311_v31 = vadd.f32 %v1400_v30, %v1312_v29  ;;  %v8483_v29 = vld [vmem:[#allocation2 + $0x54] sm:$0xf0]  ;;  %v8481_v30 = vld [vmem:[#allocation2 + $0x4c] sm:$0xf] }
  0xcd   :  { %v1351_v36 = vpop.f32.mrf.mxu2 }
  0xce   :  { %v1352_v37 = vadd.f32 %v1351_v36, %v9294_v51  ;;  %v9334_v36 = vor.u32 %v8483_v29, %v6914_v27 }
  0xcf   :  { %v1314_v49 = vpop.f32.mrf.mxu0 }
  0xd0   :  { %v1440_v47 = vpop.f32.mrf.mxu3  ;;  %v1315_v55 = vadd.f32 %v1314_v49, %v9294_v51  ;;  %v1403_v56 = vpop.f32.mrf.mxu1 }
  0xd1   :  { %v9318_v53 = vadd.f32 %v1440_v47, %v1352_v37  ;;  %v9336_v47 = vor.u32 %v8481_v30, %v6916_v32 }
  0xd2   :  { %v9321_v62 = vadd.f32 %v1403_v56, %v1315_v55  ;;  %1491 = vmatmul.bf16.gmra.mxu2 %v9314_v48  ;;  %1669 = vmatmul.bf16.gmra.mxu0 %v9207_v22 }
  0xd3   :  { %1758 = vmatmul.bf16.gmra.mxu1 %v9211_v24  ;;  %11929 = vst [vmem:[#allocation40_spill] sm:$0xff] %v9336_v47 }
  0xd5   :  { %1580 = vmatmul.bf16.gmra.mxu3 %v9316_v50  ;;  %v1354_v1 = vpop.f32.mrf.mxu2 }
  0xd6   :  { %v1355_v2 = vadd.f32 %v1354_v1, %v9294_v51 }
  0xd7   :  { %v1316_v8 = vpop.f32.mrf.mxu0 }
  0xd8   :  { %v1443_v7 = vpop.f32.mrf.mxu3  ;;  %v1317_v20 = vadd.f32 %v1316_v8, %v9294_v51  ;;  %v1405_v21 = vpop.f32.mrf.mxu1  ;;  %v8652_v8 = vld [vmem:[#allocation5 + $0x3a4] sm:$0xf] }
  0xd9   :  { %v9328_v15 = vadd.f32 %v1443_v7, %v1355_v2  ;;  %v8620_v2 = vld [vmem:[#allocation5 + $0x2a4] sm:$0xf]  ;;  %v7468_v7 = vld [vmem:[#allocation5 + $0x2b0] sm:$0xf0] }
  0xda   :  { %v9331_v26 = vadd.f32 %v1405_v21, %v1317_v20  ;;  %v7471_v20 = vor.u32 %v8620_v2, %v7468_v7  ;;  %v7596_v21 = vld [vmem:[#allocation5 + $0x3b0] sm:$0xf0]  ;;  %v6932_v2 = vld [vmem:[#allocation2 + $0x78] sm:$0xf0] }
  0xdb   :  { %v7599_v29 = vor.u32 %v8652_v8, %v7596_v21 }
  0xdc   :  { %1836 = vmatpush.bf16.msra.mxu2 %v7471_v20 }
  0xdd   :  { %v1356_v33 = vpop.f32.mrf.mxu2  ;;  %1925 = vmatpush.bf16.msra.mxu3 %v7599_v29 }
  0xde   :  { %v1357_v34 = vadd.f32 %v1356_v33, %v9294_v51 }
  0xdf   :  { %v1319_v37 = vpop.f32.mrf.mxu0 }
  0xe0   :  { %v1445_v35 = vpop.f32.mrf.mxu3  ;;  %v1320_v55 = vadd.f32 %v1319_v37, %v9294_v51  ;;  %v1408_v56 = vpop.f32.mrf.mxu1 }
  0xe1   :  { %v9338_v49 = vadd.f32 %v1445_v35, %v1357_v34 }
  0xe2   :  { %v9341_v1 = vadd.f32 %v1408_v56, %v1320_v55  ;;  %1496 = vmatmul.bf16.gmra.mxu2 %v9334_v36  ;;  %1674 = vmatmul.bf16.gmra.mxu0 %v9219_v40  ;;  %v6930_v56 = vld [vmem:[#allocation2 + $0x68] sm:$0xf] }
  0xe3   :  { %1763 = vmatmul.bf16.gmra.mxu1 %v9223_v42  ;;  %v8487_v42 = vld [vmem:[#allocation2 + $0x74] sm:$0xf0] }
  0xe5   :  { %1585 = vmatmul.bf16.gmra.mxu3 %v9336_v47  ;;  %v1359_v27 = vpop.f32.mrf.mxu2  ;;  %v8485_v47 = vld [vmem:[#allocation2 + $0x6c] sm:$0xf] }
  0xe6   :  { %v1360_v30 = vadd.f32 %v1359_v27, %v9294_v51  ;;  %v9354_v27 = vor.u32 %v8487_v42, %v6930_v56  ;;  %v9356_v40 = vor.u32 %v8485_v47, %v6932_v2 }
  0xe7   :  { %v1321_v33 = vpop.f32.mrf.mxu0 }
  0xe8   :  { %v1448_v32 = vpop.f32.mrf.mxu3  ;;  %v1322_v35 = vadd.f32 %v1321_v33, %v9294_v51  ;;  %v1410_v37 = vpop.f32.mrf.mxu1  ;;  %11931 = vst [vmem:[#allocation42_spill] sm:$0xff] %v9354_v27 }
  0xe9   :  { %v9348_v34 = vadd.f32 %v1448_v32, %v1360_v30  ;;  %11932 = vst [vmem:[#allocation43_spill] sm:$0xff] %v9356_v40 }
  0xea   :  { %v9351_v55 = vadd.f32 %v1410_v37, %v1322_v35 }
  0xeb   :  { %11930 = vst [vmem:[#allocation41_spill] sm:$0xff] %v9348_v34 }
  0xed   :  { %v1361_v7 = vpop.f32.mrf.mxu2 }
  0xee   :  { %v1362_v8 = vadd.f32 %v1361_v7, %v9294_v51 }
  0xef   :  { %v1324_v20 = vpop.f32.mrf.mxu0 }
  0xf0   :  { %v1450_v21 = vpop.f32.mrf.mxu3  ;;  %v1325_v30 = vadd.f32 %v1324_v20, %v9294_v51  ;;  %v1413_v32 = vpop.f32.mrf.mxu1  ;;  %v8491_v20 = vld [vmem:[#allocation2 + $0x94] sm:$0xf0] }
  0xf1   :  { %v9358_v29 = vadd.f32 %v1450_v21, %v1362_v8  ;;  %v6946_v21 = vld [vmem:[#allocation2 + $0x88] sm:$0xf] }
  0xf2   :  { %v9361_v33 = vadd.f32 %v1413_v32, %v1325_v30  ;;  %1501 = vmatmul.bf16.gmra.mxu2 %v9354_v27  ;;  %1679 = vmatmul.bf16.gmra.mxu0 %v9231_v58  ;;  %v8489_v30 = vld [vmem:[#allocation2 + $0x8c] sm:$0xf]  ;;  %v6948_v32 = vld [vmem:[#allocation2 + $0x98] sm:$0xf0]  ;;  %v9374_v27 = vor.u32 %v8491_v20, %v6946_v21  ;;  %v8648_v21 = vld [vmem:[#allocation5 + $0x384] sm:$0xf] }
  0xf3   :  { %11933 = vst [vmem:[#allocation44_spill] sm:$0xff] %v9358_v29  ;;  %1768 = vmatmul.bf16.gmra.mxu1 %v9235_v60  ;;  %v9376_v29 = vor.u32 %v8489_v30, %v6948_v32  ;;  %v7580_v30 = vld [vmem:[#allocation5 + $0x390] sm:$0xf0] }
  0xf4   :  { %11935 = vst [vmem:[#allocation46_spill] sm:$0xff] %v9374_v27 }
  0xf5   :  { %1590 = vmatmul.bf16.gmra.mxu3 %v9356_v40  ;;  %v1364_v42 = vpop.f32.mrf.mxu2  ;;  %11936 = vst [vmem:[#allocation47_spill] sm:$0xff] %v9376_v29 }
  0xf6   :  { %v1365_v35 = vadd.f32 %v1364_v42, %v9294_v51 }
  0xf7   :  { %v1326_v37 = vpop.f32.mrf.mxu0 }
  0xf8   :  { %v1453_v47 = vpop.f32.mrf.mxu3  ;;  %v1327_v2 = vadd.f32 %v1326_v37, %v9294_v51  ;;  %v1415_v7 = vpop.f32.mrf.mxu1 }
  0xf9   :  { %v9368_v56 = vadd.f32 %v1453_v47, %v1365_v35 }
  0xfa   :  { %v9371_v8 = vadd.f32 %v1415_v7, %v1327_v2  ;;  %v7452_v7 = vld [vmem:[#allocation5 + $0x290] sm:$0xf0] }
  0xfb   :  { %11934 = vst [vmem:[#allocation45_spill] sm:$0xff] %v9368_v56  ;;  %v8493_v56 = vld [vmem:[#allocation2 + $0xac] sm:$0xf] }
  0xfd   :  { %v1366_v58 = vpop.f32.mrf.mxu2 }
  0xfe   :  { %v1367_v40 = vadd.f32 %v1366_v58, %v9294_v51  ;;  %v8616_v58 = vld [vmem:[#allocation5 + $0x284] sm:$0xf] }
  0xff   :  { %v1329_v42 = vpop.f32.mrf.mxu0  ;;  %v7455_v20 = vor.u32 %v8616_v58, %v7452_v7  ;;  %v6964_v58 = vld [vmem:[#allocation2 + $0xb8] sm:$0xf0] }
 0x100   :  { %v1455_v60 = vpop.f32.mrf.mxu3  ;;  %v1330_v47 = vadd.f32 %v1329_v42, %v9294_v51  ;;  %v1418_v37 = vpop.f32.mrf.mxu1  ;;  %v9396_v34 = vor.u32 %v8493_v56, %v6964_v58 }
 0x101   :  { %v9378_v35 = vadd.f32 %v1455_v60, %v1367_v40  ;;  %v7583_v60 = vor.u32 %v8648_v21, %v7580_v30  ;;  %1837 = vmatpush.bf16.msra.mxu2 %v7455_v20 }
 0x102   :  { %v9381_v2 = vadd.f32 %v1418_v37, %v1330_v47  ;;  %1506 = vmatmul.bf16.gmra.mxu2 %v9374_v27  ;;  %1684 = vmatmul.bf16.gmra.mxu0 %v9243_v16  ;;  %11940 = vst [vmem:[#allocation51_spill] sm:$0xff] %v9396_v34 }
 0x103   :  { %11937 = vst [vmem:[#allocation48_spill] sm:$0xff] %v9378_v35  ;;  %1773 = vmatmul.bf16.gmra.mxu1 %v9247_v18  ;;  %1926 = vmatpush.bf16.msra.mxu3 %v7583_v60  ;;  %v6962_v18 = vld [vmem:[#allocation2 + $0xa8] sm:$0xf]  ;;  %v8495_v35 = vld [vmem:[#allocation2 + $0xb4] sm:$0xf0] }
 0x105   :  { %1595 = vmatmul.bf16.gmra.mxu3 %v9376_v29  ;;  %v1369_v40 = vpop.f32.mrf.mxu2 }
 0x106   :  { %v1370_v32 = vadd.f32 %v1369_v40, %v9294_v51  ;;  %v9394_v40 = vor.u32 %v8495_v35, %v6962_v18 }
 0x107   :  { %v1331_v47 = vpop.f32.mrf.mxu0 }
 0x108   :  { %v1458_v42 = vpop.f32.mrf.mxu3  ;;  %v1332_v16 = vadd.f32 %v1331_v47, %v9294_v51  ;;  %v1420_v29 = vpop.f32.mrf.mxu1  ;;  %11939 = vst [vmem:[#allocation50_spill] sm:$0xff] %v9394_v40 }
 0x109   :  { %v9388_v37 = vadd.f32 %v1458_v42, %v1370_v32 }
 0x10a   :  { %v9391_v27 = vadd.f32 %v1420_v29, %v1332_v16 }
 0x10b   :  { %11938 = vst [vmem:[#allocation49_spill] sm:$0xff] %v9388_v37 }
 0x10d   :  { %v1371_v7 = vpop.f32.mrf.mxu2 }
 0x10e   :  { %v1372_v21 = vadd.f32 %v1371_v7, %v9294_v51 }
 0x10f   :  { %v1334_v20 = vpop.f32.mrf.mxu0 }
 0x110   :  { %v1460_v30 = vpop.f32.mrf.mxu3  ;;  %v1335_v32 = vadd.f32 %v1334_v20, %v9294_v51  ;;  %v1423_v42 = vpop.f32.mrf.mxu1  ;;  %v8499_v20 = vld [vmem:[#allocation2 + $0xd4] sm:$0xf0] }
 0x111   :  { %v9398_v60 = vadd.f32 %v1460_v30, %v1372_v21  ;;  %v6978_v30 = vld [vmem:[#allocation2 + $0xc8] sm:$0xf] }
 0x112   :  { %v9401_v16 = vadd.f32 %v1423_v42, %v1335_v32  ;;  %1511 = vmatmul.bf16.gmra.mxu2 %v9394_v40  ;;  %1689 = vmatmul.bf16.gmra.mxu0 %v9255_v9  ;;  %v8497_v32 = vld [vmem:[#allocation2 + $0xcc] sm:$0xf]  ;;  %v6980_v42 = vld [vmem:[#allocation2 + $0xd8] sm:$0xf0]  ;;  %v9414_v40 = vor.u32 %v8499_v20, %v6978_v30  ;;  %v8644_v30 = vld [vmem:[#allocation5 + $0x364] sm:$0xf] }
 0x113   :  { %11941 = vst [vmem:[#allocation52_spill] sm:$0xff] %v9398_v60  ;;  %1778 = vmatmul.bf16.gmra.mxu1 %v9259_v11  ;;  %v9416_v60 = vor.u32 %v8497_v32, %v6980_v42  ;;  %v7564_v32 = vld [vmem:[#allocation5 + $0x370] sm:$0xf0] }
 0x114   :  { %11943 = vst [vmem:[#allocation54_spill] sm:$0xff] %v9414_v40 }
 0x115   :  { %1600 = vmatmul.bf16.gmra.mxu3 %v9396_v34  ;;  %v1374_v18 = vpop.f32.mrf.mxu2  ;;  %11944 = vst [vmem:[#allocation55_spill] sm:$0xff] %v9416_v60 }
 0x116   :  { %v1375_v29 = vadd.f32 %v1374_v18, %v9294_v51 }
 0x117   :  { %v1336_v35 = vpop.f32.mrf.mxu0 }
 0x118   :  { %v1463_v56 = vpop.f32.mrf.mxu3  ;;  %v1337_v58 = vadd.f32 %v1336_v35, %v9294_v51  ;;  %v1425_v7 = vpop.f32.mrf.mxu1 }
 0x119   :  { %v9408_v47 = vadd.f32 %v1463_v56, %v1375_v29 }
 0x11a   :  { %v9411_v21 = vadd.f32 %v1425_v7, %v1337_v58  ;;  %v7436_v7 = vld [vmem:[#allocation5 + $0x270] sm:$0xf0] }
 0x11b   :  { %11942 = vst [vmem:[#allocation53_spill] sm:$0xff] %v9408_v47  ;;  %v8501_v47 = vld [vmem:[#allocation2 + $0xec] sm:$0xf] }
 0x11d   :  { %v1376_v9 = vpop.f32.mrf.mxu2 }
 0x11e   :  { %v1377_v34 = vadd.f32 %v1376_v9, %v9294_v51  ;;  %v8612_v9 = vld [vmem:[#allocation5 + $0x264] sm:$0xf] }
 0x11f   :  { %v1339_v18 = vpop.f32.mrf.mxu0  ;;  %v7439_v20 = vor.u32 %v8612_v9, %v7436_v7  ;;  %v6996_v9 = vld [vmem:[#allocation2 + $0xf8] sm:$0xf0] }
 0x120   :  { %v1465_v11 = vpop.f32.mrf.mxu3  ;;  %v1340_v56 = vadd.f32 %v1339_v18, %v9294_v51  ;;  %v1428_v35 = vpop.f32.mrf.mxu1  ;;  %v9436_v37 = vor.u32 %v8501_v47, %v6996_v9 }
 0x121   :  { %v9418_v29 = vadd.f32 %v1465_v11, %v1377_v34  ;;  %v7567_v34 = vor.u32 %v8644_v30, %v7564_v32  ;;  %1838 = vmatpush.bf16.msra.mxu2 %v7439_v20 }
 0x122   :  { %v9421_v58 = vadd.f32 %v1428_v35, %v1340_v56  ;;  %1516 = vmatmul.bf16.gmra.mxu2 %v9414_v40  ;;  %1694 = vmatmul.bf16.gmra.mxu0 %v9267_v3  ;;  %11947 = vst [vmem:[#allocation58_spill] sm:$0xff] %v9436_v37 }
 0x123   :  { %11945 = vst [vmem:[#allocation56_spill] sm:$0xff] %v9418_v29  ;;  %1783 = vmatmul.bf16.gmra.mxu1 %v9271_v13  ;;  %1927 = vmatpush.bf16.msra.mxu3 %v7567_v34  ;;  %v6994_v13 = vld [vmem:[#allocation2 + $0xe8] sm:$0xf]  ;;  %v8503_v29 = vld [vmem:[#allocation2 + $0xf4] sm:$0xf0] }
 0x125   :  { %1605 = vmatmul.bf16.gmra.mxu3 %v9416_v60  ;;  %v1379_v11 = vpop.f32.mrf.mxu2 }
 0x126   :  { %v1380_v42 = vadd.f32 %v1379_v11, %v9294_v51  ;;  %v9434_v11 = vor.u32 %v8503_v29, %v6994_v13  ;;  %v7250_v13 = vld [vmem:[#allocation5 + $0xe8] sm:$0xf] }
 0x127   :  { %v1341_v56 = vpop.f32.mrf.mxu0 }
 0x128   :  { %v1468_v18 = vpop.f32.mrf.mxu3  ;;  %v1342_v3 = vadd.f32 %v1341_v56, %v9294_v51  ;;  %v1430_v60 = vpop.f32.mrf.mxu1  ;;  %11946 = vst [vmem:[#allocation57_spill] sm:$0xff] %v9434_v11 }
 0x129   :  { %v9428_v35 = vadd.f32 %v1468_v18, %v1380_v42 }
 0x12a   :  { %v9431_v40 = vadd.f32 %v1430_v60, %v1342_v3  ;;  %v8567_v60 = vld [vmem:[#allocation5 + $0xf4] sm:$0xf0] }
 0x12b   :  { %v7251_v47 = vor.u32 %v8567_v60, %v7250_v13  ;;  %v8505_v13 = vld [vmem:[#allocation2 + $0x10c] sm:$0xf]  ;;  %v7012_v60 = vld [vmem:[#allocation2 + $0x118] sm:$0xf0] }
 0x12d   :  { %v1381_v7 = vpop.f32.mrf.mxu2  ;;  %2012 = vmatpush.bf16.msra.mxu0 %v7251_v47 }
 0x12e   :  { %v1382_v30 = vadd.f32 %v1381_v7, %v9294_v51 }
 0x12f   :  { %v1344_v20 = vpop.f32.mrf.mxu0 }
 0x130   :  { %v1470_v32 = vpop.f32.mrf.mxu3  ;;  %v1345_v42 = vadd.f32 %v1344_v20, %v9294_v51  ;;  %v1433_v18 = vpop.f32.mrf.mxu1 }
 0x131   :  { %v9438_v34 = vadd.f32 %v1470_v32, %v1382_v30 }
 0x132   :  { %v9441_v3 = vadd.f32 %v1433_v18, %v1345_v42  ;;  %1521 = vmatmul.bf16.gmra.mxu2 %v9434_v11  ;;  %1699 = vmatmul.bf16.gmra.mxu0 %v9279_v38  ;;  %v7378_v18 = vld [vmem:[#allocation5 + $0x1e8] sm:$0xf] }
 0x133   :  { %11948 = vst [vmem:[#allocation59_spill] sm:$0xff] %v9438_v34  ;;  %1788 = vmatmul.bf16.gmra.mxu1 %v9283_v44  ;;  %v7010_v38 = vld [vmem:[#allocation2 + $0x108] sm:$0xf]  ;;  %v8507_v44 = vld [vmem:[#allocation2 + $0x114] sm:$0xf0]  ;;  %v9454_v34 = vperm.slane %v9291_v46, 1 }
 0x134   :  { %v8640_v46 = vld [vmem:[#allocation5 + $0x344] sm:$0xf] }
 0x135   :  { %1610 = vmatmul.bf16.gmra.mxu3 %v9436_v37  ;;  %v1384_v29 = vpop.f32.mrf.mxu2  ;;  %v8599_v37 = vld [vmem:[#allocation5 + $0x1f4] sm:$0xf0] }
 0x136   :  { %v1385_v56 = vadd.f32 %v1384_v29, %v9294_v51  ;;  %v7379_v11 = vor.u32 %v8599_v37, %v7378_v18 }
 0x137   :  { %v1346_v7 = vpop.f32.mrf.mxu0 }
 0x138   :  { %v1473_v9 = vpop.f32.mrf.mxu3  ;;  %v1347_v32 = vadd.f32 %v1346_v7, %v9294_v51  ;;  %v1435_v20 = vpop.f32.mrf.mxu1  ;;  %2101 = vmatpush.bf16.msra.mxu1 %v7379_v11 }
 0x139   :  { %v9448_v30 = vadd.f32 %v1473_v9, %v1385_v56  ;;  %v9457_v9 = vor.u32 %v8507_v44, %v7010_v38  ;;  %v8608_v38 = vld [vmem:[#allocation5 + $0x244] sm:$0xf]  ;;  %v7420_v44 = vld [vmem:[#allocation5 + $0x250] sm:$0xf0] }
 0x13a   :  { %v9451_v42 = vadd.f32 %v1435_v20, %v1347_v32  ;;  %v9459_v32 = vor.u32 %v8505_v13, %v7012_v60  ;;  %v7423_v11 = vor.u32 %v8608_v38, %v7420_v44  ;;  %v7548_v13 = vld [vmem:[#allocation5 + $0x350] sm:$0xf0] }
 0x13b   :  { %11949 = vst [vmem:[#allocation60_spill] sm:$0xff] %v9448_v30 }
 0x13c   :  { %11950 = vst [vmem:[#allocation61_spill] sm:$0xff] %v9457_v9  ;;  %1839 = vmatpush.bf16.msra.mxu2 %v7423_v11 }
 0x13d   :  { %v1386_v29 = vpop.f32.mrf.mxu2  ;;  %11951 = vst [vmem:[#allocation62_spill] sm:$0xff] %v9459_v32 }
 0x13e   :  { %v1387_v47 = vadd.f32 %v1386_v29, %v9294_v51 }
 0x13f   :  { %v1665_v7 = vpop.f32.mrf.mxu0 }
 0x140   :  { %v1475_v56 = vpop.f32.mrf.mxu3  ;;  %v1666_v30 = vadd.f32 %v1665_v7, %v9454_v34  ;;  %v1754_v37 = vpop.f32.mrf.mxu1 }
 0x141   :  { %v9461_v20 = vadd.f32 %v1475_v56, %v1387_v47  ;;  %v7551_v47 = vor.u32 %v8640_v46, %v7548_v13 }
 0x142   :  { %v9464_v18 = vadd.f32 %v1754_v37, %v1666_v30  ;;  %1526 = vmatmul.bf16.gmra.mxu2 %v9457_v9  ;;  %1704 = vmatmul.bf16.gmra.mxu0 %v9197_v0  ;;  %v8509_v0 = vld [vmem:[#allocation2 + $0x12c] sm:$0xf]  ;;  %v7028_v9 = vld [vmem:[#allocation2 + $0x138] sm:$0xf0] }
 0x143   :  { %11952 = vst [vmem:[#allocation63_spill] sm:$0xff] %v9461_v20  ;;  %1793 = vmatmul.bf16.gmra.mxu1 %v9201_v5  ;;  %1928 = vmatpush.bf16.msra.mxu3 %v7551_v47  ;;  %v7026_v5 = vld [vmem:[#allocation2 + $0x128] sm:$0xf] }
 0x144   :  { %11953 = vst [vmem:[#allocation64_spill] sm:$0xff] %v9464_v18 }
 0x145   :  { %1615 = vmatmul.bf16.gmra.mxu3 %v9459_v32  ;;  %v1487_v51 = vpop.f32.mrf.mxu2  ;;  %v8511_v32 = vld [vmem:[#allocation2 + $0x134] sm:$0xf0] }
 0x146   :  { %v1488_v60 = vadd.f32 %v1487_v51, %v9301_v57  ;;  %v9475_v57 = vor.u32 %v8511_v32, %v7026_v5  ;;  %v9477_v51 = vor.u32 %v8509_v0, %v7028_v9  ;;  %v7234_v0 = vld [vmem:[#allocation5 + $0xc8] sm:$0xf] }
 0x147   :  { %v1667_v30 = vpop.f32.mrf.mxu0 }
 0x148   :  { %v1576_v29 = vpop.f32.mrf.mxu3  ;;  %v1668_v7 = vadd.f32 %v1667_v30, %v9454_v34  ;;  %v1756_v37 = vpop.f32.mrf.mxu1 }
 0x149   :  { %v1577_v56 = vadd.f32 %v1576_v29, %v1488_v60 }
 0x14a   :  { %v9472_v18 = vadd.f32 %v1756_v37, %v1668_v7 }
 0x14b   :  { %v2724_v29 = vmax.f32 %v1577_v56, 0.0 }
 0x14d   :  { %v1489_v20 = vpop.f32.mrf.mxu2 }
 0x14e   :  { %v1490_v38 = vadd.f32 %v1489_v20, %v9311_v31  ;;  %v8563_v31 = vld [vmem:[#allocation5 + $0xd4] sm:$0xf0] }
 0x14f   :  { %v1670_v46 = vpop.f32.mrf.mxu0  ;;  %v7235_v32 = vor.u32 %v8563_v31, %v7234_v0 }
 0x150   :  { %v1578_v44 = vpop.f32.mrf.mxu3  ;;  %v1671_v13 = vadd.f32 %v1670_v46, %v9454_v34  ;;  %v1759_v60 = vpop.f32.mrf.mxu1 }
 0x151   :  { %v1579_v11 = vadd.f32 %v1578_v44, %v1490_v38  ;;  %2013 = vmatpush.bf16.msra.mxu0 %v7235_v32 }
 0x152   :  { %v9480_v30 = vadd.f32 %v1759_v60, %v1671_v13  ;;  %1531 = vmatmul.bf16.gmra.mxu2 %v9475_v57  ;;  %1709 = vmatmul.bf16.gmra.mxu0 %v9209_v23  ;;  %v8595_v13 = vld [vmem:[#allocation5 + $0x1d4] sm:$0xf0]  ;;  %v7042_v60 = vld [vmem:[#allocation2 + $0x148] sm:$0xf] }
 0x153   :  { %v2728_v47 = vmax.f32 %v1579_v11, 0.0  ;;  %1798 = vmatmul.bf16.gmra.mxu1 %v9213_v25  ;;  %v7362_v11 = vld [vmem:[#allocation5 + $0x1c8] sm:$0xf] }
 0x154   :  { %11954 = vst [vmem:[#allocation65_spill] sm:$0xff] %v9480_v30  ;;  %v7044_v30 = vld [vmem:[#allocation2 + $0x158] sm:$0xf0] }
 0x155   :  { %1620 = vmatmul.bf16.gmra.mxu3 %v9477_v51  ;;  %v9486_v5 = vpack.c.bf16 %v2728_v47, %v2724_v29  ;;  %v1492_v9 = vpop.f32.mrf.mxu2  ;;  %v8515_v29 = vld [vmem:[#allocation2 + $0x154] sm:$0xf0]  ;;  %v7363_v47 = vor.u32 %v8595_v13, %v7362_v11 }
 0x156   :  { %v1493_v20 = vadd.f32 %v1492_v9, %v9321_v62  ;;  %v9493_v31 = vor.u32 %v8515_v29, %v7042_v60  ;;  %v7532_v60 = vld [vmem:[#allocation5 + $0x330] sm:$0xf0] }
 0x157   :  { %11955 = vst [vmem:[#allocation66_spill] sm:$0xff] %v9486_v5  ;;  %v1672_v7 = vpop.f32.mrf.mxu0  ;;  %v8513_v5 = vld [vmem:[#allocation2 + $0x14c] sm:$0xf]  ;;  %2102 = vmatpush.bf16.msra.mxu1 %v7363_v47 }
 0x158   :  { %v1581_v56 = vpop.f32.mrf.mxu3  ;;  %v1673_v38 = vadd.f32 %v1672_v7, %v9454_v34  ;;  %v1761_v44 = vpop.f32.mrf.mxu1  ;;  %v9495_v32 = vor.u32 %v8513_v5, %v7044_v30  ;;  %v7404_v30 = vld [vmem:[#allocation5 + $0x230] sm:$0xf0]  ;;  %v8636_v5 = vld [vmem:[#allocation5 + $0x324] sm:$0xf] }
 0x159   :  { %v1582_v37 = vadd.f32 %v1581_v56, %v1493_v20  ;;  %v7535_v47 = vor.u32 %v8636_v5, %v7532_v60 }
 0x15a   :  { %v9490_v46 = vadd.f32 %v1761_v44, %v1673_v38 }
 0x15b   :  { %v2732_v38 = vmax.f32 %v1582_v37, 0.0  ;;  %1929 = vmatpush.bf16.msra.mxu3 %v7535_v47 }
 0x15c   :  { %11956 = vst [vmem:[#allocation67_spill] sm:$0xff] %v9490_v46 }
 0x15d   :  { %v1494_v25 = vpop.f32.mrf.mxu2 }
 0x15e   :  { %v1495_v62 = vadd.f32 %v1494_v25, %v9331_v26  ;;  %v8604_v26 = vld [vmem:[#allocation5 + $0x224] sm:$0xf] }
 0x15f   :  { %v1675_v9 = vpop.f32.mrf.mxu0  ;;  %v7407_v13 = vor.u32 %v8604_v26, %v7404_v30 }
 0x160   :  { %v1583_v0 = vpop.f32.mrf.mxu3  ;;  %v1676_v56 = vadd.f32 %v1675_v9, %v9454_v34  ;;  %v1764_v7 = vpop.f32.mrf.mxu1 }
 0x161   :  { %v1584_v20 = vadd.f32 %v1583_v0, %v1495_v62  ;;  %1840 = vmatpush.bf16.msra.mxu2 %v7407_v13 }
 0x162   :  { %v9498_v46 = vadd.f32 %v1764_v7, %v1676_v56  ;;  %1536 = vmatmul.bf16.gmra.mxu2 %v9493_v31  ;;  %1714 = vmatmul.bf16.gmra.mxu0 %v9221_v41  ;;  %v7058_v7 = vld [vmem:[#allocation2 + $0x168] sm:$0xf] }
 0x163   :  { %v2736_v44 = vmax.f32 %v1584_v20, 0.0  ;;  %1803 = vmatmul.bf16.gmra.mxu1 %v9225_v43 }
 0x164   :  { %11957 = vst [vmem:[#allocation68_spill] sm:$0xff] %v9498_v46 }
 0x165   :  { %1625 = vmatmul.bf16.gmra.mxu3 %v9495_v32  ;;  %v9504_v25 = vpack.c.bf16 %v2736_v44, %v2732_v38  ;;  %v1497_v11 = vpop.f32.mrf.mxu2  ;;  %v8519_v38 = vld [vmem:[#allocation2 + $0x174] sm:$0xf0]  ;;  %v8517_v44 = vld [vmem:[#allocation2 + $0x16c] sm:$0xf] }
 0x166   :  { %v1498_v37 = vadd.f32 %v1497_v11, %v9341_v1  ;;  %v9511_v1 = vor.u32 %v8519_v38, %v7058_v7 }
 0x167   :  { %11958 = vst [vmem:[#allocation69_spill] sm:$0xff] %v9504_v25  ;;  %v1677_v62 = vpop.f32.mrf.mxu0  ;;  %v7060_v25 = vld [vmem:[#allocation2 + $0x178] sm:$0xf0] }
 0x168   :  { %v1586_v29 = vpop.f32.mrf.mxu3  ;;  %v1678_v9 = vadd.f32 %v1677_v62, %v9454_v34  ;;  %v1766_v20 = vpop.f32.mrf.mxu1  ;;  %11959 = vst [vmem:[#allocation70_spill] sm:$0xff] %v9511_v1  ;;  %v9513_v11 = vor.u32 %v8517_v44, %v7060_v25  ;;  %v8559_v25 = vld [vmem:[#allocation5 + $0xb4] sm:$0xf0] }
 0x169   :  { %v1587_v0 = vadd.f32 %v1586_v29, %v1498_v37 }
 0x16a   :  { %v9508_v56 = vadd.f32 %v1766_v20, %v1678_v9  ;;  %11960 = vst [vmem:[#allocation71_spill] sm:$0xff] %v9513_v11 }
 0x16b   :  { %v2740_v29 = vmax.f32 %v1587_v0, 0.0 }
 0x16d   :  { %v1499_v46 = vpop.f32.mrf.mxu2 }
 0x16e   :  { %v1500_v26 = vadd.f32 %v1499_v46, %v9351_v55  ;;  %v7218_v46 = vld [vmem:[#allocation5 + $0xa8] sm:$0xf] }
 0x16f   :  { %v1680_v5 = vpop.f32.mrf.mxu0  ;;  %v7219_v20 = vor.u32 %v8559_v25, %v7218_v46 }
 0x170   :  { %v1588_v30 = vpop.f32.mrf.mxu3  ;;  %v1681_v60 = vadd.f32 %v1680_v5, %v9454_v34  ;;  %v1769_v37 = vpop.f32.mrf.mxu1 }
 0x171   :  { %v1589_v13 = vadd.f32 %v1588_v30, %v1500_v26  ;;  %2014 = vmatpush.bf16.msra.mxu0 %v7219_v20 }
 0x172   :  { %v9516_v62 = vadd.f32 %v1769_v37, %v1681_v60  ;;  %1541 = vmatmul.bf16.gmra.mxu2 %v9511_v1  ;;  %1719 = vmatmul.bf16.gmra.mxu0 %v9233_v59  ;;  %v8591_v60 = vld [vmem:[#allocation5 + $0x1b4] sm:$0xf0]  ;;  %v7074_v37 = vld [vmem:[#allocation2 + $0x188] sm:$0xf] }
 0x173   :  { %v2744_v47 = vmax.f32 %v1589_v13, 0.0  ;;  %1808 = vmatmul.bf16.gmra.mxu1 %v9237_v61  ;;  %v7346_v13 = vld [vmem:[#allocation5 + $0x1a8] sm:$0xf] }
 0x174   :  { %11961 = vst [vmem:[#allocation72_spill] sm:$0xff] %v9516_v62  ;;  %v7076_v62 = vld [vmem:[#allocation2 + $0x198] sm:$0xf0] }
 0x175   :  { %1630 = vmatmul.bf16.gmra.mxu3 %v9513_v11  ;;  %v9522_v55 = vpack.c.bf16 %v2744_v47, %v2740_v29  ;;  %v1502_v9 = vpop.f32.mrf.mxu2  ;;  %v8523_v29 = vld [vmem:[#allocation2 + $0x194] sm:$0xf0]  ;;  %v7347_v47 = vor.u32 %v8591_v60, %v7346_v13 }
 0x176   :  { %v1503_v7 = vadd.f32 %v1502_v9, %v9361_v33  ;;  %v9529_v25 = vor.u32 %v8523_v29, %v7074_v37  ;;  %v7516_v37 = vld [vmem:[#allocation5 + $0x310] sm:$0xf0] }
 0x177   :  { %11962 = vst [vmem:[#allocation73_spill] sm:$0xff] %v9522_v55  ;;  %v1682_v38 = vpop.f32.mrf.mxu0  ;;  %v8521_v55 = vld [vmem:[#allocation2 + $0x18c] sm:$0xf]  ;;  %2103 = vmatpush.bf16.msra.mxu1 %v7347_v47 }
 0x178   :  { %v1591_v0 = vpop.f32.mrf.mxu3  ;;  %v1683_v26 = vadd.f32 %v1682_v38, %v9454_v34  ;;  %v1771_v30 = vpop.f32.mrf.mxu1  ;;  %11964 = vst [vmem:[#allocation75_spill] sm:$0xff] %v9529_v25  ;;  %v9531_v20 = vor.u32 %v8521_v55, %v7076_v62  ;;  %v7388_v62 = vld [vmem:[#allocation5 + $0x210] sm:$0xf0]  ;;  %v8632_v55 = vld [vmem:[#allocation5 + $0x304] sm:$0xf] }
 0x179   :  { %v1592_v44 = vadd.f32 %v1591_v0, %v1503_v7  ;;  %v7519_v47 = vor.u32 %v8632_v55, %v7516_v37  ;;  %v8587_v37 = vld [vmem:[#allocation5 + $0x194] sm:$0xf0] }
 0x17a   :  { %v9526_v5 = vadd.f32 %v1771_v30, %v1683_v26  ;;  %11965 = vst [vmem:[#allocation76_spill] sm:$0xff] %v9531_v20 }
 0x17b   :  { %v2748_v26 = vmax.f32 %v1592_v44, 0.0  ;;  %1930 = vmatpush.bf16.msra.mxu3 %v7519_v47 }
 0x17c   :  { %11963 = vst [vmem:[#allocation74_spill] sm:$0xff] %v9526_v5 }
 0x17d   :  { %v1504_v61 = vpop.f32.mrf.mxu2 }
 0x17e   :  { %v1505_v33 = vadd.f32 %v1504_v61, %v9371_v8  ;;  %v8600_v8 = vld [vmem:[#allocation5 + $0x204] sm:$0xf] }
 0x17f   :  { %v1685_v9 = vpop.f32.mrf.mxu0  ;;  %v7391_v60 = vor.u32 %v8600_v8, %v7388_v62  ;;  %v7202_v8 = vld [vmem:[#allocation5 + $0x88] sm:$0xf]  ;;  %v8555_v62 = vld [vmem:[#allocation5 + $0x94] sm:$0xf0] }
 0x180   :  { %v1593_v46 = vpop.f32.mrf.mxu3  ;;  %v1686_v0 = vadd.f32 %v1685_v9, %v9454_v34  ;;  %v1774_v38 = vpop.f32.mrf.mxu1 }
 0x181   :  { %v1594_v7 = vadd.f32 %v1593_v46, %v1505_v33  ;;  %1841 = vmatpush.bf16.msra.mxu2 %v7391_v60  ;;  %v7203_v60 = vor.u32 %v8555_v62, %v7202_v8  ;;  %v8547_v8 = vld [vmem:[#allocation5 + $0x54] sm:$0xf0]  ;;  %v7298_v62 = vld [vmem:[#allocation5 + $0x148] sm:$0xf] }
 0x182   :  { %v9534_v5 = vadd.f32 %v1774_v38, %v1686_v0  ;;  %1546 = vmatmul.bf16.gmra.mxu2 %v9529_v25  ;;  %1724 = vmatmul.bf16.gmra.mxu0 %v9245_v17  ;;  %v7090_v38 = vld [vmem:[#allocation2 + $0x1a8] sm:$0xf] }
 0x183   :  { %v2752_v30 = vmax.f32 %v1594_v7, 0.0  ;;  %1813 = vmatmul.bf16.gmra.mxu1 %v9249_v19  ;;  %v7330_v19 = vld [vmem:[#allocation5 + $0x188] sm:$0xf]  ;;  %2015 = vmatpush.bf16.msra.mxu0 %v7203_v60 }
 0x184   :  { %11966 = vst [vmem:[#allocation77_spill] sm:$0xff] %v9534_v5  ;;  %v7331_v47 = vor.u32 %v8587_v37, %v7330_v19 }
 0x185   :  { %1635 = vmatmul.bf16.gmra.mxu3 %v9531_v20  ;;  %v9540_v61 = vpack.c.bf16 %v2752_v30, %v2748_v26  ;;  %v1507_v13 = vpop.f32.mrf.mxu2  ;;  %v8527_v26 = vld [vmem:[#allocation2 + $0x1b4] sm:$0xf0]  ;;  %v8525_v30 = vld [vmem:[#allocation2 + $0x1ac] sm:$0xf] }
 0x186   :  { %v1508_v44 = vadd.f32 %v1507_v13, %v9381_v2  ;;  %v9547_v13 = vor.u32 %v8527_v26, %v7090_v38  ;;  %2104 = vmatpush.bf16.msra.mxu1 %v7331_v47  ;;  %v8551_v20 = vld [vmem:[#allocation5 + $0x74] sm:$0xf0] }
 0x187   :  { %11967 = vst [vmem:[#allocation78_spill] sm:$0xff] %v9540_v61  ;;  %v1687_v33 = vpop.f32.mrf.mxu0  ;;  %v7092_v61 = vld [vmem:[#allocation2 + $0x1b8] sm:$0xf0]  ;;  %v8583_v38 = vld [vmem:[#allocation5 + $0x174] sm:$0xf0] }
 0x188   :  { %v1596_v29 = vpop.f32.mrf.mxu3  ;;  %v1688_v9 = vadd.f32 %v1687_v33, %v9454_v34  ;;  %v1776_v7 = vpop.f32.mrf.mxu1 }
 0x189   :  { %v1597_v46 = vadd.f32 %v1596_v29, %v1508_v44  ;;  %v9549_v29 = vor.u32 %v8525_v30, %v7092_v61  ;;  %v7314_v61 = vld [vmem:[#allocation5 + $0x168] sm:$0xf] }
 0x18a   :  { %v9544_v0 = vadd.f32 %v1776_v7, %v1688_v9  ;;  %v7315_v19 = vor.u32 %v8583_v38, %v7314_v61  ;;  %v8575_v61 = vld [vmem:[#allocation5 + $0x134] sm:$0xf0]  ;;  %v7106_v38 = vld [vmem:[#allocation2 + $0x1c8] sm:$0xf] }
 0x18b   :  { %v2756_v17 = vmax.f32 %v1597_v46, 0.0  ;;  %v7170_v46 = vld [vmem:[#allocation5 + $0x48] sm:$0xf] }
 0x18c   :  { %11968 = vst [vmem:[#allocation79_spill] sm:$0xff] %v9544_v0  ;;  %v7186_v0 = vld [vmem:[#allocation5 + $0x68] sm:$0xf]  ;;  %2105 = vmatpush.bf16.msra.mxu1 %v7315_v19  ;;  %v7171_v60 = vor.u32 %v8547_v8, %v7170_v46  ;;  %v7108_v46 = vld [vmem:[#allocation2 + $0x1d8] sm:$0xf0] }
 0x18d   :  { %v1509_v5 = vpop.f32.mrf.mxu2 }
 0x18e   :  { %v1510_v2 = vadd.f32 %v1509_v5, %v9391_v27  ;;  %v7187_v5 = vor.u32 %v8551_v20, %v7186_v0  ;;  %v8579_v20 = vld [vmem:[#allocation5 + $0x154] sm:$0xf0] }
 0x18f   :  { %v1690_v44 = vpop.f32.mrf.mxu0  ;;  %v7299_v37 = vor.u32 %v8579_v20, %v7298_v62  ;;  %v7138_v62 = vld [vmem:[#allocation5 + $0x8] sm:$0xf] }
 0x190   :  { %v1598_v55 = vpop.f32.mrf.mxu3  ;;  %v1691_v9 = vadd.f32 %v1690_v44, %v9454_v34  ;;  %v1779_v7 = vpop.f32.mrf.mxu1  ;;  %2016 = vmatpush.bf16.msra.mxu0 %v7187_v5 }
 0x191   :  { %v1599_v33 = vadd.f32 %v1598_v55, %v1510_v2  ;;  %2106 = vmatpush.bf16.msra.mxu1 %v7299_v37 }
 0x192   :  { %v9552_v27 = vadd.f32 %v1779_v7, %v1691_v9  ;;  %1551 = vmatmul.bf16.gmra.mxu2 %v9547_v13  ;;  %1729 = vmatmul.bf16.gmra.mxu0 %v9257_v10  ;;  %v7282_v9 = vld [vmem:[#allocation5 + $0x128] sm:$0xf] }
 0x193   :  { %v2760_v25 = vmax.f32 %v1599_v33, 0.0  ;;  %1818 = vmatmul.bf16.gmra.mxu1 %v9261_v12  ;;  %v7283_v19 = vor.u32 %v8575_v61, %v7282_v9 }
 0x194   :  { %2017 = vmatpush.bf16.msra.mxu0 %v7171_v60 }
 0x195   :  { %1640 = vmatmul.bf16.gmra.mxu3 %v9549_v29  ;;  %v9558_v26 = vpack.c.bf16 %v2760_v25, %v2756_v17  ;;  %v1512_v30 = vpop.f32.mrf.mxu2  ;;  %v7154_v17 = vld [vmem:[#allocation5 + $0x28] sm:$0xf]  ;;  %v8543_v25 = vld [vmem:[#allocation5 + $0x34] sm:$0xf0]  ;;  %2107 = vmatpush.bf16.msra.mxu1 %v7283_v19 }
 0x196   :  { %v1513_v2 = vadd.f32 %v1512_v30, %v9401_v16  ;;  %v7155_v5 = vor.u32 %v8543_v25, %v7154_v17  ;;  %v8531_v16 = vld [vmem:[#allocation2 + $0x1d4] sm:$0xf0]  ;;  %v8529_v30 = vld [vmem:[#allocation2 + $0x1cc] sm:$0xf] }
 0x197   :  { %11969 = vst [vmem:[#allocation80_spill] sm:$0xff] %v9558_v26  ;;  %v1692_v0 = vpop.f32.mrf.mxu0  ;;  %v9567_v17 = vor.u32 %v8529_v30, %v7108_v46  ;;  %v7634_v30 = vld [vmem:[#allocation5 + $0x3e8] sm:$0xf] }
 0x198   :  { %v1601_v55 = vpop.f32.mrf.mxu3  ;;  %v1693_v47 = vadd.f32 %v1692_v0, %v9454_v34  ;;  %v1781_v33 = vpop.f32.mrf.mxu1  ;;  %2018 = vmatpush.bf16.msra.mxu0 %v7155_v5  ;;  %v9565_v0 = vor.u32 %v8531_v16, %v7106_v38  ;;  %v7506_v38 = vld [vmem:[#allocation5 + $0x2e8] sm:$0xf]  ;;  %v8631_v16 = vld [vmem:[#allocation5 + $0x2f4] sm:$0xf0] }
 0x199   :  { %v1602_v44 = vadd.f32 %v1601_v55, %v1513_v2  ;;  %v8539_v2 = vld [vmem:[#allocation5 + $0x14] sm:$0xf0]  ;;  %v7266_v55 = vld [vmem:[#allocation5 + $0x108] sm:$0xf] }
 0x19a   :  { %v9562_v7 = vadd.f32 %v1781_v33, %v1693_v47  ;;  %v7139_v37 = vor.u32 %v8539_v2, %v7138_v62  ;;  %v8571_v47 = vld [vmem:[#allocation5 + $0x114] sm:$0xf0] }
 0x19b   :  { %v7267_v25 = vor.u32 %v8571_v47, %v7266_v55  ;;  %v2764_v19 = vmax.f32 %v1602_v44, 0.0  ;;  %v8663_v62 = vld [vmem:[#allocation5 + $0x3f4] sm:$0xf0] }
 0x19c   :  { %11970 = vst [vmem:[#allocation81_spill] sm:$0xff] %v9562_v7  ;;  %2019 = vmatpush.bf16.msra.mxu0 %v7139_v37  ;;  %v7635_v55 = vor.u32 %v8663_v62, %v7634_v30 }
 0x19d   :  { %v1514_v8 = vpop.f32.mrf.mxu2  ;;  %2108 = vmatpush.bf16.msra.mxu1 %v7267_v25  ;;  %v8535_v25 = vld [vmem:[#allocation2 + $0x1f4] sm:$0xf0] }
 0x19e   :  { %v1515_v60 = vadd.f32 %v1514_v8, %v9411_v21  ;;  %v7507_v8 = vor.u32 %v8631_v16, %v7506_v38  ;;  %2279 = vmatpush.bf16.msrb.mxu3 %v7635_v55 }
 0x19f   :  { %v1695_v33 = vpop.f32.mrf.mxu0 }
 0x1a0   :  { %v1603_v20 = vpop.f32.mrf.mxu3  ;;  %v1696_v61 = vadd.f32 %v1695_v33, %v9454_v34  ;;  %v1784_v5 = vpop.f32.mrf.mxu1  ;;  %2190 = vmatpush.bf16.msrb.mxu2 %v7507_v8 }
 0x1a1   :  { %v1604_v9 = vadd.f32 %v1603_v20, %v1515_v60 }
 0x1a2   :  { %v9570_v7 = vadd.f32 %v1784_v5, %v1696_v61  ;;  %1556 = vmatmul.bf16.gmra.mxu2 %v9565_v0  ;;  %1734 = vmatmul.bf16.gmra.mxu0 %v9269_v6  ;;  %v7124_v61 = vld [vmem:[#allocation2 + $0x1f8] sm:$0xf0] }
 0x1a3   :  { %v2768_v26 = vmax.f32 %v1604_v9, 0.0  ;;  %1823 = vmatmul.bf16.gmra.mxu1 %v9273_v14  ;;  %v8533_v9 = vld [vmem:[#allocation2 + $0x1ec] sm:$0xf] }
 0x1a4   :  { %v9585_v30 = vor.u32 %v8533_v9, %v7124_v61 }
 0x1a5   :  { %1645 = vmatmul.bf16.gmra.mxu3 %v9567_v17  ;;  %v9576_v21 = vpack.c.bf16 %v2768_v26, %v2764_v19  ;;  %v1517_v46 = vpop.f32.mrf.mxu2  ;;  %v7122_v26 = vld [vmem:[#allocation2 + $0x1e8] sm:$0xf] }
 0x1a6   :  { %v1518_v44 = vadd.f32 %v1517_v46, %v9421_v58  ;;  %v9583_v58 = vor.u32 %v8535_v25, %v7122_v26 }
 0x1a7   :  { %11971 = vst [vmem:[#allocation82_spill] sm:$0xff] %v9576_v21  ;;  %v1697_v60 = vpop.f32.mrf.mxu0 }
 0x1a8   :  { %v1606_v2 = vpop.f32.mrf.mxu3  ;;  %v1698_v37 = vadd.f32 %v1697_v60, %v9454_v34  ;;  %v1786_v47 = vpop.f32.mrf.mxu1 }
 0x1a9   :  { %v1607_v20 = vadd.f32 %v1606_v2, %v1518_v44 }
 0x1aa   :  { %v9580_v33 = vadd.f32 %v1786_v47, %v1698_v37 }
 0x1ab   :  { %v2772_v44 = vmax.f32 %v1607_v20, 0.0 }
 0x1ad   :  { %v1519_v5 = vpop.f32.mrf.mxu2 }
 0x1ae   :  { %v1520_v19 = vadd.f32 %v1519_v5, %v9431_v40 }
 0x1af   :  { %v1700_v16 = vpop.f32.mrf.mxu0 }
 0x1b0   :  { %v1608_v38 = vpop.f32.mrf.mxu3  ;;  %v1701_v8 = vadd.f32 %v1700_v16, %v9454_v34  ;;  %v1789_v62 = vpop.f32.mrf.mxu1 }
 0x1b1   :  { %v1609_v46 = vadd.f32 %v1608_v38, %v1520_v19 }
 0x1b2   :  { %v9588_v55 = vadd.f32 %v1789_v62, %v1701_v8  ;;  %1561 = vmatmul.bf16.gmra.mxu2 %v9583_v58  ;;  %1739 = vmatmul.bf16.gmra.mxu0 %v9281_v39 }
 0x1b3   :  { %v2776_v2 = vmax.f32 %v1609_v46, 0.0  ;;  %1828 = vmatmul.bf16.gmra.mxu1 %v9285_v45 }
 0x1b5   :  { %1650 = vmatmul.bf16.gmra.mxu3 %v9585_v30  ;;  %v9594_v40 = vpack.c.bf16 %v2776_v2, %v2772_v44  ;;  %v1522_v60 = vpop.f32.mrf.mxu2 }
 0x1b6   :  { %v1523_v37 = vadd.f32 %v1522_v60, %v9441_v3 }
 0x1b7   :  { %11972 = vst [vmem:[#allocation83_spill] sm:$0xff] %v9594_v40  ;;  %v1702_v26 = vpop.f32.mrf.mxu0 }
 0x1b8   :  { %v1611_v47 = vpop.f32.mrf.mxu3  ;;  %v1703_v20 = vadd.f32 %v1702_v26, %v9454_v34  ;;  %v1791_v9 = vpop.f32.mrf.mxu1 }
 0x1b9   :  { %v1612_v25 = vadd.f32 %v1611_v47, %v1523_v37  ;;  %v8627_v37 = vld [vmem:[#allocation5 + $0x2d4] sm:$0xf0]  ;;  %v7618_v47 = vld [vmem:[#allocation5 + $0x3c8] sm:$0xf] }
 0x1ba   :  { %v9598_v61 = vadd.f32 %v1791_v9, %v1703_v20  ;;  %v8659_v9 = vld [vmem:[#allocation5 + $0x3d4] sm:$0xf0] }
 0x1bb   :  { %v2780_v44 = vmax.f32 %v1612_v25, 0.0 }
 0x1bd   :  { %v1524_v5 = vpop.f32.mrf.mxu2 }
 0x1be   :  { %v1525_v19 = vadd.f32 %v1524_v5, %v9451_v42  ;;  %v7490_v42 = vld [vmem:[#allocation5 + $0x2c8] sm:$0xf] }
 0x1bf   :  { %v1705_v16 = vpop.f32.mrf.mxu0  ;;  %v7491_v20 = vor.u32 %v8627_v37, %v7490_v42 }
 0x1c0   :  { %v1613_v38 = vpop.f32.mrf.mxu3  ;;  %v1706_v8 = vadd.f32 %v1705_v16, %v9454_v34  ;;  %v1794_v62 = vpop.f32.mrf.mxu1 }
 0x1c1   :  { %v1614_v46 = vadd.f32 %v1613_v38, %v1525_v19  ;;  %v7619_v19 = vor.u32 %v8659_v9, %v7618_v47  ;;  %2191 = vmatpush.bf16.msrb.mxu2 %v7491_v20 }
 0x1c2   :  { %v9602_v3 = vadd.f32 %v1794_v62, %v1706_v8  ;;  %1842 = vmatmul.bf16.vlgmr.msra.gmra.mxu2 %v9296_v52  ;;  %2020 = vmatmul.bf16.vlgmr.msra.gmra.mxu0 %v9195_v63 }
 0x1c3   :  { %v2784_v2 = vmax.f32 %v1614_v46, 0.0  ;;  %2109 = vmatmul.bf16.vlgmr.msra.gmra.mxu1 %v9199_v4  ;;  %2280 = vmatpush.bf16.msrb.mxu3 %v7619_v19 }
 0x1c5   :  { %1931 = vmatmul.bf16.vlgmr.msra.gmra.mxu3 %v9298_v54  ;;  %v9608_v60 = vpack.c.bf16 %v2784_v2, %v2780_v44  ;;  %v1527_v26 = vpop.f32.mrf.mxu2 }
 0x1c6   :  { %v1528_v25 = vadd.f32 %v1527_v26, %v9308_v28 }
 0x1c7   :  { %11973 = vst [vmem:[#allocation84_spill] sm:$0xff] %v9608_v60  ;;  %v1707_v38 = vpop.f32.mrf.mxu0 }
 0x1c8   :  { %v1616_v5 = vpop.f32.mrf.mxu3  ;;  %v1708_v46 = vadd.f32 %v1707_v38, %v9454_v34  ;;  %v1796_v8 = vpop.f32.mrf.mxu1 }
 0x1c9   :  { %v1617_v16 = vadd.f32 %v1616_v5, %v1528_v25 }
 0x1ca   :  { %v9612_v62 = vadd.f32 %v1796_v8, %v1708_v46 }
 0x1cb   :  { %v2788_v26 = vmax.f32 %v1617_v16, 0.0 }
 0x1cd   :  { %v1529_v44 = vpop.f32.mrf.mxu2 }
 0x1ce   :  { %v1530_v2 = vadd.f32 %v1529_v44, %v9318_v53 }
 0x1cf   :  { %v1710_v40 = vpop.f32.mrf.mxu0 }
 0x1d0   :  { %v1618_v60 = vpop.f32.mrf.mxu3  ;;  %v1711_v37 = vadd.f32 %v1710_v40, %v9454_v34  ;;  %v1799_v28 = vpop.f32.mrf.mxu1 }
 0x1d1   :  { %v1619_v42 = vadd.f32 %v1618_v60, %v1530_v2 }
 0x1d2   :  { %v9616_v9 = vadd.f32 %v1799_v28, %v1711_v37  ;;  %1847 = vmatmul.bf16.gmra.mxu2 %v9314_v48  ;;  %2025 = vmatmul.bf16.gmra.mxu0 %v9207_v22 }
 0x1d3   :  { %v2792_v47 = vmax.f32 %v1619_v42, 0.0  ;;  %2114 = vmatmul.bf16.gmra.mxu1 %v9211_v24 }
 0x1d5   :  { %1936 = vmatmul.bf16.gmra.mxu3 %v9316_v50  ;;  %v9622_v20 = vpack.c.bf16 %v2792_v47, %v2788_v26  ;;  %v1532_v53 = vpop.f32.mrf.mxu2 }
 0x1d6   :  { %v1533_v60 = vadd.f32 %v1532_v53, %v9328_v15  ;;  %v11976_v53 = vld [vmem:[#allocation23_spill] sm:$0xff] }
 0x1d7   :  { %11974 = vst [vmem:[#allocation85_spill] sm:$0xff] %v9622_v20  ;;  %v1712_v40 = vpop.f32.mrf.mxu0 }
 0x1d8   :  { %v1621_v25 = vpop.f32.mrf.mxu3  ;;  %v1713_v19 = vadd.f32 %v1712_v40, %v9454_v34  ;;  %v1801_v38 = vpop.f32.mrf.mxu1 }
 0x1d9   :  { %v1622_v5 = vadd.f32 %v1621_v25, %v1533_v60  ;;  %v11977_v60 = vld [vmem:[#allocation40_spill] sm:$0xff] }
 0x1da   :  { %v9626_v16 = vadd.f32 %v1801_v38, %v1713_v19  ;;  %v11978_v25 = vld [vmem:[#allocation24_spill] sm:$0xff]  ;;  %v8623_v19 = vld [vmem:[#allocation5 + $0x2b4] sm:$0xf0] }
 0x1db   :  { %v2796_v26 = vmax.f32 %v1622_v5, 0.0  ;;  %v7602_v38 = vld [vmem:[#allocation5 + $0x3a8] sm:$0xf]  ;;  %v11980_v5 = vld [vmem:[#allocation41_spill] sm:$0xff] }
 0x1dd   :  { %v1534_v46 = vpop.f32.mrf.mxu2 }
 0x1de   :  { %v1535_v8 = vadd.f32 %v1534_v46, %v9338_v49  ;;  %v7474_v49 = vld [vmem:[#allocation5 + $0x2a8] sm:$0xf] }
 0x1df   :  { %v1715_v2 = vpop.f32.mrf.mxu0 }
 0x1e0   :  { %v1623_v44 = vpop.f32.mrf.mxu3  ;;  %v1716_v37 = vadd.f32 %v1715_v2, %v9454_v34  ;;  %v1804_v28 = vpop.f32.mrf.mxu1 }
 0x1e1   :  { %v1624_v42 = vadd.f32 %v1623_v44, %v1535_v8  ;;  %v7475_v8 = vor.u32 %v8623_v19, %v7474_v49  ;;  %v8655_v44 = vld [vmem:[#allocation5 + $0x3b4] sm:$0xf0] }
 0x1e2   :  { %v9630_v15 = vadd.f32 %v1804_v28, %v1716_v37  ;;  %1852 = vmatmul.bf16.gmra.mxu2 %v9334_v36  ;;  %2030 = vmatmul.bf16.gmra.mxu0 %v11976_v53  ;;  %v7603_v37 = vor.u32 %v8655_v44, %v7602_v38 }
 0x1e3   :  { %v2800_v47 = vmax.f32 %v1624_v42, 0.0  ;;  %2119 = vmatmul.bf16.gmra.mxu1 %v11978_v25  ;;  %2192 = vmatpush.bf16.msrb.mxu2 %v7475_v8  ;;  %v11984_v8 = vld [vmem:[#allocation42_spill] sm:$0xff] }
 0x1e4   :  { %11975 = vst [vmem:[#allocation86_spill] sm:$0xff] %v9630_v15  ;;  %2281 = vmatpush.bf16.msrb.mxu3 %v7603_v37 }
 0x1e5   :  { %1941 = vmatmul.bf16.gmra.mxu3 %v11977_v60  ;;  %v9636_v40 = vpack.c.bf16 %v2800_v47, %v2796_v26  ;;  %v1537_v46 = vpop.f32.mrf.mxu2  ;;  %v11982_v47 = vld [vmem:[#allocation44_spill] sm:$0xff] }
 0x1e6   :  { %v1538_v2 = vadd.f32 %v1537_v46, %v11980_v5 }
 0x1e7   :  { %11979 = vst [vmem:[#allocation87_spill] sm:$0xff] %v9636_v40  ;;  %v1717_v28 = vpop.f32.mrf.mxu0 }
 0x1e8   :  { %v1626_v42 = vpop.f32.mrf.mxu3  ;;  %v1718_v21 = vadd.f32 %v1717_v28, %v9454_v34  ;;  %v1806_v15 = vpop.f32.mrf.mxu1  ;;  %v11989_v28 = vld [vmem:[#allocation45_spill] sm:$0xff] }
 0x1e9   :  { %v1627_v20 = vadd.f32 %v1626_v42, %v1538_v2  ;;  %v11985_v2 = vld [vmem:[#allocation26_spill] sm:$0xff]  ;;  %v11986_v42 = vld [vmem:[#allocation43_spill] sm:$0xff] }
 0x1ea   :  { %v9640_v25 = vadd.f32 %v1806_v15, %v1718_v21  ;;  %v11987_v21 = vld [vmem:[#allocation28_spill] sm:$0xff] }
 0x1eb   :  { %v2804_v5 = vmax.f32 %v1627_v20, 0.0 }
 0x1ec   :  { %11981 = vst [vmem:[#allocation41_spill] sm:$0xff] %v9640_v25 }
 0x1ed   :  { %v1539_v26 = vpop.f32.mrf.mxu2 }
 0x1ee   :  { %v1540_v40 = vadd.f32 %v1539_v26, %v11982_v47 }
 0x1ef   :  { %v1720_v53 = vpop.f32.mrf.mxu0 }
 0x1f0   :  { %v1628_v60 = vpop.f32.mrf.mxu3  ;;  %v1721_v19 = vadd.f32 %v1720_v53, %v9454_v34  ;;  %v1809_v46 = vpop.f32.mrf.mxu1 }
 0x1f1   :  { %v1629_v49 = vadd.f32 %v1628_v60, %v1540_v40 }
 0x1f2   :  { %v9644_v44 = vadd.f32 %v1809_v46, %v1721_v19  ;;  %1857 = vmatmul.bf16.gmra.mxu2 %v11984_v8  ;;  %2035 = vmatmul.bf16.gmra.mxu0 %v11985_v2  ;;  %v11991_v46 = vld [vmem:[#allocation48_spill] sm:$0xff] }
 0x1f3   :  { %v2808_v38 = vmax.f32 %v1629_v49, 0.0  ;;  %2124 = vmatmul.bf16.gmra.mxu1 %v11987_v21 }
 0x1f4   :  { %11983 = vst [vmem:[#allocation44_spill] sm:$0xff] %v9644_v44 }
 0x1f5   :  { %1946 = vmatmul.bf16.gmra.mxu3 %v11986_v42  ;;  %v9650_v15 = vpack.c.bf16 %v2808_v38, %v2804_v5  ;;  %v1542_v37 = vpop.f32.mrf.mxu2 }
 0x1f6   :  { %v1543_v60 = vadd.f32 %v1542_v37, %v11989_v28  ;;  %v11993_v28 = vld [vmem:[#allocation46_spill] sm:$0xff] }
 0x1f7   :  { %11988 = vst [vmem:[#allocation88_spill] sm:$0xff] %v9650_v15  ;;  %v1722_v53 = vpop.f32.mrf.mxu0 }
 0x1f8   :  { %v1631_v40 = vpop.f32.mrf.mxu3  ;;  %v1723_v20 = vadd.f32 %v1722_v53, %v9454_v34  ;;  %v1811_v47 = vpop.f32.mrf.mxu1  ;;  %v11996_v53 = vld [vmem:[#allocation32_spill] sm:$0xff] }
 0x1f9   :  { %v1632_v26 = vadd.f32 %v1631_v40, %v1543_v60  ;;  %v11994_v60 = vld [vmem:[#allocation30_spill] sm:$0xff]  ;;  %v11995_v40 = vld [vmem:[#allocation47_spill] sm:$0xff] }
 0x1fa   :  { %v9654_v49 = vadd.f32 %v1811_v47, %v1723_v20  ;;  %v7458_v47 = vld [vmem:[#allocation5 + $0x288] sm:$0xf] }
 0x1fb   :  { %v2812_v15 = vmax.f32 %v1632_v26, 0.0  ;;  %v11998_v26 = vld [vmem:[#allocation49_spill] sm:$0xff] }
 0x1fc   :  { %11990 = vst [vmem:[#allocation45_spill] sm:$0xff] %v9654_v49 }
 0x1fd   :  { %v1544_v19 = vpop.f32.mrf.mxu2 }
 0x1fe   :  { %v1545_v44 = vadd.f32 %v1544_v19, %v11991_v46  ;;  %v8619_v19 = vld [vmem:[#allocation5 + $0x294] sm:$0xf0] }
 0x1ff   :  { %v1725_v42 = vpop.f32.mrf.mxu0  ;;  %v8651_v46 = vld [vmem:[#allocation5 + $0x394] sm:$0xf0] }
 0x200   :  { %v1633_v2 = vpop.f32.mrf.mxu3  ;;  %v1726_v5 = vadd.f32 %v1725_v42, %v9454_v34  ;;  %v1814_v38 = vpop.f32.mrf.mxu1  ;;  %v7459_v42 = vor.u32 %v8619_v19, %v7458_v47 }
 0x201   :  { %v1634_v8 = vadd.f32 %v1633_v2, %v1545_v44  ;;  %v7586_v44 = vld [vmem:[#allocation5 + $0x388] sm:$0xf] }
 0x202   :  { %v9658_v37 = vadd.f32 %v1814_v38, %v1726_v5  ;;  %1862 = vmatmul.bf16.gmra.mxu2 %v11993_v28  ;;  %2040 = vmatmul.bf16.gmra.mxu0 %v11994_v60  ;;  %v7587_v38 = vor.u32 %v8651_v46, %v7586_v44 }
 0x203   :  { %v2816_v21 = vmax.f32 %v1634_v8, 0.0  ;;  %2129 = vmatmul.bf16.gmra.mxu1 %v11996_v53  ;;  %2193 = vmatpush.bf16.msrb.mxu2 %v7459_v42  ;;  %v12001_v42 = vld [vmem:[#allocation50_spill] sm:$0xff] }
 0x204   :  { %11992 = vst [vmem:[#allocation48_spill] sm:$0xff] %v9658_v37  ;;  %2282 = vmatpush.bf16.msrb.mxu3 %v7587_v38  ;;  %v12006_v38 = vld [vmem:[#allocation53_spill] sm:$0xff] }
 0x205   :  { %1951 = vmatmul.bf16.gmra.mxu3 %v11995_v40  ;;  %v9664_v20 = vpack.c.bf16 %v2816_v21, %v2812_v15  ;;  %v1547_v2 = vpop.f32.mrf.mxu2  ;;  %v11999_v15 = vld [vmem:[#allocation52_spill] sm:$0xff] }
 0x206   :  { %v1548_v8 = vadd.f32 %v1547_v2, %v11998_v26 }
 0x207   :  { %11997 = vst [vmem:[#allocation89_spill] sm:$0xff] %v9664_v20  ;;  %v1727_v37 = vpop.f32.mrf.mxu0 }
 0x208   :  { %v1636_v5 = vpop.f32.mrf.mxu3  ;;  %v1728_v60 = vadd.f32 %v1727_v37, %v9454_v34  ;;  %v1816_v40 = vpop.f32.mrf.mxu1  ;;  %v12002_v37 = vld [vmem:[#allocation34_spill] sm:$0xff] }
 0x209   :  { %v1637_v28 = vadd.f32 %v1636_v5, %v1548_v8  ;;  %v12003_v8 = vld [vmem:[#allocation51_spill] sm:$0xff] }
 0x20a   :  { %v9668_v53 = vadd.f32 %v1816_v40, %v1728_v60  ;;  %v12004_v60 = vld [vmem:[#allocation35_spill] sm:$0xff] }
 0x20b   :  { %v2820_v26 = vmax.f32 %v1637_v28, 0.0 }
 0x20d   :  { %v1549_v21 = vpop.f32.mrf.mxu2 }
 0x20e   :  { %v1550_v20 = vadd.f32 %v1549_v21, %v11999_v15 }
 0x20f   :  { %v1730_v25 = vpop.f32.mrf.mxu0 }
 0x210   :  { %v1638_v49 = vpop.f32.mrf.mxu3  ;;  %v1731_v19 = vadd.f32 %v1730_v25, %v9454_v34  ;;  %v1819_v2 = vpop.f32.mrf.mxu1 }
 0x211   :  { %v1639_v47 = vadd.f32 %v1638_v49, %v1550_v20 }
 0x212   :  { %v9672_v46 = vadd.f32 %v1819_v2, %v1731_v19  ;;  %1867 = vmatmul.bf16.gmra.mxu2 %v12001_v42  ;;  %2045 = vmatmul.bf16.gmra.mxu0 %v12002_v37  ;;  %v12008_v2 = vld [vmem:[#allocation56_spill] sm:$0xff] }
 0x213   :  { %v2824_v44 = vmax.f32 %v1639_v47, 0.0  ;;  %2134 = vmatmul.bf16.gmra.mxu1 %v12004_v60 }
 0x214   :  { %12000 = vst [vmem:[#allocation49_spill] sm:$0xff] %v9672_v46 }
 0x215   :  { %1956 = vmatmul.bf16.gmra.mxu3 %v12003_v8  ;;  %v9678_v40 = vpack.c.bf16 %v2824_v44, %v2820_v26  ;;  %v1552_v5 = vpop.f32.mrf.mxu2 }
 0x216   :  { %v1553_v49 = vadd.f32 %v1552_v5, %v12006_v38  ;;  %v12010_v38 = vld [vmem:[#allocation54_spill] sm:$0xff] }
 0x217   :  { %12005 = vst [vmem:[#allocation52_spill] sm:$0xff] %v9678_v40  ;;  %v1732_v25 = vpop.f32.mrf.mxu0 }
 0x218   :  { %v1641_v20 = vpop.f32.mrf.mxu3  ;;  %v1733_v28 = vadd.f32 %v1732_v25, %v9454_v34  ;;  %v1821_v15 = vpop.f32.mrf.mxu1  ;;  %v12013_v25 = vld [vmem:[#allocation37_spill] sm:$0xff] }
 0x219   :  { %v1642_v21 = vadd.f32 %v1641_v20, %v1553_v49  ;;  %v12011_v49 = vld [vmem:[#allocation36_spill] sm:$0xff]  ;;  %v12012_v20 = vld [vmem:[#allocation55_spill] sm:$0xff] }
 0x21a   :  { %v9682_v47 = vadd.f32 %v1821_v15, %v1733_v28  ;;  %v7442_v15 = vld [vmem:[#allocation5 + $0x268] sm:$0xf] }
 0x21b   :  { %v2828_v40 = vmax.f32 %v1642_v21, 0.0 }
 0x21c   :  { %12007 = vst [vmem:[#allocation53_spill] sm:$0xff] %v9682_v47 }
 0x21d   :  { %v1554_v19 = vpop.f32.mrf.mxu2 }
 0x21e   :  { %v1555_v46 = vadd.f32 %v1554_v19, %v12008_v2  ;;  %v8615_v19 = vld [vmem:[#allocation5 + $0x274] sm:$0xf0] }
 0x21f   :  { %v1735_v8 = vpop.f32.mrf.mxu0  ;;  %v8647_v2 = vld [vmem:[#allocation5 + $0x374] sm:$0xf0] }
 0x220   :  { %v1643_v37 = vpop.f32.mrf.mxu3  ;;  %v1736_v26 = vadd.f32 %v1735_v8, %v9454_v34  ;;  %v1824_v44 = vpop.f32.mrf.mxu1  ;;  %v7570_v8 = vld [vmem:[#allocation5 + $0x368] sm:$0xf] }
 0x221   :  { %v1644_v42 = vadd.f32 %v1643_v37, %v1555_v46  ;;  %v7443_v37 = vor.u32 %v8615_v19, %v7442_v15 }
 0x222   :  { %v9686_v5 = vadd.f32 %v1824_v44, %v1736_v26  ;;  %1872 = vmatmul.bf16.gmra.mxu2 %v12010_v38  ;;  %2050 = vmatmul.bf16.gmra.mxu0 %v12011_v49  ;;  %v7571_v26 = vor.u32 %v8647_v2, %v7570_v8 }
 0x223   :  { %v2832_v60 = vmax.f32 %v1644_v42, 0.0  ;;  %2139 = vmatmul.bf16.gmra.mxu1 %v12013_v25  ;;  %2194 = vmatpush.bf16.msrb.mxu2 %v7443_v37  ;;  %v12017_v37 = vld [vmem:[#allocation57_spill] sm:$0xff] }
 0x224   :  { %12009 = vst [vmem:[#allocation56_spill] sm:$0xff] %v9686_v5  ;;  %2283 = vmatpush.bf16.msrb.mxu3 %v7571_v26  ;;  %v8565_v26 = vld [vmem:[#allocation5 + $0xec] sm:$0xf] }
 0x225   :  { %1961 = vmatmul.bf16.gmra.mxu3 %v12012_v20  ;;  %v9692_v28 = vpack.c.bf16 %v2832_v60, %v2828_v40  ;;  %v1557_v46 = vpop.f32.mrf.mxu2  ;;  %v12015_v40 = vld [vmem:[#allocation59_spill] sm:$0xff] }
 0x226   :  { %v1558_v42 = vadd.f32 %v1557_v46, %v9428_v35 }
 0x227   :  { %12014 = vst [vmem:[#allocation90_spill] sm:$0xff] %v9692_v28  ;;  %v1737_v44 = vpop.f32.mrf.mxu0 }
 0x228   :  { %v1646_v21 = vpop.f32.mrf.mxu3  ;;  %v1738_v49 = vadd.f32 %v1737_v44, %v9454_v34  ;;  %v1826_v20 = vpop.f32.mrf.mxu1  ;;  %v7252_v44 = vld [vmem:[#allocation5 + $0xf8] sm:$0xf0] }
 0x229   :  { %v1647_v5 = vadd.f32 %v1646_v21, %v1558_v42  ;;  %v12018_v42 = vld [vmem:[#allocation38_spill] sm:$0xff] }
 0x22a   :  { %v9696_v25 = vadd.f32 %v1826_v20, %v1738_v49  ;;  %v12019_v21 = vld [vmem:[#allocation58_spill] sm:$0xff]  ;;  %v12020_v49 = vld [vmem:[#allocation39_spill] sm:$0xff] }
 0x22b   :  { %v2836_v46 = vmax.f32 %v1647_v5, 0.0 }
 0x22d   :  { %v1559_v60 = vpop.f32.mrf.mxu2 }
 0x22e   :  { %v1560_v28 = vadd.f32 %v1559_v60, %v12015_v40  ;;  %v12022_v60 = vld [vmem:[#allocation60_spill] sm:$0xff] }
 0x22f   :  { %v1740_v15 = vpop.f32.mrf.mxu0 }
 0x230   :  { %v1648_v38 = vpop.f32.mrf.mxu3  ;;  %v1741_v47 = vadd.f32 %v1740_v15, %v9454_v34  ;;  %v1829_v35 = vpop.f32.mrf.mxu1 }
 0x231   :  { %v1649_v19 = vadd.f32 %v1648_v38, %v1560_v28  ;;  %v7255_v28 = vor.u32 %v8565_v26, %v7252_v44  ;;  %v12025_v44 = vld [vmem:[#allocation63_spill] sm:$0xff] }
 0x232   :  { %v9700_v2 = vadd.f32 %v1829_v35, %v1741_v47  ;;  %1877 = vmatmul.bf16.gmra.mxu2 %v12017_v37  ;;  %2055 = vmatmul.bf16.gmra.mxu0 %v12018_v42  ;;  %v7380_v42 = vld [vmem:[#allocation5 + $0x1f8] sm:$0xf0] }
 0x233   :  { %v2840_v8 = vmax.f32 %v1649_v19, 0.0  ;;  %2144 = vmatmul.bf16.gmra.mxu1 %v12020_v49  ;;  %2368 = vmatpush.bf16.msrb.mxu0 %v7255_v28 }
 0x234   :  { %12016 = vst [vmem:[#allocation59_spill] sm:$0xff] %v9700_v2 }
 0x235   :  { %1966 = vmatmul.bf16.gmra.mxu3 %v12019_v21  ;;  %v9706_v20 = vpack.c.bf16 %v2840_v8, %v2836_v46  ;;  %v1562_v38 = vpop.f32.mrf.mxu2  ;;  %v8597_v21 = vld [vmem:[#allocation5 + $0x1ec] sm:$0xf]  ;;  %v9712_v46 = vld [vmem:[#allocation7] sm:$0xf] }
 0x236   :  { %v1563_v40 = vadd.f32 %v1562_v38, %v12022_v60  ;;  %v7383_v49 = vor.u32 %v8597_v21, %v7380_v42  ;;  %12024 = vst [vmem:[#allocation92_spill] sm:$0xff] %v9712_v46  ;;  %v9715_v8 = vperm.slane %v9712_v46, 2  ;;  %v12027_v42 = vld [vmem:[#allocation61_spill] sm:$0xff]  ;;  %v12028_v21 = vld [vmem:[#allocation20_spill] sm:$0xff]  ;;  %v8643_v46 = vld [vmem:[#allocation5 + $0x354] sm:$0xf0] }
 0x237   :  { %12021 = vst [vmem:[#allocation91_spill] sm:$0xff] %v9706_v20  ;;  %v1742_v15 = vpop.f32.mrf.mxu0  ;;  %v12029_v20 = vld [vmem:[#allocation62_spill] sm:$0xff] }
 0x238   :  { %v1651_v5 = vpop.f32.mrf.mxu3  ;;  %v1743_v19 = vadd.f32 %v1742_v15, %v9454_v34  ;;  %v1831_v35 = vpop.f32.mrf.mxu1  ;;  %2457 = vmatpush.bf16.msrb.mxu1 %v7383_v49 }
 0x239   :  { %v1652_v47 = vadd.f32 %v1651_v5, %v1563_v40 }
 0x23a   :  { %v9710_v2 = vadd.f32 %v1831_v35, %v1743_v19 }
 0x23b   :  { %v2844_v15 = vmax.f32 %v1652_v47, 0.0  ;;  %v12032_v47 = vld [vmem:[#allocation64_spill] sm:$0xff] }
 0x23c   :  { %12023 = vst [vmem:[#allocation60_spill] sm:$0xff] %v9710_v2  ;;  %v12030_v2 = vld [vmem:[#allocation21_spill] sm:$0xff] }
 0x23d   :  { %v1564_v26 = vpop.f32.mrf.mxu2 }
 0x23e   :  { %v1565_v38 = vadd.f32 %v1564_v26, %v12025_v44  ;;  %v7426_v26 = vld [vmem:[#allocation5 + $0x248] sm:$0xf]  ;;  %v8611_v44 = vld [vmem:[#allocation5 + $0x254] sm:$0xf0] }
 0x23f   :  { %v2021_v28 = vpop.f32.mrf.mxu0 }
 0x240   :  { %v1653_v60 = vpop.f32.mrf.mxu3  ;;  %v2022_v34 = vadd.f32 %v2021_v28, %v9715_v8  ;;  %v2110_v5 = vpop.f32.mrf.mxu1  ;;  %v7427_v28 = vor.u32 %v8611_v44, %v7426_v26 }
 0x241   :  { %v1654_v40 = vadd.f32 %v1653_v60, %v1565_v38  ;;  %v7554_v38 = vld [vmem:[#allocation5 + $0x348] sm:$0xf] }
 0x242   :  { %v9719_v35 = vadd.f32 %v2110_v5, %v2022_v34  ;;  %1882 = vmatmul.bf16.gmra.mxu2 %v12027_v42  ;;  %2060 = vmatmul.bf16.gmra.mxu0 %v12028_v21  ;;  %v7555_v5 = vor.u32 %v8643_v46, %v7554_v38 }
 0x243   :  { %v2848_v19 = vmax.f32 %v1654_v40, 0.0  ;;  %2149 = vmatmul.bf16.gmra.mxu1 %v12030_v2  ;;  %2195 = vmatpush.bf16.msrb.mxu2 %v7427_v28 }
 0x244   :  { %12026 = vst [vmem:[#allocation63_spill] sm:$0xff] %v9719_v35  ;;  %2284 = vmatpush.bf16.msrb.mxu3 %v7555_v5 }
 0x245   :  { %1971 = vmatmul.bf16.gmra.mxu3 %v12029_v20  ;;  %v9725_v49 = vpack.c.bf16 %v2848_v19, %v2844_v15  ;;  %v1843_v60 = vpop.f32.mrf.mxu2 }
 0x246   :  { %v1844_v40 = vadd.f32 %v1843_v60, %v12032_v47 }
 0x247   :  { %12031 = vst [vmem:[#allocation93_spill] sm:$0xff] %v9725_v49  ;;  %v2023_v35 = vpop.f32.mrf.mxu0 }
 0x248   :  { %v1932_v34 = vpop.f32.mrf.mxu3  ;;  %v2024_v21 = vadd.f32 %v2023_v35, %v9715_v8  ;;  %v2112_v20 = vpop.f32.mrf.mxu1 }
 0x249   :  { %v1933_v42 = vadd.f32 %v1932_v34, %v1844_v40 }
 0x24a   :  { %v9729_v2 = vadd.f32 %v2112_v20, %v2024_v21  ;;  %v12034_v20 = vld [vmem:[#allocation22_spill] sm:$0xff] }
 0x24b   :  { %v2725_v47 = vmax.f32 %v1933_v42, 0.0  ;;  %v7236_v21 = vld [vmem:[#allocation5 + $0xd8] sm:$0xf0] }
 0x24d   :  { %v1845_v15 = vpop.f32.mrf.mxu2 }
 0x24e   :  { %v1846_v19 = vadd.f32 %v1845_v15, %v9472_v18  ;;  %v8561_v18 = vld [vmem:[#allocation5 + $0xcc] sm:$0xf] }
 0x24f   :  { %v2026_v37 = vpop.f32.mrf.mxu0  ;;  %v7239_v28 = vor.u32 %v8561_v18, %v7236_v21 }
 0x250   :  { %v1934_v49 = vpop.f32.mrf.mxu3  ;;  %v2027_v44 = vadd.f32 %v2026_v37, %v9715_v8  ;;  %v2115_v60 = vpop.f32.mrf.mxu1  ;;  %v12036_v37 = vld [vmem:[#allocation65_spill] sm:$0xff] }
 0x251   :  { %v1935_v26 = vadd.f32 %v1934_v49, %v1846_v19  ;;  %2369 = vmatpush.bf16.msrb.mxu0 %v7239_v28 }
 0x252   :  { %v9733_v38 = vadd.f32 %v2115_v60, %v2027_v44  ;;  %1887 = vmatmul.bf16.gmra.mxu2 %v9475_v57  ;;  %2065 = vmatmul.bf16.gmra.mxu0 %v9209_v23  ;;  %v8593_v44 = vld [vmem:[#allocation5 + $0x1cc] sm:$0xf]  ;;  %v7364_v60 = vld [vmem:[#allocation5 + $0x1d8] sm:$0xf0] }
 0x253   :  { %v2729_v46 = vmax.f32 %v1935_v26, 0.0  ;;  %2154 = vmatmul.bf16.gmra.mxu1 %v12034_v20 }
 0x254   :  { %12033 = vst [vmem:[#allocation64_spill] sm:$0xff] %v9733_v38  ;;  %v7367_v38 = vor.u32 %v8593_v44, %v7364_v60  ;;  %v8639_v44 = vld [vmem:[#allocation5 + $0x334] sm:$0xf0] }
 0x255   :  { %1976 = vmatmul.bf16.gmra.mxu3 %v9477_v51  ;;  %v9739_v35 = vpack.c.bf16 %v2729_v46, %v2725_v47  ;;  %v1848_v49 = vpop.f32.mrf.mxu2  ;;  %v12037_v46 = vld [vmem:[#allocation67_spill] sm:$0xff] }
 0x256   :  { %v1849_v40 = vadd.f32 %v1848_v49, %v12036_v37  ;;  %2458 = vmatpush.bf16.msrb.mxu1 %v7367_v38 }
 0x257   :  { %12035 = vst [vmem:[#allocation94_spill] sm:$0xff] %v9739_v35  ;;  %v2028_v34 = vpop.f32.mrf.mxu0 }
 0x258   :  { %v1937_v42 = vpop.f32.mrf.mxu3  ;;  %v2029_v15 = vadd.f32 %v2028_v34, %v9715_v8  ;;  %v2117_v19 = vpop.f32.mrf.mxu1  ;;  %v7410_v34 = vld [vmem:[#allocation5 + $0x228] sm:$0xf] }
 0x259   :  { %v1938_v5 = vadd.f32 %v1937_v42, %v1849_v40 }
 0x25a   :  { %v9743_v26 = vadd.f32 %v2117_v19, %v2029_v15  ;;  %v8607_v15 = vld [vmem:[#allocation5 + $0x234] sm:$0xf0] }
 0x25b   :  { %v2733_v28 = vmax.f32 %v1938_v5, 0.0  ;;  %v7411_v19 = vor.u32 %v8607_v15, %v7410_v34  ;;  %v12040_v5 = vld [vmem:[#allocation68_spill] sm:$0xff] }
 0x25d   :  { %v1850_v47 = vpop.f32.mrf.mxu2  ;;  %2196 = vmatpush.bf16.msrb.mxu2 %v7411_v19  ;;  %v12042_v19 = vld [vmem:[#allocation29_spill] sm:$0xff] }
 0x25e   :  { %v1851_v35 = vadd.f32 %v1850_v47, %v12037_v46 }
 0x25f   :  { %v2031_v18 = vpop.f32.mrf.mxu0 }
 0x260   :  { %v1939_v20 = vpop.f32.mrf.mxu3  ;;  %v2032_v49 = vadd.f32 %v2031_v18, %v9715_v8  ;;  %v2120_v37 = vpop.f32.mrf.mxu1 }
 0x261   :  { %v1940_v21 = vadd.f32 %v1939_v20, %v1851_v35  ;;  %v7538_v20 = vld [vmem:[#allocation5 + $0x328] sm:$0xf] }
 0x262   :  { %v9747_v42 = vadd.f32 %v2120_v37, %v2032_v49  ;;  %1892 = vmatmul.bf16.gmra.mxu2 %v9493_v31  ;;  %2070 = vmatmul.bf16.gmra.mxu0 %v9221_v41  ;;  %v7539_v46 = vor.u32 %v8639_v44, %v7538_v20 }
 0x263   :  { %v2737_v40 = vmax.f32 %v1940_v21, 0.0  ;;  %2159 = vmatmul.bf16.gmra.mxu1 %v9225_v43 }
 0x264   :  { %12038 = vst [vmem:[#allocation65_spill] sm:$0xff] %v9747_v42  ;;  %2285 = vmatpush.bf16.msrb.mxu3 %v7539_v46 }
 0x265   :  { %1981 = vmatmul.bf16.gmra.mxu3 %v9495_v32  ;;  %v9753_v38 = vpack.c.bf16 %v2737_v40, %v2733_v28  ;;  %v1853_v35 = vpop.f32.mrf.mxu2 }
 0x266   :  { %v1854_v60 = vadd.f32 %v1853_v35, %v12040_v5 }
 0x267   :  { %12039 = vst [vmem:[#allocation67_spill] sm:$0xff] %v9753_v38  ;;  %v2033_v18 = vpop.f32.mrf.mxu0 }
 0x268   :  { %v1942_v47 = vpop.f32.mrf.mxu3  ;;  %v2034_v49 = vadd.f32 %v2033_v18, %v9715_v8  ;;  %v2122_v37 = vpop.f32.mrf.mxu1 }
 0x269   :  { %v1943_v21 = vadd.f32 %v1942_v47, %v1854_v60  ;;  %v7220_v47 = vld [vmem:[#allocation5 + $0xb8] sm:$0xf0] }
 0x26a   :  { %v9757_v42 = vadd.f32 %v2122_v37, %v2034_v49 }
 0x26b   :  { %v2741_v5 = vmax.f32 %v1943_v21, 0.0 }
 0x26d   :  { %v1855_v28 = vpop.f32.mrf.mxu2 }
 0x26e   :  { %v1856_v40 = vadd.f32 %v1855_v28, %v9508_v56  ;;  %v8557_v56 = vld [vmem:[#allocation5 + $0xac] sm:$0xf] }
 0x26f   :  { %v2036_v43 = vpop.f32.mrf.mxu0  ;;  %v7223_v46 = vor.u32 %v8557_v56, %v7220_v47 }
 0x270   :  { %v1944_v38 = vpop.f32.mrf.mxu3  ;;  %v2037_v15 = vadd.f32 %v2036_v43, %v9715_v8  ;;  %v2125_v35 = vpop.f32.mrf.mxu1  ;;  %v12044_v43 = vld [vmem:[#allocation72_spill] sm:$0xff] }
 0x271   :  { %v1945_v34 = vadd.f32 %v1944_v38, %v1856_v40  ;;  %2370 = vmatpush.bf16.msrb.mxu0 %v7223_v46 }
 0x272   :  { %v9761_v44 = vadd.f32 %v2125_v35, %v2037_v15  ;;  %1897 = vmatmul.bf16.gmra.mxu2 %v9511_v1  ;;  %2075 = vmatmul.bf16.gmra.mxu0 %v9233_v59  ;;  %v8589_v15 = vld [vmem:[#allocation5 + $0x1ac] sm:$0xf]  ;;  %v7348_v35 = vld [vmem:[#allocation5 + $0x1b8] sm:$0xf0] }
 0x273   :  { %v2745_v20 = vmax.f32 %v1945_v34, 0.0  ;;  %2164 = vmatmul.bf16.gmra.mxu1 %v12042_v19 }
 0x274   :  { %12041 = vst [vmem:[#allocation68_spill] sm:$0xff] %v9761_v44  ;;  %v7351_v44 = vor.u32 %v8589_v15, %v7348_v35  ;;  %v12051_v15 = vld [vmem:[#allocation33_spill] sm:$0xff]  ;;  %v7394_v35 = vld [vmem:[#allocation5 + $0x208] sm:$0xf] }
 0x275   :  { %1986 = vmatmul.bf16.gmra.mxu3 %v9513_v11  ;;  %v9767_v60 = vpack.c.bf16 %v2745_v20, %v2741_v5  ;;  %v1858_v38 = vpop.f32.mrf.mxu2  ;;  %v12046_v20 = vld [vmem:[#allocation74_spill] sm:$0xff]  ;;  %v12055_v11 = vld [vmem:[#allocation79_spill] sm:$0xff] }
 0x276   :  { %v1859_v18 = vadd.f32 %v1858_v38, %v12044_v43  ;;  %2459 = vmatpush.bf16.msrb.mxu1 %v7351_v44 }
 0x277   :  { %12043 = vst [vmem:[#allocation95_spill] sm:$0xff] %v9767_v60  ;;  %v2038_v49 = vpop.f32.mrf.mxu0 }
 0x278   :  { %v1947_v21 = vpop.f32.mrf.mxu3  ;;  %v2039_v28 = vadd.f32 %v2038_v49, %v9715_v8  ;;  %v2127_v40 = vpop.f32.mrf.mxu1  ;;  %v12048_v49 = vld [vmem:[#allocation75_spill] sm:$0xff] }
 0x279   :  { %v1948_v37 = vadd.f32 %v1947_v21, %v1859_v18 }
 0x27a   :  { %v9771_v34 = vadd.f32 %v2127_v40, %v2039_v28  ;;  %v12049_v28 = vld [vmem:[#allocation31_spill] sm:$0xff]  ;;  %v12050_v40 = vld [vmem:[#allocation76_spill] sm:$0xff] }
 0x27b   :  { %v2749_v46 = vmax.f32 %v1948_v37, 0.0  ;;  %v12053_v37 = vld [vmem:[#allocation77_spill] sm:$0xff] }
 0x27c   :  { %12045 = vst [vmem:[#allocation72_spill] sm:$0xff] %v9771_v34  ;;  %v8585_v34 = vld [vmem:[#allocation5 + $0x18c] sm:$0xf] }
 0x27d   :  { %v1860_v5 = vpop.f32.mrf.mxu2 }
 0x27e   :  { %v1861_v60 = vadd.f32 %v1860_v5, %v12046_v20  ;;  %v8603_v5 = vld [vmem:[#allocation5 + $0x214] sm:$0xf0] }
 0x27f   :  { %v2041_v56 = vpop.f32.mrf.mxu0  ;;  %v7395_v20 = vor.u32 %v8603_v5, %v7394_v35 }
 0x280   :  { %v1949_v19 = vpop.f32.mrf.mxu3  ;;  %v2042_v38 = vadd.f32 %v2041_v56, %v9715_v8  ;;  %v2130_v43 = vpop.f32.mrf.mxu1  ;;  %v8635_v56 = vld [vmem:[#allocation5 + $0x314] sm:$0xf0] }
 0x281   :  { %v1950_v47 = vadd.f32 %v1949_v19, %v1861_v60  ;;  %v7522_v19 = vld [vmem:[#allocation5 + $0x308] sm:$0xf]  ;;  %2197 = vmatpush.bf16.msrb.mxu2 %v7395_v20 }
 0x282   :  { %v9775_v21 = vadd.f32 %v2130_v43, %v2042_v38  ;;  %1902 = vmatmul.bf16.gmra.mxu2 %v12048_v49  ;;  %2080 = vmatmul.bf16.gmra.mxu0 %v12049_v28  ;;  %v7523_v43 = vor.u32 %v8635_v56, %v7522_v19 }
 0x283   :  { %v2753_v18 = vmax.f32 %v1950_v47, 0.0  ;;  %2169 = vmatmul.bf16.gmra.mxu1 %v12051_v15 }
 0x284   :  { %12047 = vst [vmem:[#allocation74_spill] sm:$0xff] %v9775_v21  ;;  %2286 = vmatpush.bf16.msrb.mxu3 %v7523_v43 }
 0x285   :  { %1991 = vmatmul.bf16.gmra.mxu3 %v12050_v40  ;;  %v9781_v44 = vpack.c.bf16 %v2753_v18, %v2749_v46  ;;  %v1863_v60 = vpop.f32.mrf.mxu2  ;;  %v8553_v18 = vld [vmem:[#allocation5 + $0x8c] sm:$0xf] }
 0x286   :  { %v1864_v47 = vadd.f32 %v1863_v60, %v12053_v37  ;;  %v7332_v60 = vld [vmem:[#allocation5 + $0x198] sm:$0xf0] }
 0x287   :  { %12052 = vst [vmem:[#allocation96_spill] sm:$0xff] %v9781_v44  ;;  %v2043_v21 = vpop.f32.mrf.mxu0  ;;  %v7204_v44 = vld [vmem:[#allocation5 + $0x98] sm:$0xf0]  ;;  %v7335_v19 = vor.u32 %v8585_v34, %v7332_v60 }
 0x288   :  { %v1952_v38 = vpop.f32.mrf.mxu3  ;;  %v2044_v28 = vadd.f32 %v2043_v21, %v9715_v8  ;;  %v2132_v40 = vpop.f32.mrf.mxu1  ;;  %v7207_v59 = vor.u32 %v8553_v18, %v7204_v44  ;;  %v8549_v21 = vld [vmem:[#allocation5 + $0x6c] sm:$0xf]  ;;  %v7316_v44 = vld [vmem:[#allocation5 + $0x178] sm:$0xf0] }
 0x289   :  { %v1953_v49 = vadd.f32 %v1952_v38, %v1864_v47  ;;  %2460 = vmatpush.bf16.msrb.mxu1 %v7335_v19  ;;  %v7172_v18 = vld [vmem:[#allocation5 + $0x58] sm:$0xf0] }
 0x28a   :  { %v9785_v15 = vadd.f32 %v2132_v40, %v2044_v28  ;;  %2371 = vmatpush.bf16.msrb.mxu0 %v7207_v59  ;;  %v7188_v28 = vld [vmem:[#allocation5 + $0x78] sm:$0xf0]  ;;  %v8581_v40 = vld [vmem:[#allocation5 + $0x16c] sm:$0xf] }
 0x28b   :  { %v2757_v38 = vmax.f32 %v1953_v49, 0.0  ;;  %v7319_v34 = vor.u32 %v8581_v40, %v7316_v44  ;;  %v8545_v49 = vld [vmem:[#allocation5 + $0x4c] sm:$0xf]  ;;  %v7300_v19 = vld [vmem:[#allocation5 + $0x158] sm:$0xf0] }
 0x28c   :  { %12054 = vst [vmem:[#allocation77_spill] sm:$0xff] %v9785_v15  ;;  %v8541_v40 = vld [vmem:[#allocation5 + $0x2c] sm:$0xf] }
 0x28d   :  { %v1865_v46 = vpop.f32.mrf.mxu2  ;;  %2461 = vmatpush.bf16.msrb.mxu1 %v7319_v34  ;;  %v7284_v34 = vld [vmem:[#allocation5 + $0x138] sm:$0xf0] }
 0x28e   :  { %v1866_v35 = vadd.f32 %v1865_v46, %v12055_v11  ;;  %v7191_v11 = vor.u32 %v8549_v21, %v7188_v28 }
 0x28f   :  { %v2046_v37 = vpop.f32.mrf.mxu0 }
 0x290   :  { %v1954_v5 = vpop.f32.mrf.mxu3  ;;  %v2047_v20 = vadd.f32 %v2046_v37, %v9715_v8  ;;  %v2135_v47 = vpop.f32.mrf.mxu1  ;;  %2372 = vmatpush.bf16.msrb.mxu0 %v7191_v11  ;;  %v7175_v37 = vor.u32 %v8545_v49, %v7172_v18  ;;  %v7140_v49 = vld [vmem:[#allocation5 + $0x18] sm:$0xf0]  ;;  %v8569_v18 = vld [vmem:[#allocation5 + $0x10c] sm:$0xf] }
 0x291   :  { %v1955_v56 = vadd.f32 %v1954_v5, %v1866_v35  ;;  %v8577_v35 = vld [vmem:[#allocation5 + $0x14c] sm:$0xf] }
 0x292   :  { %v9789_v15 = vadd.f32 %v2135_v47, %v2047_v20  ;;  %1907 = vmatmul.bf16.gmra.mxu2 %v9547_v13  ;;  %2085 = vmatmul.bf16.gmra.mxu0 %v9257_v10  ;;  %v7303_v20 = vor.u32 %v8577_v35, %v7300_v19  ;;  %v12058_v35 = vld [vmem:[#allocation81_spill] sm:$0xff] }
 0x293   :  { %v2761_v43 = vmax.f32 %v1955_v56, 0.0  ;;  %2174 = vmatmul.bf16.gmra.mxu1 %v9261_v12 }
 0x294   :  { %12056 = vst [vmem:[#allocation79_spill] sm:$0xff] %v9789_v15  ;;  %2373 = vmatpush.bf16.msrb.mxu0 %v7175_v37  ;;  %2462 = vmatpush.bf16.msrb.mxu1 %v7303_v20  ;;  %v7268_v37 = vld [vmem:[#allocation5 + $0x118] sm:$0xf0] }
 0x295   :  { %1996 = vmatmul.bf16.gmra.mxu3 %v9549_v29  ;;  %v9795_v59 = vpack.c.bf16 %v2761_v43, %v2757_v38  ;;  %v1868_v46 = vpop.f32.mrf.mxu2  ;;  %v7156_v38 = vld [vmem:[#allocation5 + $0x38] sm:$0xf0]  ;;  %v8573_v43 = vld [vmem:[#allocation5 + $0x12c] sm:$0xf]  ;;  %v7271_v20 = vor.u32 %v8569_v18, %v7268_v37 }
 0x296   :  { %v1869_v5 = vadd.f32 %v1868_v46, %v9552_v27  ;;  %v7159_v44 = vor.u32 %v8541_v40, %v7156_v38  ;;  %v8537_v46 = vld [vmem:[#allocation5 + $0xc] sm:$0xf]  ;;  %v7636_v18 = vld [vmem:[#allocation5 + $0x3f8] sm:$0xf0] }
 0x297   :  { %12057 = vst [vmem:[#allocation97_spill] sm:$0xff] %v9795_v59  ;;  %v2048_v56 = vpop.f32.mrf.mxu0  ;;  %v7287_v59 = vor.u32 %v8573_v43, %v7284_v34  ;;  %v7143_v19 = vor.u32 %v8537_v46, %v7140_v49  ;;  %v7508_v34 = vld [vmem:[#allocation5 + $0x2f8] sm:$0xf0] }
 0x298   :  { %v1957_v60 = vpop.f32.mrf.mxu3  ;;  %v2049_v21 = vadd.f32 %v2048_v56, %v9715_v8  ;;  %v2137_v28 = vpop.f32.mrf.mxu1  ;;  %2374 = vmatpush.bf16.msrb.mxu0 %v7159_v44  ;;  %v8629_v44 = vld [vmem:[#allocation5 + $0x2ec] sm:$0xf] }
 0x299   :  { %v1958_v47 = vadd.f32 %v1957_v60, %v1869_v5  ;;  %2463 = vmatpush.bf16.msrb.mxu1 %v7287_v59  ;;  %v7511_v49 = vor.u32 %v8629_v44, %v7508_v34 }
 0x29a   :  { %v9799_v11 = vadd.f32 %v2137_v28, %v2049_v21 }
 0x29b   :  { %v2765_v40 = vmax.f32 %v1958_v47, 0.0  ;;  %2546 = vmatpush.bf16.msra.mxu2 %v7511_v49 }
 0x29c   :  { %2375 = vmatpush.bf16.msrb.mxu0 %v7143_v19 }
 0x29d   :  { %v1870_v27 = vpop.f32.mrf.mxu2  ;;  %2464 = vmatpush.bf16.msrb.mxu1 %v7271_v20 }
 0x29e   :  { %v1871_v5 = vadd.f32 %v1870_v27, %v12058_v35  ;;  %v8661_v27 = vld [vmem:[#allocation5 + $0x3ec] sm:$0xf] }
 0x29f   :  { %v2051_v56 = vpop.f32.mrf.mxu0  ;;  %v7639_v35 = vor.u32 %v8661_v27, %v7636_v18 }
 0x2a0   :  { %v1959_v60 = vpop.f32.mrf.mxu3  ;;  %v2052_v21 = vadd.f32 %v2051_v56, %v9715_v8  ;;  %v2140_v28 = vpop.f32.mrf.mxu1 }
 0x2a1   :  { %v1960_v15 = vadd.f32 %v1959_v60, %v1871_v5  ;;  %2635 = vmatpush.bf16.msra.mxu3 %v7639_v35 }
 0x2a2   :  { %v9803_v43 = vadd.f32 %v2140_v28, %v2052_v21  ;;  %1912 = vmatmul.bf16.gmra.mxu2 %v9565_v0  ;;  %2090 = vmatmul.bf16.gmra.mxu0 %v9269_v6 }
 0x2a3   :  { %v2769_v38 = vmax.f32 %v1960_v15, 0.0  ;;  %2179 = vmatmul.bf16.gmra.mxu1 %v9273_v14 }
 0x2a5   :  { %2001 = vmatmul.bf16.gmra.mxu3 %v9567_v17  ;;  %v9809_v59 = vpack.c.bf16 %v2769_v38, %v2765_v40  ;;  %v1873_v46 = vpop.f32.mrf.mxu2 }
 0x2a6   :  { %v1874_v15 = vadd.f32 %v1873_v46, %v9570_v7 }
 0x2a7   :  { %12059 = vst [vmem:[#allocation81_spill] sm:$0xff] %v9809_v59  ;;  %v2053_v5 = vpop.f32.mrf.mxu0 }
 0x2a8   :  { %v1962_v47 = vpop.f32.mrf.mxu3  ;;  %v2054_v19 = vadd.f32 %v2053_v5, %v9715_v8  ;;  %v2142_v37 = vpop.f32.mrf.mxu1 }
 0x2a9   :  { %v1963_v60 = vadd.f32 %v1962_v47, %v1874_v15 }
 0x2aa   :  { %v9813_v56 = vadd.f32 %v2142_v37, %v2054_v19 }
 0x2ab   :  { %v2773_v34 = vmax.f32 %v1963_v60, 0.0 }
 0x2ad   :  { %v1875_v20 = vpop.f32.mrf.mxu2 }
 0x2ae   :  { %v1876_v21 = vadd.f32 %v1875_v20, %v9580_v33 }
 0x2af   :  { %v2056_v40 = vpop.f32.mrf.mxu0 }
 0x2b0   :  { %v1964_v28 = vpop.f32.mrf.mxu3  ;;  %v2057_v44 = vadd.f32 %v2056_v40, %v9715_v8  ;;  %v2145_v7 = vpop.f32.mrf.mxu1 }
 0x2b1   :  { %v1965_v38 = vadd.f32 %v1964_v28, %v1876_v21 }
 0x2b2   :  { %v9817_v46 = vadd.f32 %v2145_v7, %v2057_v44  ;;  %1917 = vmatmul.bf16.gmra.mxu2 %v9583_v58  ;;  %2095 = vmatmul.bf16.gmra.mxu0 %v9281_v39 }
 0x2b3   :  { %v2777_v27 = vmax.f32 %v1965_v38, 0.0  ;;  %2184 = vmatmul.bf16.gmra.mxu1 %v9285_v45 }
 0x2b5   :  { %2006 = vmatmul.bf16.gmra.mxu3 %v9585_v30  ;;  %v9823_v49 = vpack.c.bf16 %v2777_v27, %v2773_v34  ;;  %v1878_v33 = vpop.f32.mrf.mxu2 }
 0x2b6   :  { %v1879_v18 = vadd.f32 %v1878_v33, %v9588_v55  ;;  %v7492_v33 = vld [vmem:[#allocation5 + $0x2d8] sm:$0xf0] }
 0x2b7   :  { %12060 = vst [vmem:[#allocation98_spill] sm:$0xff] %v9823_v49  ;;  %v2058_v47 = vpop.f32.mrf.mxu0 }
 0x2b8   :  { %v1967_v15 = vpop.f32.mrf.mxu3  ;;  %v2059_v5 = vadd.f32 %v2058_v47, %v9715_v8  ;;  %v2147_v60 = vpop.f32.mrf.mxu1 }
 0x2b9   :  { %v1968_v35 = vadd.f32 %v1967_v15, %v1879_v18  ;;  %v8657_v18 = vld [vmem:[#allocation5 + $0x3cc] sm:$0xf] }
 0x2ba   :  { %v9827_v19 = vadd.f32 %v2147_v60, %v2059_v5  ;;  %v7620_v5 = vld [vmem:[#allocation5 + $0x3d8] sm:$0xf0] }
 0x2bb   :  { %v2781_v7 = vmax.f32 %v1968_v35, 0.0 }
 0x2bd   :  { %v1880_v37 = vpop.f32.mrf.mxu2 }
 0x2be   :  { %v1881_v20 = vadd.f32 %v1880_v37, %v9598_v61  ;;  %v8625_v61 = vld [vmem:[#allocation5 + $0x2cc] sm:$0xf]  ;;  %v7623_v37 = vor.u32 %v8657_v18, %v7620_v5 }
 0x2bf   :  { %v2061_v28 = vpop.f32.mrf.mxu0  ;;  %v7495_v47 = vor.u32 %v8625_v61, %v7492_v33 }
 0x2c0   :  { %v1969_v21 = vpop.f32.mrf.mxu3  ;;  %v2062_v38 = vadd.f32 %v2061_v28, %v9715_v8  ;;  %v2150_v44 = vpop.f32.mrf.mxu1  ;;  %2636 = vmatpush.bf16.msra.mxu3 %v7623_v37 }
 0x2c1   :  { %v1970_v40 = vadd.f32 %v1969_v21, %v1881_v20  ;;  %2547 = vmatpush.bf16.msra.mxu2 %v7495_v47 }
 0x2c2   :  { %v9831_v55 = vadd.f32 %v2150_v44, %v2062_v38  ;;  %2198 = vmatmul.bf16.vlgmr.msrb.gmra.mxu2 %v9296_v52  ;;  %2376 = vmatmul.bf16.vlgmr.msrb.gmra.mxu0 %v9195_v63 }
 0x2c3   :  { %v2785_v34 = vmax.f32 %v1970_v40, 0.0  ;;  %2465 = vmatmul.bf16.vlgmr.msrb.gmra.mxu1 %v9199_v4 }
 0x2c5   :  { %2287 = vmatmul.bf16.vlgmr.msrb.gmra.mxu3 %v9298_v54  ;;  %v9837_v27 = vpack.c.bf16 %v2785_v34, %v2781_v7  ;;  %v1883_v15 = vpop.f32.mrf.mxu2 }
 0x2c6   :  { %v1884_v35 = vadd.f32 %v1883_v15, %v9602_v3 }
 0x2c7   :  { %12061 = vst [vmem:[#allocation99_spill] sm:$0xff] %v9837_v27  ;;  %v2063_v20 = vpop.f32.mrf.mxu0 }
 0x2c8   :  { %v1972_v60 = vpop.f32.mrf.mxu3  ;;  %v2064_v63 = vadd.f32 %v2063_v20, %v9715_v8  ;;  %v2152_v28 = vpop.f32.mrf.mxu1 }
 0x2c9   :  { %v1973_v21 = vadd.f32 %v1972_v60, %v1884_v35 }
 0x2ca   :  { %v9841_v4 = vadd.f32 %v2152_v28, %v2064_v63 }
 0x2cb   :  { %v2789_v33 = vmax.f32 %v1973_v21, 0.0 }
 0x2cd   :  { %v1885_v40 = vpop.f32.mrf.mxu2 }
 0x2ce   :  { %v1886_v38 = vadd.f32 %v1885_v40, %v9612_v62 }
 0x2cf   :  { %v2066_v7 = vpop.f32.mrf.mxu0 }
 0x2d0   :  { %v1974_v44 = vpop.f32.mrf.mxu3  ;;  %v2067_v61 = vadd.f32 %v2066_v7, %v9715_v8  ;;  %v2155_v3 = vpop.f32.mrf.mxu1 }
 0x2d1   :  { %v1975_v34 = vadd.f32 %v1974_v44, %v1886_v38 }
 0x2d2   :  { %v9845_v15 = vadd.f32 %v2155_v3, %v2067_v61  ;;  %2203 = vmatmul.bf16.gmra.mxu2 %v9314_v48  ;;  %2381 = vmatmul.bf16.gmra.mxu0 %v9207_v22  ;;  %v12063_v3 = vld [vmem:[#allocation23_spill] sm:$0xff] }
 0x2d3   :  { %v2793_v18 = vmax.f32 %v1975_v34, 0.0  ;;  %2470 = vmatmul.bf16.gmra.mxu1 %v9211_v24 }
 0x2d5   :  { %2292 = vmatmul.bf16.gmra.mxu3 %v9316_v50  ;;  %v9851_v47 = vpack.c.bf16 %v2793_v18, %v2789_v33  ;;  %v1888_v62 = vpop.f32.mrf.mxu2  ;;  %v12064_v33 = vld [vmem:[#allocation40_spill] sm:$0xff] }
 0x2d6   :  { %v1889_v5 = vadd.f32 %v1888_v62, %v9616_v9  ;;  %v12065_v18 = vld [vmem:[#allocation24_spill] sm:$0xff] }
 0x2d7   :  { %12062 = vst [vmem:[#allocation100_spill] sm:$0xff] %v9851_v47  ;;  %v2068_v60 = vpop.f32.mrf.mxu0 }
 0x2d8   :  { %v1977_v35 = vpop.f32.mrf.mxu3  ;;  %v2069_v20 = vadd.f32 %v2068_v60, %v9715_v8  ;;  %v2157_v21 = vpop.f32.mrf.mxu1 }
 0x2d9   :  { %v1978_v37 = vadd.f32 %v1977_v35, %v1889_v5  ;;  %v7476_v5 = vld [vmem:[#allocation5 + $0x2b8] sm:$0xf0]  ;;  %v8653_v35 = vld [vmem:[#allocation5 + $0x3ac] sm:$0xf] }
 0x2da   :  { %v9855_v63 = vadd.f32 %v2157_v21, %v2069_v20  ;;  %v7604_v21 = vld [vmem:[#allocation5 + $0x3b8] sm:$0xf0] }
 0x2db   :  { %v2797_v34 = vmax.f32 %v1978_v37, 0.0  ;;  %v12067_v37 = vld [vmem:[#allocation86_spill] sm:$0xff] }
 0x2dd   :  { %v1890_v28 = vpop.f32.mrf.mxu2 }
 0x2de   :  { %v1891_v22 = vadd.f32 %v1890_v28, %v9626_v16  ;;  %v8621_v16 = vld [vmem:[#allocation5 + $0x2ac] sm:$0xf] }
 0x2df   :  { %v2071_v38 = vpop.f32.mrf.mxu0  ;;  %v7479_v20 = vor.u32 %v8621_v16, %v7476_v5 }
 0x2e0   :  { %v1979_v40 = vpop.f32.mrf.mxu3  ;;  %v2072_v24 = vadd.f32 %v2071_v38, %v9715_v8  ;;  %v2160_v7 = vpop.f32.mrf.mxu1 }
 0x2e1   :  { %v1980_v44 = vadd.f32 %v1979_v40, %v1891_v22  ;;  %v7607_v40 = vor.u32 %v8653_v35, %v7604_v21  ;;  %2548 = vmatpush.bf16.msra.mxu2 %v7479_v20  ;;  %v12069_v20 = vld [vmem:[#allocation42_spill] sm:$0xff] }
 0x2e2   :  { %v9859_v9 = vadd.f32 %v2160_v7, %v2072_v24  ;;  %2208 = vmatmul.bf16.gmra.mxu2 %v9334_v36  ;;  %2386 = vmatmul.bf16.gmra.mxu0 %v12063_v3 }
 0x2e3   :  { %v2801_v61 = vmax.f32 %v1980_v44, 0.0  ;;  %2475 = vmatmul.bf16.gmra.mxu1 %v12065_v18  ;;  %2637 = vmatpush.bf16.msra.mxu3 %v7607_v40  ;;  %v12072_v40 = vld [vmem:[#allocation28_spill] sm:$0xff] }
 0x2e5   :  { %2297 = vmatmul.bf16.gmra.mxu3 %v12064_v33  ;;  %v9865_v62 = vpack.c.bf16 %v2801_v61, %v2797_v34  ;;  %v1893_v60 = vpop.f32.mrf.mxu2  ;;  %v12068_v61 = vld [vmem:[#allocation41_spill] sm:$0xff] }
 0x2e6   :  { %v1894_v28 = vadd.f32 %v1893_v60, %v12067_v37 }
 0x2e7   :  { %12066 = vst [vmem:[#allocation23_spill] sm:$0xff] %v9865_v62  ;;  %v2073_v38 = vpop.f32.mrf.mxu0 }
 0x2e8   :  { %v1982_v22 = vpop.f32.mrf.mxu3  ;;  %v2074_v24 = vadd.f32 %v2073_v38, %v9715_v8  ;;  %v2162_v7 = vpop.f32.mrf.mxu1 }
 0x2e9   :  { %v1983_v44 = vadd.f32 %v1982_v22, %v1894_v28  ;;  %v12070_v28 = vld [vmem:[#allocation26_spill] sm:$0xff]  ;;  %v12071_v22 = vld [vmem:[#allocation43_spill] sm:$0xff] }
 0x2ea   :  { %v9869_v3 = vadd.f32 %v2162_v7, %v2074_v24  ;;  %v12074_v7 = vld [vmem:[#allocation44_spill] sm:$0xff] }
 0x2eb   :  { %v2805_v37 = vmax.f32 %v1983_v44, 0.0 }
 0x2ed   :  { %v1895_v34 = vpop.f32.mrf.mxu2 }
 0x2ee   :  { %v1896_v18 = vadd.f32 %v1895_v34, %v12068_v61 }
 0x2ef   :  { %v2076_v47 = vpop.f32.mrf.mxu0 }
 0x2f0   :  { %v1984_v62 = vpop.f32.mrf.mxu3  ;;  %v2077_v5 = vadd.f32 %v2076_v47, %v9715_v8  ;;  %v2165_v60 = vpop.f32.mrf.mxu1 }
 0x2f1   :  { %v1985_v16 = vadd.f32 %v1984_v62, %v1896_v18 }
 0x2f2   :  { %v9873_v21 = vadd.f32 %v2165_v60, %v2077_v5  ;;  %2213 = vmatmul.bf16.gmra.mxu2 %v12069_v20  ;;  %2391 = vmatmul.bf16.gmra.mxu0 %v12070_v28  ;;  %v12076_v60 = vld [vmem:[#allocation45_spill] sm:$0xff] }
 0x2f3   :  { %v2809_v35 = vmax.f32 %v1985_v16, 0.0  ;;  %2480 = vmatmul.bf16.gmra.mxu1 %v12072_v40 }
 0x2f5   :  { %2302 = vmatmul.bf16.gmra.mxu3 %v12071_v22  ;;  %v9879_v38 = vpack.c.bf16 %v2809_v35, %v2805_v37  ;;  %v1898_v24 = vpop.f32.mrf.mxu2 }
 0x2f6   :  { %v1899_v62 = vadd.f32 %v1898_v24, %v12074_v7  ;;  %v12078_v7 = vld [vmem:[#allocation46_spill] sm:$0xff] }
 0x2f7   :  { %12073 = vst [vmem:[#allocation40_spill] sm:$0xff] %v9879_v38  ;;  %v2078_v47 = vpop.f32.mrf.mxu0 }
 0x2f8   :  { %v1987_v34 = vpop.f32.mrf.mxu3  ;;  %v2079_v44 = vadd.f32 %v2078_v47, %v9715_v8  ;;  %v2167_v18 = vpop.f32.mrf.mxu1  ;;  %v12081_v47 = vld [vmem:[#allocation32_spill] sm:$0xff] }
 0x2f9   :  { %v1988_v61 = vadd.f32 %v1987_v34, %v1899_v62  ;;  %v12079_v62 = vld [vmem:[#allocation30_spill] sm:$0xff]  ;;  %v12080_v34 = vld [vmem:[#allocation47_spill] sm:$0xff] }
 0x2fa   :  { %v9883_v16 = vadd.f32 %v2167_v18, %v2079_v44  ;;  %v8617_v18 = vld [vmem:[#allocation5 + $0x28c] sm:$0xf] }
 0x2fb   :  { %v2813_v40 = vmax.f32 %v1988_v61, 0.0  ;;  %v12083_v61 = vld [vmem:[#allocation48_spill] sm:$0xff] }
 0x2fc   :  { %12075 = vst [vmem:[#allocation24_spill] sm:$0xff] %v9883_v16 }
 0x2fd   :  { %v1900_v5 = vpop.f32.mrf.mxu2 }
 0x2fe   :  { %v1901_v28 = vadd.f32 %v1900_v5, %v12076_v60  ;;  %v7460_v5 = vld [vmem:[#allocation5 + $0x298] sm:$0xf0] }
 0x2ff   :  { %v2081_v49 = vpop.f32.mrf.mxu0 }
 0x300   :  { %v1989_v27 = vpop.f32.mrf.mxu3  ;;  %v2082_v37 = vadd.f32 %v2081_v49, %v9715_v8  ;;  %v2170_v35 = vpop.f32.mrf.mxu1  ;;  %v7463_v49 = vor.u32 %v8617_v18, %v7460_v5 }
 0x301   :  { %v1990_v59 = vadd.f32 %v1989_v27, %v1901_v28  ;;  %v8649_v27 = vld [vmem:[#allocation5 + $0x38c] sm:$0xf]  ;;  %v7588_v28 = vld [vmem:[#allocation5 + $0x398] sm:$0xf0] }
 0x302   :  { %v9887_v24 = vadd.f32 %v2170_v35, %v2082_v37  ;;  %2218 = vmatmul.bf16.gmra.mxu2 %v12078_v7  ;;  %2396 = vmatmul.bf16.gmra.mxu0 %v12079_v62  ;;  %v7591_v35 = vor.u32 %v8649_v27, %v7588_v28 }
 0x303   :  { %v2817_v38 = vmax.f32 %v1990_v59, 0.0  ;;  %2485 = vmatmul.bf16.gmra.mxu1 %v12081_v47  ;;  %2549 = vmatpush.bf16.msra.mxu2 %v7463_v49  ;;  %v12085_v49 = vld [vmem:[#allocation50_spill] sm:$0xff] }
 0x304   :  { %12077 = vst [vmem:[#allocation86_spill] sm:$0xff] %v9887_v24  ;;  %2638 = vmatpush.bf16.msra.mxu3 %v7591_v35  ;;  %v12090_v35 = vld [vmem:[#allocation49_spill] sm:$0xff] }
 0x305   :  { %2307 = vmatmul.bf16.gmra.mxu3 %v12080_v34  ;;  %v9893_v44 = vpack.c.bf16 %v2817_v38, %v2813_v40  ;;  %v1903_v60 = vpop.f32.mrf.mxu2 }
 0x306   :  { %v1904_v59 = vadd.f32 %v1903_v60, %v12083_v61 }
 0x307   :  { %12082 = vst [vmem:[#allocation41_spill] sm:$0xff] %v9893_v44  ;;  %v2083_v24 = vpop.f32.mrf.mxu0 }
 0x308   :  { %v1992_v37 = vpop.f32.mrf.mxu3  ;;  %v2084_v62 = vadd.f32 %v2083_v24, %v9715_v8  ;;  %v2172_v34 = vpop.f32.mrf.mxu1  ;;  %v12086_v24 = vld [vmem:[#allocation34_spill] sm:$0xff] }
 0x309   :  { %v1993_v7 = vadd.f32 %v1992_v37, %v1904_v59  ;;  %v12087_v59 = vld [vmem:[#allocation51_spill] sm:$0xff] }
 0x30a   :  { %v9897_v47 = vadd.f32 %v2172_v34, %v2084_v62  ;;  %v12088_v34 = vld [vmem:[#allocation35_spill] sm:$0xff] }
 0x30b   :  { %v2821_v61 = vmax.f32 %v1993_v7, 0.0 }
 0x30d   :  { %v1905_v38 = vpop.f32.mrf.mxu2 }
 0x30e   :  { %v1906_v40 = vadd.f32 %v1905_v38, %v9668_v53 }
 0x30f   :  { %v2086_v16 = vpop.f32.mrf.mxu0 }
 0x310   :  { %v1994_v44 = vpop.f32.mrf.mxu3  ;;  %v2087_v5 = vadd.f32 %v2086_v16, %v9715_v8  ;;  %v2175_v60 = vpop.f32.mrf.mxu1 }
 0x311   :  { %v1995_v18 = vadd.f32 %v1994_v44, %v1906_v40 }
 0x312   :  { %v9901_v28 = vadd.f32 %v2175_v60, %v2087_v5  ;;  %2223 = vmatmul.bf16.gmra.mxu2 %v12085_v49  ;;  %2401 = vmatmul.bf16.gmra.mxu0 %v12086_v24  ;;  %v12092_v60 = vld [vmem:[#allocation53_spill] sm:$0xff] }
 0x313   :  { %v2825_v27 = vmax.f32 %v1995_v18, 0.0  ;;  %2490 = vmatmul.bf16.gmra.mxu1 %v12088_v34 }
 0x314   :  { %12084 = vst [vmem:[#allocation42_spill] sm:$0xff] %v9901_v28 }
 0x315   :  { %2312 = vmatmul.bf16.gmra.mxu3 %v12087_v59  ;;  %v9907_v37 = vpack.c.bf16 %v2825_v27, %v2821_v61  ;;  %v1908_v53 = vpop.f32.mrf.mxu2 }
 0x316   :  { %v1909_v44 = vadd.f32 %v1908_v53, %v12090_v35  ;;  %v12094_v35 = vld [vmem:[#allocation54_spill] sm:$0xff] }
 0x317   :  { %12089 = vst [vmem:[#allocation26_spill] sm:$0xff] %v9907_v37  ;;  %v2088_v16 = vpop.f32.mrf.mxu0 }
 0x318   :  { %v1997_v62 = vpop.f32.mrf.mxu3  ;;  %v2089_v7 = vadd.f32 %v2088_v16, %v9715_v8  ;;  %v2177_v40 = vpop.f32.mrf.mxu1  ;;  %v12097_v16 = vld [vmem:[#allocation37_spill] sm:$0xff] }
 0x319   :  { %v1998_v38 = vadd.f32 %v1997_v62, %v1909_v44  ;;  %v12095_v44 = vld [vmem:[#allocation36_spill] sm:$0xff]  ;;  %v12096_v62 = vld [vmem:[#allocation55_spill] sm:$0xff] }
 0x31a   :  { %v9911_v18 = vadd.f32 %v2177_v40, %v2089_v7  ;;  %v8613_v40 = vld [vmem:[#allocation5 + $0x26c] sm:$0xf] }
 0x31b   :  { %v2829_v34 = vmax.f32 %v1998_v38, 0.0  ;;  %v12099_v38 = vld [vmem:[#allocation56_spill] sm:$0xff] }
 0x31c   :  { %12091 = vst [vmem:[#allocation43_spill] sm:$0xff] %v9911_v18 }
 0x31d   :  { %v1910_v5 = vpop.f32.mrf.mxu2 }
 0x31e   :  { %v1911_v24 = vadd.f32 %v1910_v5, %v12092_v60  ;;  %v7444_v5 = vld [vmem:[#allocation5 + $0x278] sm:$0xf0] }
 0x31f   :  { %v2091_v59 = vpop.f32.mrf.mxu0  ;;  %v7447_v60 = vor.u32 %v8613_v40, %v7444_v5 }
 0x320   :  { %v1999_v28 = vpop.f32.mrf.mxu3  ;;  %v2092_v61 = vadd.f32 %v2091_v59, %v9715_v8  ;;  %v2180_v27 = vpop.f32.mrf.mxu1  ;;  %v8645_v59 = vld [vmem:[#allocation5 + $0x36c] sm:$0xf] }
 0x321   :  { %v2000_v49 = vadd.f32 %v1999_v28, %v1911_v24  ;;  %v7572_v24 = vld [vmem:[#allocation5 + $0x378] sm:$0xf0]  ;;  %2550 = vmatpush.bf16.msra.mxu2 %v7447_v60  ;;  %v12101_v60 = vld [vmem:[#allocation57_spill] sm:$0xff] }
 0x322   :  { %v9915_v53 = vadd.f32 %v2180_v27, %v2092_v61  ;;  %2228 = vmatmul.bf16.gmra.mxu2 %v12094_v35  ;;  %2406 = vmatmul.bf16.gmra.mxu0 %v12095_v44  ;;  %v7575_v27 = vor.u32 %v8645_v59, %v7572_v24 }
 0x323   :  { %v2833_v37 = vmax.f32 %v2000_v49, 0.0  ;;  %2495 = vmatmul.bf16.gmra.mxu1 %v12097_v16 }
 0x324   :  { %12093 = vst [vmem:[#allocation28_spill] sm:$0xff] %v9915_v53  ;;  %2639 = vmatpush.bf16.msra.mxu3 %v7575_v27  ;;  %v8694_v27 = vld [vmem:[#allocation8 + $0xec] sm:$0xf0] }
 0x325   :  { %2317 = vmatmul.bf16.gmra.mxu3 %v12096_v62  ;;  %v9921_v7 = vpack.c.bf16 %v2833_v37, %v2829_v34  ;;  %v1913_v28 = vpop.f32.mrf.mxu2 }
 0x326   :  { %v1914_v49 = vadd.f32 %v1913_v28, %v12099_v38 }
 0x327   :  { %12098 = vst [vmem:[#allocation44_spill] sm:$0xff] %v9921_v7  ;;  %v2093_v53 = vpop.f32.mrf.mxu0 }
 0x328   :  { %v2002_v61 = vpop.f32.mrf.mxu3  ;;  %v2094_v44 = vadd.f32 %v2093_v53, %v9715_v8  ;;  %v2182_v62 = vpop.f32.mrf.mxu1  ;;  %v12102_v53 = vld [vmem:[#allocation38_spill] sm:$0xff] }
 0x329   :  { %v2003_v35 = vadd.f32 %v2002_v61, %v1914_v49  ;;  %v12103_v49 = vld [vmem:[#allocation58_spill] sm:$0xff] }
 0x32a   :  { %v9925_v16 = vadd.f32 %v2182_v62, %v2094_v44  ;;  %v12104_v62 = vld [vmem:[#allocation39_spill] sm:$0xff] }
 0x32b   :  { %v2837_v38 = vmax.f32 %v2003_v35, 0.0 }
 0x32d   :  { %v1915_v37 = vpop.f32.mrf.mxu2 }
 0x32e   :  { %v1916_v34 = vadd.f32 %v1915_v37, %v9696_v25  ;;  %v7754_v25 = vld [vmem:[#allocation8 + $0xe0] sm:$0xf] }
 0x32f   :  { %v2096_v40 = vpop.f32.mrf.mxu0  ;;  %v7755_v44 = vor.u32 %v8694_v27, %v7754_v25  ;;  %v12106_v37 = vld [vmem:[#allocation59_spill] sm:$0xff]  ;;  %v12109_v25 = vld [vmem:[#allocation60_spill] sm:$0xff] }
 0x330   :  { %v2004_v7 = vpop.f32.mrf.mxu3  ;;  %v2097_v18 = vadd.f32 %v2096_v40, %v9715_v8  ;;  %v2185_v28 = vpop.f32.mrf.mxu1 }
 0x331   :  { %v2005_v5 = vadd.f32 %v2004_v7, %v1916_v34  ;;  %3694 = vmatpush.bf16.msra.mxu0 %v7755_v44 }
 0x332   :  { %v9929_v24 = vadd.f32 %v2185_v28, %v2097_v18  ;;  %2233 = vmatmul.bf16.gmra.mxu2 %v12101_v60  ;;  %2411 = vmatmul.bf16.gmra.mxu0 %v12102_v53 }
 0x333   :  { %v2841_v59 = vmax.f32 %v2005_v5, 0.0  ;;  %2500 = vmatmul.bf16.gmra.mxu1 %v12104_v62 }
 0x334   :  { %12100 = vst [vmem:[#allocation45_spill] sm:$0xff] %v9929_v24  ;;  %v7882_v24 = vld [vmem:[#allocation8 + $0x1e0] sm:$0xf] }
 0x335   :  { %2322 = vmatmul.bf16.gmra.mxu3 %v12103_v49  ;;  %v9935_v61 = vpack.c.bf16 %v2841_v59, %v2837_v38  ;;  %v1918_v7 = vpop.f32.mrf.mxu2  ;;  %v8726_v49 = vld [vmem:[#allocation8 + $0x1ec] sm:$0xf0]  ;;  %v12108_v38 = vld [vmem:[#allocation92_spill] sm:$0xff] }
 0x336   :  { %v1919_v34 = vadd.f32 %v1918_v7, %v12106_v37  ;;  %v7883_v62 = vor.u32 %v8726_v49, %v7882_v24  ;;  %v9942_v59 = vperm.slane %v12108_v38, 3  ;;  %v12112_v24 = vld [vmem:[#allocation20_spill] sm:$0xff]  ;;  %v12113_v49 = vld [vmem:[#allocation62_spill] sm:$0xff] }
 0x337   :  { %12105 = vst [vmem:[#allocation30_spill] sm:$0xff] %v9935_v61  ;;  %v2098_v40 = vpop.f32.mrf.mxu0  ;;  %v7428_v38 = vld [vmem:[#allocation5 + $0x258] sm:$0xf0] }
 0x338   :  { %v2007_v35 = vpop.f32.mrf.mxu3  ;;  %v2099_v5 = vadd.f32 %v2098_v40, %v9715_v8  ;;  %v2187_v28 = vpop.f32.mrf.mxu1  ;;  %3783 = vmatpush.bf16.msra.mxu1 %v7883_v62 }
 0x339   :  { %v2008_v18 = vadd.f32 %v2007_v35, %v1919_v34 }
 0x33a   :  { %v9939_v53 = vadd.f32 %v2187_v28, %v2099_v5  ;;  %v12111_v5 = vld [vmem:[#allocation61_spill] sm:$0xff] }
 0x33b   :  { %v2845_v8 = vmax.f32 %v2008_v18, 0.0  ;;  %v12114_v28 = vld [vmem:[#allocation21_spill] sm:$0xff]  ;;  %v12116_v18 = vld [vmem:[#allocation63_spill] sm:$0xff] }
 0x33c   :  { %12107 = vst [vmem:[#allocation32_spill] sm:$0xff] %v9939_v53 }
 0x33d   :  { %v1920_v61 = vpop.f32.mrf.mxu2 }
 0x33e   :  { %v1921_v27 = vadd.f32 %v1920_v61, %v12109_v25  ;;  %v8609_v61 = vld [vmem:[#allocation5 + $0x24c] sm:$0xf] }
 0x33f   :  { %v2377_v37 = vpop.f32.mrf.mxu0  ;;  %v8641_v25 = vld [vmem:[#allocation5 + $0x34c] sm:$0xf] }
 0x340   :  { %v2009_v7 = vpop.f32.mrf.mxu3  ;;  %v2378_v44 = vadd.f32 %v2377_v37, %v9942_v59  ;;  %v2466_v34 = vpop.f32.mrf.mxu1  ;;  %v7556_v37 = vld [vmem:[#allocation5 + $0x358] sm:$0xf0] }
 0x341   :  { %v2010_v60 = vadd.f32 %v2009_v7, %v1921_v27  ;;  %v7431_v7 = vor.u32 %v8609_v61, %v7428_v38 }
 0x342   :  { %v9946_v40 = vadd.f32 %v2466_v34, %v2378_v44  ;;  %2238 = vmatmul.bf16.gmra.mxu2 %v12111_v5  ;;  %2416 = vmatmul.bf16.gmra.mxu0 %v12112_v24  ;;  %v7559_v34 = vor.u32 %v8641_v25, %v7556_v37 }
 0x343   :  { %v2849_v35 = vmax.f32 %v2010_v60, 0.0  ;;  %2505 = vmatmul.bf16.gmra.mxu1 %v12114_v28  ;;  %2551 = vmatpush.bf16.msra.mxu2 %v7431_v7  ;;  %v8690_v7 = vld [vmem:[#allocation8 + $0xcc] sm:$0xf0] }
 0x344   :  { %12110 = vst [vmem:[#allocation48_spill] sm:$0xff] %v9946_v40  ;;  %2640 = vmatpush.bf16.msra.mxu3 %v7559_v34 }
 0x345   :  { %2327 = vmatmul.bf16.gmra.mxu3 %v12113_v49  ;;  %v9952_v62 = vpack.c.bf16 %v2849_v35, %v2845_v8  ;;  %v2199_v27 = vpop.f32.mrf.mxu2 }
 0x346   :  { %v2200_v60 = vadd.f32 %v2199_v27, %v12116_v18 }
 0x347   :  { %12115 = vst [vmem:[#allocation34_spill] sm:$0xff] %v9952_v62  ;;  %v2379_v40 = vpop.f32.mrf.mxu0 }
 0x348   :  { %v2288_v44 = vpop.f32.mrf.mxu3  ;;  %v2380_v24 = vadd.f32 %v2379_v40, %v9942_v59  ;;  %v2468_v49 = vpop.f32.mrf.mxu1  ;;  %v12117_v40 = vld [vmem:[#allocation22_spill] sm:$0xff] }
 0x349   :  { %v2289_v5 = vadd.f32 %v2288_v44, %v2200_v60 }
 0x34a   :  { %v9956_v28 = vadd.f32 %v2468_v49, %v2380_v24 }
 0x34b   :  { %v2726_v18 = vmax.f32 %v2289_v5, 0.0 }
 0x34d   :  { %v2201_v8 = vpop.f32.mrf.mxu2 }
 0x34e   :  { %v2202_v35 = vadd.f32 %v2201_v8, %v9729_v2  ;;  %v7738_v2 = vld [vmem:[#allocation8 + $0xc0] sm:$0xf] }
 0x34f   :  { %v2382_v53 = vpop.f32.mrf.mxu0  ;;  %v7739_v60 = vor.u32 %v8690_v7, %v7738_v2 }
 0x350   :  { %v2290_v62 = vpop.f32.mrf.mxu3  ;;  %v2383_v38 = vadd.f32 %v2382_v53, %v9942_v59  ;;  %v2471_v27 = vpop.f32.mrf.mxu1  ;;  %v12119_v53 = vld [vmem:[#allocation64_spill] sm:$0xff] }
 0x351   :  { %v2291_v61 = vadd.f32 %v2290_v62, %v2202_v35  ;;  %3695 = vmatpush.bf16.msra.mxu0 %v7739_v60 }
 0x352   :  { %v9960_v37 = vadd.f32 %v2471_v27, %v2383_v38  ;;  %2243 = vmatmul.bf16.gmra.mxu2 %v9475_v57  ;;  %2421 = vmatmul.bf16.gmra.mxu0 %v9209_v23  ;;  %v8722_v38 = vld [vmem:[#allocation8 + $0x1cc] sm:$0xf0] }
 0x353   :  { %v2730_v25 = vmax.f32 %v2291_v61, 0.0  ;;  %2510 = vmatmul.bf16.gmra.mxu1 %v12117_v40  ;;  %v7866_v61 = vld [vmem:[#allocation8 + $0x1c0] sm:$0xf] }
 0x354   :  { %v7867_v27 = vor.u32 %v8722_v38, %v7866_v61  ;;  %v8637_v61 = vld [vmem:[#allocation5 + $0x32c] sm:$0xf] }
 0x355   :  { %2332 = vmatmul.bf16.gmra.mxu3 %v9477_v51  ;;  %v9966_v49 = vpack.c.bf16 %v2730_v25, %v2726_v18  ;;  %v2204_v62 = vpop.f32.mrf.mxu2 }
 0x356   :  { %v2205_v44 = vadd.f32 %v2204_v62, %v12119_v53  ;;  %3784 = vmatpush.bf16.msra.mxu1 %v7867_v27 }
 0x357   :  { %12118 = vst [vmem:[#allocation35_spill] sm:$0xff] %v9966_v49  ;;  %v2384_v34 = vpop.f32.mrf.mxu0 }
 0x358   :  { %v2293_v5 = vpop.f32.mrf.mxu3  ;;  %v2385_v8 = vadd.f32 %v2384_v34, %v9942_v59  ;;  %v2473_v35 = vpop.f32.mrf.mxu1  ;;  %v12120_v34 = vld [vmem:[#allocation25_spill] sm:$0xff] }
 0x359   :  { %v2294_v24 = vadd.f32 %v2293_v5, %v2205_v44 }
 0x35a   :  { %v9970_v23 = vadd.f32 %v2473_v35, %v2385_v8  ;;  %v7412_v35 = vld [vmem:[#allocation5 + $0x238] sm:$0xf0] }
 0x35b   :  { %v2734_v60 = vmax.f32 %v2294_v24, 0.0  ;;  %v12122_v24 = vld [vmem:[#allocation65_spill] sm:$0xff] }
 0x35d   :  { %v2206_v18 = vpop.f32.mrf.mxu2 }
 0x35e   :  { %v2207_v25 = vadd.f32 %v2206_v18, %v9743_v26  ;;  %v8605_v26 = vld [vmem:[#allocation5 + $0x22c] sm:$0xf]  ;;  %v7540_v18 = vld [vmem:[#allocation5 + $0x338] sm:$0xf0] }
 0x35f   :  { %v2387_v2 = vpop.f32.mrf.mxu0  ;;  %v7415_v27 = vor.u32 %v8605_v26, %v7412_v35 }
 0x360   :  { %v2295_v40 = vpop.f32.mrf.mxu3  ;;  %v2388_v62 = vadd.f32 %v2387_v2, %v9942_v59  ;;  %v2476_v53 = vpop.f32.mrf.mxu1  ;;  %v7543_v2 = vor.u32 %v8637_v61, %v7540_v18 }
 0x361   :  { %v2296_v7 = vadd.f32 %v2295_v40, %v2207_v25  ;;  %2552 = vmatpush.bf16.msra.mxu2 %v7415_v27  ;;  %v12125_v27 = vld [vmem:[#allocation27_spill] sm:$0xff] }
 0x362   :  { %v9974_v5 = vadd.f32 %v2476_v53, %v2388_v62  ;;  %2248 = vmatmul.bf16.gmra.mxu2 %v9493_v31  ;;  %2426 = vmatmul.bf16.gmra.mxu0 %v9221_v41 }
 0x363   :  { %v2738_v44 = vmax.f32 %v2296_v7, 0.0  ;;  %2515 = vmatmul.bf16.gmra.mxu1 %v12120_v34  ;;  %2641 = vmatpush.bf16.msra.mxu3 %v7543_v2 }
 0x365   :  { %2337 = vmatmul.bf16.gmra.mxu3 %v9495_v32  ;;  %v9980_v8 = vpack.c.bf16 %v2738_v44, %v2734_v60  ;;  %v2209_v38 = vpop.f32.mrf.mxu2 }
 0x366   :  { %v2210_v25 = vadd.f32 %v2209_v38, %v12122_v24 }
 0x367   :  { %12121 = vst [vmem:[#allocation49_spill] sm:$0xff] %v9980_v8  ;;  %v2389_v7 = vpop.f32.mrf.mxu0 }
 0x368   :  { %v2298_v40 = vpop.f32.mrf.mxu3  ;;  %v2390_v41 = vadd.f32 %v2389_v7, %v9942_v59  ;;  %v2478_v53 = vpop.f32.mrf.mxu1  ;;  %v8686_v7 = vld [vmem:[#allocation8 + $0xac] sm:$0xf0] }
 0x369   :  { %v2299_v62 = vadd.f32 %v2298_v40, %v2210_v25  ;;  %v12126_v25 = vld [vmem:[#allocation71_spill] sm:$0xff]  ;;  %v12127_v40 = vld [vmem:[#allocation29_spill] sm:$0xff] }
 0x36a   :  { %v9984_v34 = vadd.f32 %v2478_v53, %v2390_v41 }
 0x36b   :  { %v2742_v24 = vmax.f32 %v2299_v62, 0.0 }
 0x36c   :  { %12123 = vst [vmem:[#allocation53_spill] sm:$0xff] %v9984_v34 }
 0x36d   :  { %v2211_v60 = vpop.f32.mrf.mxu2 }
 0x36e   :  { %v2212_v44 = vadd.f32 %v2211_v60, %v9757_v42  ;;  %v7722_v42 = vld [vmem:[#allocation8 + $0xa0] sm:$0xf] }
 0x36f   :  { %v2392_v49 = vpop.f32.mrf.mxu0  ;;  %v7723_v41 = vor.u32 %v8686_v7, %v7722_v42 }
 0x370   :  { %v2300_v8 = vpop.f32.mrf.mxu3  ;;  %v2393_v35 = vadd.f32 %v2392_v49, %v9942_v59  ;;  %v2481_v38 = vpop.f32.mrf.mxu1  ;;  %v12129_v49 = vld [vmem:[#allocation68_spill] sm:$0xff] }
 0x371   :  { %v2301_v26 = vadd.f32 %v2300_v8, %v2212_v44  ;;  %3696 = vmatpush.bf16.msra.mxu0 %v7723_v41 }
 0x372   :  { %v9988_v18 = vadd.f32 %v2481_v38, %v2393_v35  ;;  %2253 = vmatmul.bf16.gmra.mxu2 %v9511_v1  ;;  %2431 = vmatmul.bf16.gmra.mxu0 %v12125_v27  ;;  %v7850_v27 = vld [vmem:[#allocation8 + $0x1a0] sm:$0xf]  ;;  %v12140_v1 = vld [vmem:[#allocation77_spill] sm:$0xff] }
 0x373   :  { %v2746_v61 = vmax.f32 %v2301_v26, 0.0  ;;  %2520 = vmatmul.bf16.gmra.mxu1 %v12127_v40 }
 0x374   :  { %12124 = vst [vmem:[#allocation36_spill] sm:$0xff] %v9988_v18  ;;  %v8718_v18 = vld [vmem:[#allocation8 + $0x1ac] sm:$0xf0] }
 0x375   :  { %2342 = vmatmul.bf16.gmra.mxu3 %v12126_v25  ;;  %v9994_v2 = vpack.c.bf16 %v2746_v61, %v2742_v24  ;;  %v2214_v8 = vpop.f32.mrf.mxu2  ;;  %v7851_v40 = vor.u32 %v8718_v18, %v7850_v27  ;;  %v12131_v61 = vld [vmem:[#allocation72_spill] sm:$0xff]  ;;  %v12136_v18 = vld [vmem:[#allocation33_spill] sm:$0xff] }
 0x376   :  { %v2215_v53 = vadd.f32 %v2214_v8, %v12129_v49 }
 0x377   :  { %12128 = vst [vmem:[#allocation37_spill] sm:$0xff] %v9994_v2  ;;  %v2394_v60 = vpop.f32.mrf.mxu0  ;;  %3785 = vmatpush.bf16.msra.mxu1 %v7851_v40  ;;  %v8601_v40 = vld [vmem:[#allocation5 + $0x20c] sm:$0xf] }
 0x378   :  { %v2303_v62 = vpop.f32.mrf.mxu3  ;;  %v2395_v26 = vadd.f32 %v2394_v60, %v9942_v59  ;;  %v2483_v35 = vpop.f32.mrf.mxu1  ;;  %v12133_v60 = vld [vmem:[#allocation75_spill] sm:$0xff] }
 0x379   :  { %v2304_v44 = vadd.f32 %v2303_v62, %v2215_v53 }
 0x37a   :  { %v9998_v38 = vadd.f32 %v2483_v35, %v2395_v26  ;;  %v12134_v26 = vld [vmem:[#allocation31_spill] sm:$0xff]  ;;  %v12135_v35 = vld [vmem:[#allocation76_spill] sm:$0xff] }
 0x37b   :  { %v2750_v41 = vmax.f32 %v2304_v44, 0.0  ;;  %v12138_v44 = vld [vmem:[#allocation74_spill] sm:$0xff] }
 0x37c   :  { %12130 = vst [vmem:[#allocation56_spill] sm:$0xff] %v9998_v38  ;;  %v7834_v38 = vld [vmem:[#allocation8 + $0x180] sm:$0xf] }
 0x37d   :  { %v2216_v24 = vpop.f32.mrf.mxu2 }
 0x37e   :  { %v2217_v2 = vadd.f32 %v2216_v24, %v12131_v61  ;;  %v7396_v24 = vld [vmem:[#allocation5 + $0x218] sm:$0xf0] }
 0x37f   :  { %v2397_v42 = vpop.f32.mrf.mxu0  ;;  %v7399_v61 = vor.u32 %v8601_v40, %v7396_v24 }
 0x380   :  { %v2305_v25 = vpop.f32.mrf.mxu3  ;;  %v2398_v8 = vadd.f32 %v2397_v42, %v9942_v59  ;;  %v2486_v49 = vpop.f32.mrf.mxu1  ;;  %v7524_v42 = vld [vmem:[#allocation5 + $0x318] sm:$0xf0] }
 0x381   :  { %v2306_v7 = vadd.f32 %v2305_v25, %v2217_v2  ;;  %v8633_v25 = vld [vmem:[#allocation5 + $0x30c] sm:$0xf]  ;;  %2553 = vmatpush.bf16.msra.mxu2 %v7399_v61 }
 0x382   :  { %v10002_v62 = vadd.f32 %v2486_v49, %v2398_v8  ;;  %2258 = vmatmul.bf16.gmra.mxu2 %v12133_v60  ;;  %2436 = vmatmul.bf16.gmra.mxu0 %v12134_v26  ;;  %v7527_v49 = vor.u32 %v8633_v25, %v7524_v42 }
 0x383   :  { %v2754_v53 = vmax.f32 %v2306_v7, 0.0  ;;  %2525 = vmatmul.bf16.gmra.mxu1 %v12136_v18 }
 0x384   :  { %12132 = vst [vmem:[#allocation38_spill] sm:$0xff] %v10002_v62  ;;  %2642 = vmatpush.bf16.msra.mxu3 %v7527_v49 }
 0x385   :  { %2347 = vmatmul.bf16.gmra.mxu3 %v12135_v35  ;;  %v10008_v27 = vpack.c.bf16 %v2754_v53, %v2750_v41  ;;  %v2219_v2 = vpop.f32.mrf.mxu2  ;;  %v7706_v53 = vld [vmem:[#allocation8 + $0x80] sm:$0xf] }
 0x386   :  { %v2220_v7 = vadd.f32 %v2219_v2, %v12138_v44  ;;  %v8714_v2 = vld [vmem:[#allocation8 + $0x18c] sm:$0xf0] }
 0x387   :  { %12137 = vst [vmem:[#allocation39_spill] sm:$0xff] %v10008_v27  ;;  %v2399_v62 = vpop.f32.mrf.mxu0  ;;  %v8682_v27 = vld [vmem:[#allocation8 + $0x8c] sm:$0xf0]  ;;  %v7835_v25 = vor.u32 %v8714_v2, %v7834_v38 }
 0x388   :  { %v2308_v8 = vpop.f32.mrf.mxu3  ;;  %v2400_v26 = vadd.f32 %v2399_v62, %v9942_v59  ;;  %v2488_v35 = vpop.f32.mrf.mxu1  ;;  %v7707_v34 = vor.u32 %v8682_v27, %v7706_v53  ;;  %v7690_v62 = vld [vmem:[#allocation8 + $0x60] sm:$0xf]  ;;  %v8710_v27 = vld [vmem:[#allocation8 + $0x16c] sm:$0xf0] }
 0x389   :  { %v2309_v60 = vadd.f32 %v2308_v8, %v2220_v7  ;;  %3786 = vmatpush.bf16.msra.mxu1 %v7835_v25  ;;  %v7818_v8 = vld [vmem:[#allocation8 + $0x160] sm:$0xf]  ;;  %v8674_v53 = vld [vmem:[#allocation8 + $0x4c] sm:$0xf0] }
 0x38a   :  { %v10012_v18 = vadd.f32 %v2488_v35, %v2400_v26  ;;  %3697 = vmatpush.bf16.msra.mxu0 %v7707_v34  ;;  %v8678_v35 = vld [vmem:[#allocation8 + $0x6c] sm:$0xf0]  ;;  %v7819_v38 = vor.u32 %v8710_v27, %v7818_v8 }
 0x38b   :  { %v2758_v49 = vmax.f32 %v2309_v60, 0.0  ;;  %v7674_v60 = vld [vmem:[#allocation8 + $0x40] sm:$0xf]  ;;  %v8670_v8 = vld [vmem:[#allocation8 + $0x2c] sm:$0xf0] }
 0x38c   :  { %12139 = vst [vmem:[#allocation59_spill] sm:$0xff] %v10012_v18  ;;  %v7675_v25 = vor.u32 %v8674_v53, %v7674_v60  ;;  %v8702_v27 = vld [vmem:[#allocation8 + $0x12c] sm:$0xf0]  ;;  %v7642_v60 = vld [vmem:[#allocation8] sm:$0xf] }
 0x38d   :  { %v2221_v41 = vpop.f32.mrf.mxu2  ;;  %3787 = vmatpush.bf16.msra.mxu1 %v7819_v38  ;;  %v8666_v53 = vld [vmem:[#allocation8 + $0xc] sm:$0xf0] }
 0x38e   :  { %v2222_v40 = vadd.f32 %v2221_v41, %v12140_v1  ;;  %v7691_v1 = vor.u32 %v8678_v35, %v7690_v62  ;;  %v7658_v35 = vld [vmem:[#allocation8 + $0x20] sm:$0xf] }
 0x38f   :  { %v2402_v44 = vpop.f32.mrf.mxu0 }
 0x390   :  { %v2310_v24 = vpop.f32.mrf.mxu3  ;;  %v2403_v61 = vadd.f32 %v2402_v44, %v9942_v59  ;;  %v2491_v7 = vpop.f32.mrf.mxu1  ;;  %3698 = vmatpush.bf16.msra.mxu0 %v7691_v1  ;;  %v7659_v1 = vor.u32 %v8670_v8, %v7658_v35 }
 0x391   :  { %v2311_v42 = vadd.f32 %v2310_v24, %v2222_v40  ;;  %v7802_v40 = vld [vmem:[#allocation8 + $0x140] sm:$0xf] }
 0x392   :  { %v10016_v18 = vadd.f32 %v2491_v7, %v2403_v61  ;;  %2263 = vmatmul.bf16.gmra.mxu2 %v9547_v13  ;;  %2441 = vmatmul.bf16.gmra.mxu0 %v9257_v10  ;;  %v12141_v24 = vld [vmem:[#allocation79_spill] sm:$0xff]  ;;  %v8706_v10 = vld [vmem:[#allocation8 + $0x14c] sm:$0xf0] }
 0x393   :  { %v2762_v26 = vmax.f32 %v2311_v42, 0.0  ;;  %2530 = vmatmul.bf16.gmra.mxu1 %v9261_v12  ;;  %v7803_v61 = vor.u32 %v8706_v10, %v7802_v40  ;;  %v7770_v40 = vld [vmem:[#allocation8 + $0x100] sm:$0xf] }
 0x394   :  { %3699 = vmatpush.bf16.msra.mxu0 %v7675_v25  ;;  %v8698_v25 = vld [vmem:[#allocation8 + $0x10c] sm:$0xf0] }
 0x395   :  { %2352 = vmatmul.bf16.gmra.mxu3 %v9549_v29  ;;  %v10022_v34 = vpack.c.bf16 %v2762_v26, %v2758_v49  ;;  %v2224_v41 = vpop.f32.mrf.mxu2  ;;  %3788 = vmatpush.bf16.msra.mxu1 %v7803_v61  ;;  %v7786_v49 = vld [vmem:[#allocation8 + $0x120] sm:$0xf] }
 0x396   :  { %v2225_v2 = vadd.f32 %v2224_v41, %v12141_v24  ;;  %v7787_v38 = vor.u32 %v8702_v27, %v7786_v49  ;;  %v8758_v27 = vld [vmem:[#allocation8 + $0x2ec] sm:$0xf0] }
 0x397   :  { %v2404_v42 = vpop.f32.mrf.mxu0 }
 0x398   :  { %v2313_v44 = vpop.f32.mrf.mxu3  ;;  %v2405_v62 = vadd.f32 %v2404_v42, %v9942_v59  ;;  %v2493_v12 = vpop.f32.mrf.mxu1  ;;  %3700 = vmatpush.bf16.msra.mxu0 %v7659_v1  ;;  %v7771_v42 = vor.u32 %v8698_v25, %v7770_v40  ;;  %v8010_v1 = vld [vmem:[#allocation8 + $0x2e0] sm:$0xf] }
 0x399   :  { %v2314_v7 = vadd.f32 %v2313_v44, %v2225_v2  ;;  %3789 = vmatpush.bf16.msra.mxu1 %v7787_v38  ;;  %v7643_v44 = vor.u32 %v8666_v53, %v7642_v60  ;;  %v8138_v38 = vld [vmem:[#allocation8 + $0x3e0] sm:$0xf]  ;;  %v8011_v60 = vor.u32 %v8758_v27, %v8010_v1  ;;  %v8790_v53 = vld [vmem:[#allocation8 + $0x3ec] sm:$0xf0] }
 0x39a   :  { %v10026_v26 = vadd.f32 %v2493_v12, %v2405_v62 }
 0x39b   :  { %v2766_v35 = vmax.f32 %v2314_v7, 0.0  ;;  %3872 = vmatpush.bf16.msrb.mxu2 %v8011_v60 }
 0x39c   :  { %3701 = vmatpush.bf16.msra.mxu0 %v7643_v44 }
 0x39d   :  { %v2226_v41 = vpop.f32.mrf.mxu2  ;;  %3790 = vmatpush.bf16.msra.mxu1 %v7771_v42 }
 0x39e   :  { %v2227_v24 = vadd.f32 %v2226_v41, %v9799_v11 }
 0x39f   :  { %v2407_v10 = vpop.f32.mrf.mxu0 }
 0x3a0   :  { %v2315_v2 = vpop.f32.mrf.mxu3  ;;  %v2408_v62 = vadd.f32 %v2407_v10, %v9942_v59  ;;  %v2496_v12 = vpop.f32.mrf.mxu1 }
 0x3a1   :  { %v2316_v61 = vadd.f32 %v2315_v2, %v2227_v24  ;;  %v8139_v24 = vor.u32 %v8790_v53, %v8138_v38 }
 0x3a2   :  { %v10030_v49 = vadd.f32 %v2496_v12, %v2408_v62  ;;  %2268 = vmatmul.bf16.gmra.mxu2 %v9565_v0  ;;  %2446 = vmatmul.bf16.gmra.mxu0 %v9269_v6 }
 0x3a3   :  { %v2770_v8 = vmax.f32 %v2316_v61, 0.0  ;;  %2535 = vmatmul.bf16.gmra.mxu1 %v9273_v14  ;;  %3961 = vmatpush.bf16.msrb.mxu3 %v8139_v24 }
 0x3a5   :  { %2357 = vmatmul.bf16.gmra.mxu3 %v9567_v17  ;;  %v10036_v11 = vpack.c.bf16 %v2770_v8, %v2766_v35  ;;  %v2229_v41 = vpop.f32.mrf.mxu2 }
 0x3a6   :  { %v2230_v7 = vadd.f32 %v2229_v41, %v9803_v43 }
 0x3a7   :  { %v2409_v2 = vpop.f32.mrf.mxu0 }
 0x3a8   :  { %v2318_v40 = vpop.f32.mrf.mxu3  ;;  %v2410_v6 = vadd.f32 %v2409_v2, %v9942_v59  ;;  %v2498_v25 = vpop.f32.mrf.mxu1 }
 0x3a9   :  { %v2319_v44 = vadd.f32 %v2318_v40, %v2230_v7 }
 0x3aa   :  { %v10040_v14 = vadd.f32 %v2498_v25, %v2410_v6 }
 0x3ab   :  { %v2774_v8 = vmax.f32 %v2319_v44, 0.0 }
 0x3ad   :  { %v2231_v10 = vpop.f32.mrf.mxu2 }
 0x3ae   :  { %v2232_v42 = vadd.f32 %v2231_v10, %v9813_v56 }
 0x3af   :  { %v2412_v62 = vpop.f32.mrf.mxu0 }
 0x3b0   :  { %v2320_v61 = vpop.f32.mrf.mxu3  ;;  %v2413_v35 = vadd.f32 %v2412_v62, %v9942_v59  ;;  %v2501_v43 = vpop.f32.mrf.mxu1 }
 0x3b1   :  { %v2321_v12 = vadd.f32 %v2320_v61, %v2232_v42 }
 0x3b2   :  { %v10044_v27 = vadd.f32 %v2501_v43, %v2413_v35  ;;  %2273 = vmatmul.bf16.gmra.mxu2 %v9583_v58  ;;  %2451 = vmatmul.bf16.gmra.mxu0 %v9281_v39  ;;  %v12144_v35 = vld [vmem:[#allocation94_spill] sm:$0xff] }
 0x3b3   :  { %v2778_v1 = vmax.f32 %v2321_v12, 0.0  ;;  %2540 = vmatmul.bf16.gmra.mxu1 %v9285_v45  ;;  %v12143_v12 = vld [vmem:[#allocation66_spill] sm:$0xff] }
 0x3b5   :  { %2362 = vmatmul.bf16.gmra.mxu3 %v9585_v30  ;;  %v10050_v38 = vpack.c.bf16 %v2778_v1, %v2774_v8  ;;  %v2234_v56 = vpop.f32.mrf.mxu2  ;;  %v8754_v8 = vld [vmem:[#allocation8 + $0x2cc] sm:$0xf0]  ;;  %v8122_v1 = vld [vmem:[#allocation8 + $0x3c0] sm:$0xf] }
 0x3b6   :  { %v2235_v41 = vadd.f32 %v2234_v56, %v9817_v46 }
 0x3b7   :  { %12142 = vst [vmem:[#allocation92_spill] sm:$0xff] %v10050_v38  ;;  %v2414_v53 = vpop.f32.mrf.mxu0 }
 0x3b8   :  { %v2323_v60 = vpop.f32.mrf.mxu3  ;;  %v2415_v40 = vadd.f32 %v2414_v53, %v9942_v59  ;;  %v2503_v24 = vpop.f32.mrf.mxu1 }
 0x3b9   :  { %v2324_v7 = vadd.f32 %v2323_v60, %v2235_v41  ;;  %v8786_v60 = vld [vmem:[#allocation8 + $0x3cc] sm:$0xf0] }
 0x3ba   :  { %v10054_v2 = vadd.f32 %v2503_v24, %v2415_v40  ;;  %v8123_v40 = vor.u32 %v8786_v60, %v8122_v1  ;;  %v12146_v1 = vld [vmem:[#allocation69_spill] sm:$0xff] }
 0x3bb   :  { %v2782_v61 = vmax.f32 %v2324_v7, 0.0 }
 0x3bc   :  { %3962 = vmatpush.bf16.msrb.mxu3 %v8123_v40 }
 0x3bd   :  { %v2236_v44 = vpop.f32.mrf.mxu2 }
 0x3be   :  { %v2237_v39 = vadd.f32 %v2236_v44, %v9827_v19  ;;  %v7994_v19 = vld [vmem:[#allocation8 + $0x2c0] sm:$0xf] }
 0x3bf   :  { %v2417_v25 = vpop.f32.mrf.mxu0  ;;  %v7995_v41 = vor.u32 %v8754_v8, %v7994_v19 }
 0x3c0   :  { %v2325_v6 = vpop.f32.mrf.mxu3  ;;  %v2418_v45 = vadd.f32 %v2417_v25, %v9942_v59  ;;  %v2506_v42 = vpop.f32.mrf.mxu1 }
 0x3c1   :  { %v2326_v10 = vadd.f32 %v2325_v6, %v2237_v39  ;;  %3873 = vmatpush.bf16.msrb.mxu2 %v7995_v41 }
 0x3c2   :  { %v10058_v46 = vadd.f32 %v2506_v42, %v2418_v45  ;;  %2554 = vmatmul.bf16.vlgmr.msra.gmra.mxu2 %v9296_v52  ;;  %3702 = vmatmul.bf16.vlgmr.msra.gmra.mxu0 %v12143_v12 }
 0x3c3   :  { %v2786_v62 = vmax.f32 %v2326_v10, 0.0  ;;  %3791 = vmatmul.bf16.vlgmr.msra.gmra.mxu1 %v12144_v35 }
 0x3c5   :  { %2643 = vmatmul.bf16.vlgmr.msra.gmra.mxu3 %v9298_v54  ;;  %v10064_v43 = vpack.c.bf16 %v2786_v62, %v2782_v61  ;;  %v2239_v56 = vpop.f32.mrf.mxu2 }
 0x3c6   :  { %v2240_v53 = vadd.f32 %v2239_v56, %v9831_v55  ;;  %v12147_v56 = vld [vmem:[#allocation67_spill] sm:$0xff] }
 0x3c7   :  { %12145 = vst [vmem:[#allocation60_spill] sm:$0xff] %v10064_v43  ;;  %v2419_v24 = vpop.f32.mrf.mxu0 }
 0x3c8   :  { %v2328_v7 = vpop.f32.mrf.mxu3  ;;  %v2420_v44 = vadd.f32 %v2419_v24, %v9942_v59  ;;  %v2508_v54 = vpop.f32.mrf.mxu1 }
 0x3c9   :  { %v2329_v52 = vadd.f32 %v2328_v7, %v2240_v53 }
 0x3ca   :  { %v10068_v39 = vadd.f32 %v2508_v54, %v2420_v44 }
 0x3cb   :  { %v2790_v62 = vmax.f32 %v2329_v52, 0.0 }
 0x3cd   :  { %v2241_v6 = vpop.f32.mrf.mxu2 }
 0x3ce   :  { %v2242_v25 = vadd.f32 %v2241_v6, %v9841_v4 }
 0x3cf   :  { %v2422_v45 = vpop.f32.mrf.mxu0 }
 0x3d0   :  { %v2330_v10 = vpop.f32.mrf.mxu3  ;;  %v2423_v61 = vadd.f32 %v2422_v45, %v9942_v59  ;;  %v2511_v55 = vpop.f32.mrf.mxu1 }
 0x3d1   :  { %v2331_v42 = vadd.f32 %v2330_v10, %v2242_v25 }
 0x3d2   :  { %v10072_v8 = vadd.f32 %v2511_v55, %v2423_v61  ;;  %2559 = vmatmul.bf16.gmra.mxu2 %v9314_v48  ;;  %3707 = vmatmul.bf16.gmra.mxu0 %v12146_v1  ;;  %v12149_v55 = vld [vmem:[#allocation73_spill] sm:$0xff] }
 0x3d3   :  { %v2794_v19 = vmax.f32 %v2331_v42, 0.0  ;;  %3796 = vmatmul.bf16.gmra.mxu1 %v12147_v56 }
 0x3d5   :  { %2648 = vmatmul.bf16.gmra.mxu3 %v9316_v50  ;;  %v10078_v41 = vpack.c.bf16 %v2794_v19, %v2790_v62  ;;  %v2244_v4 = vpop.f32.mrf.mxu2  ;;  %v12150_v62 = vld [vmem:[#allocation95_spill] sm:$0xff] }
 0x3d6   :  { %v2245_v60 = vadd.f32 %v2244_v4, %v9845_v15  ;;  %v8750_v4 = vld [vmem:[#allocation8 + $0x2ac] sm:$0xf0] }
 0x3d7   :  { %12148 = vst [vmem:[#allocation20_spill] sm:$0xff] %v10078_v41  ;;  %v2424_v7 = vpop.f32.mrf.mxu0 }
 0x3d8   :  { %v2333_v53 = vpop.f32.mrf.mxu3  ;;  %v2425_v24 = vadd.f32 %v2424_v7, %v9942_v59  ;;  %v2513_v52 = vpop.f32.mrf.mxu1 }
 0x3d9   :  { %v2334_v40 = vadd.f32 %v2333_v53, %v2245_v60  ;;  %v8106_v60 = vld [vmem:[#allocation8 + $0x3a0] sm:$0xf] }
 0x3da   :  { %v10082_v44 = vadd.f32 %v2513_v52, %v2425_v24  ;;  %v8782_v24 = vld [vmem:[#allocation8 + $0x3ac] sm:$0xf0] }
 0x3db   :  { %v2798_v42 = vmax.f32 %v2334_v40, 0.0 }
 0x3dd   :  { %v2246_v48 = vpop.f32.mrf.mxu2 }
 0x3de   :  { %v2247_v54 = vadd.f32 %v2246_v48, %v9855_v63  ;;  %v7978_v63 = vld [vmem:[#allocation8 + $0x2a0] sm:$0xf]  ;;  %v8107_v48 = vor.u32 %v8782_v24, %v8106_v60  ;;  %v12153_v24 = vld [vmem:[#allocation96_spill] sm:$0xff] }
 0x3df   :  { %v2427_v50 = vpop.f32.mrf.mxu0  ;;  %v7979_v7 = vor.u32 %v8750_v4, %v7978_v63 }
 0x3e0   :  { %v2335_v6 = vpop.f32.mrf.mxu3  ;;  %v2428_v10 = vadd.f32 %v2427_v50, %v9942_v59  ;;  %v2516_v45 = vpop.f32.mrf.mxu1  ;;  %3963 = vmatpush.bf16.msrb.mxu3 %v8107_v48 }
 0x3e1   :  { %v2336_v25 = vadd.f32 %v2335_v6, %v2247_v54  ;;  %3874 = vmatpush.bf16.msrb.mxu2 %v7979_v7  ;;  %v12152_v7 = vld [vmem:[#allocation78_spill] sm:$0xff] }
 0x3e2   :  { %v10086_v15 = vadd.f32 %v2516_v45, %v2428_v10  ;;  %2564 = vmatmul.bf16.gmra.mxu2 %v9334_v36  ;;  %3712 = vmatmul.bf16.gmra.mxu0 %v12149_v55 }
 0x3e3   :  { %v2802_v61 = vmax.f32 %v2336_v25, 0.0  ;;  %3801 = vmatmul.bf16.gmra.mxu1 %v12150_v62 }
 0x3e5   :  { %2653 = vmatmul.bf16.gmra.mxu3 %v12064_v33  ;;  %v10092_v19 = vpack.c.bf16 %v2802_v61, %v2798_v42  ;;  %v2249_v53 = vpop.f32.mrf.mxu2 }
 0x3e6   :  { %v2250_v40 = vadd.f32 %v2249_v53, %v9859_v9 }
 0x3e7   :  { %12151 = vst [vmem:[#allocation21_spill] sm:$0xff] %v10092_v19  ;;  %v2429_v54 = vpop.f32.mrf.mxu0 }
 0x3e8   :  { %v2338_v52 = vpop.f32.mrf.mxu3  ;;  %v2430_v6 = vadd.f32 %v2429_v54, %v9942_v59  ;;  %v2518_v33 = vpop.f32.mrf.mxu1 }
 0x3e9   :  { %v2339_v36 = vadd.f32 %v2338_v52, %v2250_v40 }
 0x3ea   :  { %v10096_v50 = vadd.f32 %v2518_v33, %v2430_v6 }
 0x3eb   :  { %v2806_v4 = vmax.f32 %v2339_v36, 0.0 }
 0x3ed   :  { %v2251_v25 = vpop.f32.mrf.mxu2 }
 0x3ee   :  { %v2252_v10 = vadd.f32 %v2251_v25, %v9869_v3 }
 0x3ef   :  { %v2432_v42 = vpop.f32.mrf.mxu0 }
 0x3f0   :  { %v2340_v45 = vpop.f32.mrf.mxu3  ;;  %v2433_v63 = vadd.f32 %v2432_v42, %v9942_v59  ;;  %v2521_v9 = vpop.f32.mrf.mxu1 }
 0x3f1   :  { %v2341_v61 = vadd.f32 %v2340_v45, %v2252_v10  ;;  %v12155_v10 = vld [vmem:[#allocation24_spill] sm:$0xff] }
 0x3f2   :  { %v10100_v53 = vadd.f32 %v2521_v9, %v2433_v63  ;;  %2569 = vmatmul.bf16.gmra.mxu2 %v12069_v20  ;;  %3717 = vmatmul.bf16.gmra.mxu0 %v12152_v7 }
 0x3f3   :  { %v2810_v60 = vmax.f32 %v2341_v61, 0.0  ;;  %3806 = vmatmul.bf16.gmra.mxu1 %v12153_v24 }
 0x3f5   :  { %2658 = vmatmul.bf16.gmra.mxu3 %v12071_v22  ;;  %v10106_v40 = vpack.c.bf16 %v2810_v60, %v2806_v4  ;;  %v2254_v3 = vpop.f32.mrf.mxu2 }
 0x3f6   :  { %v2255_v52 = vadd.f32 %v2254_v3, %v9873_v21  ;;  %v12156_v3 = vld [vmem:[#allocation46_spill] sm:$0xff] }
 0x3f7   :  { %12154 = vst [vmem:[#allocation63_spill] sm:$0xff] %v10106_v40  ;;  %v2434_v54 = vpop.f32.mrf.mxu0 }
 0x3f8   :  { %v2343_v48 = vpop.f32.mrf.mxu3  ;;  %v2435_v36 = vadd.f32 %v2434_v54, %v9942_v59  ;;  %v2523_v33 = vpop.f32.mrf.mxu1  ;;  %v12159_v54 = vld [vmem:[#allocation97_spill] sm:$0xff] }
 0x3f9   :  { %v2344_v6 = vadd.f32 %v2343_v48, %v2255_v52  ;;  %v12157_v52 = vld [vmem:[#allocation80_spill] sm:$0xff]  ;;  %v12158_v48 = vld [vmem:[#allocation47_spill] sm:$0xff] }
 0x3fa   :  { %v10110_v25 = vadd.f32 %v2523_v33, %v2435_v36  ;;  %v7962_v33 = vld [vmem:[#allocation8 + $0x280] sm:$0xf] }
 0x3fb   :  { %v2814_v4 = vmax.f32 %v2344_v6, 0.0  ;;  %v12161_v6 = vld [vmem:[#allocation86_spill] sm:$0xff] }
 0x3fd   :  { %v2256_v20 = vpop.f32.mrf.mxu2 }
 0x3fe   :  { %v2257_v45 = vadd.f32 %v2256_v20, %v12155_v10  ;;  %v8746_v20 = vld [vmem:[#allocation8 + $0x28c] sm:$0xf0]  ;;  %v8090_v10 = vld [vmem:[#allocation8 + $0x380] sm:$0xf] }
 0x3ff   :  { %v2437_v22 = vpop.f32.mrf.mxu0 }
 0x400   :  { %v2345_v42 = vpop.f32.mrf.mxu3  ;;  %v2438_v63 = vadd.f32 %v2437_v22, %v9942_v59  ;;  %v2526_v9 = vpop.f32.mrf.mxu1  ;;  %v8778_v22 = vld [vmem:[#allocation8 + $0x38c] sm:$0xf0] }
 0x401   :  { %v2346_v61 = vadd.f32 %v2345_v42, %v2257_v45  ;;  %v7963_v42 = vor.u32 %v8746_v20, %v7962_v33 }
 0x402   :  { %v10114_v21 = vadd.f32 %v2526_v9, %v2438_v63  ;;  %2574 = vmatmul.bf16.gmra.mxu2 %v12156_v3  ;;  %3722 = vmatmul.bf16.gmra.mxu0 %v12157_v52  ;;  %v8091_v9 = vor.u32 %v8778_v22, %v8090_v10 }
 0x403   :  { %v2818_v60 = vmax.f32 %v2346_v61, 0.0  ;;  %3811 = vmatmul.bf16.gmra.mxu1 %v12159_v54  ;;  %3875 = vmatpush.bf16.msrb.mxu2 %v7963_v42  ;;  %v12163_v42 = vld [vmem:[#allocation50_spill] sm:$0xff] }
 0x404   :  { %3964 = vmatpush.bf16.msrb.mxu3 %v8091_v9  ;;  %v12168_v9 = vld [vmem:[#allocation42_spill] sm:$0xff] }
 0x405   :  { %2663 = vmatmul.bf16.gmra.mxu3 %v12158_v48  ;;  %v10120_v36 = vpack.c.bf16 %v2818_v60, %v2814_v4  ;;  %v2259_v45 = vpop.f32.mrf.mxu2 }
 0x406   :  { %v2260_v61 = vadd.f32 %v2259_v45, %v12161_v6 }
 0x407   :  { %12160 = vst [vmem:[#allocation22_spill] sm:$0xff] %v10120_v36  ;;  %v2439_v40 = vpop.f32.mrf.mxu0 }
 0x408   :  { %v2348_v63 = vpop.f32.mrf.mxu3  ;;  %v2440_v19 = vadd.f32 %v2439_v40, %v9942_v59  ;;  %v2528_v48 = vpop.f32.mrf.mxu1  ;;  %v12164_v40 = vld [vmem:[#allocation82_spill] sm:$0xff] }
 0x409   :  { %v2349_v3 = vadd.f32 %v2348_v63, %v2260_v61  ;;  %v12165_v61 = vld [vmem:[#allocation51_spill] sm:$0xff] }
 0x40a   :  { %v10124_v41 = vadd.f32 %v2528_v48, %v2440_v19  ;;  %v12166_v19 = vld [vmem:[#allocation81_spill] sm:$0xff] }
 0x40b   :  { %v2822_v6 = vmax.f32 %v2349_v3, 0.0 }
 0x40d   :  { %v2261_v4 = vpop.f32.mrf.mxu2 }
 0x40e   :  { %v2262_v60 = vadd.f32 %v2261_v4, %v9897_v47 }
 0x40f   :  { %v2442_v43 = vpop.f32.mrf.mxu0 }
 0x410   :  { %v2350_v36 = vpop.f32.mrf.mxu3  ;;  %v2443_v20 = vadd.f32 %v2442_v43, %v9942_v59  ;;  %v2531_v45 = vpop.f32.mrf.mxu1 }
 0x411   :  { %v2351_v33 = vadd.f32 %v2350_v36, %v2262_v60 }
 0x412   :  { %v10128_v22 = vadd.f32 %v2531_v45, %v2443_v20  ;;  %2579 = vmatmul.bf16.gmra.mxu2 %v12163_v42  ;;  %3727 = vmatmul.bf16.gmra.mxu0 %v12164_v40  ;;  %v12170_v45 = vld [vmem:[#allocation43_spill] sm:$0xff] }
 0x413   :  { %v2826_v10 = vmax.f32 %v2351_v33, 0.0  ;;  %3816 = vmatmul.bf16.gmra.mxu1 %v12166_v19 }
 0x414   :  { %12162 = vst [vmem:[#allocation64_spill] sm:$0xff] %v10128_v22 }
 0x415   :  { %2668 = vmatmul.bf16.gmra.mxu3 %v12165_v61  ;;  %v10134_v63 = vpack.c.bf16 %v2826_v10, %v2822_v6  ;;  %v2264_v47 = vpop.f32.mrf.mxu2 }
 0x416   :  { %v2265_v36 = vadd.f32 %v2264_v47, %v12168_v9  ;;  %v12172_v9 = vld [vmem:[#allocation54_spill] sm:$0xff] }
 0x417   :  { %12167 = vst [vmem:[#allocation25_spill] sm:$0xff] %v10134_v63  ;;  %v2444_v43 = vpop.f32.mrf.mxu0 }
 0x418   :  { %v2353_v48 = vpop.f32.mrf.mxu3  ;;  %v2445_v3 = vadd.f32 %v2444_v43, %v9942_v59  ;;  %v2533_v60 = vpop.f32.mrf.mxu1  ;;  %v12175_v43 = vld [vmem:[#allocation98_spill] sm:$0xff] }
 0x419   :  { %v2354_v4 = vadd.f32 %v2353_v48, %v2265_v36  ;;  %v12173_v36 = vld [vmem:[#allocation83_spill] sm:$0xff] }
 0x41a   :  { %v10138_v33 = vadd.f32 %v2533_v60, %v2445_v3  ;;  %v12174_v48 = vld [vmem:[#allocation55_spill] sm:$0xff] }
 0x41b   :  { %v2830_v63 = vmax.f32 %v2354_v4, 0.0  ;;  %v7946_v60 = vld [vmem:[#allocation8 + $0x260] sm:$0xf]  ;;  %v12177_v4 = vld [vmem:[#allocation28_spill] sm:$0xff] }
 0x41c   :  { %12169 = vst [vmem:[#allocation65_spill] sm:$0xff] %v10138_v33 }
 0x41d   :  { %v2266_v20 = vpop.f32.mrf.mxu2 }
 0x41e   :  { %v2267_v42 = vadd.f32 %v2266_v20, %v12170_v45  ;;  %v8742_v20 = vld [vmem:[#allocation8 + $0x26c] sm:$0xf0] }
 0x41f   :  { %v2447_v61 = vpop.f32.mrf.mxu0 }
 0x420   :  { %v2355_v38 = vpop.f32.mrf.mxu3  ;;  %v2448_v6 = vadd.f32 %v2447_v61, %v9942_v59  ;;  %v2536_v10 = vpop.f32.mrf.mxu1  ;;  %v8774_v61 = vld [vmem:[#allocation8 + $0x36c] sm:$0xf0] }
 0x421   :  { %v2356_v22 = vadd.f32 %v2355_v38, %v2267_v42  ;;  %v8074_v38 = vld [vmem:[#allocation8 + $0x360] sm:$0xf]  ;;  %v7947_v42 = vor.u32 %v8742_v20, %v7946_v60 }
 0x422   :  { %v10142_v47 = vadd.f32 %v2536_v10, %v2448_v6  ;;  %2584 = vmatmul.bf16.gmra.mxu2 %v12172_v9  ;;  %3732 = vmatmul.bf16.gmra.mxu0 %v12173_v36  ;;  %v8075_v10 = vor.u32 %v8774_v61, %v8074_v38 }
 0x423   :  { %v2834_v19 = vmax.f32 %v2356_v22, 0.0  ;;  %3821 = vmatmul.bf16.gmra.mxu1 %v12175_v43  ;;  %3876 = vmatpush.bf16.msrb.mxu2 %v7947_v42  ;;  %v12179_v42 = vld [vmem:[#allocation57_spill] sm:$0xff] }
 0x424   :  { %12171 = vst [vmem:[#allocation27_spill] sm:$0xff] %v10142_v47  ;;  %3965 = vmatpush.bf16.msrb.mxu3 %v8075_v10  ;;  %v7756_v10 = vld [vmem:[#allocation8 + $0xf0] sm:$0xf0] }
 0x425   :  { %2673 = vmatmul.bf16.gmra.mxu3 %v12174_v48  ;;  %v10148_v3 = vpack.c.bf16 %v2834_v19, %v2830_v63  ;;  %v2269_v45 = vpop.f32.mrf.mxu2 }
 0x426   :  { %v2270_v22 = vadd.f32 %v2269_v45, %v12177_v4 }
 0x427   :  { %12176 = vst [vmem:[#allocation29_spill] sm:$0xff] %v10148_v3  ;;  %v2449_v47 = vpop.f32.mrf.mxu0 }
 0x428   :  { %v2358_v6 = vpop.f32.mrf.mxu3  ;;  %v2450_v36 = vadd.f32 %v2449_v47, %v9942_v59  ;;  %v2538_v48 = vpop.f32.mrf.mxu1  ;;  %v12180_v47 = vld [vmem:[#allocation84_spill] sm:$0xff] }
 0x429   :  { %v2359_v9 = vadd.f32 %v2358_v6, %v2270_v22  ;;  %v12181_v22 = vld [vmem:[#allocation58_spill] sm:$0xff] }
 0x42a   :  { %v10152_v43 = vadd.f32 %v2538_v48, %v2450_v36  ;;  %v12182_v36 = vld [vmem:[#allocation99_spill] sm:$0xff] }
 0x42b   :  { %v2838_v4 = vmax.f32 %v2359_v9, 0.0 }
 0x42d   :  { %v2271_v19 = vpop.f32.mrf.mxu2 }
 0x42e   :  { %v2272_v63 = vadd.f32 %v2271_v19, %v9925_v16  ;;  %v8692_v16 = vld [vmem:[#allocation8 + $0xe4] sm:$0xf] }
 0x42f   :  { %v2452_v33 = vpop.f32.mrf.mxu0  ;;  %v7759_v48 = vor.u32 %v8692_v16, %v7756_v10  ;;  %v12187_v10 = vld [vmem:[#allocation32_spill] sm:$0xff] }
 0x430   :  { %v2360_v3 = vpop.f32.mrf.mxu3  ;;  %v2453_v20 = vadd.f32 %v2452_v33, %v9942_v59  ;;  %v2541_v45 = vpop.f32.mrf.mxu1  ;;  %v12184_v33 = vld [vmem:[#allocation45_spill] sm:$0xff] }
 0x431   :  { %v2361_v60 = vadd.f32 %v2360_v3, %v2272_v63  ;;  %4050 = vmatpush.bf16.msrb.mxu0 %v7759_v48 }
 0x432   :  { %v10156_v61 = vadd.f32 %v2541_v45, %v2453_v20  ;;  %2589 = vmatmul.bf16.gmra.mxu2 %v12179_v42  ;;  %3737 = vmatmul.bf16.gmra.mxu0 %v12180_v47  ;;  %v10166_v42 = vld [vmem:[#allocation10] sm:$0xf] }
 0x433   :  { %v2842_v38 = vmax.f32 %v2361_v60, 0.0  ;;  %3826 = vmatmul.bf16.gmra.mxu1 %v12182_v36  ;;  %12185 = vst [vmem:[#allocation31_spill] sm:$0xff] %v10166_v42 }
 0x434   :  { %12178 = vst [vmem:[#allocation68_spill] sm:$0xff] %v10156_v61  ;;  %v8724_v61 = vld [vmem:[#allocation8 + $0x1e4] sm:$0xf] }
 0x435   :  { %2678 = vmatmul.bf16.gmra.mxu3 %v12181_v22  ;;  %v10162_v6 = vpack.c.bf16 %v2842_v38, %v2838_v4  ;;  %v2274_v3 = vpop.f32.mrf.mxu2  ;;  %v7884_v4 = vld [vmem:[#allocation8 + $0x1f0] sm:$0xf0] }
 0x436   :  { %v2275_v19 = vadd.f32 %v2274_v3, %v12184_v33  ;;  %v7887_v38 = vor.u32 %v8724_v61, %v7884_v4  ;;  %v12190_v61 = vld [vmem:[#allocation85_spill] sm:$0xff]  ;;  %v12191_v4 = vld [vmem:[#allocation62_spill] sm:$0xff] }
 0x437   :  { %12183 = vst [vmem:[#allocation72_spill] sm:$0xff] %v10162_v6  ;;  %v2454_v63 = vpop.f32.mrf.mxu0  ;;  %v10171_v6 = vperm.slane %v10166_v42, 0  ;;  %v8770_v42 = vld [vmem:[#allocation8 + $0x34c] sm:$0xf0] }
 0x438   :  { %v2363_v9 = vpop.f32.mrf.mxu3  ;;  %v2455_v20 = vadd.f32 %v2454_v63, %v9942_v59  ;;  %v2543_v45 = vpop.f32.mrf.mxu1  ;;  %4139 = vmatpush.bf16.msrb.mxu1 %v7887_v38 }
 0x439   :  { %v2364_v60 = vadd.f32 %v2363_v9, %v2275_v19 }
 0x43a   :  { %v10168_v22 = vadd.f32 %v2543_v45, %v2455_v20  ;;  %v12189_v45 = vld [vmem:[#allocation61_spill] sm:$0xff] }
 0x43b   :  { %v2846_v63 = vmax.f32 %v2364_v60, 0.0  ;;  %v12194_v60 = vld [vmem:[#allocation48_spill] sm:$0xff] }
 0x43c   :  { %12186 = vst [vmem:[#allocation33_spill] sm:$0xff] %v10168_v22  ;;  %v12192_v22 = vld [vmem:[#allocation100_spill] sm:$0xff] }
 0x43d   :  { %v2276_v16 = vpop.f32.mrf.mxu2 }
 0x43e   :  { %v2277_v3 = vadd.f32 %v2276_v16, %v12187_v10  ;;  %v7930_v16 = vld [vmem:[#allocation8 + $0x240] sm:$0xf]  ;;  %v8738_v10 = vld [vmem:[#allocation8 + $0x24c] sm:$0xf0] }
 0x43f   :  { %v3703_v48 = vpop.f32.mrf.mxu0 }
 0x440   :  { %v2365_v33 = vpop.f32.mrf.mxu3  ;;  %v3704_v59 = vadd.f32 %v3703_v48, %v10171_v6  ;;  %v3792_v9 = vpop.f32.mrf.mxu1  ;;  %v7931_v48 = vor.u32 %v8738_v10, %v7930_v16 }
 0x441   :  { %v2366_v19 = vadd.f32 %v2365_v33, %v2277_v3  ;;  %v8058_v3 = vld [vmem:[#allocation8 + $0x340] sm:$0xf] }
 0x442   :  { %v10175_v20 = vadd.f32 %v3792_v9, %v3704_v59  ;;  %2594 = vmatmul.bf16.gmra.mxu2 %v12189_v45  ;;  %3742 = vmatmul.bf16.gmra.mxu0 %v12190_v61  ;;  %v8059_v9 = vor.u32 %v8770_v42, %v8058_v3 }
 0x443   :  { %v2850_v36 = vmax.f32 %v2366_v19, 0.0  ;;  %3831 = vmatmul.bf16.gmra.mxu1 %v12192_v22  ;;  %3877 = vmatpush.bf16.msrb.mxu2 %v7931_v48 }
 0x444   :  { %12188 = vst [vmem:[#allocation74_spill] sm:$0xff] %v10175_v20  ;;  %3966 = vmatpush.bf16.msrb.mxu3 %v8059_v9 }
 0x445   :  { %2683 = vmatmul.bf16.gmra.mxu3 %v12191_v4  ;;  %v10181_v38 = vpack.c.bf16 %v2850_v36, %v2846_v63  ;;  %v2555_v33 = vpop.f32.mrf.mxu2 }
 0x446   :  { %v2556_v19 = vadd.f32 %v2555_v33, %v12194_v60 }
 0x447   :  { %12193 = vst [vmem:[#allocation77_spill] sm:$0xff] %v10181_v38  ;;  %v3705_v20 = vpop.f32.mrf.mxu0 }
 0x448   :  { %v2644_v59 = vpop.f32.mrf.mxu3  ;;  %v3706_v61 = vadd.f32 %v3705_v20, %v10171_v6  ;;  %v3794_v4 = vpop.f32.mrf.mxu1  ;;  %v12196_v20 = vld [vmem:[#allocation87_spill] sm:$0xff] }
 0x449   :  { %v2645_v45 = vadd.f32 %v2644_v59, %v2556_v19  ;;  %v7740_v19 = vld [vmem:[#allocation8 + $0xd0] sm:$0xf0] }
 0x44a   :  { %v10185_v22 = vadd.f32 %v3794_v4, %v3706_v61  ;;  %v12197_v61 = vld [vmem:[#allocation23_spill] sm:$0xff] }
 0x44b   :  { %v2727_v60 = vmax.f32 %v2645_v45, 0.0 }
 0x44d   :  { %v2557_v36 = vpop.f32.mrf.mxu2 }
 0x44e   :  { %v2558_v63 = vadd.f32 %v2557_v36, %v9956_v28  ;;  %v8688_v28 = vld [vmem:[#allocation8 + $0xc4] sm:$0xf] }
 0x44f   :  { %v3708_v47 = vpop.f32.mrf.mxu0  ;;  %v7743_v59 = vor.u32 %v8688_v28, %v7740_v19 }
 0x450   :  { %v2646_v38 = vpop.f32.mrf.mxu3  ;;  %v3709_v10 = vadd.f32 %v3708_v47, %v10171_v6  ;;  %v3797_v33 = vpop.f32.mrf.mxu1 }
 0x451   :  { %v2647_v16 = vadd.f32 %v2646_v38, %v2558_v63  ;;  %4051 = vmatpush.bf16.msrb.mxu0 %v7743_v59 }
 0x452   :  { %v10189_v3 = vadd.f32 %v3797_v33, %v3709_v10  ;;  %2599 = vmatmul.bf16.gmra.mxu2 %v9475_v57  ;;  %3747 = vmatmul.bf16.gmra.mxu0 %v12196_v20 }
 0x453   :  { %v2731_v42 = vmax.f32 %v2647_v16, 0.0  ;;  %3836 = vmatmul.bf16.gmra.mxu1 %v12197_v61  ;;  %v7868_v16 = vld [vmem:[#allocation8 + $0x1d0] sm:$0xf0] }
 0x454   :  { %12195 = vst [vmem:[#allocation79_spill] sm:$0xff] %v10189_v3  ;;  %v12220_v3 = vld [vmem:[#allocation59_spill] sm:$0xff] }
 0x455   :  { %2688 = vmatmul.bf16.gmra.mxu3 %v9477_v51  ;;  %v10195_v48 = vpack.c.bf16 %v2731_v42, %v2727_v60  ;;  %v2560_v38 = vpop.f32.mrf.mxu2  ;;  %v8720_v51 = vld [vmem:[#allocation8 + $0x1c4] sm:$0xf] }
 0x456   :  { %v2561_v47 = vadd.f32 %v2560_v38, %v9960_v37  ;;  %v7871_v10 = vor.u32 %v8720_v51, %v7868_v16  ;;  %v8734_v51 = vld [vmem:[#allocation8 + $0x22c] sm:$0xf0]  ;;  %v8042_v16 = vld [vmem:[#allocation8 + $0x320] sm:$0xf] }
 0x457   :  { %v3710_v45 = vpop.f32.mrf.mxu0 }
 0x458   :  { %v2649_v9 = vpop.f32.mrf.mxu3  ;;  %v3711_v57 = vadd.f32 %v3710_v45, %v10171_v6  ;;  %v3799_v36 = vpop.f32.mrf.mxu1  ;;  %4140 = vmatpush.bf16.msrb.mxu1 %v7871_v10  ;;  %v12200_v45 = vld [vmem:[#allocation88_spill] sm:$0xff] }
 0x459   :  { %v2650_v4 = vadd.f32 %v2649_v9, %v2561_v47 }
 0x45a   :  { %v10199_v63 = vadd.f32 %v3799_v36, %v3711_v57  ;;  %v12201_v57 = vld [vmem:[#allocation40_spill] sm:$0xff] }
 0x45b   :  { %v2735_v59 = vmax.f32 %v2650_v4, 0.0 }
 0x45c   :  { %12198 = vst [vmem:[#allocation66_spill] sm:$0xff] %v10199_v63  ;;  %v8712_v63 = vld [vmem:[#allocation8 + $0x184] sm:$0xf] }
 0x45d   :  { %v2562_v33 = vpop.f32.mrf.mxu2 }
 0x45e   :  { %v2563_v60 = vadd.f32 %v2562_v33, %v9970_v23  ;;  %v7914_v23 = vld [vmem:[#allocation8 + $0x220] sm:$0xf] }
 0x45f   :  { %v3713_v28 = vpop.f32.mrf.mxu0  ;;  %v7915_v33 = vor.u32 %v8734_v51, %v7914_v23 }
 0x460   :  { %v2651_v42 = vpop.f32.mrf.mxu3  ;;  %v3714_v37 = vadd.f32 %v3713_v28, %v10171_v6  ;;  %v3802_v38 = vpop.f32.mrf.mxu1 }
 0x461   :  { %v2652_v19 = vadd.f32 %v2651_v42, %v2563_v60  ;;  %v8766_v60 = vld [vmem:[#allocation8 + $0x32c] sm:$0xf0]  ;;  %3878 = vmatpush.bf16.msrb.mxu2 %v7915_v33  ;;  %v12205_v33 = vld [vmem:[#allocation70_spill] sm:$0xff] }
 0x462   :  { %v10203_v9 = vadd.f32 %v3802_v38, %v3714_v37  ;;  %2604 = vmatmul.bf16.gmra.mxu2 %v9493_v31  ;;  %3752 = vmatmul.bf16.gmra.mxu0 %v12200_v45  ;;  %v8043_v28 = vor.u32 %v8766_v60, %v8042_v16 }
 0x463   :  { %v2739_v47 = vmax.f32 %v2652_v19, 0.0  ;;  %3841 = vmatmul.bf16.gmra.mxu1 %v12201_v57 }
 0x464   :  { %12199 = vst [vmem:[#allocation69_spill] sm:$0xff] %v10203_v9  ;;  %3967 = vmatpush.bf16.msrb.mxu3 %v8043_v28  ;;  %v12208_v28 = vld [vmem:[#allocation41_spill] sm:$0xff] }
 0x465   :  { %2693 = vmatmul.bf16.gmra.mxu3 %v9495_v32  ;;  %v10209_v36 = vpack.c.bf16 %v2739_v47, %v2735_v59  ;;  %v2565_v10 = vpop.f32.mrf.mxu2  ;;  %v12203_v47 = vld [vmem:[#allocation53_spill] sm:$0xff] }
 0x466   :  { %v2566_v4 = vadd.f32 %v2565_v10, %v9974_v5 }
 0x467   :  { %v3715_v19 = vpop.f32.mrf.mxu0 }
 0x468   :  { %v2654_v42 = vpop.f32.mrf.mxu3  ;;  %v3716_v37 = vadd.f32 %v3715_v19, %v10171_v6  ;;  %v3804_v32 = vpop.f32.mrf.mxu1 }
 0x469   :  { %v2655_v31 = vadd.f32 %v2654_v42, %v2566_v4  ;;  %v12206_v4 = vld [vmem:[#allocation89_spill] sm:$0xff]  ;;  %v12207_v42 = vld [vmem:[#allocation71_spill] sm:$0xff] }
 0x46a   :  { %v10213_v38 = vadd.f32 %v3804_v32, %v3716_v37  ;;  %v8684_v37 = vld [vmem:[#allocation8 + $0xa4] sm:$0xf]  ;;  %v7724_v32 = vld [vmem:[#allocation8 + $0xb0] sm:$0xf0] }
 0x46b   :  { %v2743_v10 = vmax.f32 %v2655_v31, 0.0 }
 0x46c   :  { %12202 = vst [vmem:[#allocation67_spill] sm:$0xff] %v10213_v38 }
 0x46d   :  { %v2567_v59 = vpop.f32.mrf.mxu2 }
 0x46e   :  { %v2568_v9 = vadd.f32 %v2567_v59, %v12203_v47 }
 0x46f   :  { %v3718_v45 = vpop.f32.mrf.mxu0 }
 0x470   :  { %v2656_v57 = vpop.f32.mrf.mxu3  ;;  %v3719_v51 = vadd.f32 %v3718_v45, %v10171_v6  ;;  %v3807_v5 = vpop.f32.mrf.mxu1  ;;  %v12210_v45 = vld [vmem:[#allocation36_spill] sm:$0xff] }
 0x471   :  { %v2657_v23 = vadd.f32 %v2656_v57, %v2568_v9  ;;  %v7727_v57 = vor.u32 %v8684_v37, %v7724_v32 }
 0x472   :  { %v10217_v60 = vadd.f32 %v3807_v5, %v3719_v51  ;;  %2609 = vmatmul.bf16.gmra.mxu2 %v12205_v33  ;;  %3757 = vmatmul.bf16.gmra.mxu0 %v12206_v4 }
 0x473   :  { %v2747_v16 = vmax.f32 %v2657_v23, 0.0  ;;  %3846 = vmatmul.bf16.gmra.mxu1 %v12208_v28  ;;  %4052 = vmatpush.bf16.msrb.mxu0 %v7727_v57 }
 0x474   :  { %12204 = vst [vmem:[#allocation78_spill] sm:$0xff] %v10217_v60  ;;  %v7852_v60 = vld [vmem:[#allocation8 + $0x1b0] sm:$0xf0] }
 0x475   :  { %2698 = vmatmul.bf16.gmra.mxu3 %v12207_v42  ;;  %v10223_v19 = vpack.c.bf16 %v2747_v16, %v2743_v10  ;;  %v2570_v9 = vpop.f32.mrf.mxu2  ;;  %v8716_v42 = vld [vmem:[#allocation8 + $0x1a4] sm:$0xf] }
 0x476   :  { %v2571_v59 = vadd.f32 %v2570_v9, %v12210_v45  ;;  %v7855_v28 = vor.u32 %v8716_v42, %v7852_v60  ;;  %v12212_v16 = vld [vmem:[#allocation56_spill] sm:$0xff]  ;;  %v12217_v60 = vld [vmem:[#allocation26_spill] sm:$0xff]  ;;  %v7898_v42 = vld [vmem:[#allocation8 + $0x200] sm:$0xf] }
 0x477   :  { %12209 = vst [vmem:[#allocation96_spill] sm:$0xff] %v10223_v19  ;;  %v3720_v47 = vpop.f32.mrf.mxu0 }
 0x478   :  { %v2659_v31 = vpop.f32.mrf.mxu3  ;;  %v3721_v51 = vadd.f32 %v3720_v47, %v10171_v6  ;;  %v3809_v5 = vpop.f32.mrf.mxu1  ;;  %4141 = vmatpush.bf16.msrb.mxu1 %v7855_v28  ;;  %v12214_v47 = vld [vmem:[#allocation75_spill] sm:$0xff] }
 0x479   :  { %v2660_v23 = vadd.f32 %v2659_v31, %v2571_v59 }
 0x47a   :  { %v10227_v33 = vadd.f32 %v3809_v5, %v3721_v51  ;;  %v12215_v51 = vld [vmem:[#allocation52_spill] sm:$0xff] }
 0x47b   :  { %v2751_v57 = vmax.f32 %v2660_v23, 0.0  ;;  %v12216_v5 = vld [vmem:[#allocation76_spill] sm:$0xff]  ;;  %v12218_v23 = vld [vmem:[#allocation38_spill] sm:$0xff] }
 0x47c   :  { %12211 = vst [vmem:[#allocation24_spill] sm:$0xff] %v10227_v33  ;;  %v7708_v33 = vld [vmem:[#allocation8 + $0x90] sm:$0xf0] }
 0x47d   :  { %v2572_v10 = vpop.f32.mrf.mxu2 }
 0x47e   :  { %v2573_v4 = vadd.f32 %v2572_v10, %v12212_v16  ;;  %v8730_v10 = vld [vmem:[#allocation8 + $0x20c] sm:$0xf0] }
 0x47f   :  { %v3723_v37 = vpop.f32.mrf.mxu0  ;;  %v7899_v16 = vor.u32 %v8730_v10, %v7898_v42 }
 0x480   :  { %v2661_v38 = vpop.f32.mrf.mxu3  ;;  %v3724_v9 = vadd.f32 %v3723_v37, %v10171_v6  ;;  %v3812_v45 = vpop.f32.mrf.mxu1  ;;  %v8762_v37 = vld [vmem:[#allocation8 + $0x30c] sm:$0xf0] }
 0x481   :  { %v2662_v32 = vadd.f32 %v2661_v38, %v2573_v4  ;;  %v8026_v38 = vld [vmem:[#allocation8 + $0x300] sm:$0xf]  ;;  %3879 = vmatpush.bf16.msrb.mxu2 %v7899_v16 }
 0x482   :  { %v10231_v31 = vadd.f32 %v3812_v45, %v3724_v9  ;;  %2614 = vmatmul.bf16.gmra.mxu2 %v12214_v47  ;;  %3762 = vmatmul.bf16.gmra.mxu0 %v12215_v51  ;;  %v8027_v45 = vor.u32 %v8762_v37, %v8026_v38 }
 0x483   :  { %v2755_v59 = vmax.f32 %v2662_v32, 0.0  ;;  %3851 = vmatmul.bf16.gmra.mxu1 %v12217_v60 }
 0x484   :  { %12213 = vst [vmem:[#allocation46_spill] sm:$0xff] %v10231_v31  ;;  %3968 = vmatpush.bf16.msrb.mxu3 %v8027_v45 }
 0x485   :  { %2703 = vmatmul.bf16.gmra.mxu3 %v12216_v5  ;;  %v10237_v28 = vpack.c.bf16 %v2755_v59, %v2751_v57  ;;  %v2575_v4 = vpop.f32.mrf.mxu2  ;;  %v8680_v59 = vld [vmem:[#allocation8 + $0x84] sm:$0xf] }
 0x486   :  { %v2576_v32 = vadd.f32 %v2575_v4, %v12218_v23  ;;  %v7711_v61 = vor.u32 %v8680_v59, %v7708_v33  ;;  %v7836_v4 = vld [vmem:[#allocation8 + $0x190] sm:$0xf0] }
 0x487   :  { %v3725_v31 = vpop.f32.mrf.mxu0  ;;  %v7839_v38 = vor.u32 %v8712_v63, %v7836_v4  ;;  %v12223_v63 = vld [vmem:[#allocation44_spill] sm:$0xff] }
 0x488   :  { %v2664_v9 = vpop.f32.mrf.mxu3  ;;  %v3726_v51 = vadd.f32 %v3725_v31, %v10171_v6  ;;  %v3814_v5 = vpop.f32.mrf.mxu1  ;;  %4053 = vmatpush.bf16.msrb.mxu0 %v7711_v61  ;;  %v8676_v31 = vld [vmem:[#allocation8 + $0x64] sm:$0xf] }
 0x489   :  { %v2665_v47 = vadd.f32 %v2664_v9, %v2576_v32  ;;  %4142 = vmatpush.bf16.msrb.mxu1 %v7839_v38  ;;  %v8708_v9 = vld [vmem:[#allocation8 + $0x164] sm:$0xf] }
 0x48a   :  { %v10241_v60 = vadd.f32 %v3814_v5, %v3726_v51  ;;  %v7692_v51 = vld [vmem:[#allocation8 + $0x70] sm:$0xf0]  ;;  %v8704_v4 = vld [vmem:[#allocation8 + $0x144] sm:$0xf] }
 0x48b   :  { %v2759_v45 = vmax.f32 %v2665_v47, 0.0  ;;  %v7695_v33 = vor.u32 %v8676_v31, %v7692_v51  ;;  %v8672_v47 = vld [vmem:[#allocation8 + $0x44] sm:$0xf] }
 0x48c   :  { %12219 = vst [vmem:[#allocation80_spill] sm:$0xff] %v10241_v60 }
 0x48d   :  { %v2577_v57 = vpop.f32.mrf.mxu2  ;;  %4054 = vmatpush.bf16.msrb.mxu0 %v7695_v33 }
 0x48e   :  { %v2578_v42 = vadd.f32 %v2577_v57, %v12220_v3  ;;  %v12222_v3 = vld [vmem:[#allocation90_spill] sm:$0xff] }
 0x48f   :  { %v3728_v23 = vpop.f32.mrf.mxu0  ;;  %v7820_v57 = vld [vmem:[#allocation8 + $0x170] sm:$0xf0] }
 0x490   :  { %v2666_v10 = vpop.f32.mrf.mxu3  ;;  %v3729_v16 = vadd.f32 %v3728_v23, %v10171_v6  ;;  %v3817_v32 = vpop.f32.mrf.mxu1  ;;  %v7823_v59 = vor.u32 %v8708_v9, %v7820_v57  ;;  %v8668_v9 = vld [vmem:[#allocation8 + $0x24] sm:$0xf] }
 0x491   :  { %v2667_v37 = vadd.f32 %v2666_v10, %v2578_v42  ;;  %v7676_v10 = vld [vmem:[#allocation8 + $0x50] sm:$0xf0] }
 0x492   :  { %v10245_v60 = vadd.f32 %v3817_v32, %v3729_v16  ;;  %2619 = vmatmul.bf16.gmra.mxu2 %v9547_v13  ;;  %3767 = vmatmul.bf16.gmra.mxu0 %v12222_v3  ;;  %v7679_v38 = vor.u32 %v8672_v47, %v7676_v10  ;;  %v7644_v47 = vld [vmem:[#allocation8 + $0x10] sm:$0xf0]  ;;  %v8696_v10 = vld [vmem:[#allocation8 + $0x104] sm:$0xf] }
 0x493   :  { %v2763_v5 = vmax.f32 %v2667_v37, 0.0  ;;  %3856 = vmatmul.bf16.gmra.mxu1 %v12223_v63  ;;  %v7804_v37 = vld [vmem:[#allocation8 + $0x150] sm:$0xf0] }
 0x494   :  { %12221 = vst [vmem:[#allocation47_spill] sm:$0xff] %v10245_v60  ;;  %4143 = vmatpush.bf16.msrb.mxu1 %v7823_v59  ;;  %v7807_v32 = vor.u32 %v8704_v4, %v7804_v37  ;;  %4055 = vmatpush.bf16.msrb.mxu0 %v7679_v38  ;;  %v7788_v59 = vld [vmem:[#allocation8 + $0x130] sm:$0xf0] }
 0x495   :  { %2708 = vmatmul.bf16.gmra.mxu3 %v9549_v29  ;;  %v10251_v61 = vpack.c.bf16 %v2763_v5, %v2759_v45  ;;  %v2580_v42 = vpop.f32.mrf.mxu2  ;;  %v7660_v45 = vld [vmem:[#allocation8 + $0x30] sm:$0xf0]  ;;  %v8700_v5 = vld [vmem:[#allocation8 + $0x124] sm:$0xf] }
 0x496   :  { %v2581_v23 = vadd.f32 %v2580_v42, %v10016_v18  ;;  %v7663_v57 = vor.u32 %v8668_v9, %v7660_v45  ;;  %v7791_v60 = vor.u32 %v8700_v5, %v7788_v59  ;;  %v8664_v42 = vld [vmem:[#allocation8 + $0x4] sm:$0xf]  ;;  %v7772_v38 = vld [vmem:[#allocation8 + $0x110] sm:$0xf0] }
 0x497   :  { %12224 = vst [vmem:[#allocation86_spill] sm:$0xff] %v10251_v61  ;;  %v3730_v16 = vpop.f32.mrf.mxu0  ;;  %v8756_v59 = vld [vmem:[#allocation8 + $0x2e4] sm:$0xf] }
 0x498   :  { %v2669_v13 = vpop.f32.mrf.mxu3  ;;  %v3731_v29 = vadd.f32 %v3730_v16, %v10171_v6  ;;  %v3819_v51 = vpop.f32.mrf.mxu1  ;;  %4144 = vmatpush.bf16.msrb.mxu1 %v7807_v32  ;;  %4056 = vmatpush.bf16.msrb.mxu0 %v7663_v57  ;;  %v7775_v16 = vor.u32 %v8696_v10, %v7772_v38 }
 0x499   :  { %v2670_v31 = vadd.f32 %v2669_v13, %v2581_v23  ;;  %v7647_v13 = vor.u32 %v8664_v42, %v7644_v47  ;;  %v8788_v42 = vld [vmem:[#allocation8 + $0x3e4] sm:$0xf] }
 0x49a   :  { %v10255_v33 = vadd.f32 %v3819_v51, %v3731_v29 }
 0x49b   :  { %v2767_v9 = vmax.f32 %v2670_v31, 0.0 }
 0x49c   :  { %4145 = vmatpush.bf16.msrb.mxu1 %v7791_v60  ;;  %4057 = vmatpush.bf16.msrb.mxu0 %v7647_v13  ;;  %v12225_v60 = vld [vmem:[#allocation91_spill] sm:$0xff] }
 0x49d   :  { %v2582_v18 = vpop.f32.mrf.mxu2 }
 0x49e   :  { %v2583_v4 = vadd.f32 %v2582_v18, %v10026_v26  ;;  %v12226_v26 = vld [vmem:[#allocation30_spill] sm:$0xff] }
 0x49f   :  { %v3733_v37 = vpop.f32.mrf.mxu0  ;;  %v8012_v18 = vld [vmem:[#allocation8 + $0x2f0] sm:$0xf0] }
 0x4a0   :  { %v2671_v23 = vpop.f32.mrf.mxu3  ;;  %v3734_v29 = vadd.f32 %v3733_v37, %v10171_v6  ;;  %v3822_v51 = vpop.f32.mrf.mxu1  ;;  %4146 = vmatpush.bf16.msrb.mxu1 %v7775_v16  ;;  %v8015_v10 = vor.u32 %v8756_v59, %v8012_v18 }
 0x4a1   :  { %v2672_v32 = vadd.f32 %v2671_v23, %v2583_v4  ;;  %v8140_v4 = vld [vmem:[#allocation8 + $0x3f0] sm:$0xf0] }
 0x4a2   :  { %v10259_v5 = vadd.f32 %v3822_v51, %v3734_v29  ;;  %2624 = vmatmul.bf16.gmra.mxu2 %v9565_v0  ;;  %3772 = vmatmul.bf16.gmra.mxu0 %v12225_v60  ;;  %v8143_v13 = vor.u32 %v8788_v42, %v8140_v4  ;;  %v12229_v4 = vld [vmem:[#allocation34_spill] sm:$0xff] }
 0x4a3   :  { %v2771_v45 = vmax.f32 %v2672_v32, 0.0  ;;  %3861 = vmatmul.bf16.gmra.mxu1 %v12226_v26  ;;  %4228 = vmatpush.bf16.msra.mxu2 %v8015_v10  ;;  %v12228_v10 = vld [vmem:[#allocation93_spill] sm:$0xff] }
 0x4a4   :  { %4317 = vmatpush.bf16.msra.mxu3 %v8143_v13 }
 0x4a5   :  { %2713 = vmatmul.bf16.gmra.mxu3 %v9567_v17  ;;  %v10265_v57 = vpack.c.bf16 %v2771_v45, %v2767_v9  ;;  %v2585_v47 = vpop.f32.mrf.mxu2 }
 0x4a6   :  { %v2586_v31 = vadd.f32 %v2585_v47, %v10030_v49 }
 0x4a7   :  { %12227 = vst [vmem:[#allocation50_spill] sm:$0xff] %v10265_v57  ;;  %v3735_v38 = vpop.f32.mrf.mxu0 }
 0x4a8   :  { %v2674_v23 = vpop.f32.mrf.mxu3  ;;  %v3736_v37 = vadd.f32 %v3735_v38, %v10171_v6  ;;  %v3824_v17 = vpop.f32.mrf.mxu1 }
 0x4a9   :  { %v2675_v0 = vadd.f32 %v2674_v23, %v2586_v31 }
 0x4aa   :  { %v10269_v16 = vadd.f32 %v3824_v17, %v3736_v37 }
 0x4ab   :  { %v2775_v18 = vmax.f32 %v2675_v0, 0.0 }
 0x4ad   :  { %v2587_v32 = vpop.f32.mrf.mxu2 }
 0x4ae   :  { %v2588_v29 = vadd.f32 %v2587_v32, %v10040_v14 }
 0x4af   :  { %v3738_v9 = vpop.f32.mrf.mxu0 }
 0x4b0   :  { %v2676_v51 = vpop.f32.mrf.mxu3  ;;  %v3739_v59 = vadd.f32 %v3738_v9, %v10171_v6  ;;  %v3827_v49 = vpop.f32.mrf.mxu1 }
 0x4b1   :  { %v2677_v45 = vadd.f32 %v2676_v51, %v2588_v29 }
 0x4b2   :  { %v10273_v47 = vadd.f32 %v3827_v49, %v3739_v59  ;;  %2629 = vmatmul.bf16.gmra.mxu2 %v9583_v58  ;;  %3777 = vmatmul.bf16.gmra.mxu0 %v12228_v10 }
 0x4b3   :  { %v2779_v42 = vmax.f32 %v2677_v45, 0.0  ;;  %3866 = vmatmul.bf16.gmra.mxu1 %v12229_v4 }
 0x4b5   :  { %2718 = vmatmul.bf16.gmra.mxu3 %v9585_v30  ;;  %v10279_v31 = vpack.c.bf16 %v2779_v42, %v2775_v18  ;;  %v2590_v14 = vpop.f32.mrf.mxu2  ;;  %v12232_v42 = vld [vmem:[#allocation35_spill] sm:$0xff] }
 0x4b6   :  { %v2591_v23 = vadd.f32 %v2590_v14, %v10044_v27 }
 0x4b7   :  { %12230 = vst [vmem:[#allocation82_spill] sm:$0xff] %v10279_v31  ;;  %v3740_v38 = vpop.f32.mrf.mxu0 }
 0x4b8   :  { %v2679_v13 = vpop.f32.mrf.mxu3  ;;  %v3741_v0 = vadd.f32 %v3740_v38, %v10171_v6  ;;  %v3829_v17 = vpop.f32.mrf.mxu1 }
 0x4b9   :  { %v2680_v37 = vadd.f32 %v2679_v13, %v2591_v23  ;;  %v7996_v23 = vld [vmem:[#allocation8 + $0x2d0] sm:$0xf0]  ;;  %v8784_v13 = vld [vmem:[#allocation8 + $0x3c4] sm:$0xf] }
 0x4ba   :  { %v10283_v32 = vadd.f32 %v3829_v17, %v3741_v0  ;;  %v8124_v17 = vld [vmem:[#allocation8 + $0x3d0] sm:$0xf0] }
 0x4bb   :  { %v2783_v49 = vmax.f32 %v2680_v37, 0.0 }
 0x4bd   :  { %v2592_v58 = vpop.f32.mrf.mxu2 }
 0x4be   :  { %v2593_v29 = vadd.f32 %v2592_v58, %v10054_v2  ;;  %v8752_v2 = vld [vmem:[#allocation8 + $0x2c4] sm:$0xf] }
 0x4bf   :  { %v3743_v30 = vpop.f32.mrf.mxu0  ;;  %v7999_v0 = vor.u32 %v8752_v2, %v7996_v23 }
 0x4c0   :  { %v2681_v51 = vpop.f32.mrf.mxu3  ;;  %v3744_v45 = vadd.f32 %v3743_v30, %v10171_v6  ;;  %v3832_v59 = vpop.f32.mrf.mxu1 }
 0x4c1   :  { %v2682_v9 = vadd.f32 %v2681_v51, %v2593_v29  ;;  %v8127_v29 = vor.u32 %v8784_v13, %v8124_v17  ;;  %4229 = vmatpush.bf16.msra.mxu2 %v7999_v0  ;;  %v12235_v0 = vld [vmem:[#allocation49_spill] sm:$0xff] }
 0x4c2   :  { %v10287_v27 = vadd.f32 %v3832_v59, %v3744_v45  ;;  %3880 = vmatmul.bf16.vlgmr.msrb.gmra.mxu2 %v12232_v42  ;;  %4058 = vmatmul.bf16.vlgmr.msrb.gmra.mxu0 %v12143_v12 }
 0x4c3   :  { %v2787_v18 = vmax.f32 %v2682_v9, 0.0  ;;  %4147 = vmatmul.bf16.vlgmr.msrb.gmra.mxu1 %v12144_v35  ;;  %4318 = vmatpush.bf16.msra.mxu3 %v8127_v29 }
 0x4c4   :  { %12231 = vst [vmem:[#allocation51_spill] sm:$0xff] %v10287_v27 }
 0x4c5   :  { %3969 = vmatmul.bf16.vlgmr.msrb.gmra.mxu3 %v10195_v48  ;;  %v10293_v14 = vpack.c.bf16 %v2787_v18, %v2783_v49  ;;  %v2595_v38 = vpop.f32.mrf.mxu2 }
 0x4c6   :  { %v2596_v37 = vadd.f32 %v2595_v38, %v10058_v46 }
 0x4c7   :  { %12233 = vst [vmem:[#allocation42_spill] sm:$0xff] %v10293_v14  ;;  %v3745_v51 = vpop.f32.mrf.mxu0 }
 0x4c8   :  { %v2684_v58 = vpop.f32.mrf.mxu3  ;;  %v3746_v9 = vadd.f32 %v3745_v51, %v10171_v6  ;;  %v3834_v45 = vpop.f32.mrf.mxu1 }
 0x4c9   :  { %v2685_v30 = vadd.f32 %v2684_v58, %v2596_v37 }
 0x4ca   :  { %v10297_v59 = vadd.f32 %v3834_v45, %v3746_v9 }
 0x4cb   :  { %v2791_v38 = vmax.f32 %v2685_v30, 0.0 }
 0x4cd   :  { %v2597_v49 = vpop.f32.mrf.mxu2 }
 0x4ce   :  { %v2598_v18 = vadd.f32 %v2597_v49, %v10068_v39 }
 0x4cf   :  { %v3748_v35 = vpop.f32.mrf.mxu0 }
 0x4d0   :  { %v2686_v27 = vpop.f32.mrf.mxu3  ;;  %v3749_v23 = vadd.f32 %v3748_v35, %v10171_v6  ;;  %v3837_v46 = vpop.f32.mrf.mxu1 }
 0x4d1   :  { %v2687_v2 = vadd.f32 %v2686_v27, %v2598_v18 }
 0x4d2   :  { %v10301_v17 = vadd.f32 %v3837_v46, %v3749_v23  ;;  %3885 = vmatmul.bf16.gmra.mxu2 %v12235_v0  ;;  %4063 = vmatmul.bf16.gmra.mxu0 %v12146_v1 }
 0x4d3   :  { %v2795_v13 = vmax.f32 %v2687_v2, 0.0  ;;  %4152 = vmatmul.bf16.gmra.mxu1 %v12147_v56 }
 0x4d4   :  { %12234 = vst [vmem:[#allocation43_spill] sm:$0xff] %v10301_v17 }
 0x4d5   :  { %3974 = vmatmul.bf16.gmra.mxu3 %v10209_v36  ;;  %v10307_v37 = vpack.c.bf16 %v2795_v13, %v2791_v38  ;;  %v2600_v39 = vpop.f32.mrf.mxu2 }
 0x4d6   :  { %v2601_v27 = vadd.f32 %v2600_v39, %v10072_v8  ;;  %v12238_v39 = vld [vmem:[#allocation37_spill] sm:$0xff] }
 0x4d7   :  { %12236 = vst [vmem:[#allocation54_spill] sm:$0xff] %v10307_v37  ;;  %v3750_v35 = vpop.f32.mrf.mxu0 }
 0x4d8   :  { %v2689_v58 = vpop.f32.mrf.mxu3  ;;  %v3751_v51 = vadd.f32 %v3750_v35, %v10171_v6  ;;  %v3839_v30 = vpop.f32.mrf.mxu1  ;;  %v8780_v35 = vld [vmem:[#allocation8 + $0x3a4] sm:$0xf] }
 0x4d9   :  { %v2690_v29 = vadd.f32 %v2689_v58, %v2601_v27  ;;  %v7980_v58 = vld [vmem:[#allocation8 + $0x2b0] sm:$0xf0] }
 0x4da   :  { %v10311_v9 = vadd.f32 %v3839_v30, %v3751_v51 }
 0x4db   :  { %v2799_v13 = vmax.f32 %v2690_v29, 0.0 }
 0x4dd   :  { %v2602_v45 = vpop.f32.mrf.mxu2 }
 0x4de   :  { %v2603_v49 = vadd.f32 %v2602_v45, %v10082_v44  ;;  %v8748_v44 = vld [vmem:[#allocation8 + $0x2a4] sm:$0xf]  ;;  %v8108_v45 = vld [vmem:[#allocation8 + $0x3b0] sm:$0xf0] }
 0x4df   :  { %v3753_v2 = vpop.f32.mrf.mxu0  ;;  %v7983_v30 = vor.u32 %v8748_v44, %v7980_v58 }
 0x4e0   :  { %v2691_v18 = vpop.f32.mrf.mxu3  ;;  %v3754_v46 = vadd.f32 %v3753_v2, %v10171_v6  ;;  %v3842_v38 = vpop.f32.mrf.mxu1 }
 0x4e1   :  { %v2692_v23 = vadd.f32 %v2691_v18, %v2603_v49  ;;  %v8111_v18 = vor.u32 %v8780_v35, %v8108_v45  ;;  %4230 = vmatpush.bf16.msra.mxu2 %v7983_v30  ;;  %v12241_v30 = vld [vmem:[#allocation39_spill] sm:$0xff] }
 0x4e2   :  { %v10315_v8 = vadd.f32 %v3842_v38, %v3754_v46  ;;  %3890 = vmatmul.bf16.gmra.mxu2 %v12238_v39  ;;  %4068 = vmatmul.bf16.gmra.mxu0 %v12149_v55 }
 0x4e3   :  { %v2803_v17 = vmax.f32 %v2692_v23, 0.0  ;;  %4157 = vmatmul.bf16.gmra.mxu1 %v12150_v62  ;;  %4319 = vmatpush.bf16.msra.mxu3 %v8111_v18 }
 0x4e4   :  { %12237 = vst [vmem:[#allocation55_spill] sm:$0xff] %v10315_v8 }
 0x4e5   :  { %3979 = vmatmul.bf16.gmra.mxu3 %v10223_v19  ;;  %v10321_v27 = vpack.c.bf16 %v2803_v17, %v2799_v13  ;;  %v2605_v51 = vpop.f32.mrf.mxu2 }
 0x4e6   :  { %v2606_v29 = vadd.f32 %v2605_v51, %v10086_v15 }
 0x4e7   :  { %12239 = vst [vmem:[#allocation28_spill] sm:$0xff] %v10321_v27  ;;  %v3755_v2 = vpop.f32.mrf.mxu0 }
 0x4e8   :  { %v2694_v49 = vpop.f32.mrf.mxu3  ;;  %v3756_v46 = vadd.f32 %v3755_v2, %v10171_v6  ;;  %v3844_v38 = vpop.f32.mrf.mxu1 }
 0x4e9   :  { %v2695_v23 = vadd.f32 %v2694_v49, %v2606_v29 }
 0x4ea   :  { %v10325_v8 = vadd.f32 %v3844_v38, %v3756_v46 }
 0x4eb   :  { %v2807_v51 = vmax.f32 %v2695_v23, 0.0 }
 0x4ed   :  { %v2607_v17 = vpop.f32.mrf.mxu2 }
 0x4ee   :  { %v2608_v13 = vadd.f32 %v2607_v17, %v10096_v50 }
 0x4ef   :  { %v3758_v19 = vpop.f32.mrf.mxu0 }
 0x4f0   :  { %v2696_v62 = vpop.f32.mrf.mxu3  ;;  %v3759_v58 = vadd.f32 %v3758_v19, %v10171_v6  ;;  %v3847_v15 = vpop.f32.mrf.mxu1 }
 0x4f1   :  { %v2697_v44 = vadd.f32 %v2696_v62, %v2608_v13 }
 0x4f2   :  { %v10329_v45 = vadd.f32 %v3847_v15, %v3759_v58  ;;  %3895 = vmatmul.bf16.gmra.mxu2 %v12241_v30  ;;  %4073 = vmatmul.bf16.gmra.mxu0 %v12152_v7 }
 0x4f3   :  { %v2811_v35 = vmax.f32 %v2697_v44, 0.0  ;;  %4162 = vmatmul.bf16.gmra.mxu1 %v12153_v24 }
 0x4f4   :  { %12240 = vst [vmem:[#allocation57_spill] sm:$0xff] %v10329_v45 }
 0x4f5   :  { %3984 = vmatmul.bf16.gmra.mxu3 %v10237_v28  ;;  %v10335_v29 = vpack.c.bf16 %v2811_v35, %v2807_v51  ;;  %v2610_v50 = vpop.f32.mrf.mxu2 }
 0x4f6   :  { %v2611_v62 = vadd.f32 %v2610_v50, %v10100_v53 }
 0x4f7   :  { %12242 = vst [vmem:[#allocation58_spill] sm:$0xff] %v10335_v29  ;;  %v3760_v19 = vpop.f32.mrf.mxu0 }
 0x4f8   :  { %v2699_v49 = vpop.f32.mrf.mxu3  ;;  %v3761_v2 = vadd.f32 %v3760_v19, %v10171_v6  ;;  %v3849_v23 = vpop.f32.mrf.mxu1 }
 0x4f9   :  { %v2700_v18 = vadd.f32 %v2699_v49, %v2611_v62  ;;  %v7964_v62 = vld [vmem:[#allocation8 + $0x290] sm:$0xf0]  ;;  %v8776_v49 = vld [vmem:[#allocation8 + $0x384] sm:$0xf] }
 0x4fa   :  { %v10339_v46 = vadd.f32 %v3849_v23, %v3761_v2  ;;  %v8092_v23 = vld [vmem:[#allocation8 + $0x390] sm:$0xf0] }
 0x4fb   :  { %v2815_v35 = vmax.f32 %v2700_v18, 0.0 }
 0x4fd   :  { %v2612_v38 = vpop.f32.mrf.mxu2 }
 0x4fe   :  { %v2613_v17 = vadd.f32 %v2612_v38, %v10110_v25  ;;  %v8744_v25 = vld [vmem:[#allocation8 + $0x284] sm:$0xf] }
 0x4ff   :  { %v3763_v44 = vpop.f32.mrf.mxu0  ;;  %v7967_v2 = vor.u32 %v8744_v25, %v7964_v62 }
 0x500   :  { %v2701_v13 = vpop.f32.mrf.mxu3  ;;  %v3764_v15 = vadd.f32 %v3763_v44, %v10171_v6  ;;  %v3852_v51 = vpop.f32.mrf.mxu1 }
 0x501   :  { %v2702_v58 = vadd.f32 %v2701_v13, %v2613_v17  ;;  %v8095_v17 = vor.u32 %v8776_v49, %v8092_v23  ;;  %4231 = vmatpush.bf16.msra.mxu2 %v7967_v2  ;;  %v12246_v2 = vld [vmem:[#allocation81_spill] sm:$0xff] }
 0x502   :  { %v10343_v53 = vadd.f32 %v3852_v51, %v3764_v15  ;;  %3900 = vmatmul.bf16.gmra.mxu2 %v10022_v34  ;;  %4078 = vmatmul.bf16.gmra.mxu0 %v12157_v52 }
 0x503   :  { %v2819_v45 = vmax.f32 %v2702_v58, 0.0  ;;  %4167 = vmatmul.bf16.gmra.mxu1 %v12159_v54  ;;  %4320 = vmatpush.bf16.msra.mxu3 %v8095_v17 }
 0x504   :  { %12243 = vst [vmem:[#allocation45_spill] sm:$0xff] %v10343_v53 }
 0x505   :  { %3989 = vmatmul.bf16.gmra.mxu3 %v10251_v61  ;;  %v10349_v50 = vpack.c.bf16 %v2819_v45, %v2815_v35  ;;  %v2615_v19 = vpop.f32.mrf.mxu2 }
 0x506   :  { %v2616_v18 = vadd.f32 %v2615_v19, %v10114_v21 }
 0x507   :  { %12244 = vst [vmem:[#allocation32_spill] sm:$0xff] %v10349_v50  ;;  %v3765_v13 = vpop.f32.mrf.mxu0 }
 0x508   :  { %v2704_v38 = vpop.f32.mrf.mxu3  ;;  %v3766_v58 = vadd.f32 %v3765_v13, %v10171_v6  ;;  %v3854_v15 = vpop.f32.mrf.mxu1 }
 0x509   :  { %v2705_v44 = vadd.f32 %v2704_v38, %v2616_v18  ;;  %v12248_v38 = vld [vmem:[#allocation64_spill] sm:$0xff] }
 0x50a   :  { %v10353_v51 = vadd.f32 %v3854_v15, %v3766_v58 }
 0x50b   :  { %v2823_v19 = vmax.f32 %v2705_v44, 0.0 }
 0x50d   :  { %v2617_v45 = vpop.f32.mrf.mxu2 }
 0x50e   :  { %v2618_v35 = vadd.f32 %v2617_v45, %v10124_v41 }
 0x50f   :  { %v3768_v54 = vpop.f32.mrf.mxu0 }
 0x510   :  { %v2706_v53 = vpop.f32.mrf.mxu3  ;;  %v3769_v62 = vadd.f32 %v3768_v54, %v10171_v6  ;;  %v3857_v21 = vpop.f32.mrf.mxu1 }
 0x511   :  { %v2707_v25 = vadd.f32 %v2706_v53, %v2618_v35  ;;  %v12250_v35 = vld [vmem:[#allocation65_spill] sm:$0xff] }
 0x512   :  { %v10357_v23 = vadd.f32 %v3857_v21, %v3769_v62  ;;  %3905 = vmatmul.bf16.gmra.mxu2 %v10036_v11  ;;  %4083 = vmatmul.bf16.gmra.mxu0 %v12164_v40 }
 0x513   :  { %v2827_v49 = vmax.f32 %v2707_v25, 0.0  ;;  %4172 = vmatmul.bf16.gmra.mxu1 %v12246_v2 }
 0x514   :  { %12245 = vst [vmem:[#allocation61_spill] sm:$0xff] %v10357_v23 }
 0x515   :  { %3994 = vmatmul.bf16.gmra.mxu3 %v10265_v57  ;;  %v10363_v18 = vpack.c.bf16 %v2827_v49, %v2823_v19  ;;  %v2620_v41 = vpop.f32.mrf.mxu2 }
 0x516   :  { %v2621_v53 = vadd.f32 %v2620_v41, %v12248_v38  ;;  %v12252_v38 = vld [vmem:[#allocation92_spill] sm:$0xff] }
 0x517   :  { %12247 = vst [vmem:[#allocation62_spill] sm:$0xff] %v10363_v18  ;;  %v3770_v54 = vpop.f32.mrf.mxu0 }
 0x518   :  { %v2709_v17 = vpop.f32.mrf.mxu3  ;;  %v3771_v44 = vadd.f32 %v3770_v54, %v10171_v6  ;;  %v3859_v58 = vpop.f32.mrf.mxu1 }
 0x519   :  { %v2710_v13 = vadd.f32 %v2709_v17, %v2621_v53  ;;  %v12253_v53 = vld [vmem:[#allocation83_spill] sm:$0xff]  ;;  %v12254_v17 = vld [vmem:[#allocation98_spill] sm:$0xff] }
 0x51a   :  { %v10367_v15 = vadd.f32 %v3859_v58, %v3771_v44  ;;  %v8740_v44 = vld [vmem:[#allocation8 + $0x264] sm:$0xf]  ;;  %v7948_v58 = vld [vmem:[#allocation8 + $0x270] sm:$0xf0] }
 0x51b   :  { %v2831_v2 = vmax.f32 %v2710_v13, 0.0  ;;  %v12255_v13 = vld [vmem:[#allocation27_spill] sm:$0xff] }
 0x51c   :  { %12249 = vst [vmem:[#allocation48_spill] sm:$0xff] %v10367_v15 }
 0x51d   :  { %v2622_v45 = vpop.f32.mrf.mxu2 }
 0x51e   :  { %v2623_v25 = vadd.f32 %v2622_v45, %v12250_v35  ;;  %v8772_v45 = vld [vmem:[#allocation8 + $0x364] sm:$0xf] }
 0x51f   :  { %v3773_v21 = vpop.f32.mrf.mxu0 }
 0x520   :  { %v2711_v62 = vpop.f32.mrf.mxu3  ;;  %v3774_v19 = vadd.f32 %v3773_v21, %v10171_v6  ;;  %v3862_v49 = vpop.f32.mrf.mxu1 }
 0x521   :  { %v2712_v23 = vadd.f32 %v2711_v62, %v2623_v25  ;;  %v7951_v25 = vor.u32 %v8740_v44, %v7948_v58  ;;  %v8076_v62 = vld [vmem:[#allocation8 + $0x370] sm:$0xf0] }
 0x522   :  { %v10371_v41 = vadd.f32 %v3862_v49, %v3774_v19  ;;  %3910 = vmatmul.bf16.gmra.mxu2 %v12252_v38  ;;  %4088 = vmatmul.bf16.gmra.mxu0 %v12253_v53  ;;  %v8079_v19 = vor.u32 %v8772_v45, %v8076_v62 }
 0x523   :  { %v2835_v57 = vmax.f32 %v2712_v23, 0.0  ;;  %4177 = vmatmul.bf16.gmra.mxu1 %v12254_v17  ;;  %4232 = vmatpush.bf16.msra.mxu2 %v7951_v25  ;;  %v12257_v25 = vld [vmem:[#allocation60_spill] sm:$0xff] }
 0x524   :  { %12251 = vst [vmem:[#allocation53_spill] sm:$0xff] %v10371_v41  ;;  %4321 = vmatpush.bf16.msra.mxu3 %v8079_v19 }
 0x525   :  { %3999 = vmatmul.bf16.gmra.mxu3 %v10279_v31  ;;  %v10377_v54 = vpack.c.bf16 %v2835_v57, %v2831_v2  ;;  %v2625_v35 = vpop.f32.mrf.mxu2 }
 0x526   :  { %v2626_v23 = vadd.f32 %v2625_v35, %v12255_v13 }
 0x527   :  { %v3775_v49 = vpop.f32.mrf.mxu0 }
 0x528   :  { %v2714_v21 = vpop.f32.mrf.mxu3  ;;  %v3776_v53 = vadd.f32 %v3775_v49, %v10171_v6  ;;  %v3864_v31 = vpop.f32.mrf.mxu1 }
 0x529   :  { %v2715_v41 = vadd.f32 %v2714_v21, %v2626_v23  ;;  %v12258_v23 = vld [vmem:[#allocation84_spill] sm:$0xff]  ;;  %v8695_v21 = vld [vmem:[#allocation8 + $0xf4] sm:$0xf0] }
 0x52a   :  { %v10381_v17 = vadd.f32 %v3864_v31, %v3776_v53  ;;  %v12259_v31 = vld [vmem:[#allocation99_spill] sm:$0xff] }
 0x52b   :  { %v2839_v13 = vmax.f32 %v2715_v41, 0.0 }
 0x52d   :  { %v2627_v57 = vpop.f32.mrf.mxu2 }
 0x52e   :  { %v2628_v2 = vadd.f32 %v2627_v57, %v10152_v43  ;;  %v7762_v43 = vld [vmem:[#allocation8 + $0xe8] sm:$0xf] }
 0x52f   :  { %v3778_v15 = vpop.f32.mrf.mxu0  ;;  %v7763_v19 = vor.u32 %v8695_v21, %v7762_v43  ;;  %v12262_v43 = vld [vmem:[#allocation33_spill] sm:$0xff] }
 0x530   :  { %v2716_v38 = vpop.f32.mrf.mxu3  ;;  %v3779_v58 = vadd.f32 %v3778_v15, %v10171_v6  ;;  %v3867_v35 = vpop.f32.mrf.mxu1  ;;  %v12260_v15 = vld [vmem:[#allocation68_spill] sm:$0xff] }
 0x531   :  { %v2717_v44 = vadd.f32 %v2716_v38, %v2628_v2  ;;  %4406 = vmatpush.bf16.msra.mxu0 %v7763_v19 }
 0x532   :  { %v10385_v62 = vadd.f32 %v3867_v35, %v3779_v58  ;;  %3915 = vmatmul.bf16.gmra.mxu2 %v12257_v25  ;;  %4093 = vmatmul.bf16.gmra.mxu0 %v12258_v23 }
 0x533   :  { %v2843_v45 = vmax.f32 %v2717_v44, 0.0  ;;  %4182 = vmatmul.bf16.gmra.mxu1 %v12259_v31 }
 0x534   :  { %12256 = vst [vmem:[#allocation70_spill] sm:$0xff] %v10385_v62  ;;  %v7890_v62 = vld [vmem:[#allocation8 + $0x1e8] sm:$0xf] }
 0x535   :  { %4004 = vmatmul.bf16.gmra.mxu3 %v10293_v14  ;;  %v10391_v53 = vpack.c.bf16 %v2843_v45, %v2839_v13  ;;  %v2630_v38 = vpop.f32.mrf.mxu2  ;;  %v8727_v14 = vld [vmem:[#allocation8 + $0x1f4] sm:$0xf0]  ;;  %v12261_v13 = vld [vmem:[#allocation31_spill] sm:$0xff] }
 0x536   :  { %v2631_v49 = vadd.f32 %v2630_v38, %v12260_v15  ;;  %v7891_v31 = vor.u32 %v8727_v14, %v7890_v62  ;;  %v10398_v45 = vperm.slane %v12261_v13, 1  ;;  %v12265_v14 = vld [vmem:[#allocation85_spill] sm:$0xff]  ;;  %v12266_v62 = vld [vmem:[#allocation100_spill] sm:$0xff] }
 0x537   :  { %v3780_v57 = vpop.f32.mrf.mxu0 }
 0x538   :  { %v2719_v41 = vpop.f32.mrf.mxu3  ;;  %v3781_v44 = vadd.f32 %v3780_v57, %v10171_v6  ;;  %v3869_v58 = vpop.f32.mrf.mxu1  ;;  %4495 = vmatpush.bf16.msra.mxu1 %v7891_v31  ;;  %v8736_v31 = vld [vmem:[#allocation8 + $0x244] sm:$0xf] }
 0x539   :  { %v2720_v2 = vadd.f32 %v2719_v41, %v2631_v49 }
 0x53a   :  { %v10395_v35 = vadd.f32 %v3869_v58, %v3781_v44  ;;  %v12264_v44 = vld [vmem:[#allocation20_spill] sm:$0xff] }
 0x53b   :  { %v2847_v6 = vmax.f32 %v2720_v2, 0.0  ;;  %v8768_v58 = vld [vmem:[#allocation8 + $0x344] sm:$0xf] }
 0x53d   :  { %v2632_v23 = vpop.f32.mrf.mxu2 }
 0x53e   :  { %v2633_v21 = vadd.f32 %v2632_v23, %v12262_v43  ;;  %v7932_v23 = vld [vmem:[#allocation8 + $0x250] sm:$0xf0] }
 0x53f   :  { %v4059_v15 = vpop.f32.mrf.mxu0  ;;  %v7935_v43 = vor.u32 %v8736_v31, %v7932_v23 }
 0x540   :  { %v2721_v38 = vpop.f32.mrf.mxu3  ;;  %v4060_v19 = vadd.f32 %v4059_v15, %v10398_v45  ;;  %v4148_v49 = vpop.f32.mrf.mxu1 }
 0x541   :  { %v2722_v25 = vadd.f32 %v2721_v38, %v2633_v21  ;;  %v8060_v21 = vld [vmem:[#allocation8 + $0x350] sm:$0xf0]  ;;  %4233 = vmatpush.bf16.msra.mxu2 %v7935_v43 }
 0x542   :  { %v10402_v57 = vadd.f32 %v4148_v49, %v4060_v19  ;;  %3920 = vmatmul.bf16.gmra.mxu2 %v12264_v44  ;;  %4098 = vmatmul.bf16.gmra.mxu0 %v12265_v14  ;;  %v8063_v2 = vor.u32 %v8768_v58, %v8060_v21 }
 0x543   :  { %v2851_v41 = vmax.f32 %v2722_v25, 0.0  ;;  %4187 = vmatmul.bf16.gmra.mxu1 %v12266_v62  ;;  %v12267_v25 = vld [vmem:[#allocation74_spill] sm:$0xff] }
 0x544   :  { %12263 = vst [vmem:[#allocation71_spill] sm:$0xff] %v10402_v57  ;;  %4322 = vmatpush.bf16.msra.mxu3 %v8063_v2  ;;  %v12269_v2 = vld [vmem:[#allocation21_spill] sm:$0xff] }
 0x545   :  { %4009 = vmatmul.bf16.gmra.mxu3 %v10307_v37  ;;  %v10408_v13 = vpack.c.bf16 %v2851_v41, %v2847_v6  ;;  %v3881_v38 = vpop.f32.mrf.mxu2 }
 0x546   :  { %v3882_v15 = vadd.f32 %v3881_v38, %v12267_v25 }
 0x547   :  { %v4061_v49 = vpop.f32.mrf.mxu0 }
 0x548   :  { %v3970_v19 = vpop.f32.mrf.mxu3  ;;  %v4062_v37 = vadd.f32 %v4061_v49, %v10398_v45  ;;  %v4150_v14 = vpop.f32.mrf.mxu1  ;;  %v12272_v49 = vld [vmem:[#allocation79_spill] sm:$0xff] }
 0x549   :  { %v3971_v57 = vadd.f32 %v3970_v19, %v3882_v15 }
 0x54a   :  { %v10412_v62 = vadd.f32 %v4150_v14, %v4062_v37  ;;  %v12270_v37 = vld [vmem:[#allocation23_spill] sm:$0xff]  ;;  %v7746_v14 = vld [vmem:[#allocation8 + $0xc8] sm:$0xf] }
 0x54b   :  { %v5118_v38 = vmax.f32 %v3971_v57, 0.0 }
 0x54d   :  { %v3883_v44 = vpop.f32.mrf.mxu2 }
 0x54e   :  { %v3884_v6 = vadd.f32 %v3883_v44, %v10185_v22  ;;  %v8691_v22 = vld [vmem:[#allocation8 + $0xd4] sm:$0xf0] }
 0x54f   :  { %v4064_v31 = vpop.f32.mrf.mxu0  ;;  %v7747_v15 = vor.u32 %v8691_v22, %v7746_v14 }
 0x550   :  { %v3972_v41 = vpop.f32.mrf.mxu3  ;;  %v4065_v58 = vadd.f32 %v4064_v31, %v10398_v45  ;;  %v4153_v21 = vpop.f32.mrf.mxu1 }
 0x551   :  { %v3973_v23 = vadd.f32 %v3972_v41, %v3884_v6  ;;  %4407 = vmatpush.bf16.msra.mxu0 %v7747_v15 }
 0x552   :  { %v10416_v43 = vadd.f32 %v4153_v21, %v4065_v58  ;;  %3925 = vmatmul.bf16.gmra.mxu2 %v12269_v2  ;;  %4103 = vmatmul.bf16.gmra.mxu0 %v12196_v20 }
 0x553   :  { %v5122_v25 = vmax.f32 %v3973_v23, 0.0  ;;  %4192 = vmatmul.bf16.gmra.mxu1 %v12270_v37 }
 0x554   :  { %12268 = vst [vmem:[#allocation36_spill] sm:$0xff] %v10416_v43  ;;  %v7874_v43 = vld [vmem:[#allocation8 + $0x1c8] sm:$0xf] }
 0x555   :  { %4014 = vmatmul.bf16.gmra.mxu3 %v10321_v27  ;;  %v10422_v44 = vpack.c.bf16 %v5122_v25, %v5118_v38  ;;  %v3886_v19 = vpop.f32.mrf.mxu2  ;;  %v8723_v27 = vld [vmem:[#allocation8 + $0x1d4] sm:$0xf0] }
 0x556   :  { %v3887_v6 = vadd.f32 %v3886_v19, %v12272_v49  ;;  %v7875_v37 = vor.u32 %v8723_v27, %v7874_v43  ;;  %v12274_v38 = vld [vmem:[#allocation66_spill] sm:$0xff]  ;;  %v12278_v27 = vld [vmem:[#allocation40_spill] sm:$0xff] }
 0x557   :  { %12271 = vst [vmem:[#allocation56_spill] sm:$0xff] %v10422_v44  ;;  %v4066_v41 = vpop.f32.mrf.mxu0  ;;  %v8732_v43 = vld [vmem:[#allocation8 + $0x224] sm:$0xf] }
 0x558   :  { %v3975_v57 = vpop.f32.mrf.mxu3  ;;  %v4067_v23 = vadd.f32 %v4066_v41, %v10398_v45  ;;  %v4155_v58 = vpop.f32.mrf.mxu1  ;;  %4496 = vmatpush.bf16.msra.mxu1 %v7875_v37  ;;  %v12276_v41 = vld [vmem:[#allocation63_spill] sm:$0xff]  ;;  %v8764_v37 = vld [vmem:[#allocation8 + $0x324] sm:$0xf] }
 0x559   :  { %v3976_v31 = vadd.f32 %v3975_v57, %v3887_v6 }
 0x55a   :  { %v10426_v21 = vadd.f32 %v4155_v58, %v4067_v23  ;;  %v12277_v23 = vld [vmem:[#allocation88_spill] sm:$0xff] }
 0x55b   :  { %v5126_v49 = vmax.f32 %v3976_v31, 0.0 }
 0x55c   :  { %12273 = vst [vmem:[#allocation75_spill] sm:$0xff] %v10426_v21  ;;  %v12282_v21 = vld [vmem:[#allocation67_spill] sm:$0xff] }
 0x55d   :  { %v3888_v20 = vpop.f32.mrf.mxu2 }
 0x55e   :  { %v3889_v25 = vadd.f32 %v3888_v20, %v12274_v38  ;;  %v7916_v20 = vld [vmem:[#allocation8 + $0x230] sm:$0xf0] }
 0x55f   :  { %v4069_v22 = vpop.f32.mrf.mxu0  ;;  %v7919_v58 = vor.u32 %v8732_v43, %v7916_v20  ;;  %v8044_v38 = vld [vmem:[#allocation8 + $0x330] sm:$0xf0] }
 0x560   :  { %v3977_v14 = vpop.f32.mrf.mxu3  ;;  %v4070_v19 = vadd.f32 %v4069_v22, %v10398_v45  ;;  %v4158_v15 = vpop.f32.mrf.mxu1  ;;  %v8047_v31 = vor.u32 %v8764_v37, %v8044_v38 }
 0x561   :  { %v3978_v44 = vadd.f32 %v3977_v14, %v3889_v25  ;;  %4234 = vmatpush.bf16.msra.mxu2 %v7919_v58 }
 0x562   :  { %v10430_v57 = vadd.f32 %v4158_v15, %v4070_v19  ;;  %3930 = vmatmul.bf16.gmra.mxu2 %v12276_v41  ;;  %4108 = vmatmul.bf16.gmra.mxu0 %v12277_v23 }
 0x563   :  { %v5130_v6 = vmax.f32 %v3978_v44, 0.0  ;;  %4197 = vmatmul.bf16.gmra.mxu1 %v12278_v27  ;;  %v12280_v44 = vld [vmem:[#allocation69_spill] sm:$0xff]  ;;  %4323 = vmatpush.bf16.msra.mxu3 %v8047_v31  ;;  %v12284_v31 = vld [vmem:[#allocation22_spill] sm:$0xff] }
 0x564   :  { %12275 = vst [vmem:[#allocation76_spill] sm:$0xff] %v10430_v57 }
 0x565   :  { %4019 = vmatmul.bf16.gmra.mxu3 %v10335_v29  ;;  %v10436_v25 = vpack.c.bf16 %v5130_v6, %v5126_v49  ;;  %v3891_v14 = vpop.f32.mrf.mxu2 }
 0x566   :  { %v3892_v22 = vadd.f32 %v3891_v14, %v12280_v44 }
 0x567   :  { %12279 = vst [vmem:[#allocation38_spill] sm:$0xff] %v10436_v25  ;;  %v4071_v15 = vpop.f32.mrf.mxu0 }
 0x568   :  { %v3980_v19 = vpop.f32.mrf.mxu3  ;;  %v4072_v29 = vadd.f32 %v4071_v15, %v10398_v45  ;;  %v4160_v23 = vpop.f32.mrf.mxu1 }
 0x569   :  { %v3981_v57 = vadd.f32 %v3980_v19, %v3892_v22  ;;  %v12285_v22 = vld [vmem:[#allocation89_spill] sm:$0xff] }
 0x56a   :  { %v10440_v27 = vadd.f32 %v4160_v23, %v4072_v29  ;;  %v12286_v29 = vld [vmem:[#allocation41_spill] sm:$0xff]  ;;  %v7730_v23 = vld [vmem:[#allocation8 + $0xa8] sm:$0xf] }
 0x56b   :  { %v5134_v14 = vmax.f32 %v3981_v57, 0.0 }
 0x56c   :  { %12281 = vst [vmem:[#allocation59_spill] sm:$0xff] %v10440_v27  ;;  %v12300_v27 = vld [vmem:[#allocation29_spill] sm:$0xff] }
 0x56d   :  { %v3893_v41 = vpop.f32.mrf.mxu2 }
 0x56e   :  { %v3894_v43 = vadd.f32 %v3893_v41, %v12282_v21  ;;  %v8687_v21 = vld [vmem:[#allocation8 + $0xb4] sm:$0xf0] }
 0x56f   :  { %v4074_v49 = vpop.f32.mrf.mxu0  ;;  %v7731_v41 = vor.u32 %v8687_v21, %v7730_v23  ;;  %v12290_v23 = vld [vmem:[#allocation24_spill] sm:$0xff] }
 0x570   :  { %v3982_v20 = vpop.f32.mrf.mxu3  ;;  %v4075_v37 = vadd.f32 %v4074_v49, %v10398_v45  ;;  %v4163_v38 = vpop.f32.mrf.mxu1 }
 0x571   :  { %v3983_v6 = vadd.f32 %v3982_v20, %v3894_v43  ;;  %v12288_v43 = vld [vmem:[#allocation78_spill] sm:$0xff]  ;;  %4408 = vmatpush.bf16.msra.mxu0 %v7731_v41 }
 0x572   :  { %v10444_v58 = vadd.f32 %v4163_v38, %v4075_v37  ;;  %3935 = vmatmul.bf16.gmra.mxu2 %v12284_v31  ;;  %4113 = vmatmul.bf16.gmra.mxu0 %v12285_v22 }
 0x573   :  { %v5138_v44 = vmax.f32 %v3983_v6, 0.0  ;;  %4202 = vmatmul.bf16.gmra.mxu1 %v12286_v29 }
 0x574   :  { %12283 = vst [vmem:[#allocation90_spill] sm:$0xff] %v10444_v58  ;;  %v7858_v58 = vld [vmem:[#allocation8 + $0x1a8] sm:$0xf] }
 0x575   :  { %4024 = vmatmul.bf16.gmra.mxu3 %v10349_v50  ;;  %v10450_v19 = vpack.c.bf16 %v5138_v44, %v5134_v14  ;;  %v3896_v15 = vpop.f32.mrf.mxu2  ;;  %v8719_v50 = vld [vmem:[#allocation8 + $0x1b4] sm:$0xf0] }
 0x576   :  { %v3897_v20 = vadd.f32 %v3896_v15, %v12288_v43  ;;  %v7859_v29 = vor.u32 %v8719_v50, %v7858_v58  ;;  %v12294_v50 = vld [vmem:[#allocation26_spill] sm:$0xff]  ;;  %v8728_v58 = vld [vmem:[#allocation8 + $0x204] sm:$0xf] }
 0x577   :  { %12287 = vst [vmem:[#allocation44_spill] sm:$0xff] %v10450_v19  ;;  %v4076_v49 = vpop.f32.mrf.mxu0 }
 0x578   :  { %v3985_v57 = vpop.f32.mrf.mxu3  ;;  %v4077_v37 = vadd.f32 %v4076_v49, %v10398_v45  ;;  %v4165_v38 = vpop.f32.mrf.mxu1  ;;  %4497 = vmatpush.bf16.msra.mxu1 %v7859_v29  ;;  %v12292_v49 = vld [vmem:[#allocation25_spill] sm:$0xff]  ;;  %v8760_v29 = vld [vmem:[#allocation8 + $0x304] sm:$0xf] }
 0x579   :  { %v3986_v6 = vadd.f32 %v3985_v57, %v3897_v20 }
 0x57a   :  { %v10454_v25 = vadd.f32 %v4165_v38, %v4077_v37  ;;  %v12293_v37 = vld [vmem:[#allocation52_spill] sm:$0xff] }
 0x57b   :  { %v5142_v43 = vmax.f32 %v3986_v6, 0.0 }
 0x57c   :  { %12289 = vst [vmem:[#allocation91_spill] sm:$0xff] %v10454_v25  ;;  %v7714_v25 = vld [vmem:[#allocation8 + $0x88] sm:$0xf] }
 0x57d   :  { %v3898_v22 = vpop.f32.mrf.mxu2 }
 0x57e   :  { %v3899_v14 = vadd.f32 %v3898_v22, %v12290_v23  ;;  %v7900_v22 = vld [vmem:[#allocation8 + $0x210] sm:$0xf0] }
 0x57f   :  { %v4079_v21 = vpop.f32.mrf.mxu0  ;;  %v7903_v38 = vor.u32 %v8728_v58, %v7900_v22  ;;  %v8028_v23 = vld [vmem:[#allocation8 + $0x310] sm:$0xf0]  ;;  %v8683_v58 = vld [vmem:[#allocation8 + $0x94] sm:$0xf0]  ;;  %v7842_v22 = vld [vmem:[#allocation8 + $0x188] sm:$0xf] }
 0x580   :  { %v3987_v44 = vpop.f32.mrf.mxu3  ;;  %v4080_v15 = vadd.f32 %v4079_v21, %v10398_v45  ;;  %v4168_v41 = vpop.f32.mrf.mxu1  ;;  %v8031_v6 = vor.u32 %v8760_v29, %v8028_v23  ;;  %v7715_v29 = vor.u32 %v8683_v58, %v7714_v25  ;;  %v8715_v23 = vld [vmem:[#allocation8 + $0x194] sm:$0xf0] }
 0x581   :  { %v3988_v19 = vadd.f32 %v3987_v44, %v3899_v14  ;;  %4235 = vmatpush.bf16.msra.mxu2 %v7903_v38 }
 0x582   :  { %v10458_v57 = vadd.f32 %v4168_v41, %v4080_v15  ;;  %3940 = vmatmul.bf16.gmra.mxu2 %v12292_v49  ;;  %4118 = vmatmul.bf16.gmra.mxu0 %v12293_v37 }
 0x583   :  { %v5146_v20 = vmax.f32 %v3988_v19, 0.0  ;;  %4207 = vmatmul.bf16.gmra.mxu1 %v12294_v50  ;;  %v12296_v19 = vld [vmem:[#allocation46_spill] sm:$0xff]  ;;  %4324 = vmatpush.bf16.msra.mxu3 %v8031_v6 }
 0x584   :  { %12291 = vst [vmem:[#allocation30_spill] sm:$0xff] %v10458_v57  ;;  %4409 = vmatpush.bf16.msra.mxu0 %v7715_v29  ;;  %v12302_v29 = vld [vmem:[#allocation47_spill] sm:$0xff] }
 0x585   :  { %4029 = vmatmul.bf16.gmra.mxu3 %v10363_v18  ;;  %v10464_v14 = vpack.c.bf16 %v5146_v20, %v5142_v43  ;;  %v3901_v44 = vpop.f32.mrf.mxu2  ;;  %v12298_v43 = vld [vmem:[#allocation80_spill] sm:$0xff] }
 0x586   :  { %v3902_v21 = vadd.f32 %v3901_v44, %v12296_v19  ;;  %v7843_v19 = vor.u32 %v8715_v23, %v7842_v22 }
 0x587   :  { %12295 = vst [vmem:[#allocation93_spill] sm:$0xff] %v10464_v14  ;;  %v4081_v41 = vpop.f32.mrf.mxu0 }
 0x588   :  { %v3990_v15 = vpop.f32.mrf.mxu3  ;;  %v4082_v18 = vadd.f32 %v4081_v41, %v10398_v45  ;;  %v4170_v37 = vpop.f32.mrf.mxu1  ;;  %4498 = vmatpush.bf16.msra.mxu1 %v7843_v19 }
 0x589   :  { %v3991_v57 = vadd.f32 %v3990_v15, %v3902_v21  ;;  %v7698_v15 = vld [vmem:[#allocation8 + $0x68] sm:$0xf] }
 0x58a   :  { %v10468_v50 = vadd.f32 %v4170_v37, %v4082_v18  ;;  %v8679_v18 = vld [vmem:[#allocation8 + $0x74] sm:$0xf0]  ;;  %v7826_v37 = vld [vmem:[#allocation8 + $0x168] sm:$0xf] }
 0x58b   :  { %v5150_v41 = vmax.f32 %v3991_v57, 0.0  ;;  %v7699_v25 = vor.u32 %v8679_v18, %v7698_v15  ;;  %v7682_v57 = vld [vmem:[#allocation8 + $0x48] sm:$0xf] }
 0x58c   :  { %12297 = vst [vmem:[#allocation34_spill] sm:$0xff] %v10468_v50 }
 0x58d   :  { %v3903_v49 = vpop.f32.mrf.mxu2  ;;  %4410 = vmatpush.bf16.msra.mxu0 %v7699_v25 }
 0x58e   :  { %v3904_v20 = vadd.f32 %v3903_v49, %v12298_v43  ;;  %v8711_v49 = vld [vmem:[#allocation8 + $0x174] sm:$0xf0] }
 0x58f   :  { %v4084_v44 = vpop.f32.mrf.mxu0  ;;  %v8675_v43 = vld [vmem:[#allocation8 + $0x54] sm:$0xf0] }
 0x590   :  { %v3992_v14 = vpop.f32.mrf.mxu3  ;;  %v4085_v6 = vadd.f32 %v4084_v44, %v10398_v45  ;;  %v4173_v21 = vpop.f32.mrf.mxu1  ;;  %v7683_v19 = vor.u32 %v8675_v43, %v7682_v57  ;;  %v7650_v57 = vld [vmem:[#allocation8 + $0x8] sm:$0xf]  ;;  %v8667_v43 = vld [vmem:[#allocation8 + $0x14] sm:$0xf0] }
 0x591   :  { %v3993_v38 = vadd.f32 %v3992_v14, %v3904_v20  ;;  %v7827_v14 = vor.u32 %v8711_v49, %v7826_v37  ;;  %v7810_v20 = vld [vmem:[#allocation8 + $0x148] sm:$0xf]  ;;  %v8671_v37 = vld [vmem:[#allocation8 + $0x34] sm:$0xf0] }
 0x592   :  { %v10472_v31 = vadd.f32 %v4173_v21, %v4085_v6  ;;  %3945 = vmatmul.bf16.gmra.mxu2 %v12300_v27  ;;  %4123 = vmatmul.bf16.gmra.mxu0 %v12222_v3 }
 0x593   :  { %v5154_v50 = vmax.f32 %v3993_v38, 0.0  ;;  %4212 = vmatmul.bf16.gmra.mxu1 %v12223_v63  ;;  %v8707_v38 = vld [vmem:[#allocation8 + $0x154] sm:$0xf0]  ;;  %4411 = vmatpush.bf16.msra.mxu0 %v7683_v19 }
 0x594   :  { %12299 = vst [vmem:[#allocation35_spill] sm:$0xff] %v10472_v31  ;;  %4499 = vmatpush.bf16.msra.mxu1 %v7827_v14  ;;  %v7811_v21 = vor.u32 %v8707_v38, %v7810_v20  ;;  %v8703_v14 = vld [vmem:[#allocation8 + $0x134] sm:$0xf0]  ;;  %v7778_v20 = vld [vmem:[#allocation8 + $0x108] sm:$0xf] }
 0x595   :  { %4034 = vmatmul.bf16.gmra.mxu3 %v10377_v54  ;;  %v10478_v58 = vpack.c.bf16 %v5154_v50, %v5150_v41  ;;  %v3906_v22 = vpop.f32.mrf.mxu2  ;;  %v7666_v50 = vld [vmem:[#allocation8 + $0x28] sm:$0xf]  ;;  %v8699_v19 = vld [vmem:[#allocation8 + $0x114] sm:$0xf0] }
 0x596   :  { %v3907_v23 = vadd.f32 %v3906_v22, %v12302_v29  ;;  %v7794_v41 = vld [vmem:[#allocation8 + $0x128] sm:$0xf]  ;;  %v7667_v49 = vor.u32 %v8671_v37, %v7666_v50 }
 0x597   :  { %12301 = vst [vmem:[#allocation49_spill] sm:$0xff] %v10478_v58  ;;  %v4086_v6 = vpop.f32.mrf.mxu0  ;;  %v7795_v58 = vor.u32 %v8703_v14, %v7794_v41  ;;  %v8146_v14 = vld [vmem:[#allocation8 + $0x3e8] sm:$0xf] }
 0x598   :  { %v3995_v44 = vpop.f32.mrf.mxu3  ;;  %v4087_v18 = vadd.f32 %v4086_v6, %v10398_v45  ;;  %v4175_v31 = vpop.f32.mrf.mxu1  ;;  %4500 = vmatpush.bf16.msra.mxu1 %v7811_v21  ;;  %4412 = vmatpush.bf16.msra.mxu0 %v7667_v49  ;;  %v7779_v6 = vor.u32 %v8699_v19, %v7778_v20  ;;  %v8759_v49 = vld [vmem:[#allocation8 + $0x2f4] sm:$0xf0] }
 0x599   :  { %v3996_v15 = vadd.f32 %v3995_v44, %v3907_v23  ;;  %v7651_v44 = vor.u32 %v8667_v43, %v7650_v57  ;;  %v8791_v57 = vld [vmem:[#allocation8 + $0x3f4] sm:$0xf0] }
 0x59a   :  { %v10482_v25 = vadd.f32 %v4175_v31, %v4087_v18 }
 0x59b   :  { %v5158_v50 = vmax.f32 %v3996_v15, 0.0  ;;  %v8147_v15 = vor.u32 %v8791_v57, %v8146_v14 }
 0x59c   :  { %4501 = vmatpush.bf16.msra.mxu1 %v7795_v58  ;;  %4413 = vmatpush.bf16.msra.mxu0 %v7651_v44  ;;  %v12303_v58 = vld [vmem:[#allocation72_spill] sm:$0xff] }
 0x59d   :  { %v3908_v22 = vpop.f32.mrf.mxu2  ;;  %4673 = vmatpush.bf16.msrb.mxu3 %v8147_v15 }
 0x59e   :  { %v3909_v29 = vadd.f32 %v3908_v22, %v10255_v33  ;;  %v8018_v33 = vld [vmem:[#allocation8 + $0x2e8] sm:$0xf] }
 0x59f   :  { %v4089_v38 = vpop.f32.mrf.mxu0  ;;  %v8019_v22 = vor.u32 %v8759_v49, %v8018_v33 }
 0x5a0   :  { %v3997_v23 = vpop.f32.mrf.mxu3  ;;  %v4090_v31 = vadd.f32 %v4089_v38, %v10398_v45  ;;  %v4178_v18 = vpop.f32.mrf.mxu1  ;;  %4502 = vmatpush.bf16.msra.mxu1 %v7779_v6 }
 0x5a1   :  { %v3998_v21 = vadd.f32 %v3997_v23, %v3909_v29  ;;  %4584 = vmatpush.bf16.msrb.mxu2 %v8019_v22 }
 0x5a2   :  { %v10486_v41 = vadd.f32 %v4178_v18, %v4090_v31  ;;  %3950 = vmatmul.bf16.gmra.mxu2 %v12303_v58  ;;  %4128 = vmatmul.bf16.gmra.mxu0 %v12225_v60 }
 0x5a3   :  { %v5162_v37 = vmax.f32 %v3998_v21, 0.0  ;;  %4217 = vmatmul.bf16.gmra.mxu1 %v12226_v26 }
 0x5a5   :  { %4039 = vmatmul.bf16.gmra.mxu3 %v10391_v53  ;;  %v10492_v43 = vpack.c.bf16 %v5162_v37, %v5158_v50  ;;  %v3911_v20 = vpop.f32.mrf.mxu2 }
 0x5a6   :  { %v3912_v29 = vadd.f32 %v3911_v20, %v10259_v5  ;;  %v12305_v20 = vld [vmem:[#allocation77_spill] sm:$0xff] }
 0x5a7   :  { %12304 = vst [vmem:[#allocation37_spill] sm:$0xff] %v10492_v43  ;;  %v4091_v44 = vpop.f32.mrf.mxu0 }
 0x5a8   :  { %v4000_v23 = vpop.f32.mrf.mxu3  ;;  %v4092_v38 = vadd.f32 %v4091_v44, %v10398_v45  ;;  %v4180_v6 = vpop.f32.mrf.mxu1 }
 0x5a9   :  { %v4001_v19 = vadd.f32 %v4000_v23, %v3912_v29 }
 0x5aa   :  { %v10496_v21 = vadd.f32 %v4180_v6, %v4092_v38 }
 0x5ab   :  { %v5166_v5 = vmax.f32 %v4001_v19, 0.0 }
 0x5ad   :  { %v3913_v31 = vpop.f32.mrf.mxu2 }
 0x5ae   :  { %v3914_v18 = vadd.f32 %v3913_v31, %v10269_v16 }
 0x5af   :  { %v4094_v50 = vpop.f32.mrf.mxu0 }
 0x5b0   :  { %v4002_v33 = vpop.f32.mrf.mxu3  ;;  %v4095_v49 = vadd.f32 %v4094_v50, %v10398_v45  ;;  %v4183_v14 = vpop.f32.mrf.mxu1 }
 0x5b1   :  { %v4003_v37 = vadd.f32 %v4002_v33, %v3914_v18 }
 0x5b2   :  { %v10500_v22 = vadd.f32 %v4183_v14, %v4095_v49  ;;  %3955 = vmatmul.bf16.gmra.mxu2 %v12305_v20  ;;  %4133 = vmatmul.bf16.gmra.mxu0 %v12228_v10 }
 0x5b3   :  { %v5170_v57 = vmax.f32 %v4003_v37, 0.0  ;;  %4222 = vmatmul.bf16.gmra.mxu1 %v12229_v4 }
 0x5b5   :  { %4044 = vmatmul.bf16.gmra.mxu3 %v10408_v13  ;;  %v10506_v15 = vpack.c.bf16 %v5170_v57, %v5166_v5  ;;  %v3916_v16 = vpop.f32.mrf.mxu2 }
 0x5b6   :  { %v3917_v29 = vadd.f32 %v3916_v16, %v10273_v47  ;;  %v12308_v16 = vld [vmem:[#allocation94_spill] sm:$0xff] }
 0x5b7   :  { %12306 = vst [vmem:[#allocation39_spill] sm:$0xff] %v10506_v15  ;;  %v4096_v44 = vpop.f32.mrf.mxu0 }
 0x5b8   :  { %v4005_v23 = vpop.f32.mrf.mxu3  ;;  %v4097_v19 = vadd.f32 %v4096_v44, %v10398_v45  ;;  %v4185_v6 = vpop.f32.mrf.mxu1 }
 0x5b9   :  { %v4006_v38 = vadd.f32 %v4005_v23, %v3917_v29  ;;  %v8002_v29 = vld [vmem:[#allocation8 + $0x2c8] sm:$0xf] }
 0x5ba   :  { %v10510_v31 = vadd.f32 %v4185_v6, %v4097_v19  ;;  %v8130_v23 = vld [vmem:[#allocation8 + $0x3c8] sm:$0xf]  ;;  %v8787_v19 = vld [vmem:[#allocation8 + $0x3d4] sm:$0xf0] }
 0x5bb   :  { %v5174_v57 = vmax.f32 %v4006_v38, 0.0  ;;  %v8131_v38 = vor.u32 %v8787_v19, %v8130_v23 }
 0x5bd   :  { %v3918_v18 = vpop.f32.mrf.mxu2  ;;  %4674 = vmatpush.bf16.msrb.mxu3 %v8131_v38 }
 0x5be   :  { %v3919_v33 = vadd.f32 %v3918_v18, %v10283_v32  ;;  %v8755_v32 = vld [vmem:[#allocation8 + $0x2d4] sm:$0xf0] }
 0x5bf   :  { %v4099_v37 = vpop.f32.mrf.mxu0  ;;  %v8003_v44 = vor.u32 %v8755_v32, %v8002_v29 }
 0x5c0   :  { %v4007_v50 = vpop.f32.mrf.mxu3  ;;  %v4100_v14 = vadd.f32 %v4099_v37, %v10398_v45  ;;  %v4188_v5 = vpop.f32.mrf.mxu1 }
 0x5c1   :  { %v4008_v49 = vadd.f32 %v4007_v50, %v3919_v33  ;;  %v12310_v33 = vld [vmem:[#allocation51_spill] sm:$0xff]  ;;  %4585 = vmatpush.bf16.msrb.mxu2 %v8003_v44 }
 0x5c2   :  { %v10514_v47 = vadd.f32 %v4188_v5, %v4100_v14  ;;  %4236 = vmatmul.bf16.vlgmr.msra.gmra.mxu2 %v12232_v42  ;;  %4414 = vmatmul.bf16.vlgmr.msra.gmra.mxu0 %v12143_v12 }
 0x5c3   :  { %v5178_v15 = vmax.f32 %v4008_v49, 0.0  ;;  %4503 = vmatmul.bf16.vlgmr.msra.gmra.mxu1 %v12308_v16 }
 0x5c4   :  { %12307 = vst [vmem:[#allocation64_spill] sm:$0xff] %v10514_v47 }
 0x5c5   :  { %4325 = vmatmul.bf16.vlgmr.msra.gmra.mxu3 %v10195_v48  ;;  %v10520_v6 = vpack.c.bf16 %v5178_v15, %v5174_v57  ;;  %v3921_v18 = vpop.f32.mrf.mxu2 }
 0x5c6   :  { %v3922_v50 = vadd.f32 %v3921_v18, %v12310_v33 }
 0x5c7   :  { %12309 = vst [vmem:[#allocation65_spill] sm:$0xff] %v10520_v6  ;;  %v4101_v49 = vpop.f32.mrf.mxu0 }
 0x5c8   :  { %v4010_v37 = vpop.f32.mrf.mxu3  ;;  %v4102_v5 = vadd.f32 %v4101_v49, %v10398_v45  ;;  %v4190_v43 = vpop.f32.mrf.mxu1 }
 0x5c9   :  { %v4011_v14 = vadd.f32 %v4010_v37, %v3922_v50 }
 0x5ca   :  { %v10524_v47 = vadd.f32 %v4190_v43, %v4102_v5 }
 0x5cb   :  { %v5182_v18 = vmax.f32 %v4011_v14, 0.0 }
 0x5cd   :  { %v3923_v16 = vpop.f32.mrf.mxu2 }
 0x5ce   :  { %v3924_v29 = vadd.f32 %v3923_v16, %v10297_v59  ;;  %v12312_v16 = vld [vmem:[#allocation43_spill] sm:$0xff] }
 0x5cf   :  { %v4104_v15 = vpop.f32.mrf.mxu0 }
 0x5d0   :  { %v4012_v32 = vpop.f32.mrf.mxu3  ;;  %v4105_v23 = vadd.f32 %v4104_v15, %v10398_v45  ;;  %v4193_v19 = vpop.f32.mrf.mxu1 }
 0x5d1   :  { %v4013_v57 = vadd.f32 %v4012_v32, %v3924_v29 }
 0x5d2   :  { %v10528_v44 = vadd.f32 %v4193_v19, %v4105_v23  ;;  %4241 = vmatmul.bf16.gmra.mxu2 %v12235_v0  ;;  %4419 = vmatmul.bf16.gmra.mxu0 %v12146_v1 }
 0x5d3   :  { %v5186_v33 = vmax.f32 %v4013_v57, 0.0  ;;  %4508 = vmatmul.bf16.gmra.mxu1 %v12147_v56 }
 0x5d5   :  { %4330 = vmatmul.bf16.gmra.mxu3 %v10209_v36  ;;  %v10534_v43 = vpack.c.bf16 %v5186_v33, %v5182_v18  ;;  %v3926_v59 = vpop.f32.mrf.mxu2 }
 0x5d6   :  { %v3927_v38 = vadd.f32 %v3926_v59, %v12312_v16  ;;  %v12314_v16 = vld [vmem:[#allocation96_spill] sm:$0xff] }
 0x5d7   :  { %12311 = vst [vmem:[#allocation27_spill] sm:$0xff] %v10534_v43  ;;  %v4106_v37 = vpop.f32.mrf.mxu0 }
 0x5d8   :  { %v4015_v50 = vpop.f32.mrf.mxu3  ;;  %v4107_v14 = vadd.f32 %v4106_v37, %v10398_v45  ;;  %v4195_v5 = vpop.f32.mrf.mxu1  ;;  %v8114_v37 = vld [vmem:[#allocation8 + $0x3a8] sm:$0xf] }
 0x5d9   :  { %v4016_v49 = vadd.f32 %v4015_v50, %v3927_v38  ;;  %v12315_v38 = vld [vmem:[#allocation95_spill] sm:$0xff]  ;;  %v7986_v50 = vld [vmem:[#allocation8 + $0x2a8] sm:$0xf] }
 0x5da   :  { %v10538_v29 = vadd.f32 %v4195_v5, %v4107_v14  ;;  %v8783_v5 = vld [vmem:[#allocation8 + $0x3b4] sm:$0xf0] }
 0x5db   :  { %v5190_v43 = vmax.f32 %v4016_v49, 0.0  ;;  %v8115_v49 = vor.u32 %v8783_v5, %v8114_v37 }
 0x5dd   :  { %v3928_v32 = vpop.f32.mrf.mxu2  ;;  %4675 = vmatpush.bf16.msrb.mxu3 %v8115_v49 }
 0x5de   :  { %v3929_v15 = vadd.f32 %v3928_v32, %v10311_v9  ;;  %v8751_v9 = vld [vmem:[#allocation8 + $0x2b4] sm:$0xf0] }
 0x5df   :  { %v4109_v23 = vpop.f32.mrf.mxu0  ;;  %v7987_v14 = vor.u32 %v8751_v9, %v7986_v50 }
 0x5e0   :  { %v4017_v57 = vpop.f32.mrf.mxu3  ;;  %v4110_v18 = vadd.f32 %v4109_v23, %v10398_v45  ;;  %v4198_v33 = vpop.f32.mrf.mxu1 }
 0x5e1   :  { %v4018_v19 = vadd.f32 %v4017_v57, %v3929_v15  ;;  %v12317_v57 = vld [vmem:[#allocation55_spill] sm:$0xff]  ;;  %4586 = vmatpush.bf16.msrb.mxu2 %v7987_v14 }
 0x5e2   :  { %v10542_v59 = vadd.f32 %v4198_v33, %v4110_v18  ;;  %4246 = vmatmul.bf16.gmra.mxu2 %v12238_v39  ;;  %4424 = vmatmul.bf16.gmra.mxu0 %v12149_v55 }
 0x5e3   :  { %v5194_v6 = vmax.f32 %v4018_v19, 0.0  ;;  %4513 = vmatmul.bf16.gmra.mxu1 %v12315_v38 }
 0x5e4   :  { %12313 = vst [vmem:[#allocation68_spill] sm:$0xff] %v10542_v59 }
 0x5e5   :  { %4335 = vmatmul.bf16.gmra.mxu3 %v12314_v16  ;;  %v10548_v32 = vpack.c.bf16 %v5194_v6, %v5190_v43  ;;  %v3931_v15 = vpop.f32.mrf.mxu2 }
 0x5e6   :  { %v3932_v23 = vadd.f32 %v3931_v15, %v12317_v57 }
 0x5e7   :  { %12316 = vst [vmem:[#allocation31_spill] sm:$0xff] %v10548_v32  ;;  %v4111_v18 = vpop.f32.mrf.mxu0 }
 0x5e8   :  { %v4020_v19 = vpop.f32.mrf.mxu3  ;;  %v4112_v59 = vadd.f32 %v4111_v18, %v10398_v45  ;;  %v4200_v16 = vpop.f32.mrf.mxu1 }
 0x5e9   :  { %v4021_v33 = vadd.f32 %v4020_v19, %v3932_v23 }
 0x5ea   :  { %v10552_v38 = vadd.f32 %v4200_v16, %v4112_v59 }
 0x5eb   :  { %v5198_v15 = vmax.f32 %v4021_v33, 0.0 }
 0x5ed   :  { %v3933_v55 = vpop.f32.mrf.mxu2 }
 0x5ee   :  { %v3934_v50 = vadd.f32 %v3933_v55, %v10325_v8  ;;  %v12319_v8 = vld [vmem:[#allocation57_spill] sm:$0xff] }
 0x5ef   :  { %v4114_v6 = vpop.f32.mrf.mxu0 }
 0x5f0   :  { %v4022_v9 = vpop.f32.mrf.mxu3  ;;  %v4115_v37 = vadd.f32 %v4114_v6, %v10398_v45  ;;  %v4203_v5 = vpop.f32.mrf.mxu1 }
 0x5f1   :  { %v4023_v43 = vadd.f32 %v4022_v9, %v3934_v50 }
 0x5f2   :  { %v10556_v14 = vadd.f32 %v4203_v5, %v4115_v37  ;;  %4251 = vmatmul.bf16.gmra.mxu2 %v12241_v30  ;;  %4429 = vmatmul.bf16.gmra.mxu0 %v12152_v7 }
 0x5f3   :  { %v5202_v57 = vmax.f32 %v4023_v43, 0.0  ;;  %4518 = vmatmul.bf16.gmra.mxu1 %v12153_v24 }
 0x5f5   :  { %4340 = vmatmul.bf16.gmra.mxu3 %v10237_v28  ;;  %v10562_v59 = vpack.c.bf16 %v5202_v57, %v5198_v15  ;;  %v3936_v55 = vpop.f32.mrf.mxu2 }
 0x5f6   :  { %v3937_v16 = vadd.f32 %v3936_v55, %v12319_v8  ;;  %v12321_v8 = vld [vmem:[#allocation97_spill] sm:$0xff] }
 0x5f7   :  { %12318 = vst [vmem:[#allocation33_spill] sm:$0xff] %v10562_v59  ;;  %v4116_v23 = vpop.f32.mrf.mxu0 }
 0x5f8   :  { %v4025_v49 = vpop.f32.mrf.mxu3  ;;  %v4117_v18 = vadd.f32 %v4116_v23, %v10398_v45  ;;  %v4205_v33 = vpop.f32.mrf.mxu1 }
 0x5f9   :  { %v4026_v19 = vadd.f32 %v4025_v49, %v3937_v16  ;;  %v7970_v16 = vld [vmem:[#allocation8 + $0x288] sm:$0xf] }
 0x5fa   :  { %v10566_v50 = vadd.f32 %v4205_v33, %v4117_v18  ;;  %v8098_v49 = vld [vmem:[#allocation8 + $0x388] sm:$0xf]  ;;  %v8779_v18 = vld [vmem:[#allocation8 + $0x394] sm:$0xf0] }
 0x5fb   :  { %v5206_v59 = vmax.f32 %v4026_v19, 0.0  ;;  %v8099_v19 = vor.u32 %v8779_v18, %v8098_v49 }
 0x5fd   :  { %v3938_v9 = vpop.f32.mrf.mxu2  ;;  %4676 = vmatpush.bf16.msrb.mxu3 %v8099_v19  ;;  %v12325_v19 = vld [vmem:[#allocation50_spill] sm:$0xff] }
 0x5fe   :  { %v3939_v6 = vadd.f32 %v3938_v9, %v10339_v46  ;;  %v8747_v46 = vld [vmem:[#allocation8 + $0x294] sm:$0xf0] }
 0x5ff   :  { %v4119_v37 = vpop.f32.mrf.mxu0  ;;  %v7971_v23 = vor.u32 %v8747_v46, %v7970_v16 }
 0x600   :  { %v4027_v43 = vpop.f32.mrf.mxu3  ;;  %v4120_v15 = vadd.f32 %v4119_v37, %v10398_v45  ;;  %v4208_v57 = vpop.f32.mrf.mxu1 }
 0x601   :  { %v4028_v5 = vadd.f32 %v4027_v43, %v3939_v6  ;;  %v12323_v6 = vld [vmem:[#allocation45_spill] sm:$0xff]  ;;  %4587 = vmatpush.bf16.msrb.mxu2 %v7971_v23 }
 0x602   :  { %v10570_v55 = vadd.f32 %v4208_v57, %v4120_v15  ;;  %4256 = vmatmul.bf16.gmra.mxu2 %v10022_v34  ;;  %4434 = vmatmul.bf16.gmra.mxu0 %v12157_v52 }
 0x603   :  { %v5210_v32 = vmax.f32 %v4028_v5, 0.0  ;;  %4523 = vmatmul.bf16.gmra.mxu1 %v12321_v8 }
 0x604   :  { %12320 = vst [vmem:[#allocation74_spill] sm:$0xff] %v10570_v55 }
 0x605   :  { %4345 = vmatmul.bf16.gmra.mxu3 %v10251_v61  ;;  %v10576_v33 = vpack.c.bf16 %v5210_v32, %v5206_v59  ;;  %v3941_v9 = vpop.f32.mrf.mxu2 }
 0x606   :  { %v3942_v43 = vadd.f32 %v3941_v9, %v12323_v6 }
 0x607   :  { %12322 = vst [vmem:[#allocation79_spill] sm:$0xff] %v10576_v33  ;;  %v4121_v5 = vpop.f32.mrf.mxu0 }
 0x608   :  { %v4030_v37 = vpop.f32.mrf.mxu3  ;;  %v4122_v57 = vadd.f32 %v4121_v5, %v10398_v45  ;;  %v4210_v55 = vpop.f32.mrf.mxu1 }
 0x609   :  { %v4031_v15 = vadd.f32 %v4030_v37, %v3942_v43 }
 0x60a   :  { %v10580_v8 = vadd.f32 %v4210_v55, %v4122_v57  ;;  %v12326_v55 = vld [vmem:[#allocation81_spill] sm:$0xff] }
 0x60b   :  { %v5214_v9 = vmax.f32 %v4031_v15, 0.0 }
 0x60d   :  { %v3943_v61 = vpop.f32.mrf.mxu2 }
 0x60e   :  { %v3944_v16 = vadd.f32 %v3943_v61, %v10353_v51  ;;  %v12328_v51 = vld [vmem:[#allocation61_spill] sm:$0xff] }
 0x60f   :  { %v4124_v32 = vpop.f32.mrf.mxu0 }
 0x610   :  { %v4032_v46 = vpop.f32.mrf.mxu3  ;;  %v4125_v49 = vadd.f32 %v4124_v32, %v10398_v45  ;;  %v4213_v18 = vpop.f32.mrf.mxu1 }
 0x611   :  { %v4033_v59 = vadd.f32 %v4032_v46, %v3944_v16 }
 0x612   :  { %v10584_v23 = vadd.f32 %v4213_v18, %v4125_v49  ;;  %4261 = vmatmul.bf16.gmra.mxu2 %v10036_v11  ;;  %4439 = vmatmul.bf16.gmra.mxu0 %v12164_v40  ;;  %v12330_v49 = vld [vmem:[#allocation48_spill] sm:$0xff] }
 0x613   :  { %v5218_v6 = vmax.f32 %v4033_v59, 0.0  ;;  %4528 = vmatmul.bf16.gmra.mxu1 %v12326_v55 }
 0x614   :  { %12324 = vst [vmem:[#allocation66_spill] sm:$0xff] %v10584_v23 }
 0x615   :  { %4350 = vmatmul.bf16.gmra.mxu3 %v12325_v19  ;;  %v10590_v43 = vpack.c.bf16 %v5218_v6, %v5214_v9  ;;  %v3946_v61 = vpop.f32.mrf.mxu2 }
 0x616   :  { %v3947_v37 = vadd.f32 %v3946_v61, %v12328_v51  ;;  %v12332_v51 = vld [vmem:[#allocation92_spill] sm:$0xff] }
 0x617   :  { %12327 = vst [vmem:[#allocation69_spill] sm:$0xff] %v10590_v43  ;;  %v4126_v57 = vpop.f32.mrf.mxu0 }
 0x618   :  { %v4035_v5 = vpop.f32.mrf.mxu3  ;;  %v4127_v15 = vadd.f32 %v4126_v57, %v10398_v45  ;;  %v4215_v46 = vpop.f32.mrf.mxu1  ;;  %v12335_v57 = vld [vmem:[#allocation98_spill] sm:$0xff] }
 0x619   :  { %v4036_v16 = vadd.f32 %v4035_v5, %v3947_v37  ;;  %v12333_v37 = vld [vmem:[#allocation83_spill] sm:$0xff]  ;;  %v12334_v5 = vld [vmem:[#allocation82_spill] sm:$0xff] }
 0x61a   :  { %v10594_v32 = vadd.f32 %v4215_v46, %v4127_v15  ;;  %v7954_v15 = vld [vmem:[#allocation8 + $0x268] sm:$0xf]  ;;  %v8743_v46 = vld [vmem:[#allocation8 + $0x274] sm:$0xf0] }
 0x61b   :  { %v5222_v43 = vmax.f32 %v4036_v16, 0.0 }
 0x61c   :  { %12329 = vst [vmem:[#allocation67_spill] sm:$0xff] %v10594_v32 }
 0x61d   :  { %v3948_v59 = vpop.f32.mrf.mxu2 }
 0x61e   :  { %v3949_v18 = vadd.f32 %v3948_v59, %v12330_v49  ;;  %v8082_v59 = vld [vmem:[#allocation8 + $0x368] sm:$0xf]  ;;  %v7955_v49 = vor.u32 %v8743_v46, %v7954_v15 }
 0x61f   :  { %v4129_v23 = vpop.f32.mrf.mxu0 }
 0x620   :  { %v4037_v33 = vpop.f32.mrf.mxu3  ;;  %v4130_v9 = vadd.f32 %v4129_v23, %v10398_v45  ;;  %v4218_v6 = vpop.f32.mrf.mxu1  ;;  %4588 = vmatpush.bf16.msrb.mxu2 %v7955_v49 }
 0x621   :  { %v4038_v19 = vadd.f32 %v4037_v33, %v3949_v18  ;;  %v8775_v33 = vld [vmem:[#allocation8 + $0x374] sm:$0xf0] }
 0x622   :  { %v10598_v61 = vadd.f32 %v4218_v6, %v4130_v9  ;;  %4266 = vmatmul.bf16.gmra.mxu2 %v12332_v51  ;;  %4444 = vmatmul.bf16.gmra.mxu0 %v12333_v37  ;;  %v8083_v16 = vor.u32 %v8775_v33, %v8082_v59 }
 0x623   :  { %v5226_v55 = vmax.f32 %v4038_v19, 0.0  ;;  %4533 = vmatmul.bf16.gmra.mxu1 %v12335_v57  ;;  %v12337_v19 = vld [vmem:[#allocation53_spill] sm:$0xff] }
 0x624   :  { %12331 = vst [vmem:[#allocation78_spill] sm:$0xff] %v10598_v61  ;;  %4677 = vmatpush.bf16.msrb.mxu3 %v8083_v16  ;;  %v12339_v16 = vld [vmem:[#allocation60_spill] sm:$0xff] }
 0x625   :  { %4355 = vmatmul.bf16.gmra.mxu3 %v12334_v5  ;;  %v10604_v18 = vpack.c.bf16 %v5226_v55, %v5222_v43  ;;  %v3951_v23 = vpop.f32.mrf.mxu2 }
 0x626   :  { %v3952_v9 = vadd.f32 %v3951_v23, %v12337_v19 }
 0x627   :  { %12336 = vst [vmem:[#allocation24_spill] sm:$0xff] %v10604_v18  ;;  %v4131_v61 = vpop.f32.mrf.mxu0 }
 0x628   :  { %v4040_v6 = vpop.f32.mrf.mxu3  ;;  %v4132_v5 = vadd.f32 %v4131_v61, %v10398_v45  ;;  %v4220_v51 = vpop.f32.mrf.mxu1  ;;  %v12341_v61 = vld [vmem:[#allocation42_spill] sm:$0xff] }
 0x629   :  { %v4041_v37 = vadd.f32 %v4040_v6, %v3952_v9  ;;  %v12340_v9 = vld [vmem:[#allocation84_spill] sm:$0xff] }
 0x62a   :  { %v10608_v57 = vadd.f32 %v4220_v51, %v4132_v5  ;;  %v12342_v51 = vld [vmem:[#allocation99_spill] sm:$0xff]  ;;  %v8693_v5 = vld [vmem:[#allocation8 + $0xec] sm:$0xf] }
 0x62b   :  { %v5230_v23 = vmax.f32 %v4041_v37, 0.0 }
 0x62d   :  { %v3953_v32 = vpop.f32.mrf.mxu2 }
 0x62e   :  { %v3954_v15 = vadd.f32 %v3953_v32, %v10381_v17  ;;  %v7764_v17 = vld [vmem:[#allocation8 + $0xf8] sm:$0xf0] }
 0x62f   :  { %v4134_v55 = vpop.f32.mrf.mxu0 }
 0x630   :  { %v4042_v46 = vpop.f32.mrf.mxu3  ;;  %v4135_v59 = vadd.f32 %v4134_v55, %v10398_v45  ;;  %v4223_v33 = vpop.f32.mrf.mxu1 }
 0x631   :  { %v4043_v43 = vadd.f32 %v4042_v46, %v3954_v15  ;;  %v7767_v15 = vor.u32 %v8693_v5, %v7764_v17  ;;  %v12344_v46 = vld [vmem:[#allocation70_spill] sm:$0xff] }
 0x632   :  { %v10612_v49 = vadd.f32 %v4223_v33, %v4135_v59  ;;  %4271 = vmatmul.bf16.gmra.mxu2 %v12339_v16  ;;  %4449 = vmatmul.bf16.gmra.mxu0 %v12340_v9  ;;  %v7892_v9 = vld [vmem:[#allocation8 + $0x1f8] sm:$0xf0]  ;;  %v10624_v16 = vld [vmem:[#allocation10] sm:$0xf] }
 0x633   :  { %v5234_v19 = vmax.f32 %v4043_v43, 0.0  ;;  %4538 = vmatmul.bf16.gmra.mxu1 %v12342_v51  ;;  %4762 = vmatpush.bf16.msrb.mxu0 %v7767_v15 }
 0x634   :  { %12338 = vst [vmem:[#allocation46_spill] sm:$0xff] %v10612_v49 }
 0x635   :  { %4360 = vmatmul.bf16.gmra.mxu3 %v12341_v61  ;;  %v10618_v32 = vpack.c.bf16 %v5234_v19, %v5230_v23  ;;  %v3956_v6 = vpop.f32.mrf.mxu2  ;;  %v8725_v61 = vld [vmem:[#allocation8 + $0x1ec] sm:$0xf]  ;;  %v10627_v23 = vperm.slane %v10624_v16, 2 }
 0x636   :  { %v3957_v55 = vadd.f32 %v3956_v6, %v12344_v46  ;;  %v7895_v51 = vor.u32 %v8725_v61, %v7892_v9  ;;  %v12347_v9 = vld [vmem:[#allocation20_spill] sm:$0xff]  ;;  %v12348_v61 = vld [vmem:[#allocation85_spill] sm:$0xff] }
 0x637   :  { %12343 = vst [vmem:[#allocation80_spill] sm:$0xff] %v10618_v32  ;;  %v4136_v43 = vpop.f32.mrf.mxu0 }
 0x638   :  { %v4045_v37 = vpop.f32.mrf.mxu3  ;;  %v4137_v33 = vadd.f32 %v4136_v43, %v10398_v45  ;;  %v4225_v18 = vpop.f32.mrf.mxu1  ;;  %4851 = vmatpush.bf16.msrb.mxu1 %v7895_v51  ;;  %v12349_v43 = vld [vmem:[#allocation54_spill] sm:$0xff]  ;;  %v7938_v51 = vld [vmem:[#allocation8 + $0x248] sm:$0xf] }
 0x639   :  { %v4046_v59 = vadd.f32 %v4045_v37, %v3957_v55 }
 0x63a   :  { %v10622_v49 = vadd.f32 %v4225_v18, %v4137_v33  ;;  %v12350_v33 = vld [vmem:[#allocation100_spill] sm:$0xff] }
 0x63b   :  { %v5238_v18 = vmax.f32 %v4046_v59, 0.0 }
 0x63c   :  { %12345 = vst [vmem:[#allocation29_spill] sm:$0xff] %v10622_v49 }
 0x63d   :  { %v3958_v19 = vpop.f32.mrf.mxu2 }
 0x63e   :  { %v3959_v5 = vadd.f32 %v3958_v19, %v10395_v35  ;;  %v8739_v35 = vld [vmem:[#allocation8 + $0x254] sm:$0xf0]  ;;  %v8066_v19 = vld [vmem:[#allocation8 + $0x348] sm:$0xf] }
 0x63f   :  { %v4415_v6 = vpop.f32.mrf.mxu0  ;;  %v7939_v32 = vor.u32 %v8739_v35, %v7938_v51 }
 0x640   :  { %v4047_v17 = vpop.f32.mrf.mxu3  ;;  %v4416_v45 = vadd.f32 %v4415_v6, %v10627_v23  ;;  %v4504_v46 = vpop.f32.mrf.mxu1 }
 0x641   :  { %v4048_v15 = vadd.f32 %v4047_v17, %v3959_v5  ;;  %v8771_v5 = vld [vmem:[#allocation8 + $0x354] sm:$0xf0]  ;;  %4589 = vmatpush.bf16.msrb.mxu2 %v7939_v32 }
 0x642   :  { %v10631_v37 = vadd.f32 %v4504_v46, %v4416_v45  ;;  %4276 = vmatmul.bf16.gmra.mxu2 %v12347_v9  ;;  %4454 = vmatmul.bf16.gmra.mxu0 %v12348_v61  ;;  %v8067_v59 = vor.u32 %v8771_v5, %v8066_v19 }
 0x643   :  { %v5242_v55 = vmax.f32 %v4048_v15, 0.0  ;;  %4543 = vmatmul.bf16.gmra.mxu1 %v12350_v33  ;;  %v12352_v15 = vld [vmem:[#allocation71_spill] sm:$0xff] }
 0x644   :  { %12346 = vst [vmem:[#allocation47_spill] sm:$0xff] %v10631_v37  ;;  %4678 = vmatpush.bf16.msrb.mxu3 %v8067_v59  ;;  %v12355_v59 = vld [vmem:[#allocation87_spill] sm:$0xff] }
 0x645   :  { %4365 = vmatmul.bf16.gmra.mxu3 %v12349_v43  ;;  %v10637_v17 = vpack.c.bf16 %v5242_v55, %v5238_v18  ;;  %v4237_v6 = vpop.f32.mrf.mxu2 }
 0x646   :  { %v4238_v45 = vadd.f32 %v4237_v6, %v12352_v15 }
 0x647   :  { %12351 = vst [vmem:[#allocation72_spill] sm:$0xff] %v10637_v17  ;;  %v4417_v37 = vpop.f32.mrf.mxu0 }
 0x648   :  { %v4326_v46 = vpop.f32.mrf.mxu3  ;;  %v4418_v43 = vadd.f32 %v4417_v37, %v10627_v23  ;;  %v4506_v9 = vpop.f32.mrf.mxu1  ;;  %v12356_v37 = vld [vmem:[#allocation28_spill] sm:$0xff] }
 0x649   :  { %v4327_v61 = vadd.f32 %v4326_v46, %v4238_v45 }
 0x64a   :  { %v10641_v33 = vadd.f32 %v4506_v9, %v4418_v43  ;;  %v12357_v9 = vld [vmem:[#allocation23_spill] sm:$0xff]  ;;  %v8689_v43 = vld [vmem:[#allocation8 + $0xcc] sm:$0xf] }
 0x64b   :  { %v5119_v6 = vmax.f32 %v4327_v61, 0.0 }
 0x64c   :  { %12353 = vst [vmem:[#allocation77_spill] sm:$0xff] %v10641_v33 }
 0x64d   :  { %v4239_v49 = vpop.f32.mrf.mxu2 }
 0x64e   :  { %v4240_v51 = vadd.f32 %v4239_v49, %v10412_v62  ;;  %v7748_v62 = vld [vmem:[#allocation8 + $0xd8] sm:$0xf0] }
 0x64f   :  { %v4420_v18 = vpop.f32.mrf.mxu0  ;;  %v7751_v45 = vor.u32 %v8689_v43, %v7748_v62 }
 0x650   :  { %v4328_v35 = vpop.f32.mrf.mxu3  ;;  %v4421_v19 = vadd.f32 %v4420_v18, %v10627_v23  ;;  %v4509_v5 = vpop.f32.mrf.mxu1 }
 0x651   :  { %v4329_v55 = vadd.f32 %v4328_v35, %v4240_v51  ;;  %v12359_v51 = vld [vmem:[#allocation36_spill] sm:$0xff]  ;;  %4763 = vmatpush.bf16.msrb.mxu0 %v7751_v45 }
 0x652   :  { %v10645_v32 = vadd.f32 %v4509_v5, %v4421_v19  ;;  %4281 = vmatmul.bf16.gmra.mxu2 %v12269_v2  ;;  %4459 = vmatmul.bf16.gmra.mxu0 %v12355_v59  ;;  %v12370_v2 = vld [vmem:[#allocation59_spill] sm:$0xff] }
 0x653   :  { %v5123_v15 = vmax.f32 %v4329_v55, 0.0  ;;  %4548 = vmatmul.bf16.gmra.mxu1 %v12357_v9 }
 0x654   :  { %12354 = vst [vmem:[#allocation51_spill] sm:$0xff] %v10645_v32  ;;  %v8721_v32 = vld [vmem:[#allocation8 + $0x1cc] sm:$0xf] }
 0x655   :  { %4370 = vmatmul.bf16.gmra.mxu3 %v12356_v37  ;;  %v10651_v49 = vpack.c.bf16 %v5123_v15, %v5119_v6  ;;  %v4242_v46 = vpop.f32.mrf.mxu2  ;;  %v7876_v37 = vld [vmem:[#allocation8 + $0x1d8] sm:$0xf0] }
 0x656   :  { %v4243_v35 = vadd.f32 %v4242_v46, %v12359_v51  ;;  %v7879_v9 = vor.u32 %v8721_v32, %v7876_v37  ;;  %v12361_v6 = vld [vmem:[#allocation75_spill] sm:$0xff]  ;;  %v12366_v32 = vld [vmem:[#allocation40_spill] sm:$0xff] }
 0x657   :  { %12358 = vst [vmem:[#allocation43_spill] sm:$0xff] %v10651_v49  ;;  %v4422_v18 = vpop.f32.mrf.mxu0  ;;  %v7922_v37 = vld [vmem:[#allocation8 + $0x228] sm:$0xf] }
 0x658   :  { %v4331_v61 = vpop.f32.mrf.mxu3  ;;  %v4423_v19 = vadd.f32 %v4422_v18, %v10627_v23  ;;  %v4511_v5 = vpop.f32.mrf.mxu1  ;;  %4852 = vmatpush.bf16.msrb.mxu1 %v7879_v9  ;;  %v12363_v18 = vld [vmem:[#allocation63_spill] sm:$0xff]  ;;  %v8050_v9 = vld [vmem:[#allocation8 + $0x328] sm:$0xf] }
 0x659   :  { %v4332_v55 = vadd.f32 %v4331_v61, %v4243_v35 }
 0x65a   :  { %v10655_v17 = vadd.f32 %v4511_v5, %v4423_v19  ;;  %v12364_v19 = vld [vmem:[#allocation88_spill] sm:$0xff]  ;;  %v12365_v5 = vld [vmem:[#allocation58_spill] sm:$0xff] }
 0x65b   :  { %v5127_v51 = vmax.f32 %v4332_v55, 0.0 }
 0x65c   :  { %12360 = vst [vmem:[#allocation55_spill] sm:$0xff] %v10655_v17 }
 0x65d   :  { %v4244_v59 = vpop.f32.mrf.mxu2 }
 0x65e   :  { %v4245_v15 = vadd.f32 %v4244_v59, %v12361_v6  ;;  %v8735_v59 = vld [vmem:[#allocation8 + $0x234] sm:$0xf0] }
 0x65f   :  { %v4425_v62 = vpop.f32.mrf.mxu0  ;;  %v7923_v6 = vor.u32 %v8735_v59, %v7922_v37 }
 0x660   :  { %v4333_v43 = vpop.f32.mrf.mxu3  ;;  %v4426_v46 = vadd.f32 %v4425_v62, %v10627_v23  ;;  %v4514_v45 = vpop.f32.mrf.mxu1 }
 0x661   :  { %v4334_v49 = vadd.f32 %v4333_v43, %v4245_v15  ;;  %v8767_v15 = vld [vmem:[#allocation8 + $0x334] sm:$0xf0]  ;;  %4590 = vmatpush.bf16.msrb.mxu2 %v7923_v6 }
 0x662   :  { %v10659_v61 = vadd.f32 %v4514_v45, %v4426_v46  ;;  %4286 = vmatmul.bf16.gmra.mxu2 %v12363_v18  ;;  %4464 = vmatmul.bf16.gmra.mxu0 %v12364_v19  ;;  %v8051_v55 = vor.u32 %v8767_v15, %v8050_v9 }
 0x663   :  { %v5131_v35 = vmax.f32 %v4334_v49, 0.0  ;;  %4553 = vmatmul.bf16.gmra.mxu1 %v12366_v32  ;;  %v12368_v49 = vld [vmem:[#allocation76_spill] sm:$0xff] }
 0x664   :  { %12362 = vst [vmem:[#allocation57_spill] sm:$0xff] %v10659_v61  ;;  %4679 = vmatpush.bf16.msrb.mxu3 %v8051_v55  ;;  %v12372_v55 = vld [vmem:[#allocation22_spill] sm:$0xff] }
 0x665   :  { %4375 = vmatmul.bf16.gmra.mxu3 %v12365_v5  ;;  %v10665_v43 = vpack.c.bf16 %v5131_v35, %v5127_v51  ;;  %v4247_v62 = vpop.f32.mrf.mxu2 }
 0x666   :  { %v4248_v46 = vadd.f32 %v4247_v62, %v12368_v49 }
 0x667   :  { %12367 = vst [vmem:[#allocation45_spill] sm:$0xff] %v10665_v43  ;;  %v4427_v61 = vpop.f32.mrf.mxu0 }
 0x668   :  { %v4336_v45 = vpop.f32.mrf.mxu3  ;;  %v4428_v5 = vadd.f32 %v4427_v61, %v10627_v23  ;;  %v4516_v18 = vpop.f32.mrf.mxu1  ;;  %v12374_v61 = vld [vmem:[#allocation32_spill] sm:$0xff] }
 0x669   :  { %v4337_v19 = vadd.f32 %v4336_v45, %v4248_v46  ;;  %v12373_v46 = vld [vmem:[#allocation89_spill] sm:$0xff] }
 0x66a   :  { %v10669_v32 = vadd.f32 %v4516_v18, %v4428_v5  ;;  %v12375_v18 = vld [vmem:[#allocation41_spill] sm:$0xff] }
 0x66b   :  { %v5135_v62 = vmax.f32 %v4337_v19, 0.0  ;;  %v8685_v5 = vld [vmem:[#allocation8 + $0xac] sm:$0xf] }
 0x66c   :  { %12369 = vst [vmem:[#allocation61_spill] sm:$0xff] %v10669_v32  ;;  %v8681_v32 = vld [vmem:[#allocation8 + $0x8c] sm:$0xf] }
 0x66d   :  { %v4249_v17 = vpop.f32.mrf.mxu2 }
 0x66e   :  { %v4250_v37 = vadd.f32 %v4249_v17, %v12370_v2  ;;  %v7732_v2 = vld [vmem:[#allocation8 + $0xb8] sm:$0xf0] }
 0x66f   :  { %v4430_v51 = vpop.f32.mrf.mxu0  ;;  %v7735_v17 = vor.u32 %v8685_v5, %v7732_v2  ;;  %v12379_v5 = vld [vmem:[#allocation91_spill] sm:$0xff] }
 0x670   :  { %v4338_v59 = vpop.f32.mrf.mxu3  ;;  %v4431_v9 = vadd.f32 %v4430_v51, %v10627_v23  ;;  %v4519_v15 = vpop.f32.mrf.mxu1 }
 0x671   :  { %v4339_v35 = vadd.f32 %v4338_v59, %v4250_v37  ;;  %v12377_v59 = vld [vmem:[#allocation90_spill] sm:$0xff]  ;;  %4764 = vmatpush.bf16.msrb.mxu0 %v7735_v17 }
 0x672   :  { %v10673_v6 = vadd.f32 %v4519_v15, %v4431_v9  ;;  %4291 = vmatmul.bf16.gmra.mxu2 %v12372_v55  ;;  %4469 = vmatmul.bf16.gmra.mxu0 %v12373_v46  ;;  %v7860_v46 = vld [vmem:[#allocation8 + $0x1b8] sm:$0xf0] }
 0x673   :  { %v5139_v49 = vmax.f32 %v4339_v35, 0.0  ;;  %4558 = vmatmul.bf16.gmra.mxu1 %v12375_v18 }
 0x674   :  { %12371 = vst [vmem:[#allocation48_spill] sm:$0xff] %v10673_v6 }
 0x675   :  { %4380 = vmatmul.bf16.gmra.mxu3 %v12374_v61  ;;  %v10679_v45 = vpack.c.bf16 %v5139_v49, %v5135_v62  ;;  %v4252_v37 = vpop.f32.mrf.mxu2  ;;  %v8717_v61 = vld [vmem:[#allocation8 + $0x1ac] sm:$0xf] }
 0x676   :  { %v4253_v51 = vadd.f32 %v4252_v37, %v12377_v59  ;;  %v7863_v18 = vor.u32 %v8717_v61, %v7860_v46  ;;  %v12384_v46 = vld [vmem:[#allocation26_spill] sm:$0xff]  ;;  %v7906_v61 = vld [vmem:[#allocation8 + $0x208] sm:$0xf] }
 0x677   :  { %12376 = vst [vmem:[#allocation53_spill] sm:$0xff] %v10679_v45  ;;  %v4432_v35 = vpop.f32.mrf.mxu0 }
 0x678   :  { %v4341_v19 = vpop.f32.mrf.mxu3  ;;  %v4433_v15 = vadd.f32 %v4432_v35, %v10627_v23  ;;  %v4521_v43 = vpop.f32.mrf.mxu1  ;;  %4853 = vmatpush.bf16.msrb.mxu1 %v7863_v18  ;;  %v12381_v35 = vld [vmem:[#allocation25_spill] sm:$0xff]  ;;  %v8034_v18 = vld [vmem:[#allocation8 + $0x308] sm:$0xf] }
 0x679   :  { %v4342_v9 = vadd.f32 %v4341_v19, %v4253_v51 }
 0x67a   :  { %v10683_v6 = vadd.f32 %v4521_v43, %v4433_v15  ;;  %v12382_v43 = vld [vmem:[#allocation52_spill] sm:$0xff]  ;;  %v12383_v15 = vld [vmem:[#allocation62_spill] sm:$0xff] }
 0x67b   :  { %v5143_v59 = vmax.f32 %v4342_v9, 0.0 }
 0x67c   :  { %12378 = vst [vmem:[#allocation70_spill] sm:$0xff] %v10683_v6 }
 0x67d   :  { %v4254_v55 = vpop.f32.mrf.mxu2 }
 0x67e   :  { %v4255_v62 = vadd.f32 %v4254_v55, %v12379_v5  ;;  %v8731_v55 = vld [vmem:[#allocation8 + $0x214] sm:$0xf0] }
 0x67f   :  { %v4435_v2 = vpop.f32.mrf.mxu0  ;;  %v7907_v5 = vor.u32 %v8731_v55, %v7906_v61  ;;  %v7716_v61 = vld [vmem:[#allocation8 + $0x98] sm:$0xf0]  ;;  %v8713_v55 = vld [vmem:[#allocation8 + $0x18c] sm:$0xf] }
 0x680   :  { %v4343_v49 = vpop.f32.mrf.mxu3  ;;  %v4436_v37 = vadd.f32 %v4435_v2, %v10627_v23  ;;  %v4524_v17 = vpop.f32.mrf.mxu1 }
 0x681   :  { %v4344_v45 = vadd.f32 %v4343_v49, %v4255_v62  ;;  %v8763_v62 = vld [vmem:[#allocation8 + $0x314] sm:$0xf0]  ;;  %4591 = vmatpush.bf16.msrb.mxu2 %v7907_v5 }
 0x682   :  { %v10687_v19 = vadd.f32 %v4524_v17, %v4436_v37  ;;  %4296 = vmatmul.bf16.gmra.mxu2 %v12381_v35  ;;  %4474 = vmatmul.bf16.gmra.mxu0 %v12382_v43  ;;  %v8035_v9 = vor.u32 %v8763_v62, %v8034_v18  ;;  %v7719_v18 = vor.u32 %v8681_v32, %v7716_v61  ;;  %v7844_v62 = vld [vmem:[#allocation8 + $0x198] sm:$0xf0] }
 0x683   :  { %v5147_v51 = vmax.f32 %v4344_v45, 0.0  ;;  %4563 = vmatmul.bf16.gmra.mxu1 %v12384_v46  ;;  %v12386_v45 = vld [vmem:[#allocation30_spill] sm:$0xff] }
 0x684   :  { %12380 = vst [vmem:[#allocation71_spill] sm:$0xff] %v10687_v19  ;;  %4680 = vmatpush.bf16.msrb.mxu3 %v8035_v9  ;;  %4765 = vmatpush.bf16.msrb.mxu0 %v7719_v18  ;;  %v12391_v18 = vld [vmem:[#allocation35_spill] sm:$0xff] }
 0x685   :  { %4385 = vmatmul.bf16.gmra.mxu3 %v12383_v15  ;;  %v10693_v49 = vpack.c.bf16 %v5147_v51, %v5143_v59  ;;  %v4257_v2 = vpop.f32.mrf.mxu2  ;;  %v12388_v59 = vld [vmem:[#allocation34_spill] sm:$0xff] }
 0x686   :  { %v4258_v37 = vadd.f32 %v4257_v2, %v12386_v45  ;;  %v7847_v45 = vor.u32 %v8713_v55, %v7844_v62 }
 0x687   :  { %12385 = vst [vmem:[#allocation36_spill] sm:$0xff] %v10693_v49  ;;  %v4437_v19 = vpop.f32.mrf.mxu0 }
 0x688   :  { %v4346_v17 = vpop.f32.mrf.mxu3  ;;  %v4438_v15 = vadd.f32 %v4437_v19, %v10627_v23  ;;  %v4526_v35 = vpop.f32.mrf.mxu1  ;;  %4854 = vmatpush.bf16.msrb.mxu1 %v7847_v45  ;;  %v8677_v19 = vld [vmem:[#allocation8 + $0x6c] sm:$0xf] }
 0x689   :  { %v4347_v43 = vadd.f32 %v4346_v17, %v4258_v37 }
 0x68a   :  { %v10697_v46 = vadd.f32 %v4526_v35, %v4438_v15  ;;  %v7700_v35 = vld [vmem:[#allocation8 + $0x78] sm:$0xf0]  ;;  %v8709_v15 = vld [vmem:[#allocation8 + $0x16c] sm:$0xf] }
 0x68b   :  { %v5151_v17 = vmax.f32 %v4347_v43, 0.0  ;;  %v7703_v32 = vor.u32 %v8677_v19, %v7700_v35  ;;  %v8673_v43 = vld [vmem:[#allocation8 + $0x4c] sm:$0xf] }
 0x68c   :  { %12387 = vst [vmem:[#allocation75_spill] sm:$0xff] %v10697_v46 }
 0x68d   :  { %v4259_v6 = vpop.f32.mrf.mxu2  ;;  %4766 = vmatpush.bf16.msrb.mxu0 %v7703_v32 }
 0x68e   :  { %v4260_v51 = vadd.f32 %v4259_v6, %v12388_v59  ;;  %v7828_v6 = vld [vmem:[#allocation8 + $0x178] sm:$0xf0] }
 0x68f   :  { %v4440_v2 = vpop.f32.mrf.mxu0  ;;  %v7684_v59 = vld [vmem:[#allocation8 + $0x58] sm:$0xf0] }
 0x690   :  { %v4348_v49 = vpop.f32.mrf.mxu3  ;;  %v4441_v9 = vadd.f32 %v4440_v2, %v10627_v23  ;;  %v4529_v37 = vpop.f32.mrf.mxu1  ;;  %v7687_v45 = vor.u32 %v8673_v43, %v7684_v59  ;;  %v8665_v43 = vld [vmem:[#allocation8 + $0xc] sm:$0xf]  ;;  %v7652_v59 = vld [vmem:[#allocation8 + $0x18] sm:$0xf0] }
 0x691   :  { %v4349_v5 = vadd.f32 %v4348_v49, %v4260_v51  ;;  %v7831_v49 = vor.u32 %v8709_v15, %v7828_v6  ;;  %v8705_v51 = vld [vmem:[#allocation8 + $0x14c] sm:$0xf]  ;;  %v7668_v15 = vld [vmem:[#allocation8 + $0x38] sm:$0xf0] }
 0x692   :  { %v10701_v33 = vadd.f32 %v4529_v37, %v4441_v9  ;;  %4301 = vmatmul.bf16.gmra.mxu2 %v12300_v27  ;;  %4479 = vmatmul.bf16.gmra.mxu0 %v12222_v3 }
 0x693   :  { %v5155_v46 = vmax.f32 %v4349_v5, 0.0  ;;  %4568 = vmatmul.bf16.gmra.mxu1 %v12223_v63  ;;  %v7812_v5 = vld [vmem:[#allocation8 + $0x158] sm:$0xf0]  ;;  %4767 = vmatpush.bf16.msrb.mxu0 %v7687_v45 }
 0x694   :  { %12389 = vst [vmem:[#allocation76_spill] sm:$0xff] %v10701_v33  ;;  %4855 = vmatpush.bf16.msrb.mxu1 %v7831_v49  ;;  %v7815_v37 = vor.u32 %v8705_v51, %v7812_v5  ;;  %v7796_v49 = vld [vmem:[#allocation8 + $0x138] sm:$0xf0]  ;;  %v8697_v51 = vld [vmem:[#allocation8 + $0x10c] sm:$0xf] }
 0x695   :  { %4390 = vmatmul.bf16.gmra.mxu3 %v10377_v54  ;;  %v10707_v61 = vpack.c.bf16 %v5155_v46, %v5151_v17  ;;  %v4262_v55 = vpop.f32.mrf.mxu2  ;;  %v8669_v46 = vld [vmem:[#allocation8 + $0x2c] sm:$0xf]  ;;  %v7780_v45 = vld [vmem:[#allocation8 + $0x118] sm:$0xf0] }
 0x696   :  { %v4263_v62 = vadd.f32 %v4262_v55, %v12391_v18  ;;  %v8701_v17 = vld [vmem:[#allocation8 + $0x12c] sm:$0xf]  ;;  %v7671_v6 = vor.u32 %v8669_v46, %v7668_v15 }
 0x697   :  { %12390 = vst [vmem:[#allocation59_spill] sm:$0xff] %v10707_v61  ;;  %v4442_v9 = vpop.f32.mrf.mxu0  ;;  %v7799_v61 = vor.u32 %v8701_v17, %v7796_v49 }
 0x698   :  { %v4351_v2 = vpop.f32.mrf.mxu3  ;;  %v4443_v35 = vadd.f32 %v4442_v9, %v10627_v23  ;;  %v4531_v33 = vpop.f32.mrf.mxu1  ;;  %4856 = vmatpush.bf16.msrb.mxu1 %v7815_v37  ;;  %4768 = vmatpush.bf16.msrb.mxu0 %v7671_v6  ;;  %v7783_v9 = vor.u32 %v8697_v51, %v7780_v45  ;;  %v8789_v6 = vld [vmem:[#allocation8 + $0x3ec] sm:$0xf] }
 0x699   :  { %v4352_v19 = vadd.f32 %v4351_v2, %v4263_v62  ;;  %v7655_v2 = vor.u32 %v8665_v43, %v7652_v59 }
 0x69a   :  { %v10711_v32 = vadd.f32 %v4531_v33, %v4443_v35 }
 0x69b   :  { %v5159_v46 = vmax.f32 %v4352_v19, 0.0 }
 0x69c   :  { %4857 = vmatpush.bf16.msrb.mxu1 %v7799_v61  ;;  %4769 = vmatpush.bf16.msrb.mxu0 %v7655_v2  ;;  %v8020_v61 = vld [vmem:[#allocation8 + $0x2f8] sm:$0xf0] }
 0x69d   :  { %v4264_v55 = vpop.f32.mrf.mxu2 }
 0x69e   :  { %v4265_v18 = vadd.f32 %v4264_v55, %v10482_v25  ;;  %v8757_v25 = vld [vmem:[#allocation8 + $0x2ec] sm:$0xf]  ;;  %v8148_v55 = vld [vmem:[#allocation8 + $0x3f8] sm:$0xf0] }
 0x69f   :  { %v4445_v5 = vpop.f32.mrf.mxu0  ;;  %v8023_v49 = vor.u32 %v8757_v25, %v8020_v61  ;;  %v8151_v19 = vor.u32 %v8789_v6, %v8148_v55 }
 0x6a0   :  { %v4353_v62 = vpop.f32.mrf.mxu3  ;;  %v4446_v33 = vadd.f32 %v4445_v5, %v10627_v23  ;;  %v4534_v35 = vpop.f32.mrf.mxu1  ;;  %4858 = vmatpush.bf16.msrb.mxu1 %v7783_v9 }
 0x6a1   :  { %v4354_v37 = vadd.f32 %v4353_v62, %v4265_v18  ;;  %4940 = vmatpush.bf16.msra.mxu2 %v8023_v49  ;;  %5029 = vmatpush.bf16.msra.mxu3 %v8151_v19 }
 0x6a2   :  { %v10715_v17 = vadd.f32 %v4534_v35, %v4446_v33  ;;  %4306 = vmatmul.bf16.gmra.mxu2 %v12303_v58  ;;  %4484 = vmatmul.bf16.gmra.mxu0 %v12225_v60 }
 0x6a3   :  { %v5163_v15 = vmax.f32 %v4354_v37, 0.0  ;;  %4573 = vmatmul.bf16.gmra.mxu1 %v12226_v26 }
 0x6a5   :  { %4395 = vmatmul.bf16.gmra.mxu3 %v10391_v53  ;;  %v10721_v43 = vpack.c.bf16 %v5163_v15, %v5159_v46  ;;  %v4267_v59 = vpop.f32.mrf.mxu2 }
 0x6a6   :  { %v4268_v51 = vadd.f32 %v4267_v59, %v10486_v41 }
 0x6a7   :  { %v4447_v62 = vpop.f32.mrf.mxu0 }
 0x6a8   :  { %v4356_v18 = vpop.f32.mrf.mxu3  ;;  %v4448_v45 = vadd.f32 %v4447_v62, %v10627_v23  ;;  %v4536_v5 = vpop.f32.mrf.mxu1 }
 0x6a9   :  { %v4357_v2 = vadd.f32 %v4356_v18, %v4268_v51 }
 0x6aa   :  { %v10725_v9 = vadd.f32 %v4536_v5, %v4448_v45 }
 0x6ab   :  { %v5167_v41 = vmax.f32 %v4357_v2, 0.0 }
 0x6ad   :  { %v4269_v37 = vpop.f32.mrf.mxu2 }
 0x6ae   :  { %v4270_v33 = vadd.f32 %v4269_v37, %v10496_v21 }
 0x6af   :  { %v4450_v46 = vpop.f32.mrf.mxu0 }
 0x6b0   :  { %v4358_v35 = vpop.f32.mrf.mxu3  ;;  %v4451_v25 = vadd.f32 %v4450_v46, %v10627_v23  ;;  %v4539_v61 = vpop.f32.mrf.mxu1 }
 0x6b1   :  { %v4359_v15 = vadd.f32 %v4358_v35, %v4270_v33 }
 0x6b2   :  { %v10729_v49 = vadd.f32 %v4539_v61, %v4451_v25  ;;  %4311 = vmatmul.bf16.gmra.mxu2 %v12305_v20  ;;  %4489 = vmatmul.bf16.gmra.mxu0 %v12228_v10 }
 0x6b3   :  { %v5171_v6 = vmax.f32 %v4359_v15, 0.0  ;;  %4578 = vmatmul.bf16.gmra.mxu1 %v12229_v4 }
 0x6b5   :  { %4400 = vmatmul.bf16.gmra.mxu3 %v10408_v13  ;;  %v10735_v55 = vpack.c.bf16 %v5171_v6, %v5167_v41  ;;  %v4272_v21 = vpop.f32.mrf.mxu2  ;;  %v12393_v6 = vld [vmem:[#allocation94_spill] sm:$0xff] }
 0x6b6   :  { %v4273_v59 = vadd.f32 %v4272_v21, %v10500_v22  ;;  %v8753_v21 = vld [vmem:[#allocation8 + $0x2cc] sm:$0xf] }
 0x6b7   :  { %12392 = vst [vmem:[#allocation90_spill] sm:$0xff] %v10735_v55  ;;  %v4452_v51 = vpop.f32.mrf.mxu0 }
 0x6b8   :  { %v4361_v19 = vpop.f32.mrf.mxu3  ;;  %v4453_v62 = vadd.f32 %v4452_v51, %v10627_v23  ;;  %v4541_v2 = vpop.f32.mrf.mxu1  ;;  %v8132_v51 = vld [vmem:[#allocation8 + $0x3d8] sm:$0xf0] }
 0x6b9   :  { %v4362_v18 = vadd.f32 %v4361_v19, %v4273_v59  ;;  %v8785_v59 = vld [vmem:[#allocation8 + $0x3cc] sm:$0xf] }
 0x6ba   :  { %v10739_v45 = vadd.f32 %v4541_v2, %v4453_v62 }
 0x6bb   :  { %v5175_v61 = vmax.f32 %v4362_v18, 0.0  ;;  %v8135_v18 = vor.u32 %v8785_v59, %v8132_v51 }
 0x6bd   :  { %v4274_v5 = vpop.f32.mrf.mxu2  ;;  %5030 = vmatpush.bf16.msra.mxu3 %v8135_v18 }
 0x6be   :  { %v4275_v37 = vadd.f32 %v4274_v5, %v10510_v31  ;;  %v8004_v31 = vld [vmem:[#allocation8 + $0x2d8] sm:$0xf0]  ;;  %v12395_v5 = vld [vmem:[#allocation64_spill] sm:$0xff] }
 0x6bf   :  { %v4455_v35 = vpop.f32.mrf.mxu0  ;;  %v8007_v19 = vor.u32 %v8753_v21, %v8004_v31 }
 0x6c0   :  { %v4363_v33 = vpop.f32.mrf.mxu3  ;;  %v4456_v15 = vadd.f32 %v4455_v35, %v10627_v23  ;;  %v4544_v25 = vpop.f32.mrf.mxu1 }
 0x6c1   :  { %v4364_v46 = vadd.f32 %v4363_v33, %v4275_v37  ;;  %4941 = vmatpush.bf16.msra.mxu2 %v8007_v19 }
 0x6c2   :  { %v10743_v22 = vadd.f32 %v4544_v25, %v4456_v15  ;;  %4592 = vmatmul.bf16.vlgmr.msrb.gmra.mxu2 %v12232_v42  ;;  %4770 = vmatmul.bf16.vlgmr.msrb.gmra.mxu0 %v12143_v12 }
 0x6c3   :  { %v5179_v41 = vmax.f32 %v4364_v46, 0.0  ;;  %4859 = vmatmul.bf16.vlgmr.msrb.gmra.mxu1 %v12393_v6 }
 0x6c5   :  { %4681 = vmatmul.bf16.vlgmr.msrb.gmra.mxu3 %v10195_v48  ;;  %v10749_v62 = vpack.c.bf16 %v5179_v41, %v5175_v61  ;;  %v4277_v2 = vpop.f32.mrf.mxu2 }
 0x6c6   :  { %v4278_v37 = vadd.f32 %v4277_v2, %v12395_v5 }
 0x6c7   :  { %12394 = vst [vmem:[#allocation91_spill] sm:$0xff] %v10749_v62  ;;  %v4457_v35 = vpop.f32.mrf.mxu0 }
 0x6c8   :  { %v4366_v33 = vpop.f32.mrf.mxu3  ;;  %v4458_v46 = vadd.f32 %v4457_v35, %v10627_v23  ;;  %v4546_v15 = vpop.f32.mrf.mxu1 }
 0x6c9   :  { %v4367_v12 = vadd.f32 %v4366_v33, %v4278_v37 }
 0x6ca   :  { %v10753_v25 = vadd.f32 %v4546_v15, %v4458_v46 }
 0x6cb   :  { %v5183_v2 = vmax.f32 %v4367_v12, 0.0 }
 0x6cd   :  { %v4279_v6 = vpop.f32.mrf.mxu2 }
 0x6ce   :  { %v4280_v21 = vadd.f32 %v4279_v6, %v10524_v47 }
 0x6cf   :  { %v4460_v61 = vpop.f32.mrf.mxu0 }
 0x6d0   :  { %v4368_v31 = vpop.f32.mrf.mxu3  ;;  %v4461_v59 = vadd.f32 %v4460_v61, %v10627_v23  ;;  %v4549_v51 = vpop.f32.mrf.mxu1 }
 0x6d1   :  { %v4369_v41 = vadd.f32 %v4368_v31, %v4280_v21 }
 0x6d2   :  { %v10757_v19 = vadd.f32 %v4549_v51, %v4461_v59  ;;  %4597 = vmatmul.bf16.gmra.mxu2 %v12235_v0  ;;  %4775 = vmatmul.bf16.gmra.mxu0 %v12146_v1 }
 0x6d3   :  { %v5187_v5 = vmax.f32 %v4369_v41, 0.0  ;;  %4864 = vmatmul.bf16.gmra.mxu1 %v12147_v56 }
 0x6d5   :  { %4686 = vmatmul.bf16.gmra.mxu3 %v10209_v36  ;;  %v10763_v18 = vpack.c.bf16 %v5187_v5, %v5183_v2  ;;  %v4282_v47 = vpop.f32.mrf.mxu2  ;;  %v12397_v5 = vld [vmem:[#allocation73_spill] sm:$0xff] }
 0x6d6   :  { %v4283_v37 = vadd.f32 %v4282_v47, %v10528_v44  ;;  %v12398_v47 = vld [vmem:[#allocation96_spill] sm:$0xff] }
 0x6d7   :  { %12396 = vst [vmem:[#allocation30_spill] sm:$0xff] %v10763_v18  ;;  %v4462_v35 = vpop.f32.mrf.mxu0 }
 0x6d8   :  { %v4371_v33 = vpop.f32.mrf.mxu3  ;;  %v4463_v12 = vadd.f32 %v4462_v35, %v10627_v23  ;;  %v4551_v15 = vpop.f32.mrf.mxu1  ;;  %v8781_v35 = vld [vmem:[#allocation8 + $0x3ac] sm:$0xf] }
 0x6d9   :  { %v4372_v46 = vadd.f32 %v4371_v33, %v4283_v37  ;;  %v12399_v37 = vld [vmem:[#allocation95_spill] sm:$0xff]  ;;  %v8749_v33 = vld [vmem:[#allocation8 + $0x2ac] sm:$0xf] }
 0x6da   :  { %v10767_v6 = vadd.f32 %v4551_v15, %v4463_v12  ;;  %v8116_v15 = vld [vmem:[#allocation8 + $0x3b8] sm:$0xf0] }
 0x6db   :  { %v5191_v51 = vmax.f32 %v4372_v46, 0.0  ;;  %v8119_v46 = vor.u32 %v8781_v35, %v8116_v15 }
 0x6dd   :  { %v4284_v21 = vpop.f32.mrf.mxu2  ;;  %5031 = vmatpush.bf16.msra.mxu3 %v8119_v46 }
 0x6de   :  { %v4285_v1 = vadd.f32 %v4284_v21, %v10538_v29  ;;  %v7988_v29 = vld [vmem:[#allocation8 + $0x2b8] sm:$0xf0] }
 0x6df   :  { %v4465_v61 = vpop.f32.mrf.mxu0  ;;  %v7991_v12 = vor.u32 %v8749_v33, %v7988_v29 }
 0x6e0   :  { %v4373_v31 = vpop.f32.mrf.mxu3  ;;  %v4466_v56 = vadd.f32 %v4465_v61, %v10627_v23  ;;  %v4554_v59 = vpop.f32.mrf.mxu1 }
 0x6e1   :  { %v4374_v41 = vadd.f32 %v4373_v31, %v4285_v1  ;;  %v12401_v31 = vld [vmem:[#allocation68_spill] sm:$0xff]  ;;  %4942 = vmatpush.bf16.msra.mxu2 %v7991_v12 }
 0x6e2   :  { %v10771_v44 = vadd.f32 %v4554_v59, %v4466_v56  ;;  %4602 = vmatmul.bf16.gmra.mxu2 %v12238_v39  ;;  %4780 = vmatmul.bf16.gmra.mxu0 %v12397_v5 }
 0x6e3   :  { %v5195_v2 = vmax.f32 %v4374_v41, 0.0  ;;  %4869 = vmatmul.bf16.gmra.mxu1 %v12399_v37 }
 0x6e5   :  { %4691 = vmatmul.bf16.gmra.mxu3 %v12398_v47  ;;  %v10777_v21 = vpack.c.bf16 %v5195_v2, %v5191_v51  ;;  %v4287_v1 = vpop.f32.mrf.mxu2 }
 0x6e6   :  { %v4288_v61 = vadd.f32 %v4287_v1, %v12401_v31 }
 0x6e7   :  { %12400 = vst [vmem:[#allocation34_spill] sm:$0xff] %v10777_v21  ;;  %v4467_v56 = vpop.f32.mrf.mxu0 }
 0x6e8   :  { %v4376_v41 = vpop.f32.mrf.mxu3  ;;  %v4468_v5 = vadd.f32 %v4467_v56, %v10627_v23  ;;  %v4556_v18 = vpop.f32.mrf.mxu1 }
 0x6e9   :  { %v4377_v59 = vadd.f32 %v4376_v41, %v4288_v61 }
 0x6ea   :  { %v10781_v37 = vadd.f32 %v4556_v18, %v4468_v5 }
 0x6eb   :  { %v5199_v1 = vmax.f32 %v4377_v59, 0.0 }
 0x6ed   :  { %v4289_v62 = vpop.f32.mrf.mxu2 }
 0x6ee   :  { %v4290_v33 = vadd.f32 %v4289_v62, %v10552_v38 }
 0x6ef   :  { %v4470_v51 = vpop.f32.mrf.mxu0 }
 0x6f0   :  { %v4378_v29 = vpop.f32.mrf.mxu3  ;;  %v4471_v35 = vadd.f32 %v4470_v51, %v10627_v23  ;;  %v4559_v15 = vpop.f32.mrf.mxu1 }
 0x6f1   :  { %v4379_v2 = vadd.f32 %v4378_v29, %v4290_v33 }
 0x6f2   :  { %v10785_v12 = vadd.f32 %v4559_v15, %v4471_v35  ;;  %4607 = vmatmul.bf16.gmra.mxu2 %v12241_v30  ;;  %4785 = vmatmul.bf16.gmra.mxu0 %v12152_v7 }
 0x6f3   :  { %v5203_v31 = vmax.f32 %v4379_v2, 0.0  ;;  %4874 = vmatmul.bf16.gmra.mxu1 %v12153_v24 }
 0x6f5   :  { %4696 = vmatmul.bf16.gmra.mxu3 %v10237_v28  ;;  %v10791_v18 = vpack.c.bf16 %v5203_v31, %v5199_v1  ;;  %v4292_v38 = vpop.f32.mrf.mxu2  ;;  %v12403_v31 = vld [vmem:[#allocation86_spill] sm:$0xff] }
 0x6f6   :  { %v4293_v62 = vadd.f32 %v4292_v38, %v10556_v14  ;;  %v12404_v38 = vld [vmem:[#allocation97_spill] sm:$0xff] }
 0x6f7   :  { %12402 = vst [vmem:[#allocation35_spill] sm:$0xff] %v10791_v18  ;;  %v4472_v61 = vpop.f32.mrf.mxu0 }
 0x6f8   :  { %v4381_v46 = vpop.f32.mrf.mxu3  ;;  %v4473_v56 = vadd.f32 %v4472_v61, %v10627_v23  ;;  %v4561_v59 = vpop.f32.mrf.mxu1 }
 0x6f9   :  { %v4382_v41 = vadd.f32 %v4381_v46, %v4293_v62  ;;  %v8745_v62 = vld [vmem:[#allocation8 + $0x28c] sm:$0xf] }
 0x6fa   :  { %v10795_v5 = vadd.f32 %v4561_v59, %v4473_v56  ;;  %v8777_v46 = vld [vmem:[#allocation8 + $0x38c] sm:$0xf]  ;;  %v8100_v56 = vld [vmem:[#allocation8 + $0x398] sm:$0xf0] }
 0x6fb   :  { %v5207_v15 = vmax.f32 %v4382_v41, 0.0  ;;  %v8103_v41 = vor.u32 %v8777_v46, %v8100_v56 }
 0x6fd   :  { %v4294_v33 = vpop.f32.mrf.mxu2  ;;  %5032 = vmatpush.bf16.msra.mxu3 %v8103_v41  ;;  %v12407_v41 = vld [vmem:[#allocation50_spill] sm:$0xff] }
 0x6fe   :  { %v4295_v7 = vadd.f32 %v4294_v33, %v10566_v50  ;;  %v7972_v50 = vld [vmem:[#allocation8 + $0x298] sm:$0xf0] }
 0x6ff   :  { %v4475_v51 = vpop.f32.mrf.mxu0  ;;  %v7975_v61 = vor.u32 %v8745_v62, %v7972_v50 }
 0x700   :  { %v4383_v29 = vpop.f32.mrf.mxu3  ;;  %v4476_v24 = vadd.f32 %v4475_v51, %v10627_v23  ;;  %v4564_v35 = vpop.f32.mrf.mxu1 }
 0x701   :  { %v4384_v2 = vadd.f32 %v4383_v29, %v4295_v7  ;;  %v12406_v7 = vld [vmem:[#allocation74_spill] sm:$0xff]  ;;  %4943 = vmatpush.bf16.msra.mxu2 %v7975_v61 }
 0x702   :  { %v10799_v14 = vadd.f32 %v4564_v35, %v4476_v24  ;;  %4612 = vmatmul.bf16.gmra.mxu2 %v10022_v34  ;;  %4790 = vmatmul.bf16.gmra.mxu0 %v12157_v52 }
 0x703   :  { %v5211_v1 = vmax.f32 %v4384_v2, 0.0  ;;  %4879 = vmatmul.bf16.gmra.mxu1 %v12404_v38 }
 0x705   :  { %4701 = vmatmul.bf16.gmra.mxu3 %v12403_v31  ;;  %v10805_v59 = vpack.c.bf16 %v5211_v1, %v5207_v15  ;;  %v4297_v33 = vpop.f32.mrf.mxu2 }
 0x706   :  { %v4298_v29 = vadd.f32 %v4297_v33, %v12406_v7 }
 0x707   :  { %12405 = vst [vmem:[#allocation94_spill] sm:$0xff] %v10805_v59  ;;  %v4477_v2 = vpop.f32.mrf.mxu0 }
 0x708   :  { %v4386_v51 = vpop.f32.mrf.mxu3  ;;  %v4478_v24 = vadd.f32 %v4477_v2, %v10627_v23  ;;  %v4566_v35 = vpop.f32.mrf.mxu1 }
 0x709   :  { %v4387_v52 = vadd.f32 %v4386_v51, %v4298_v29  ;;  %v12408_v29 = vld [vmem:[#allocation81_spill] sm:$0xff] }
 0x70a   :  { %v10809_v38 = vadd.f32 %v4566_v35, %v4478_v24 }
 0x70b   :  { %v5215_v33 = vmax.f32 %v4387_v52, 0.0 }
 0x70d   :  { %v4299_v18 = vpop.f32.mrf.mxu2 }
 0x70e   :  { %v4300_v62 = vadd.f32 %v4299_v18, %v10580_v8  ;;  %v12410_v18 = vld [vmem:[#allocation66_spill] sm:$0xff] }
 0x70f   :  { %v4480_v15 = vpop.f32.mrf.mxu0 }
 0x710   :  { %v4388_v50 = vpop.f32.mrf.mxu3  ;;  %v4481_v46 = vadd.f32 %v4480_v15, %v10627_v23  ;;  %v4569_v56 = vpop.f32.mrf.mxu1 }
 0x711   :  { %v4389_v1 = vadd.f32 %v4388_v50, %v4300_v62 }
 0x712   :  { %v10813_v61 = vadd.f32 %v4569_v56, %v4481_v46  ;;  %4617 = vmatmul.bf16.gmra.mxu2 %v10036_v11  ;;  %4795 = vmatmul.bf16.gmra.mxu0 %v12164_v40  ;;  %v12411_v46 = vld [vmem:[#allocation67_spill] sm:$0xff] }
 0x713   :  { %v5219_v7 = vmax.f32 %v4389_v1, 0.0  ;;  %4884 = vmatmul.bf16.gmra.mxu1 %v12408_v29 }
 0x715   :  { %4706 = vmatmul.bf16.gmra.mxu3 %v12407_v41  ;;  %v10819_v51 = vpack.c.bf16 %v5219_v7, %v5215_v33  ;;  %v4302_v8 = vpop.f32.mrf.mxu2 }
 0x716   :  { %v4303_v2 = vadd.f32 %v4302_v8, %v12410_v18  ;;  %v12413_v18 = vld [vmem:[#allocation92_spill] sm:$0xff] }
 0x717   :  { %12409 = vst [vmem:[#allocation64_spill] sm:$0xff] %v10819_v51  ;;  %v4482_v35 = vpop.f32.mrf.mxu0 }
 0x718   :  { %v4391_v24 = vpop.f32.mrf.mxu3  ;;  %v4483_v52 = vadd.f32 %v4482_v35, %v10627_v23  ;;  %v4571_v50 = vpop.f32.mrf.mxu1  ;;  %v12416_v35 = vld [vmem:[#allocation98_spill] sm:$0xff] }
 0x719   :  { %v4392_v62 = vadd.f32 %v4391_v24, %v4303_v2  ;;  %v12414_v2 = vld [vmem:[#allocation83_spill] sm:$0xff]  ;;  %v12415_v24 = vld [vmem:[#allocation82_spill] sm:$0xff] }
 0x71a   :  { %v10823_v15 = vadd.f32 %v4571_v50, %v4483_v52  ;;  %v8741_v52 = vld [vmem:[#allocation8 + $0x26c] sm:$0xf]  ;;  %v7956_v50 = vld [vmem:[#allocation8 + $0x278] sm:$0xf0] }
 0x71b   :  { %v5223_v29 = vmax.f32 %v4392_v62, 0.0 }
 0x71d   :  { %v4304_v1 = vpop.f32.mrf.mxu2 }
 0x71e   :  { %v4305_v40 = vadd.f32 %v4304_v1, %v12411_v46  ;;  %v8773_v1 = vld [vmem:[#allocation8 + $0x36c] sm:$0xf]  ;;  %v7959_v46 = vor.u32 %v8741_v52, %v7956_v50 }
 0x71f   :  { %v4485_v59 = vpop.f32.mrf.mxu0 }
 0x720   :  { %v4393_v56 = vpop.f32.mrf.mxu3  ;;  %v4486_v33 = vadd.f32 %v4485_v59, %v10627_v23  ;;  %v4574_v7 = vpop.f32.mrf.mxu1  ;;  %4944 = vmatpush.bf16.msra.mxu2 %v7959_v46 }
 0x721   :  { %v4394_v21 = vadd.f32 %v4393_v56, %v4305_v40  ;;  %v8084_v40 = vld [vmem:[#allocation8 + $0x378] sm:$0xf0] }
 0x722   :  { %v10827_v8 = vadd.f32 %v4574_v7, %v4486_v33  ;;  %4622 = vmatmul.bf16.gmra.mxu2 %v12413_v18  ;;  %4800 = vmatmul.bf16.gmra.mxu0 %v12414_v2  ;;  %v8087_v62 = vor.u32 %v8773_v1, %v8084_v40 }
 0x723   :  { %v5227_v51 = vmax.f32 %v4394_v21, 0.0  ;;  %4889 = vmatmul.bf16.gmra.mxu1 %v12416_v35  ;;  %v12418_v21 = vld [vmem:[#allocation78_spill] sm:$0xff] }
 0x724   :  { %12412 = vst [vmem:[#allocation73_spill] sm:$0xff] %v10827_v8  ;;  %5033 = vmatpush.bf16.msra.mxu3 %v8087_v62  ;;  %v12421_v62 = vld [vmem:[#allocation60_spill] sm:$0xff] }
 0x725   :  { %4711 = vmatmul.bf16.gmra.mxu3 %v12415_v24  ;;  %v10833_v56 = vpack.c.bf16 %v5227_v51, %v5223_v29  ;;  %v4307_v59 = vpop.f32.mrf.mxu2 }
 0x726   :  { %v4308_v33 = vadd.f32 %v4307_v59, %v12418_v21 }
 0x727   :  { %12417 = vst [vmem:[#allocation96_spill] sm:$0xff] %v10833_v56  ;;  %v4487_v8 = vpop.f32.mrf.mxu0 }
 0x728   :  { %v4396_v7 = vpop.f32.mrf.mxu3  ;;  %v4488_v55 = vadd.f32 %v4487_v8, %v10627_v23  ;;  %v4576_v24 = vpop.f32.mrf.mxu1  ;;  %v12423_v8 = vld [vmem:[#allocation42_spill] sm:$0xff] }
 0x729   :  { %v4397_v2 = vadd.f32 %v4396_v7, %v4308_v33  ;;  %v12422_v33 = vld [vmem:[#allocation84_spill] sm:$0xff] }
 0x72a   :  { %v10837_v35 = vadd.f32 %v4576_v24, %v4488_v55  ;;  %v12424_v55 = vld [vmem:[#allocation99_spill] sm:$0xff]  ;;  %v8210_v24 = vld [vmem:[#allocation11 + $0x70] sm:$0xf] }
 0x72b   :  { %v5231_v59 = vmax.f32 %v4397_v2, 0.0 }
 0x72c   :  { %12419 = vst [vmem:[#allocation95_spill] sm:$0xff] %v10837_v35 }
 0x72d   :  { %v4309_v18 = vpop.f32.mrf.mxu2 }
 0x72e   :  { %v4310_v52 = vadd.f32 %v4309_v18, %v10608_v57  ;;  %v8807_v57 = vld [vmem:[#allocation11 + $0x74] sm:$0xf0] }
 0x72f   :  { %v4490_v51 = vpop.f32.mrf.mxu0 }
 0x730   :  { %v4398_v50 = vpop.f32.mrf.mxu3  ;;  %v4491_v1 = vadd.f32 %v4490_v51, %v10627_v23  ;;  %v4579_v40 = vpop.f32.mrf.mxu1 }
 0x731   :  { %v4399_v29 = vadd.f32 %v4398_v50, %v4310_v52  ;;  %v8211_v52 = vor.u32 %v8807_v57, %v8210_v24  ;;  %v12426_v50 = vld [vmem:[#allocation46_spill] sm:$0xff] }
 0x732   :  { %v10841_v46 = vadd.f32 %v4579_v40, %v4491_v1  ;;  %4627 = vmatmul.bf16.gmra.mxu2 %v12421_v62  ;;  %4805 = vmatmul.bf16.gmra.mxu0 %v12422_v33  ;;  %v10854_v62 = vperm.slane %v10624_v16, 3  ;;  %v12432_v16 = vld [vmem:[#allocation54_spill] sm:$0xff] }
 0x733   :  { %v5235_v21 = vmax.f32 %v4399_v29, 0.0  ;;  %4894 = vmatmul.bf16.gmra.mxu1 %v12424_v55  ;;  %5700 = vmatpush.bf16.msra.mxu0 %v8211_v52 }
 0x734   :  { %12420 = vst [vmem:[#allocation68_spill] sm:$0xff] %v10841_v46  ;;  %v8274_v46 = vld [vmem:[#allocation11 + $0xf0] sm:$0xf] }
 0x735   :  { %4716 = vmatmul.bf16.gmra.mxu3 %v12423_v8  ;;  %v10847_v18 = vpack.c.bf16 %v5235_v21, %v5231_v59  ;;  %v4312_v7 = vpop.f32.mrf.mxu2  ;;  %v8823_v8 = vld [vmem:[#allocation11 + $0xf4] sm:$0xf0]  ;;  %v12428_v21 = vld [vmem:[#allocation29_spill] sm:$0xff] }
 0x736   :  { %v4313_v51 = vadd.f32 %v4312_v7, %v12426_v50  ;;  %v8275_v55 = vor.u32 %v8823_v8, %v8274_v46  ;;  %v12431_v46 = vld [vmem:[#allocation85_spill] sm:$0xff]  ;;  %v12433_v8 = vld [vmem:[#allocation100_spill] sm:$0xff] }
 0x737   :  { %12425 = vst [vmem:[#allocation86_spill] sm:$0xff] %v10847_v18  ;;  %v4492_v29 = vpop.f32.mrf.mxu0 }
 0x738   :  { %v4401_v2 = vpop.f32.mrf.mxu3  ;;  %v4493_v40 = vadd.f32 %v4492_v29, %v10627_v23  ;;  %v4581_v56 = vpop.f32.mrf.mxu1  ;;  %5789 = vmatpush.bf16.msra.mxu1 %v8275_v55  ;;  %v12430_v29 = vld [vmem:[#allocation20_spill] sm:$0xff]  ;;  %v7940_v55 = vld [vmem:[#allocation8 + $0x258] sm:$0xf0] }
 0x739   :  { %v4402_v1 = vadd.f32 %v4401_v2, %v4313_v51 }
 0x73a   :  { %v10851_v33 = vadd.f32 %v4581_v56, %v4493_v40  ;;  %v8737_v40 = vld [vmem:[#allocation8 + $0x24c] sm:$0xf] }
 0x73b   :  { %v5239_v23 = vmax.f32 %v4402_v1, 0.0 }
 0x73c   :  { %12427 = vst [vmem:[#allocation97_spill] sm:$0xff] %v10851_v33  ;;  %v12437_v33 = vld [vmem:[#allocation77_spill] sm:$0xff] }
 0x73d   :  { %v4314_v59 = vpop.f32.mrf.mxu2 }
 0x73e   :  { %v4315_v24 = vadd.f32 %v4314_v59, %v12428_v21  ;;  %v8769_v59 = vld [vmem:[#allocation8 + $0x34c] sm:$0xf]  ;;  %v7943_v21 = vor.u32 %v8737_v40, %v7940_v55 }
 0x73f   :  { %v4771_v7 = vpop.f32.mrf.mxu0 }
 0x740   :  { %v4403_v57 = vpop.f32.mrf.mxu3  ;;  %v4772_v52 = vadd.f32 %v4771_v7, %v10854_v62  ;;  %v4860_v51 = vpop.f32.mrf.mxu1  ;;  %4945 = vmatpush.bf16.msra.mxu2 %v7943_v21 }
 0x741   :  { %v4404_v50 = vadd.f32 %v4403_v57, %v4315_v24  ;;  %v8068_v24 = vld [vmem:[#allocation8 + $0x358] sm:$0xf0] }
 0x742   :  { %v10858_v56 = vadd.f32 %v4860_v51, %v4772_v52  ;;  %4632 = vmatmul.bf16.gmra.mxu2 %v12430_v29  ;;  %4810 = vmatmul.bf16.gmra.mxu0 %v12431_v46  ;;  %v8071_v1 = vor.u32 %v8769_v59, %v8068_v24 }
 0x743   :  { %v5243_v2 = vmax.f32 %v4404_v50, 0.0  ;;  %4899 = vmatmul.bf16.gmra.mxu1 %v12433_v8  ;;  %v12435_v50 = vld [vmem:[#allocation47_spill] sm:$0xff] }
 0x744   :  { %12429 = vst [vmem:[#allocation74_spill] sm:$0xff] %v10858_v56  ;;  %5034 = vmatpush.bf16.msra.mxu3 %v8071_v1  ;;  %v12439_v1 = vld [vmem:[#allocation21_spill] sm:$0xff] }
 0x745   :  { %4721 = vmatmul.bf16.gmra.mxu3 %v12432_v16  ;;  %v10864_v57 = vpack.c.bf16 %v5243_v2, %v5239_v23  ;;  %v4593_v7 = vpop.f32.mrf.mxu2 }
 0x746   :  { %v4594_v52 = vadd.f32 %v4593_v7, %v12435_v50 }
 0x747   :  { %12434 = vst [vmem:[#allocation50_spill] sm:$0xff] %v10864_v57  ;;  %v4773_v18 = vpop.f32.mrf.mxu0 }
 0x748   :  { %v4682_v51 = vpop.f32.mrf.mxu3  ;;  %v4774_v56 = vadd.f32 %v4773_v18, %v10854_v62  ;;  %v4862_v16 = vpop.f32.mrf.mxu1  ;;  %v12441_v18 = vld [vmem:[#allocation28_spill] sm:$0xff] }
 0x749   :  { %v4683_v46 = vadd.f32 %v4682_v51, %v4594_v52  ;;  %v12440_v52 = vld [vmem:[#allocation87_spill] sm:$0xff] }
 0x74a   :  { %v10868_v8 = vadd.f32 %v4862_v16, %v4774_v56  ;;  %v12442_v56 = vld [vmem:[#allocation23_spill] sm:$0xff]  ;;  %v8202_v16 = vld [vmem:[#allocation11 + $0x60] sm:$0xf] }
 0x74b   :  { %v5120_v7 = vmax.f32 %v4683_v46, 0.0 }
 0x74c   :  { %12436 = vst [vmem:[#allocation81_spill] sm:$0xff] %v10868_v8  ;;  %v12455_v8 = vld [vmem:[#allocation61_spill] sm:$0xff] }
 0x74d   :  { %v4595_v29 = vpop.f32.mrf.mxu2 }
 0x74e   :  { %v4596_v40 = vadd.f32 %v4595_v29, %v12437_v33  ;;  %v8805_v33 = vld [vmem:[#allocation11 + $0x64] sm:$0xf0] }
 0x74f   :  { %v4776_v23 = vpop.f32.mrf.mxu0  ;;  %v8203_v51 = vor.u32 %v8805_v33, %v8202_v16 }
 0x750   :  { %v4684_v55 = vpop.f32.mrf.mxu3  ;;  %v4777_v59 = vadd.f32 %v4776_v23, %v10854_v62  ;;  %v4865_v24 = vpop.f32.mrf.mxu1 }
 0x751   :  { %v4685_v2 = vadd.f32 %v4684_v55, %v4596_v40  ;;  %v12444_v55 = vld [vmem:[#allocation51_spill] sm:$0xff]  ;;  %5701 = vmatpush.bf16.msra.mxu0 %v8203_v51 }
 0x752   :  { %v10872_v21 = vadd.f32 %v4865_v24, %v4777_v59  ;;  %4637 = vmatmul.bf16.gmra.mxu2 %v12439_v1  ;;  %4815 = vmatmul.bf16.gmra.mxu0 %v12440_v52 }
 0x753   :  { %v5124_v50 = vmax.f32 %v4685_v2, 0.0  ;;  %4904 = vmatmul.bf16.gmra.mxu1 %v12442_v56 }
 0x754   :  { %12438 = vst [vmem:[#allocation66_spill] sm:$0xff] %v10872_v21  ;;  %v8266_v21 = vld [vmem:[#allocation11 + $0xe0] sm:$0xf] }
 0x755   :  { %4726 = vmatmul.bf16.gmra.mxu3 %v12441_v18  ;;  %v10878_v29 = vpack.c.bf16 %v5124_v50, %v5120_v7  ;;  %v4598_v40 = vpop.f32.mrf.mxu2  ;;  %v8821_v18 = vld [vmem:[#allocation11 + $0xe4] sm:$0xf0]  ;;  %v12446_v7 = vld [vmem:[#allocation55_spill] sm:$0xff] }
 0x756   :  { %v4599_v23 = vadd.f32 %v4598_v40, %v12444_v55  ;;  %v8267_v56 = vor.u32 %v8821_v18, %v8266_v21  ;;  %v12451_v21 = vld [vmem:[#allocation40_spill] sm:$0xff]  ;;  %v8733_v18 = vld [vmem:[#allocation8 + $0x22c] sm:$0xf] }
 0x757   :  { %12443 = vst [vmem:[#allocation67_spill] sm:$0xff] %v10878_v29  ;;  %v4778_v2 = vpop.f32.mrf.mxu0 }
 0x758   :  { %v4687_v46 = vpop.f32.mrf.mxu3  ;;  %v4779_v24 = vadd.f32 %v4778_v2, %v10854_v62  ;;  %v4867_v57 = vpop.f32.mrf.mxu1  ;;  %5790 = vmatpush.bf16.msra.mxu1 %v8267_v56  ;;  %v12448_v2 = vld [vmem:[#allocation63_spill] sm:$0xff]  ;;  %v8765_v56 = vld [vmem:[#allocation8 + $0x32c] sm:$0xf] }
 0x759   :  { %v4688_v59 = vadd.f32 %v4687_v46, %v4599_v23 }
 0x75a   :  { %v10882_v52 = vadd.f32 %v4867_v57, %v4779_v24  ;;  %v12449_v57 = vld [vmem:[#allocation88_spill] sm:$0xff]  ;;  %v12450_v24 = vld [vmem:[#allocation58_spill] sm:$0xff] }
 0x75b   :  { %v5128_v55 = vmax.f32 %v4688_v59, 0.0 }
 0x75c   :  { %12445 = vst [vmem:[#allocation83_spill] sm:$0xff] %v10882_v52 }
 0x75d   :  { %v4600_v1 = vpop.f32.mrf.mxu2 }
 0x75e   :  { %v4601_v50 = vadd.f32 %v4600_v1, %v12446_v7  ;;  %v7924_v1 = vld [vmem:[#allocation8 + $0x238] sm:$0xf0] }
 0x75f   :  { %v4781_v33 = vpop.f32.mrf.mxu0  ;;  %v7927_v7 = vor.u32 %v8733_v18, %v7924_v1 }
 0x760   :  { %v4689_v16 = vpop.f32.mrf.mxu3  ;;  %v4782_v40 = vadd.f32 %v4781_v33, %v10854_v62  ;;  %v4870_v51 = vpop.f32.mrf.mxu1 }
 0x761   :  { %v4690_v29 = vadd.f32 %v4689_v16, %v4601_v50  ;;  %v8052_v50 = vld [vmem:[#allocation8 + $0x338] sm:$0xf0]  ;;  %4946 = vmatpush.bf16.msra.mxu2 %v7927_v7 }
 0x762   :  { %v10886_v46 = vadd.f32 %v4870_v51, %v4782_v40  ;;  %4642 = vmatmul.bf16.gmra.mxu2 %v12448_v2  ;;  %4820 = vmatmul.bf16.gmra.mxu0 %v12449_v57  ;;  %v8055_v59 = vor.u32 %v8765_v56, %v8052_v50 }
 0x763   :  { %v5132_v23 = vmax.f32 %v4690_v29, 0.0  ;;  %4909 = vmatmul.bf16.gmra.mxu1 %v12451_v21  ;;  %v12453_v29 = vld [vmem:[#allocation57_spill] sm:$0xff] }
 0x764   :  { %12447 = vst [vmem:[#allocation98_spill] sm:$0xff] %v10886_v46  ;;  %5035 = vmatpush.bf16.msra.mxu3 %v8055_v59  ;;  %v12457_v59 = vld [vmem:[#allocation22_spill] sm:$0xff] }
 0x765   :  { %4731 = vmatmul.bf16.gmra.mxu3 %v12450_v24  ;;  %v10892_v16 = vpack.c.bf16 %v5132_v23, %v5128_v55  ;;  %v4603_v33 = vpop.f32.mrf.mxu2 }
 0x766   :  { %v4604_v40 = vadd.f32 %v4603_v33, %v12453_v29 }
 0x767   :  { %12452 = vst [vmem:[#allocation78_spill] sm:$0xff] %v10892_v16  ;;  %v4783_v46 = vpop.f32.mrf.mxu0 }
 0x768   :  { %v4692_v51 = vpop.f32.mrf.mxu3  ;;  %v4784_v24 = vadd.f32 %v4783_v46, %v10854_v62  ;;  %v4872_v2 = vpop.f32.mrf.mxu1  ;;  %v12459_v46 = vld [vmem:[#allocation32_spill] sm:$0xff] }
 0x769   :  { %v4693_v57 = vadd.f32 %v4692_v51, %v4604_v40  ;;  %v12458_v40 = vld [vmem:[#allocation89_spill] sm:$0xff] }
 0x76a   :  { %v10896_v21 = vadd.f32 %v4872_v2, %v4784_v24  ;;  %v12460_v2 = vld [vmem:[#allocation41_spill] sm:$0xff]  ;;  %v8194_v24 = vld [vmem:[#allocation11 + $0x50] sm:$0xf] }
 0x76b   :  { %v5136_v33 = vmax.f32 %v4693_v57, 0.0 }
 0x76c   :  { %12454 = vst [vmem:[#allocation84_spill] sm:$0xff] %v10896_v21  ;;  %v8186_v21 = vld [vmem:[#allocation11 + $0x40] sm:$0xf] }
 0x76d   :  { %v4605_v52 = vpop.f32.mrf.mxu2 }
 0x76e   :  { %v4606_v18 = vadd.f32 %v4605_v52, %v12455_v8  ;;  %v8803_v8 = vld [vmem:[#allocation11 + $0x54] sm:$0xf0] }
 0x76f   :  { %v4786_v55 = vpop.f32.mrf.mxu0  ;;  %v8195_v52 = vor.u32 %v8803_v8, %v8194_v24  ;;  %v12464_v24 = vld [vmem:[#allocation70_spill] sm:$0xff] }
 0x770   :  { %v4694_v1 = vpop.f32.mrf.mxu3  ;;  %v4787_v56 = vadd.f32 %v4786_v55, %v10854_v62  ;;  %v4875_v50 = vpop.f32.mrf.mxu1 }
 0x771   :  { %v4695_v23 = vadd.f32 %v4694_v1, %v4606_v18  ;;  %v12462_v1 = vld [vmem:[#allocation48_spill] sm:$0xff]  ;;  %5702 = vmatpush.bf16.msra.mxu0 %v8195_v52 }
 0x772   :  { %v10900_v7 = vadd.f32 %v4875_v50, %v4787_v56  ;;  %4647 = vmatmul.bf16.gmra.mxu2 %v12457_v59  ;;  %4825 = vmatmul.bf16.gmra.mxu0 %v12458_v40 }
 0x773   :  { %v5140_v29 = vmax.f32 %v4695_v23, 0.0  ;;  %4914 = vmatmul.bf16.gmra.mxu1 %v12460_v2 }
 0x774   :  { %12456 = vst [vmem:[#allocation99_spill] sm:$0xff] %v10900_v7  ;;  %v8258_v7 = vld [vmem:[#allocation11 + $0xd0] sm:$0xf] }
 0x775   :  { %4736 = vmatmul.bf16.gmra.mxu3 %v12459_v46  ;;  %v10906_v51 = vpack.c.bf16 %v5140_v29, %v5136_v33  ;;  %v4608_v18 = vpop.f32.mrf.mxu2  ;;  %v8819_v46 = vld [vmem:[#allocation11 + $0xd4] sm:$0xf0] }
 0x776   :  { %v4609_v55 = vadd.f32 %v4608_v18, %v12462_v1  ;;  %v8259_v2 = vor.u32 %v8819_v46, %v8258_v7  ;;  %v12469_v7 = vld [vmem:[#allocation26_spill] sm:$0xff]  ;;  %v8729_v46 = vld [vmem:[#allocation8 + $0x20c] sm:$0xf] }
 0x777   :  { %12461 = vst [vmem:[#allocation46_spill] sm:$0xff] %v10906_v51  ;;  %v4788_v23 = vpop.f32.mrf.mxu0 }
 0x778   :  { %v4697_v57 = vpop.f32.mrf.mxu3  ;;  %v4789_v50 = vadd.f32 %v4788_v23, %v10854_v62  ;;  %v4877_v16 = vpop.f32.mrf.mxu1  ;;  %5791 = vmatpush.bf16.msra.mxu1 %v8259_v2  ;;  %v12466_v23 = vld [vmem:[#allocation25_spill] sm:$0xff] }
 0x779   :  { %v4698_v56 = vadd.f32 %v4697_v57, %v4609_v55  ;;  %v8761_v2 = vld [vmem:[#allocation8 + $0x30c] sm:$0xf] }
 0x77a   :  { %v10910_v40 = vadd.f32 %v4877_v16, %v4789_v50  ;;  %v12467_v16 = vld [vmem:[#allocation52_spill] sm:$0xff]  ;;  %v12468_v50 = vld [vmem:[#allocation62_spill] sm:$0xff] }
 0x77b   :  { %v5144_v1 = vmax.f32 %v4698_v56, 0.0 }
 0x77c   :  { %12463 = vst [vmem:[#allocation29_spill] sm:$0xff] %v10910_v40 }
 0x77d   :  { %v4610_v59 = vpop.f32.mrf.mxu2 }
 0x77e   :  { %v4611_v33 = vadd.f32 %v4610_v59, %v12464_v24  ;;  %v7908_v59 = vld [vmem:[#allocation8 + $0x218] sm:$0xf0] }
 0x77f   :  { %v4791_v8 = vpop.f32.mrf.mxu0  ;;  %v7911_v24 = vor.u32 %v8729_v46, %v7908_v59  ;;  %v8801_v46 = vld [vmem:[#allocation11 + $0x44] sm:$0xf0]  ;;  %v8250_v59 = vld [vmem:[#allocation11 + $0xc0] sm:$0xf] }
 0x780   :  { %v4699_v29 = vpop.f32.mrf.mxu3  ;;  %v4792_v18 = vadd.f32 %v4791_v8, %v10854_v62  ;;  %v4880_v52 = vpop.f32.mrf.mxu1 }
 0x781   :  { %v4700_v51 = vadd.f32 %v4699_v29, %v4611_v33  ;;  %v8036_v33 = vld [vmem:[#allocation8 + $0x318] sm:$0xf0]  ;;  %4947 = vmatpush.bf16.msra.mxu2 %v7911_v24 }
 0x782   :  { %v10914_v57 = vadd.f32 %v4880_v52, %v4792_v18  ;;  %4652 = vmatmul.bf16.gmra.mxu2 %v12466_v23  ;;  %4830 = vmatmul.bf16.gmra.mxu0 %v12467_v16  ;;  %v8039_v56 = vor.u32 %v8761_v2, %v8036_v33  ;;  %v8187_v2 = vor.u32 %v8801_v46, %v8186_v21  ;;  %v8817_v33 = vld [vmem:[#allocation11 + $0xc4] sm:$0xf0] }
 0x783   :  { %v5148_v55 = vmax.f32 %v4700_v51, 0.0  ;;  %4919 = vmatmul.bf16.gmra.mxu1 %v12469_v7  ;;  %v12471_v51 = vld [vmem:[#allocation71_spill] sm:$0xff] }
 0x784   :  { %12465 = vst [vmem:[#allocation85_spill] sm:$0xff] %v10914_v57  ;;  %5036 = vmatpush.bf16.msra.mxu3 %v8039_v56  ;;  %5703 = vmatpush.bf16.msra.mxu0 %v8187_v2  ;;  %v12474_v2 = vld [vmem:[#allocation76_spill] sm:$0xff] }
 0x785   :  { %4741 = vmatmul.bf16.gmra.mxu3 %v12468_v50  ;;  %v10920_v29 = vpack.c.bf16 %v5148_v55, %v5144_v1  ;;  %v4613_v8 = vpop.f32.mrf.mxu2  ;;  %v12473_v1 = vld [vmem:[#allocation75_spill] sm:$0xff] }
 0x786   :  { %v4614_v18 = vadd.f32 %v4613_v8, %v12471_v51  ;;  %v8251_v51 = vor.u32 %v8817_v33, %v8250_v59 }
 0x787   :  { %12470 = vst [vmem:[#allocation100_spill] sm:$0xff] %v10920_v29  ;;  %v4793_v57 = vpop.f32.mrf.mxu0 }
 0x788   :  { %v4702_v52 = vpop.f32.mrf.mxu3  ;;  %v4794_v50 = vadd.f32 %v4793_v57, %v10854_v62  ;;  %v4882_v23 = vpop.f32.mrf.mxu1  ;;  %5792 = vmatpush.bf16.msra.mxu1 %v8251_v51  ;;  %v8178_v57 = vld [vmem:[#allocation11 + $0x30] sm:$0xf] }
 0x789   :  { %v4703_v16 = vadd.f32 %v4702_v52, %v4614_v18 }
 0x78a   :  { %v10924_v7 = vadd.f32 %v4882_v23, %v4794_v50  ;;  %v8799_v23 = vld [vmem:[#allocation11 + $0x34] sm:$0xf0]  ;;  %v8242_v50 = vld [vmem:[#allocation11 + $0xb0] sm:$0xf] }
 0x78b   :  { %v5152_v52 = vmax.f32 %v4703_v16, 0.0  ;;  %v8179_v21 = vor.u32 %v8799_v23, %v8178_v57  ;;  %v8170_v16 = vld [vmem:[#allocation11 + $0x20] sm:$0xf]  ;;  %v8795_v23 = vld [vmem:[#allocation11 + $0x14] sm:$0xf0] }
 0x78c   :  { %12472 = vst [vmem:[#allocation47_spill] sm:$0xff] %v10924_v7 }
 0x78d   :  { %v4615_v40 = vpop.f32.mrf.mxu2  ;;  %5704 = vmatpush.bf16.msra.mxu0 %v8179_v21 }
 0x78e   :  { %v4616_v55 = vadd.f32 %v4615_v40, %v12473_v1  ;;  %v8815_v40 = vld [vmem:[#allocation11 + $0xb4] sm:$0xf0]  ;;  %v8797_v1 = vld [vmem:[#allocation11 + $0x24] sm:$0xf0] }
 0x78f   :  { %v4796_v8 = vpop.f32.mrf.mxu0  ;;  %v8171_v51 = vor.u32 %v8797_v1, %v8170_v16  ;;  %v8154_v16 = vld [vmem:[#allocation11] sm:$0xf]  ;;  %v8793_v1 = vld [vmem:[#allocation11 + $0x4] sm:$0xf0] }
 0x790   :  { %v4704_v29 = vpop.f32.mrf.mxu3  ;;  %v4797_v56 = vadd.f32 %v4796_v8, %v10854_v62  ;;  %v4885_v18 = vpop.f32.mrf.mxu1 }
 0x791   :  { %v4705_v24 = vadd.f32 %v4704_v29, %v4616_v55  ;;  %v8243_v29 = vor.u32 %v8815_v40, %v8242_v50  ;;  %v8234_v55 = vld [vmem:[#allocation11 + $0xa0] sm:$0xf]  ;;  %5705 = vmatpush.bf16.msra.mxu0 %v8171_v51  ;;  %v8226_v50 = vld [vmem:[#allocation11 + $0x90] sm:$0xf]  ;;  %v8811_v40 = vld [vmem:[#allocation11 + $0x94] sm:$0xf0] }
 0x792   :  { %v10928_v35 = vadd.f32 %v4885_v18, %v4797_v56  ;;  %4657 = vmatmul.bf16.gmra.mxu2 %v12300_v27  ;;  %4835 = vmatmul.bf16.gmra.mxu0 %v12222_v3  ;;  %v8813_v3 = vld [vmem:[#allocation11 + $0xa4] sm:$0xf0] }
 0x793   :  { %v5156_v7 = vmax.f32 %v4705_v24, 0.0  ;;  %4924 = vmatmul.bf16.gmra.mxu1 %v12223_v63  ;;  %v8235_v56 = vor.u32 %v8813_v3, %v8234_v55  ;;  %v8218_v55 = vld [vmem:[#allocation11 + $0x80] sm:$0xf]  ;;  %v8809_v51 = vld [vmem:[#allocation11 + $0x84] sm:$0xf0] }
 0x794   :  { %5793 = vmatpush.bf16.msra.mxu1 %v8243_v29  ;;  %v8227_v29 = vor.u32 %v8811_v40, %v8226_v50  ;;  %v8402_v40 = vld [vmem:[#allocation11 + $0x1f0] sm:$0xf] }
 0x795   :  { %4746 = vmatmul.bf16.gmra.mxu3 %v10377_v54  ;;  %v10934_v46 = vpack.c.bf16 %v5156_v7, %v5152_v52  ;;  %v4618_v59 = vpop.f32.mrf.mxu2  ;;  %v8162_v7 = vld [vmem:[#allocation11 + $0x10] sm:$0xf] }
 0x796   :  { %v4619_v33 = vadd.f32 %v4618_v59, %v12474_v2  ;;  %v8163_v21 = vor.u32 %v8795_v23, %v8162_v7 }
 0x797   :  { %v4798_v24 = vpop.f32.mrf.mxu0 }
 0x798   :  { %v4707_v8 = vpop.f32.mrf.mxu3  ;;  %v4799_v57 = vadd.f32 %v4798_v24, %v10854_v62  ;;  %v4887_v63 = vpop.f32.mrf.mxu1  ;;  %5794 = vmatpush.bf16.msra.mxu1 %v8235_v56  ;;  %5706 = vmatpush.bf16.msra.mxu0 %v8163_v21  ;;  %v8219_v24 = vor.u32 %v8809_v51, %v8218_v55  ;;  %v8839_v21 = vld [vmem:[#allocation11 + $0x174] sm:$0xf0] }
 0x799   :  { %v4708_v18 = vadd.f32 %v4707_v8, %v4619_v33  ;;  %v8155_v8 = vor.u32 %v8793_v1, %v8154_v16 }
 0x79a   :  { %v10938_v52 = vadd.f32 %v4887_v63, %v4799_v57 }
 0x79b   :  { %v5160_v7 = vmax.f32 %v4708_v18, 0.0 }
 0x79c   :  { %5795 = vmatpush.bf16.msra.mxu1 %v8227_v29  ;;  %5707 = vmatpush.bf16.msra.mxu0 %v8155_v8 }
 0x79d   :  { %v4620_v59 = vpop.f32.mrf.mxu2 }
 0x79e   :  { %v4621_v2 = vadd.f32 %v4620_v59, %v10711_v32  ;;  %v8338_v32 = vld [vmem:[#allocation11 + $0x170] sm:$0xf]  ;;  %v8855_v59 = vld [vmem:[#allocation11 + $0x1f4] sm:$0xf0] }
 0x79f   :  { %v4801_v3 = vpop.f32.mrf.mxu0  ;;  %v8339_v29 = vor.u32 %v8839_v21, %v8338_v32  ;;  %v8403_v18 = vor.u32 %v8855_v59, %v8402_v40 }
 0x7a0   :  { %v4709_v33 = vpop.f32.mrf.mxu3  ;;  %v4802_v57 = vadd.f32 %v4801_v3, %v10854_v62  ;;  %v4890_v63 = vpop.f32.mrf.mxu1  ;;  %5796 = vmatpush.bf16.msra.mxu1 %v8219_v24 }
 0x7a1   :  { %v4710_v56 = vadd.f32 %v4709_v33, %v4621_v2  ;;  %5878 = vmatpush.bf16.msrb.mxu2 %v8339_v29  ;;  %5967 = vmatpush.bf16.msrb.mxu3 %v8403_v18 }
 0x7a2   :  { %v10942_v50 = vadd.f32 %v4890_v63, %v4802_v57  ;;  %4662 = vmatmul.bf16.gmra.mxu2 %v12303_v58  ;;  %4840 = vmatmul.bf16.gmra.mxu0 %v12225_v60 }
 0x7a3   :  { %v5164_v23 = vmax.f32 %v4710_v56, 0.0  ;;  %4929 = vmatmul.bf16.gmra.mxu1 %v12226_v26 }
 0x7a5   :  { %4751 = vmatmul.bf16.gmra.mxu3 %v10391_v53  ;;  %v10948_v16 = vpack.c.bf16 %v5164_v23, %v5160_v7  ;;  %v4623_v1 = vpop.f32.mrf.mxu2 }
 0x7a6   :  { %v4624_v55 = vadd.f32 %v4623_v1, %v10715_v17 }
 0x7a7   :  { %v4803_v33 = vpop.f32.mrf.mxu0 }
 0x7a8   :  { %v4712_v2 = vpop.f32.mrf.mxu3  ;;  %v4804_v8 = vadd.f32 %v4803_v33, %v10854_v62  ;;  %v4892_v51 = vpop.f32.mrf.mxu1 }
 0x7a9   :  { %v4713_v60 = vadd.f32 %v4712_v2, %v4624_v55 }
 0x7aa   :  { %v10952_v26 = vadd.f32 %v4892_v51, %v4804_v8 }
 0x7ab   :  { %v5168_v17 = vmax.f32 %v4713_v60, 0.0 }
 0x7ad   :  { %v4625_v3 = vpop.f32.mrf.mxu2 }
 0x7ae   :  { %v4626_v24 = vadd.f32 %v4625_v3, %v10725_v9 }
 0x7af   :  { %v4806_v57 = vpop.f32.mrf.mxu0 }
 0x7b0   :  { %v4714_v56 = vpop.f32.mrf.mxu3  ;;  %v4807_v7 = vadd.f32 %v4806_v57, %v10854_v62  ;;  %v4895_v23 = vpop.f32.mrf.mxu1 }
 0x7b1   :  { %v4715_v63 = vadd.f32 %v4714_v56, %v4626_v24 }
 0x7b2   :  { %v10956_v21 = vadd.f32 %v4895_v23, %v4807_v7  ;;  %4667 = vmatmul.bf16.gmra.mxu2 %v12305_v20  ;;  %4845 = vmatmul.bf16.gmra.mxu0 %v12228_v10  ;;  %v12477_v7 = vld [vmem:[#allocation43_spill] sm:$0xff]  ;;  %v8330_v23 = vld [vmem:[#allocation11 + $0x160] sm:$0xf] }
 0x7b3   :  { %v5172_v32 = vmax.f32 %v4715_v63, 0.0  ;;  %4934 = vmatmul.bf16.gmra.mxu1 %v12229_v4  ;;  %v12476_v63 = vld [vmem:[#allocation56_spill] sm:$0xff] }
 0x7b5   :  { %4756 = vmatmul.bf16.gmra.mxu3 %v10408_v13  ;;  %v10962_v40 = vpack.c.bf16 %v5172_v32, %v5168_v17  ;;  %v4628_v9 = vpop.f32.mrf.mxu2  ;;  %v8394_v17 = vld [vmem:[#allocation11 + $0x1e0] sm:$0xf] }
 0x7b6   :  { %v4629_v29 = vadd.f32 %v4628_v9, %v10729_v49  ;;  %v8853_v9 = vld [vmem:[#allocation11 + $0x1e4] sm:$0xf0] }
 0x7b7   :  { %12475 = vst [vmem:[#allocation77_spill] sm:$0xff] %v10962_v40  ;;  %v4808_v1 = vpop.f32.mrf.mxu0 }
 0x7b8   :  { %v4717_v59 = vpop.f32.mrf.mxu3  ;;  %v4809_v55 = vadd.f32 %v4808_v1, %v10854_v62  ;;  %v4897_v2 = vpop.f32.mrf.mxu1  ;;  %v8395_v1 = vor.u32 %v8853_v9, %v8394_v17  ;;  %v12479_v17 = vld [vmem:[#allocation38_spill] sm:$0xff] }
 0x7b9   :  { %v4718_v18 = vadd.f32 %v4717_v59, %v4629_v29 }
 0x7ba   :  { %v10966_v33 = vadd.f32 %v4897_v2, %v4809_v55  ;;  %5968 = vmatpush.bf16.msrb.mxu3 %v8395_v1 }
 0x7bb   :  { %v5176_v56 = vmax.f32 %v4718_v18, 0.0 }
 0x7bd   :  { %v4630_v60 = vpop.f32.mrf.mxu2 }
 0x7be   :  { %v4631_v10 = vadd.f32 %v4630_v60, %v10739_v45  ;;  %v8837_v45 = vld [vmem:[#allocation11 + $0x164] sm:$0xf0] }
 0x7bf   :  { %v4811_v51 = vpop.f32.mrf.mxu0  ;;  %v8331_v32 = vor.u32 %v8837_v45, %v8330_v23 }
 0x7c0   :  { %v4719_v8 = vpop.f32.mrf.mxu3  ;;  %v4812_v4 = vadd.f32 %v4811_v51, %v10854_v62  ;;  %v4900_v24 = vpop.f32.mrf.mxu1 }
 0x7c1   :  { %v4720_v3 = vadd.f32 %v4719_v8, %v4631_v10  ;;  %5879 = vmatpush.bf16.msrb.mxu2 %v8331_v32  ;;  %v12480_v32 = vld [vmem:[#allocation45_spill] sm:$0xff] }
 0x7c2   :  { %v10970_v49 = vadd.f32 %v4900_v24, %v4812_v4  ;;  %4948 = vmatmul.bf16.vlgmr.msra.gmra.mxu2 %v12232_v42  ;;  %5708 = vmatmul.bf16.vlgmr.msra.gmra.mxu0 %v12476_v63 }
 0x7c3   :  { %v5180_v57 = vmax.f32 %v4720_v3, 0.0  ;;  %5797 = vmatmul.bf16.vlgmr.msra.gmra.mxu1 %v12477_v7 }
 0x7c5   :  { %5037 = vmatmul.bf16.vlgmr.msra.gmra.mxu3 %v10195_v48  ;;  %v10976_v29 = vpack.c.bf16 %v5180_v57, %v5176_v56  ;;  %v4633_v59 = vpop.f32.mrf.mxu2 }
 0x7c6   :  { %v4634_v18 = vadd.f32 %v4633_v59, %v10743_v22 }
 0x7c7   :  { %12478 = vst [vmem:[#allocation87_spill] sm:$0xff] %v10976_v29  ;;  %v4813_v42 = vpop.f32.mrf.mxu0  ;;  %v12520_v29 = vld [vmem:[#allocation81_spill] sm:$0xff] }
 0x7c8   :  { %v4722_v55 = vpop.f32.mrf.mxu3  ;;  %v4814_v48 = vadd.f32 %v4813_v42, %v10854_v62  ;;  %v4902_v60 = vpop.f32.mrf.mxu1 }
 0x7c9   :  { %v4723_v2 = vadd.f32 %v4722_v55, %v4634_v18 }
 0x7ca   :  { %v10980_v10 = vadd.f32 %v4902_v60, %v4814_v48 }
 0x7cb   :  { %v5184_v22 = vmax.f32 %v4723_v2, 0.0 }
 0x7cd   :  { %v4635_v8 = vpop.f32.mrf.mxu2 }
 0x7ce   :  { %v4636_v51 = vadd.f32 %v4635_v8, %v10753_v25 }
 0x7cf   :  { %v4816_v4 = vpop.f32.mrf.mxu0 }
 0x7d0   :  { %v4724_v3 = vpop.f32.mrf.mxu3  ;;  %v4817_v56 = vadd.f32 %v4816_v4, %v10854_v62  ;;  %v4905_v57 = vpop.f32.mrf.mxu1 }
 0x7d1   :  { %v4725_v24 = vadd.f32 %v4724_v3, %v4636_v51 }
 0x7d2   :  { %v10984_v45 = vadd.f32 %v4905_v57, %v4817_v56  ;;  %4953 = vmatmul.bf16.gmra.mxu2 %v12235_v0  ;;  %5713 = vmatmul.bf16.gmra.mxu0 %v12479_v17  ;;  %v12482_v57 = vld [vmem:[#allocation44_spill] sm:$0xff] }
 0x7d3   :  { %v5188_v23 = vmax.f32 %v4725_v24, 0.0  ;;  %5802 = vmatmul.bf16.gmra.mxu1 %v12480_v32 }
 0x7d5   :  { %5042 = vmatmul.bf16.gmra.mxu3 %v10209_v36  ;;  %v10990_v9 = vpack.c.bf16 %v5188_v23, %v5184_v22  ;;  %v4638_v25 = vpop.f32.mrf.mxu2  ;;  %v12483_v22 = vld [vmem:[#allocation53_spill] sm:$0xff]  ;;  %v8322_v23 = vld [vmem:[#allocation11 + $0x150] sm:$0xf] }
 0x7d6   :  { %v4639_v59 = vadd.f32 %v4638_v25, %v10757_v19  ;;  %v8386_v25 = vld [vmem:[#allocation11 + $0x1d0] sm:$0xf] }
 0x7d7   :  { %12481 = vst [vmem:[#allocation23_spill] sm:$0xff] %v10990_v9  ;;  %v4818_v18 = vpop.f32.mrf.mxu0  ;;  %v12501_v9 = vld [vmem:[#allocation95_spill] sm:$0xff] }
 0x7d8   :  { %v4727_v1 = vpop.f32.mrf.mxu3  ;;  %v4819_v42 = vadd.f32 %v4818_v18, %v10854_v62  ;;  %v4907_v2 = vpop.f32.mrf.mxu1 }
 0x7d9   :  { %v4728_v55 = vadd.f32 %v4727_v1, %v4639_v59  ;;  %v8851_v1 = vld [vmem:[#allocation11 + $0x1d4] sm:$0xf0] }
 0x7da   :  { %v10994_v48 = vadd.f32 %v4907_v2, %v4819_v42 }
 0x7db   :  { %v5192_v24 = vmax.f32 %v4728_v55, 0.0  ;;  %v8387_v55 = vor.u32 %v8851_v1, %v8386_v25  ;;  %v12485_v1 = vld [vmem:[#allocation93_spill] sm:$0xff] }
 0x7dd   :  { %v4640_v0 = vpop.f32.mrf.mxu2  ;;  %5969 = vmatpush.bf16.msrb.mxu3 %v8387_v55 }
 0x7de   :  { %v4641_v60 = vadd.f32 %v4640_v0, %v10767_v6  ;;  %v8835_v6 = vld [vmem:[#allocation11 + $0x154] sm:$0xf0] }
 0x7df   :  { %v4821_v36 = vpop.f32.mrf.mxu0  ;;  %v8323_v59 = vor.u32 %v8835_v6, %v8322_v23 }
 0x7e0   :  { %v4729_v8 = vpop.f32.mrf.mxu3  ;;  %v4822_v3 = vadd.f32 %v4821_v36, %v10854_v62  ;;  %v4910_v4 = vpop.f32.mrf.mxu1 }
 0x7e1   :  { %v4730_v51 = vadd.f32 %v4729_v8, %v4641_v60  ;;  %5880 = vmatpush.bf16.msrb.mxu2 %v8323_v59 }
 0x7e2   :  { %v10998_v19 = vadd.f32 %v4910_v4, %v4822_v3  ;;  %4958 = vmatmul.bf16.gmra.mxu2 %v12238_v39  ;;  %5718 = vmatmul.bf16.gmra.mxu0 %v12482_v57 }
 0x7e3   :  { %v5196_v56 = vmax.f32 %v4730_v51, 0.0  ;;  %5807 = vmatmul.bf16.gmra.mxu1 %v12483_v22 }
 0x7e5   :  { %5047 = vmatmul.bf16.gmra.mxu3 %v12398_v47  ;;  %v11004_v18 = vpack.c.bf16 %v5196_v56, %v5192_v24  ;;  %v4643_v42 = vpop.f32.mrf.mxu2 }
 0x7e6   :  { %v4644_v2 = vadd.f32 %v4643_v42, %v10771_v44  ;;  %v12486_v42 = vld [vmem:[#allocation36_spill] sm:$0xff] }
 0x7e7   :  { %12484 = vst [vmem:[#allocation51_spill] sm:$0xff] %v11004_v18  ;;  %v4823_v39 = vpop.f32.mrf.mxu0 }
 0x7e8   :  { %v4732_v0 = vpop.f32.mrf.mxu3  ;;  %v4824_v47 = vadd.f32 %v4823_v39, %v10854_v62  ;;  %v4912_v8 = vpop.f32.mrf.mxu1 }
 0x7e9   :  { %v4733_v60 = vadd.f32 %v4732_v0, %v4644_v2 }
 0x7ea   :  { %v11008_v36 = vadd.f32 %v4912_v8, %v4824_v47 }
 0x7eb   :  { %v5200_v44 = vmax.f32 %v4733_v60, 0.0 }
 0x7ed   :  { %v4645_v51 = vpop.f32.mrf.mxu2 }
 0x7ee   :  { %v4646_v3 = vadd.f32 %v4645_v51, %v10781_v37 }
 0x7ef   :  { %v4826_v24 = vpop.f32.mrf.mxu0 }
 0x7f0   :  { %v4734_v4 = vpop.f32.mrf.mxu3  ;;  %v4827_v23 = vadd.f32 %v4826_v24, %v10854_v62  ;;  %v4915_v6 = vpop.f32.mrf.mxu1 }
 0x7f1   :  { %v4735_v56 = vadd.f32 %v4734_v4, %v4646_v3 }
 0x7f2   :  { %v11012_v59 = vadd.f32 %v4915_v6, %v4827_v23  ;;  %4963 = vmatmul.bf16.gmra.mxu2 %v12241_v30  ;;  %5723 = vmatmul.bf16.gmra.mxu0 %v12485_v1 }
 0x7f3   :  { %v5204_v25 = vmax.f32 %v4735_v56, 0.0  ;;  %5812 = vmatmul.bf16.gmra.mxu1 %v12486_v42 }
 0x7f5   :  { %5052 = vmatmul.bf16.gmra.mxu3 %v10237_v28  ;;  %v11018_v55 = vpack.c.bf16 %v5204_v25, %v5200_v44  ;;  %v4648_v37 = vpop.f32.mrf.mxu2  ;;  %v12488_v25 = vld [vmem:[#allocation49_spill] sm:$0xff] }
 0x7f6   :  { %v4649_v2 = vadd.f32 %v4648_v37, %v10785_v12  ;;  %v12489_v37 = vld [vmem:[#allocation59_spill] sm:$0xff] }
 0x7f7   :  { %12487 = vst [vmem:[#allocation55_spill] sm:$0xff] %v11018_v55  ;;  %v4828_v39 = vpop.f32.mrf.mxu0 }
 0x7f8   :  { %v4737_v0 = vpop.f32.mrf.mxu3  ;;  %v4829_v60 = vadd.f32 %v4828_v39, %v10854_v62  ;;  %v4917_v8 = vpop.f32.mrf.mxu1 }
 0x7f9   :  { %v4738_v47 = vadd.f32 %v4737_v0, %v4649_v2  ;;  %v8314_v2 = vld [vmem:[#allocation11 + $0x140] sm:$0xf] }
 0x7fa   :  { %v11022_v51 = vadd.f32 %v4917_v8, %v4829_v60  ;;  %v8378_v0 = vld [vmem:[#allocation11 + $0x1c0] sm:$0xf]  ;;  %v8849_v60 = vld [vmem:[#allocation11 + $0x1c4] sm:$0xf0] }
 0x7fb   :  { %v5208_v6 = vmax.f32 %v4738_v47, 0.0  ;;  %v8379_v47 = vor.u32 %v8849_v60, %v8378_v0 }
 0x7fd   :  { %v4650_v30 = vpop.f32.mrf.mxu2  ;;  %5970 = vmatpush.bf16.msrb.mxu3 %v8379_v47  ;;  %v12491_v47 = vld [vmem:[#allocation37_spill] sm:$0xff] }
 0x7fe   :  { %v4651_v3 = vadd.f32 %v4650_v30, %v10795_v5  ;;  %v8833_v5 = vld [vmem:[#allocation11 + $0x144] sm:$0xf0] }
 0x7ff   :  { %v4831_v28 = vpop.f32.mrf.mxu0  ;;  %v8315_v39 = vor.u32 %v8833_v5, %v8314_v2 }
 0x800   :  { %v4739_v4 = vpop.f32.mrf.mxu3  ;;  %v4832_v56 = vadd.f32 %v4831_v28, %v10854_v62  ;;  %v4920_v23 = vpop.f32.mrf.mxu1 }
 0x801   :  { %v4740_v24 = vadd.f32 %v4739_v4, %v4651_v3  ;;  %5881 = vmatpush.bf16.msrb.mxu2 %v8315_v39 }
 0x802   :  { %v11026_v12 = vadd.f32 %v4920_v23, %v4832_v56  ;;  %4968 = vmatmul.bf16.gmra.mxu2 %v10022_v34  ;;  %5728 = vmatmul.bf16.gmra.mxu0 %v12488_v25 }
 0x803   :  { %v5212_v44 = vmax.f32 %v4740_v24, 0.0  ;;  %5817 = vmatmul.bf16.gmra.mxu1 %v12489_v37 }
 0x805   :  { %5057 = vmatmul.bf16.gmra.mxu3 %v12403_v31  ;;  %v11032_v8 = vpack.c.bf16 %v5212_v44, %v5208_v6  ;;  %v4653_v30 = vpop.f32.mrf.mxu2 }
 0x806   :  { %v4654_v3 = vadd.f32 %v4653_v30, %v10799_v14 }
 0x807   :  { %12490 = vst [vmem:[#allocation88_spill] sm:$0xff] %v11032_v8  ;;  %v4833_v34 = vpop.f32.mrf.mxu0 }
 0x808   :  { %v4742_v4 = vpop.f32.mrf.mxu3  ;;  %v4834_v31 = vadd.f32 %v4833_v34, %v10854_v62  ;;  %v4922_v24 = vpop.f32.mrf.mxu1 }
 0x809   :  { %v4743_v28 = vadd.f32 %v4742_v4, %v4654_v3 }
 0x80a   :  { %v11036_v56 = vadd.f32 %v4922_v24, %v4834_v31 }
 0x80b   :  { %v5216_v14 = vmax.f32 %v4743_v28, 0.0 }
 0x80d   :  { %v4655_v23 = vpop.f32.mrf.mxu2 }
 0x80e   :  { %v4656_v2 = vadd.f32 %v4655_v23, %v10809_v38 }
 0x80f   :  { %v4836_v6 = vpop.f32.mrf.mxu0 }
 0x810   :  { %v4744_v5 = vpop.f32.mrf.mxu3  ;;  %v4837_v0 = vadd.f32 %v4836_v6, %v10854_v62  ;;  %v4925_v60 = vpop.f32.mrf.mxu1 }
 0x811   :  { %v4745_v44 = vadd.f32 %v4744_v5, %v4656_v2 }
 0x812   :  { %v11040_v39 = vadd.f32 %v4925_v60, %v4837_v0  ;;  %4973 = vmatmul.bf16.gmra.mxu2 %v10036_v11  ;;  %5733 = vmatmul.bf16.gmra.mxu0 %v12491_v47 }
 0x813   :  { %v5220_v30 = vmax.f32 %v4745_v44, 0.0  ;;  %5822 = vmatmul.bf16.gmra.mxu1 %v10721_v43 }
 0x815   :  { %5062 = vmatmul.bf16.gmra.mxu3 %v12407_v41  ;;  %v11046_v3 = vpack.c.bf16 %v5220_v30, %v5216_v14  ;;  %v4658_v38 = vpop.f32.mrf.mxu2 }
 0x816   :  { %v4659_v4 = vadd.f32 %v4658_v38, %v10813_v61  ;;  %v12494_v38 = vld [vmem:[#allocation92_spill] sm:$0xff] }
 0x817   :  { %12492 = vst [vmem:[#allocation40_spill] sm:$0xff] %v11046_v3  ;;  %v4838_v31 = vpop.f32.mrf.mxu0 }
 0x818   :  { %v4747_v34 = vpop.f32.mrf.mxu3  ;;  %v4839_v28 = vadd.f32 %v4838_v31, %v10854_v62  ;;  %v4927_v23 = vpop.f32.mrf.mxu1  ;;  %v12497_v31 = vld [vmem:[#allocation90_spill] sm:$0xff] }
 0x819   :  { %v4748_v24 = vadd.f32 %v4747_v34, %v4659_v4  ;;  %v12495_v4 = vld [vmem:[#allocation39_spill] sm:$0xff]  ;;  %v12496_v34 = vld [vmem:[#allocation82_spill] sm:$0xff] }
 0x81a   :  { %v11050_v2 = vadd.f32 %v4927_v23, %v4839_v28  ;;  %v8306_v28 = vld [vmem:[#allocation11 + $0x130] sm:$0xf] }
 0x81b   :  { %v5224_v14 = vmax.f32 %v4748_v24, 0.0  ;;  %v8370_v23 = vld [vmem:[#allocation11 + $0x1b0] sm:$0xf] }
 0x81d   :  { %v4660_v11 = vpop.f32.mrf.mxu2 }
 0x81e   :  { %v4661_v5 = vadd.f32 %v4660_v11, %v10823_v15  ;;  %v8831_v15 = vld [vmem:[#allocation11 + $0x134] sm:$0xf0] }
 0x81f   :  { %v4841_v41 = vpop.f32.mrf.mxu0  ;;  %v8307_v11 = vor.u32 %v8831_v15, %v8306_v28 }
 0x820   :  { %v4749_v6 = vpop.f32.mrf.mxu3  ;;  %v4842_v0 = vadd.f32 %v4841_v41, %v10854_v62  ;;  %v4930_v60 = vpop.f32.mrf.mxu1 }
 0x821   :  { %v4750_v44 = vadd.f32 %v4749_v6, %v4661_v5  ;;  %v8847_v5 = vld [vmem:[#allocation11 + $0x1b4] sm:$0xf0]  ;;  %5882 = vmatpush.bf16.msrb.mxu2 %v8307_v11 }
 0x822   :  { %v11054_v61 = vadd.f32 %v4930_v60, %v4842_v0  ;;  %4978 = vmatmul.bf16.gmra.mxu2 %v12494_v38  ;;  %5738 = vmatmul.bf16.gmra.mxu0 %v12495_v4  ;;  %v8371_v24 = vor.u32 %v8847_v5, %v8370_v23 }
 0x823   :  { %v5228_v30 = vmax.f32 %v4750_v44, 0.0  ;;  %5827 = vmatmul.bf16.gmra.mxu1 %v12497_v31  ;;  %v12499_v44 = vld [vmem:[#allocation73_spill] sm:$0xff]  ;;  %v8800_v31 = vld [vmem:[#allocation11 + $0x44] sm:$0xf] }
 0x824   :  { %12493 = vst [vmem:[#allocation57_spill] sm:$0xff] %v11054_v61  ;;  %5971 = vmatpush.bf16.msrb.mxu3 %v8371_v24  ;;  %v12503_v24 = vld [vmem:[#allocation60_spill] sm:$0xff] }
 0x825   :  { %5067 = vmatmul.bf16.gmra.mxu3 %v12496_v34  ;;  %v11060_v6 = vpack.c.bf16 %v5228_v30, %v5224_v14  ;;  %v4663_v41 = vpop.f32.mrf.mxu2 }
 0x826   :  { %v4664_v0 = vadd.f32 %v4663_v41, %v12499_v44 }
 0x827   :  { %12498 = vst [vmem:[#allocation61_spill] sm:$0xff] %v11060_v6  ;;  %v4843_v38 = vpop.f32.mrf.mxu0 }
 0x828   :  { %v4752_v60 = vpop.f32.mrf.mxu3  ;;  %v4844_v34 = vadd.f32 %v4843_v38, %v10854_v62  ;;  %v4932_v8 = vpop.f32.mrf.mxu1  ;;  %v8806_v38 = vld [vmem:[#allocation11 + $0x74] sm:$0xf] }
 0x829   :  { %v4753_v3 = vadd.f32 %v4752_v60, %v4664_v0  ;;  %v12504_v0 = vld [vmem:[#allocation65_spill] sm:$0xff]  ;;  %v12505_v60 = vld [vmem:[#allocation42_spill] sm:$0xff] }
 0x82a   :  { %v11064_v55 = vadd.f32 %v4932_v8, %v4844_v34  ;;  %v12506_v8 = vld [vmem:[#allocation91_spill] sm:$0xff] }
 0x82b   :  { %v5232_v41 = vmax.f32 %v4753_v3, 0.0 }
 0x82c   :  { %12500 = vst [vmem:[#allocation89_spill] sm:$0xff] %v11064_v55  ;;  %v12536_v55 = vld [vmem:[#allocation84_spill] sm:$0xff] }
 0x82d   :  { %v4665_v18 = vpop.f32.mrf.mxu2 }
 0x82e   :  { %v4666_v28 = vadd.f32 %v4665_v18, %v12501_v9  ;;  %v8212_v9 = vld [vmem:[#allocation11 + $0x78] sm:$0xf0] }
 0x82f   :  { %v4846_v14 = vpop.f32.mrf.mxu0 }
 0x830   :  { %v4754_v15 = vpop.f32.mrf.mxu3  ;;  %v4847_v23 = vadd.f32 %v4846_v14, %v10854_v62  ;;  %v4935_v5 = vpop.f32.mrf.mxu1 }
 0x831   :  { %v4755_v30 = vadd.f32 %v4754_v15, %v4666_v28  ;;  %v8215_v28 = vor.u32 %v8806_v38, %v8212_v9  ;;  %v12508_v15 = vld [vmem:[#allocation68_spill] sm:$0xff] }
 0x832   :  { %v11068_v11 = vadd.f32 %v4935_v5, %v4847_v23  ;;  %4983 = vmatmul.bf16.gmra.mxu2 %v12503_v24  ;;  %5743 = vmatmul.bf16.gmra.mxu0 %v12504_v0 }
 0x833   :  { %v5236_v44 = vmax.f32 %v4755_v30, 0.0  ;;  %5832 = vmatmul.bf16.gmra.mxu1 %v12506_v8  ;;  %6056 = vmatpush.bf16.msrb.mxu0 %v8215_v28 }
 0x834   :  { %12502 = vst [vmem:[#allocation41_spill] sm:$0xff] %v11068_v11 }
 0x835   :  { %5072 = vmatmul.bf16.gmra.mxu3 %v12505_v60  ;;  %v11074_v18 = vpack.c.bf16 %v5236_v44, %v5232_v41  ;;  %v4668_v34 = vpop.f32.mrf.mxu2  ;;  %v11081_v60 = vld [vmem:[%s11708_s6] sm:$0x3]  ;;  %v8822_v41 = vld [vmem:[#allocation11 + $0xf4] sm:$0xf]  ;;  %v8276_v44 = vld [vmem:[#allocation11 + $0xf8] sm:$0xf0] }
 0x836   :  { %v4669_v14 = vadd.f32 %v4668_v34, %v12508_v15  ;;  %12509 = vst [vmem:[#allocation70_spill] sm:$0xff] %v11081_v60  ;;  %v11086_v38 = vperm.slane %v11081_v60, 0  ;;  %v12511_v34 = vld [vmem:[#allocation97_spill] sm:$0xff] }
 0x837   :  { %12507 = vst [vmem:[#allocation48_spill] sm:$0xff] %v11074_v18  ;;  %v4848_v30 = vpop.f32.mrf.mxu0  ;;  %v8279_v18 = vor.u32 %v8822_v41, %v8276_v44  ;;  %v12514_v41 = vld [vmem:[#allocation27_spill] sm:$0xff]  ;;  %v12515_v44 = vld [vmem:[#allocation54_spill] sm:$0xff] }
 0x838   :  { %v4757_v3 = vpop.f32.mrf.mxu3  ;;  %v4849_v5 = vadd.f32 %v4848_v30, %v10854_v62  ;;  %v4937_v24 = vpop.f32.mrf.mxu1 }
 0x839   :  { %v4758_v23 = vadd.f32 %v4757_v3, %v4669_v14  ;;  %6145 = vmatpush.bf16.msrb.mxu1 %v8279_v18  ;;  %v8298_v18 = vld [vmem:[#allocation11 + $0x120] sm:$0xf] }
 0x83a   :  { %v11083_v6 = vadd.f32 %v4937_v24, %v4849_v5  ;;  %v12513_v24 = vld [vmem:[#allocation20_spill] sm:$0xff] }
 0x83b   :  { %v5240_v11 = vmax.f32 %v4758_v23, 0.0 }
 0x83c   :  { %12510 = vst [vmem:[#allocation52_spill] sm:$0xff] %v11083_v6  ;;  %v12516_v6 = vld [vmem:[#allocation30_spill] sm:$0xff] }
 0x83d   :  { %v4670_v9 = vpop.f32.mrf.mxu2 }
 0x83e   :  { %v4671_v28 = vadd.f32 %v4670_v9, %v12511_v34  ;;  %v8829_v9 = vld [vmem:[#allocation11 + $0x124] sm:$0xf0]  ;;  %v8362_v34 = vld [vmem:[#allocation11 + $0x1a0] sm:$0xf] }
 0x83f   :  { %v5709_v62 = vpop.f32.mrf.mxu0  ;;  %v8299_v60 = vor.u32 %v8829_v9, %v8298_v18 }
 0x840   :  { %v4759_v15 = vpop.f32.mrf.mxu3  ;;  %v5710_v3 = vadd.f32 %v5709_v62, %v11086_v38  ;;  %v5798_v30 = vpop.f32.mrf.mxu1 }
 0x841   :  { %v4760_v14 = vadd.f32 %v4759_v15, %v4671_v28  ;;  %v8845_v28 = vld [vmem:[#allocation11 + $0x1a4] sm:$0xf0]  ;;  %5883 = vmatpush.bf16.msrb.mxu2 %v8299_v60 }
 0x842   :  { %v11090_v5 = vadd.f32 %v5798_v30, %v5710_v3  ;;  %4988 = vmatmul.bf16.gmra.mxu2 %v12513_v24  ;;  %5748 = vmatmul.bf16.gmra.mxu0 %v12514_v41  ;;  %v8363_v23 = vor.u32 %v8845_v28, %v8362_v34 }
 0x843   :  { %v5244_v8 = vmax.f32 %v4760_v14, 0.0  ;;  %5837 = vmatmul.bf16.gmra.mxu1 %v12516_v6  ;;  %v12518_v14 = vld [vmem:[#allocation74_spill] sm:$0xff] }
 0x844   :  { %12512 = vst [vmem:[#allocation26_spill] sm:$0xff] %v11090_v5  ;;  %5972 = vmatpush.bf16.msrb.mxu3 %v8363_v23  ;;  %v12522_v23 = vld [vmem:[#allocation21_spill] sm:$0xff] }
 0x845   :  { %5077 = vmatmul.bf16.gmra.mxu3 %v12515_v44  ;;  %v11096_v15 = vpack.c.bf16 %v5244_v8, %v5240_v11  ;;  %v4949_v62 = vpop.f32.mrf.mxu2 }
 0x846   :  { %v4950_v3 = vadd.f32 %v4949_v62, %v12518_v14 }
 0x847   :  { %12517 = vst [vmem:[#allocation71_spill] sm:$0xff] %v11096_v15  ;;  %v5711_v24 = vpop.f32.mrf.mxu0 }
 0x848   :  { %v5038_v30 = vpop.f32.mrf.mxu3  ;;  %v5712_v44 = vadd.f32 %v5711_v24, %v11086_v38  ;;  %v5800_v41 = vpop.f32.mrf.mxu1  ;;  %v8804_v24 = vld [vmem:[#allocation11 + $0x64] sm:$0xf] }
 0x849   :  { %v5039_v5 = vadd.f32 %v5038_v30, %v4950_v3  ;;  %v12523_v3 = vld [vmem:[#allocation31_spill] sm:$0xff]  ;;  %v12524_v30 = vld [vmem:[#allocation28_spill] sm:$0xff] }
 0x84a   :  { %v11100_v6 = vadd.f32 %v5800_v41, %v5712_v44  ;;  %v12525_v41 = vld [vmem:[#allocation34_spill] sm:$0xff] }
 0x84b   :  { %v5121_v62 = vmax.f32 %v5039_v5, 0.0 }
 0x84c   :  { %12519 = vst [vmem:[#allocation75_spill] sm:$0xff] %v11100_v6 }
 0x84d   :  { %v4951_v0 = vpop.f32.mrf.mxu2 }
 0x84e   :  { %v4952_v18 = vadd.f32 %v4951_v0, %v12520_v29  ;;  %v8204_v29 = vld [vmem:[#allocation11 + $0x68] sm:$0xf0] }
 0x84f   :  { %v5714_v11 = vpop.f32.mrf.mxu0  ;;  %v8207_v44 = vor.u32 %v8804_v24, %v8204_v29 }
 0x850   :  { %v5040_v9 = vpop.f32.mrf.mxu3  ;;  %v5715_v34 = vadd.f32 %v5714_v11, %v11086_v38  ;;  %v5803_v28 = vpop.f32.mrf.mxu1 }
 0x851   :  { %v5041_v8 = vadd.f32 %v5040_v9, %v4952_v18  ;;  %v12526_v9 = vld [vmem:[#allocation66_spill] sm:$0xff]  ;;  %6057 = vmatpush.bf16.msrb.mxu0 %v8207_v44 }
 0x852   :  { %v11104_v60 = vadd.f32 %v5803_v28, %v5715_v34  ;;  %4993 = vmatmul.bf16.gmra.mxu2 %v12522_v23  ;;  %5753 = vmatmul.bf16.gmra.mxu0 %v12523_v3 }
 0x853   :  { %v5125_v14 = vmax.f32 %v5041_v8, 0.0  ;;  %5842 = vmatmul.bf16.gmra.mxu1 %v12525_v41 }
 0x854   :  { %12521 = vst [vmem:[#allocation76_spill] sm:$0xff] %v11104_v60  ;;  %v8268_v60 = vld [vmem:[#allocation11 + $0xe8] sm:$0xf0] }
 0x855   :  { %5082 = vmatmul.bf16.gmra.mxu3 %v12524_v30  ;;  %v11110_v0 = vpack.c.bf16 %v5125_v14, %v5121_v62  ;;  %v4954_v18 = vpop.f32.mrf.mxu2  ;;  %v8820_v30 = vld [vmem:[#allocation11 + $0xe4] sm:$0xf]  ;;  %v12528_v62 = vld [vmem:[#allocation83_spill] sm:$0xff] }
 0x856   :  { %v4955_v11 = vadd.f32 %v4954_v18, %v12526_v9  ;;  %v8271_v41 = vor.u32 %v8820_v30, %v8268_v60  ;;  %v12533_v60 = vld [vmem:[#allocation35_spill] sm:$0xff]  ;;  %v8354_v30 = vld [vmem:[#allocation11 + $0x190] sm:$0xf] }
 0x857   :  { %v5716_v8 = vpop.f32.mrf.mxu0 }
 0x858   :  { %v5043_v5 = vpop.f32.mrf.mxu3  ;;  %v5717_v28 = vadd.f32 %v5716_v8, %v11086_v38  ;;  %v5805_v23 = vpop.f32.mrf.mxu1  ;;  %6146 = vmatpush.bf16.msrb.mxu1 %v8271_v41  ;;  %v12530_v8 = vld [vmem:[#allocation63_spill] sm:$0xff]  ;;  %v8290_v41 = vld [vmem:[#allocation11 + $0x110] sm:$0xf] }
 0x859   :  { %v5044_v34 = vadd.f32 %v5043_v5, %v4955_v11 }
 0x85a   :  { %v11114_v15 = vadd.f32 %v5805_v23, %v5717_v28  ;;  %v12531_v28 = vld [vmem:[#allocation33_spill] sm:$0xff]  ;;  %v12532_v23 = vld [vmem:[#allocation58_spill] sm:$0xff] }
 0x85b   :  { %v5129_v9 = vmax.f32 %v5044_v34, 0.0 }
 0x85c   :  { %12527 = vst [vmem:[#allocation56_spill] sm:$0xff] %v11114_v15 }
 0x85d   :  { %v4956_v3 = vpop.f32.mrf.mxu2 }
 0x85e   :  { %v4957_v14 = vadd.f32 %v4956_v3, %v12528_v62  ;;  %v8827_v3 = vld [vmem:[#allocation11 + $0x114] sm:$0xf0] }
 0x85f   :  { %v5719_v29 = vpop.f32.mrf.mxu0  ;;  %v8291_v62 = vor.u32 %v8827_v3, %v8290_v41 }
 0x860   :  { %v5045_v24 = vpop.f32.mrf.mxu3  ;;  %v5720_v18 = vadd.f32 %v5719_v29, %v11086_v38  ;;  %v5808_v44 = vpop.f32.mrf.mxu1 }
 0x861   :  { %v5046_v6 = vadd.f32 %v5045_v24, %v4957_v14  ;;  %v8843_v14 = vld [vmem:[#allocation11 + $0x194] sm:$0xf0]  ;;  %5884 = vmatpush.bf16.msrb.mxu2 %v8291_v62 }
 0x862   :  { %v11118_v5 = vadd.f32 %v5808_v44, %v5720_v18  ;;  %4998 = vmatmul.bf16.gmra.mxu2 %v12530_v8  ;;  %5758 = vmatmul.bf16.gmra.mxu0 %v12531_v28  ;;  %v8355_v34 = vor.u32 %v8843_v14, %v8354_v30 }
 0x863   :  { %v5133_v11 = vmax.f32 %v5046_v6, 0.0  ;;  %5847 = vmatmul.bf16.gmra.mxu1 %v12533_v60  ;;  %v12534_v6 = vld [vmem:[#allocation98_spill] sm:$0xff] }
 0x864   :  { %12529 = vst [vmem:[#allocation43_spill] sm:$0xff] %v11118_v5  ;;  %5973 = vmatpush.bf16.msrb.mxu3 %v8355_v34  ;;  %v12538_v34 = vld [vmem:[#allocation22_spill] sm:$0xff] }
 0x865   :  { %5087 = vmatmul.bf16.gmra.mxu3 %v12532_v23  ;;  %v11124_v24 = vpack.c.bf16 %v5133_v11, %v5129_v9  ;;  %v4959_v29 = vpop.f32.mrf.mxu2 }
 0x866   :  { %v4960_v18 = vadd.f32 %v4959_v29, %v12534_v6 }
 0x867   :  { %v5721_v8 = vpop.f32.mrf.mxu0 }
 0x868   :  { %v5048_v44 = vpop.f32.mrf.mxu3  ;;  %v5722_v23 = vadd.f32 %v5721_v8, %v11086_v38  ;;  %v5810_v28 = vpop.f32.mrf.mxu1  ;;  %v8802_v8 = vld [vmem:[#allocation11 + $0x54] sm:$0xf] }
 0x869   :  { %v5049_v5 = vadd.f32 %v5048_v44, %v4960_v18  ;;  %v12539_v18 = vld [vmem:[#allocation79_spill] sm:$0xff]  ;;  %v12540_v44 = vld [vmem:[#allocation32_spill] sm:$0xff] }
 0x86a   :  { %v11128_v60 = vadd.f32 %v5810_v28, %v5722_v23  ;;  %v12541_v28 = vld [vmem:[#allocation94_spill] sm:$0xff] }
 0x86b   :  { %v5137_v29 = vmax.f32 %v5049_v5, 0.0 }
 0x86c   :  { %12535 = vst [vmem:[#allocation38_spill] sm:$0xff] %v11128_v60 }
 0x86d   :  { %v4961_v15 = vpop.f32.mrf.mxu2 }
 0x86e   :  { %v4962_v41 = vadd.f32 %v4961_v15, %v12536_v55  ;;  %v8196_v55 = vld [vmem:[#allocation11 + $0x58] sm:$0xf0] }
 0x86f   :  { %v5724_v9 = vpop.f32.mrf.mxu0  ;;  %v8199_v15 = vor.u32 %v8802_v8, %v8196_v55  ;;  %v12544_v8 = vld [vmem:[#allocation29_spill] sm:$0xff] }
 0x870   :  { %v5050_v3 = vpop.f32.mrf.mxu3  ;;  %v5725_v30 = vadd.f32 %v5724_v9, %v11086_v38  ;;  %v5813_v14 = vpop.f32.mrf.mxu1 }
 0x871   :  { %v5051_v11 = vadd.f32 %v5050_v3, %v4962_v41  ;;  %v12542_v3 = vld [vmem:[#allocation99_spill] sm:$0xff]  ;;  %6058 = vmatpush.bf16.msrb.mxu0 %v8199_v15 }
 0x872   :  { %v11132_v62 = vadd.f32 %v5813_v14, %v5725_v30  ;;  %5003 = vmatmul.bf16.gmra.mxu2 %v12538_v34  ;;  %5763 = vmatmul.bf16.gmra.mxu0 %v12539_v18  ;;  %v8260_v18 = vld [vmem:[#allocation11 + $0xd8] sm:$0xf0] }
 0x873   :  { %v5141_v6 = vmax.f32 %v5051_v11, 0.0  ;;  %5852 = vmatmul.bf16.gmra.mxu1 %v12541_v28 }
 0x874   :  { %12537 = vst [vmem:[#allocation45_spill] sm:$0xff] %v11132_v62 }
 0x875   :  { %5092 = vmatmul.bf16.gmra.mxu3 %v12540_v44  ;;  %v11138_v23 = vpack.c.bf16 %v5141_v6, %v5137_v29  ;;  %v4964_v41 = vpop.f32.mrf.mxu2  ;;  %v8818_v44 = vld [vmem:[#allocation11 + $0xd4] sm:$0xf] }
 0x876   :  { %v4965_v9 = vadd.f32 %v4964_v41, %v12542_v3  ;;  %v8263_v28 = vor.u32 %v8818_v44, %v8260_v18  ;;  %v12549_v18 = vld [vmem:[#allocation64_spill] sm:$0xff] }
 0x877   :  { %v5726_v11 = vpop.f32.mrf.mxu0  ;;  %v8346_v44 = vld [vmem:[#allocation11 + $0x180] sm:$0xf] }
 0x878   :  { %v5053_v5 = vpop.f32.mrf.mxu3  ;;  %v5727_v14 = vadd.f32 %v5726_v11, %v11086_v38  ;;  %v5815_v34 = vpop.f32.mrf.mxu1  ;;  %6147 = vmatpush.bf16.msrb.mxu1 %v8263_v28  ;;  %v12546_v11 = vld [vmem:[#allocation25_spill] sm:$0xff]  ;;  %v8282_v28 = vld [vmem:[#allocation11 + $0x100] sm:$0xf] }
 0x879   :  { %v5054_v30 = vadd.f32 %v5053_v5, %v4965_v9 }
 0x87a   :  { %v11142_v62 = vadd.f32 %v5815_v34, %v5727_v14  ;;  %v12547_v14 = vld [vmem:[#allocation69_spill] sm:$0xff]  ;;  %v12548_v34 = vld [vmem:[#allocation62_spill] sm:$0xff] }
 0x87b   :  { %v5145_v3 = vmax.f32 %v5054_v30, 0.0 }
 0x87c   :  { %12543 = vst [vmem:[#allocation44_spill] sm:$0xff] %v11142_v62 }
 0x87d   :  { %v4966_v60 = vpop.f32.mrf.mxu2 }
 0x87e   :  { %v4967_v29 = vadd.f32 %v4966_v60, %v12544_v8  ;;  %v8825_v60 = vld [vmem:[#allocation11 + $0x104] sm:$0xf0] }
 0x87f   :  { %v5729_v55 = vpop.f32.mrf.mxu0  ;;  %v8283_v8 = vor.u32 %v8825_v60, %v8282_v28  ;;  %v8188_v28 = vld [vmem:[#allocation11 + $0x48] sm:$0xf0]  ;;  %v8816_v60 = vld [vmem:[#allocation11 + $0xc4] sm:$0xf] }
 0x880   :  { %v5055_v6 = vpop.f32.mrf.mxu3  ;;  %v5730_v41 = vadd.f32 %v5729_v55, %v11086_v38  ;;  %v5818_v15 = vpop.f32.mrf.mxu1 }
 0x881   :  { %v5056_v61 = vadd.f32 %v5055_v6, %v4967_v29  ;;  %v8841_v29 = vld [vmem:[#allocation11 + $0x184] sm:$0xf0]  ;;  %5885 = vmatpush.bf16.msrb.mxu2 %v8283_v8 }
 0x882   :  { %v11146_v5 = vadd.f32 %v5818_v15, %v5730_v41  ;;  %5008 = vmatmul.bf16.gmra.mxu2 %v12546_v11  ;;  %5768 = vmatmul.bf16.gmra.mxu0 %v12547_v14  ;;  %v8347_v30 = vor.u32 %v8841_v29, %v8346_v44  ;;  %v8191_v44 = vor.u32 %v8800_v31, %v8188_v28  ;;  %v8252_v29 = vld [vmem:[#allocation11 + $0xc8] sm:$0xf0]  ;;  %v8244_v28 = vld [vmem:[#allocation11 + $0xb8] sm:$0xf0] }
 0x883   :  { %v5149_v9 = vmax.f32 %v5056_v61, 0.0  ;;  %5857 = vmatmul.bf16.gmra.mxu1 %v12549_v18  ;;  %v12550_v61 = vld [vmem:[#allocation85_spill] sm:$0xff] }
 0x884   :  { %12545 = vst [vmem:[#allocation53_spill] sm:$0xff] %v11146_v5  ;;  %5974 = vmatpush.bf16.msrb.mxu3 %v8347_v30  ;;  %6059 = vmatpush.bf16.msrb.mxu0 %v8191_v44  ;;  %v8172_v44 = vld [vmem:[#allocation11 + $0x28] sm:$0xf0] }
 0x885   :  { %5097 = vmatmul.bf16.gmra.mxu3 %v12548_v34  ;;  %v11152_v6 = vpack.c.bf16 %v5149_v9, %v5145_v3  ;;  %v4969_v55 = vpop.f32.mrf.mxu2  ;;  %v12552_v3 = vld [vmem:[#allocation47_spill] sm:$0xff] }
 0x886   :  { %v4970_v41 = vadd.f32 %v4969_v55, %v12550_v61  ;;  %v8255_v61 = vor.u32 %v8816_v60, %v8252_v29  ;;  %v8812_v29 = vld [vmem:[#allocation11 + $0xa4] sm:$0xf] }
 0x887   :  { %v5731_v11 = vpop.f32.mrf.mxu0 }
 0x888   :  { %v5058_v15 = vpop.f32.mrf.mxu3  ;;  %v5732_v34 = vadd.f32 %v5731_v11, %v11086_v38  ;;  %v5820_v14 = vpop.f32.mrf.mxu1  ;;  %6148 = vmatpush.bf16.msrb.mxu1 %v8255_v61  ;;  %v8814_v11 = vld [vmem:[#allocation11 + $0xb4] sm:$0xf] }
 0x889   :  { %v5059_v5 = vadd.f32 %v5058_v15, %v4970_v41  ;;  %v8798_v15 = vld [vmem:[#allocation11 + $0x34] sm:$0xf]  ;;  %v8247_v60 = vor.u32 %v8814_v11, %v8244_v28  ;;  %v8164_v11 = vld [vmem:[#allocation11 + $0x18] sm:$0xf0] }
 0x88a   :  { %v11156_v18 = vadd.f32 %v5820_v14, %v5732_v34  ;;  %v8180_v14 = vld [vmem:[#allocation11 + $0x38] sm:$0xf0] }
 0x88b   :  { %v5153_v34 = vmax.f32 %v5059_v5, 0.0  ;;  %v8183_v31 = vor.u32 %v8798_v15, %v8180_v14  ;;  %v8796_v5 = vld [vmem:[#allocation11 + $0x24] sm:$0xf] }
 0x88c   :  { %12551 = vst [vmem:[#allocation93_spill] sm:$0xff] %v11156_v18  ;;  %6149 = vmatpush.bf16.msrb.mxu1 %v8247_v60  ;;  %v8175_v61 = vor.u32 %v8796_v5, %v8172_v44  ;;  %v8228_v60 = vld [vmem:[#allocation11 + $0x98] sm:$0xf0]  ;;  %v8156_v5 = vld [vmem:[#allocation11 + $0x8] sm:$0xf0] }
 0x88d   :  { %v4971_v62 = vpop.f32.mrf.mxu2  ;;  %6060 = vmatpush.bf16.msrb.mxu0 %v8183_v31  ;;  %v8808_v44 = vld [vmem:[#allocation11 + $0x84] sm:$0xf] }
 0x88e   :  { %v4972_v9 = vadd.f32 %v4971_v62, %v12552_v3  ;;  %v12554_v62 = vld [vmem:[#allocation24_spill] sm:$0xff] }
 0x88f   :  { %v5734_v55 = vpop.f32.mrf.mxu0 }
 0x890   :  { %v5060_v4 = vpop.f32.mrf.mxu3  ;;  %v5735_v30 = vadd.f32 %v5734_v55, %v11086_v38  ;;  %v5823_v41 = vpop.f32.mrf.mxu1 }
 0x891   :  { %v5061_v8 = vadd.f32 %v5060_v4, %v4972_v9  ;;  %v12555_v4 = vld [vmem:[#allocation96_spill] sm:$0xff]  ;;  %6061 = vmatpush.bf16.msrb.mxu0 %v8175_v61  ;;  %v8220_v61 = vld [vmem:[#allocation11 + $0x88] sm:$0xf0] }
 0x892   :  { %v11160_v40 = vadd.f32 %v5823_v41, %v5735_v30  ;;  %5013 = vmatmul.bf16.gmra.mxu2 %v12300_v27  ;;  %5773 = vmatmul.bf16.gmra.mxu0 %v12554_v62 }
 0x893   :  { %v5157_v18 = vmax.f32 %v5061_v8, 0.0  ;;  %5862 = vmatmul.bf16.gmra.mxu1 %v12555_v4  ;;  %v8236_v8 = vld [vmem:[#allocation11 + $0xa8] sm:$0xf0] }
 0x894   :  { %12553 = vst [vmem:[#allocation36_spill] sm:$0xff] %v11160_v40  ;;  %v8239_v41 = vor.u32 %v8812_v29, %v8236_v8 }
 0x895   :  { %5102 = vmatmul.bf16.gmra.mxu3 %v10377_v54  ;;  %v11166_v3 = vpack.c.bf16 %v5157_v18, %v5153_v34  ;;  %v4974_v9 = vpop.f32.mrf.mxu2  ;;  %v8794_v18 = vld [vmem:[#allocation11 + $0x14] sm:$0xf] }
 0x896   :  { %v4975_v55 = vadd.f32 %v4974_v9, %v10928_v35  ;;  %6150 = vmatpush.bf16.msrb.mxu1 %v8239_v41  ;;  %v8810_v34 = vld [vmem:[#allocation11 + $0x94] sm:$0xf]  ;;  %v8167_v28 = vor.u32 %v8794_v18, %v8164_v11  ;;  %v8792_v9 = vld [vmem:[#allocation11 + $0x4] sm:$0xf] }
 0x897   :  { %v5736_v30 = vpop.f32.mrf.mxu0  ;;  %v8231_v40 = vor.u32 %v8810_v34, %v8228_v60  ;;  %v8340_v60 = vld [vmem:[#allocation11 + $0x178] sm:$0xf0] }
 0x898   :  { %v5063_v27 = vpop.f32.mrf.mxu3  ;;  %v5737_v54 = vadd.f32 %v5736_v30, %v11086_v38  ;;  %v5825_v14 = vpop.f32.mrf.mxu1  ;;  %6062 = vmatpush.bf16.msrb.mxu0 %v8167_v28  ;;  %v8223_v30 = vor.u32 %v8808_v44, %v8220_v61  ;;  %v8838_v28 = vld [vmem:[#allocation11 + $0x174] sm:$0xf] }
 0x899   :  { %v5064_v15 = vadd.f32 %v5063_v27, %v4975_v55  ;;  %v8159_v27 = vor.u32 %v8792_v9, %v8156_v5  ;;  %v8343_v9 = vor.u32 %v8838_v28, %v8340_v60  ;;  %v8404_v5 = vld [vmem:[#allocation11 + $0x1f8] sm:$0xf0] }
 0x89a   :  { %v11170_v31 = vadd.f32 %v5825_v14, %v5737_v54  ;;  %6151 = vmatpush.bf16.msrb.mxu1 %v8231_v40  ;;  %v12556_v40 = vld [vmem:[#allocation80_spill] sm:$0xff] }
 0x89b   :  { %v5161_v18 = vmax.f32 %v5064_v15, 0.0  ;;  %6234 = vmatpush.bf16.msra.mxu2 %v8343_v9 }
 0x89c   :  { %6063 = vmatpush.bf16.msrb.mxu0 %v8159_v27 }
 0x89d   :  { %v4976_v35 = vpop.f32.mrf.mxu2 }
 0x89e   :  { %v4977_v29 = vadd.f32 %v4976_v35, %v10938_v52  ;;  %6152 = vmatpush.bf16.msrb.mxu1 %v8223_v30  ;;  %v12557_v52 = vld [vmem:[#allocation86_spill] sm:$0xff] }
 0x89f   :  { %v5739_v8 = vpop.f32.mrf.mxu0  ;;  %v8854_v35 = vld [vmem:[#allocation11 + $0x1f4] sm:$0xf] }
 0x8a0   :  { %v5065_v55 = vpop.f32.mrf.mxu3  ;;  %v5740_v54 = vadd.f32 %v5739_v8, %v11086_v38  ;;  %v5828_v14 = vpop.f32.mrf.mxu1  ;;  %v8407_v15 = vor.u32 %v8854_v35, %v8404_v5  ;;  %v12558_v5 = vld [vmem:[#allocation72_spill] sm:$0xff] }
 0x8a1   :  { %v5066_v41 = vadd.f32 %v5065_v55, %v4977_v29 }
 0x8a2   :  { %v11174_v34 = vadd.f32 %v5828_v14, %v5740_v54  ;;  %5018 = vmatmul.bf16.gmra.mxu2 %v12303_v58  ;;  %5778 = vmatmul.bf16.gmra.mxu0 %v12556_v40 }
 0x8a3   :  { %v5165_v11 = vmax.f32 %v5066_v41, 0.0  ;;  %5867 = vmatmul.bf16.gmra.mxu1 %v12557_v52  ;;  %6323 = vmatpush.bf16.msra.mxu3 %v8407_v15 }
 0x8a5   :  { %5107 = vmatmul.bf16.gmra.mxu3 %v10391_v53  ;;  %v11180_v44 = vpack.c.bf16 %v5165_v11, %v5161_v18  ;;  %v4979_v29 = vpop.f32.mrf.mxu2 }
 0x8a6   :  { %v4980_v55 = vadd.f32 %v4979_v29, %v10942_v50  ;;  %v12559_v29 = vld [vmem:[#allocation50_spill] sm:$0xff] }
 0x8a7   :  { %v5741_v58 = vpop.f32.mrf.mxu0 }
 0x8a8   :  { %v5068_v27 = vpop.f32.mrf.mxu3  ;;  %v5742_v53 = vadd.f32 %v5741_v58, %v11086_v38  ;;  %v5830_v8 = vpop.f32.mrf.mxu1 }
 0x8a9   :  { %v5069_v61 = vadd.f32 %v5068_v27, %v4980_v55 }
 0x8aa   :  { %v11184_v30 = vadd.f32 %v5830_v8, %v5742_v53 }
 0x8ab   :  { %v5169_v50 = vmax.f32 %v5069_v61, 0.0 }
 0x8ad   :  { %v4981_v41 = vpop.f32.mrf.mxu2 }
 0x8ae   :  { %v4982_v54 = vadd.f32 %v4981_v41, %v10952_v26 }
 0x8af   :  { %v5744_v18 = vpop.f32.mrf.mxu0 }
 0x8b0   :  { %v5070_v14 = vpop.f32.mrf.mxu3  ;;  %v5745_v28 = vadd.f32 %v5744_v18, %v11086_v38  ;;  %v5833_v60 = vpop.f32.mrf.mxu1 }
 0x8b1   :  { %v5071_v11 = vadd.f32 %v5070_v14, %v4982_v54 }
 0x8b2   :  { %v11188_v9 = vadd.f32 %v5833_v60, %v5745_v28  ;;  %5023 = vmatmul.bf16.gmra.mxu2 %v12305_v20  ;;  %5783 = vmatmul.bf16.gmra.mxu0 %v12558_v5 }
 0x8b3   :  { %v5173_v35 = vmax.f32 %v5071_v11, 0.0  ;;  %5872 = vmatmul.bf16.gmra.mxu1 %v12559_v29 }
 0x8b5   :  { %5112 = vmatmul.bf16.gmra.mxu3 %v10408_v13  ;;  %v11194_v15 = vpack.c.bf16 %v5173_v35, %v5169_v50  ;;  %v4984_v26 = vpop.f32.mrf.mxu2  ;;  %v12560_v35 = vld [vmem:[#allocation67_spill] sm:$0xff] }
 0x8b6   :  { %v4985_v55 = vadd.f32 %v4984_v26, %v10956_v21  ;;  %v8836_v26 = vld [vmem:[#allocation11 + $0x164] sm:$0xf] }
 0x8b7   :  { %v5746_v58 = vpop.f32.mrf.mxu0 }
 0x8b8   :  { %v5073_v27 = vpop.f32.mrf.mxu3  ;;  %v5747_v61 = vadd.f32 %v5746_v58, %v11086_v38  ;;  %v5835_v8 = vpop.f32.mrf.mxu1  ;;  %v8396_v58 = vld [vmem:[#allocation11 + $0x1e8] sm:$0xf0] }
 0x8b9   :  { %v5074_v53 = vadd.f32 %v5073_v27, %v4985_v55  ;;  %v8852_v55 = vld [vmem:[#allocation11 + $0x1e4] sm:$0xf] }
 0x8ba   :  { %v11198_v41 = vadd.f32 %v5835_v8, %v5747_v61 }
 0x8bb   :  { %v5177_v60 = vmax.f32 %v5074_v53, 0.0  ;;  %v8399_v53 = vor.u32 %v8852_v55, %v8396_v58 }
 0x8bd   :  { %v4986_v20 = vpop.f32.mrf.mxu2  ;;  %6324 = vmatpush.bf16.msra.mxu3 %v8399_v53 }
 0x8be   :  { %v4987_v54 = vadd.f32 %v4986_v20, %v10966_v33  ;;  %v8332_v33 = vld [vmem:[#allocation11 + $0x168] sm:$0xf0] }
 0x8bf   :  { %v5749_v13 = vpop.f32.mrf.mxu0  ;;  %v8335_v27 = vor.u32 %v8836_v26, %v8332_v33 }
 0x8c0   :  { %v5075_v14 = vpop.f32.mrf.mxu3  ;;  %v5750_v11 = vadd.f32 %v5749_v13, %v11086_v38  ;;  %v5838_v28 = vpop.f32.mrf.mxu1 }
 0x8c1   :  { %v5076_v18 = vadd.f32 %v5075_v14, %v4987_v54  ;;  %6235 = vmatpush.bf16.msra.mxu2 %v8335_v27 }
 0x8c2   :  { %v11202_v21 = vadd.f32 %v5838_v28, %v5750_v11  ;;  %5886 = vmatmul.bf16.vlgmr.msrb.gmra.mxu2 %v12560_v35  ;;  %6064 = vmatmul.bf16.vlgmr.msrb.gmra.mxu0 %v12476_v63 }
 0x8c3   :  { %v5181_v50 = vmax.f32 %v5076_v18, 0.0  ;;  %6153 = vmatmul.bf16.vlgmr.msrb.gmra.mxu1 %v12477_v7 }
 0x8c5   :  { %5975 = vmatmul.bf16.vlgmr.msrb.gmra.mxu3 %v11110_v0  ;;  %v11208_v61 = vpack.c.bf16 %v5181_v50, %v5177_v60  ;;  %v4989_v8 = vpop.f32.mrf.mxu2 }
 0x8c6   :  { %v4990_v20 = vadd.f32 %v4989_v8, %v10970_v49  ;;  %v12562_v8 = vld [vmem:[#allocation78_spill] sm:$0xff] }
 0x8c7   :  { %12561 = vst [vmem:[#allocation49_spill] sm:$0xff] %v11208_v61  ;;  %v5751_v14 = vpop.f32.mrf.mxu0 }
 0x8c8   :  { %v5078_v54 = vpop.f32.mrf.mxu3  ;;  %v5752_v13 = vadd.f32 %v5751_v14, %v11086_v38  ;;  %v5840_v18 = vpop.f32.mrf.mxu1 }
 0x8c9   :  { %v5079_v63 = vadd.f32 %v5078_v54, %v4990_v20 }
 0x8ca   :  { %v11212_v7 = vadd.f32 %v5840_v18, %v5752_v13 }
 0x8cb   :  { %v5185_v49 = vmax.f32 %v5079_v63, 0.0 }
 0x8cd   :  { %v4991_v11 = vpop.f32.mrf.mxu2 }
 0x8ce   :  { %v4992_v28 = vadd.f32 %v4991_v11, %v10980_v10 }
 0x8cf   :  { %v5754_v60 = vpop.f32.mrf.mxu0 }
 0x8d0   :  { %v5080_v26 = vpop.f32.mrf.mxu3  ;;  %v5755_v33 = vadd.f32 %v5754_v60, %v11086_v38  ;;  %v5843_v55 = vpop.f32.mrf.mxu1 }
 0x8d1   :  { %v5081_v50 = vadd.f32 %v5080_v26, %v4992_v28 }
 0x8d2   :  { %v11216_v27 = vadd.f32 %v5843_v55, %v5755_v33  ;;  %5891 = vmatmul.bf16.gmra.mxu2 %v12562_v8  ;;  %6069 = vmatmul.bf16.gmra.mxu0 %v12479_v17 }
 0x8d3   :  { %v5189_v58 = vmax.f32 %v5081_v50, 0.0  ;;  %6158 = vmatmul.bf16.gmra.mxu1 %v12480_v32 }
 0x8d5   :  { %5980 = vmatmul.bf16.gmra.mxu3 %v11124_v24  ;;  %v11222_v53 = vpack.c.bf16 %v5189_v58, %v5185_v49  ;;  %v4994_v10 = vpop.f32.mrf.mxu2  ;;  %v12564_v58 = vld [vmem:[#allocation46_spill] sm:$0xff] }
 0x8d6   :  { %v4995_v20 = vadd.f32 %v4994_v10, %v10984_v45  ;;  %v8834_v10 = vld [vmem:[#allocation11 + $0x154] sm:$0xf] }
 0x8d7   :  { %12563 = vst [vmem:[#allocation59_spill] sm:$0xff] %v11222_v53  ;;  %v5756_v14 = vpop.f32.mrf.mxu0 }
 0x8d8   :  { %v5083_v54 = vpop.f32.mrf.mxu3  ;;  %v5757_v63 = vadd.f32 %v5756_v14, %v11086_v38  ;;  %v5845_v18 = vpop.f32.mrf.mxu1  ;;  %v8388_v14 = vld [vmem:[#allocation11 + $0x1d8] sm:$0xf0] }
 0x8d9   :  { %v5084_v13 = vadd.f32 %v5083_v54, %v4995_v20  ;;  %v8850_v20 = vld [vmem:[#allocation11 + $0x1d4] sm:$0xf] }
 0x8da   :  { %v11226_v11 = vadd.f32 %v5845_v18, %v5757_v63 }
 0x8db   :  { %v5193_v55 = vmax.f32 %v5084_v13, 0.0  ;;  %v8391_v13 = vor.u32 %v8850_v20, %v8388_v14 }
 0x8dd   :  { %v4996_v28 = vpop.f32.mrf.mxu2  ;;  %6325 = vmatpush.bf16.msra.mxu3 %v8391_v13 }
 0x8de   :  { %v4997_v17 = vadd.f32 %v4996_v28, %v10994_v48  ;;  %v8324_v48 = vld [vmem:[#allocation11 + $0x158] sm:$0xf0] }
 0x8df   :  { %v5759_v60 = vpop.f32.mrf.mxu0  ;;  %v8327_v54 = vor.u32 %v8834_v10, %v8324_v48 }
 0x8e0   :  { %v5085_v26 = vpop.f32.mrf.mxu3  ;;  %v5760_v32 = vadd.f32 %v5759_v60, %v11086_v38  ;;  %v5848_v33 = vpop.f32.mrf.mxu1 }
 0x8e1   :  { %v5086_v50 = vadd.f32 %v5085_v26, %v4997_v17  ;;  %6236 = vmatpush.bf16.msra.mxu2 %v8327_v54 }
 0x8e2   :  { %v11230_v45 = vadd.f32 %v5848_v33, %v5760_v32  ;;  %5896 = vmatmul.bf16.gmra.mxu2 %v12564_v58  ;;  %6074 = vmatmul.bf16.gmra.mxu0 %v12482_v57 }
 0x8e3   :  { %v5197_v49 = vmax.f32 %v5086_v50, 0.0  ;;  %6163 = vmatmul.bf16.gmra.mxu1 %v12483_v22 }
 0x8e5   :  { %5985 = vmatmul.bf16.gmra.mxu3 %v11138_v23  ;;  %v11236_v63 = vpack.c.bf16 %v5197_v49, %v5193_v55  ;;  %v4999_v18 = vpop.f32.mrf.mxu2 }
 0x8e6   :  { %v5000_v28 = vadd.f32 %v4999_v18, %v10998_v19  ;;  %v12566_v18 = vld [vmem:[#allocation100_spill] sm:$0xff] }
 0x8e7   :  { %12565 = vst [vmem:[#allocation37_spill] sm:$0xff] %v11236_v63  ;;  %v5761_v26 = vpop.f32.mrf.mxu0 }
 0x8e8   :  { %v5088_v17 = vpop.f32.mrf.mxu3  ;;  %v5762_v60 = vadd.f32 %v5761_v26, %v11086_v38  ;;  %v5850_v50 = vpop.f32.mrf.mxu1 }
 0x8e9   :  { %v5089_v57 = vadd.f32 %v5088_v17, %v5000_v28 }
 0x8ea   :  { %v11240_v22 = vadd.f32 %v5850_v50, %v5762_v60 }
 0x8eb   :  { %v5201_v19 = vmax.f32 %v5089_v57, 0.0 }
 0x8ed   :  { %v5001_v32 = vpop.f32.mrf.mxu2 }
 0x8ee   :  { %v5002_v33 = vadd.f32 %v5001_v32, %v11008_v36 }
 0x8ef   :  { %v5764_v55 = vpop.f32.mrf.mxu0 }
 0x8f0   :  { %v5090_v10 = vpop.f32.mrf.mxu3  ;;  %v5765_v48 = vadd.f32 %v5764_v55, %v11086_v38  ;;  %v5853_v20 = vpop.f32.mrf.mxu1 }
 0x8f1   :  { %v5091_v49 = vadd.f32 %v5090_v10, %v5002_v33 }
 0x8f2   :  { %v11244_v54 = vadd.f32 %v5853_v20, %v5765_v48  ;;  %5901 = vmatmul.bf16.gmra.mxu2 %v12566_v18  ;;  %6079 = vmatmul.bf16.gmra.mxu0 %v12485_v1 }
 0x8f3   :  { %v5205_v14 = vmax.f32 %v5091_v49, 0.0  ;;  %6168 = vmatmul.bf16.gmra.mxu1 %v12486_v42 }
 0x8f5   :  { %5990 = vmatmul.bf16.gmra.mxu3 %v11152_v6  ;;  %v11250_v13 = vpack.c.bf16 %v5205_v14, %v5201_v19  ;;  %v5004_v36 = vpop.f32.mrf.mxu2  ;;  %v8832_v14 = vld [vmem:[#allocation11 + $0x144] sm:$0xf] }
 0x8f6   :  { %v5005_v28 = vadd.f32 %v5004_v36, %v11012_v59  ;;  %v8848_v36 = vld [vmem:[#allocation11 + $0x1c4] sm:$0xf] }
 0x8f7   :  { %12567 = vst [vmem:[#allocation92_spill] sm:$0xff] %v11250_v13  ;;  %v5766_v26 = vpop.f32.mrf.mxu0 }
 0x8f8   :  { %v5093_v17 = vpop.f32.mrf.mxu3  ;;  %v5767_v57 = vadd.f32 %v5766_v26, %v11086_v38  ;;  %v5855_v50 = vpop.f32.mrf.mxu1 }
 0x8f9   :  { %v5094_v60 = vadd.f32 %v5093_v17, %v5005_v28  ;;  %v8380_v17 = vld [vmem:[#allocation11 + $0x1c8] sm:$0xf0] }
 0x8fa   :  { %v11254_v32 = vadd.f32 %v5855_v50, %v5767_v57 }
 0x8fb   :  { %v5209_v20 = vmax.f32 %v5094_v60, 0.0  ;;  %v8383_v60 = vor.u32 %v8848_v36, %v8380_v17 }
 0x8fd   :  { %v5006_v33 = vpop.f32.mrf.mxu2  ;;  %6326 = vmatpush.bf16.msra.mxu3 %v8383_v60 }
 0x8fe   :  { %v5007_v1 = vadd.f32 %v5006_v33, %v11022_v51  ;;  %v8316_v51 = vld [vmem:[#allocation11 + $0x148] sm:$0xf0] }
 0x8ff   :  { %v5769_v55 = vpop.f32.mrf.mxu0  ;;  %v8319_v28 = vor.u32 %v8832_v14, %v8316_v51 }
 0x900   :  { %v5095_v10 = vpop.f32.mrf.mxu3  ;;  %v5770_v42 = vadd.f32 %v5769_v55, %v11086_v38  ;;  %v5858_v48 = vpop.f32.mrf.mxu1 }
 0x901   :  { %v5096_v49 = vadd.f32 %v5095_v10, %v5007_v1  ;;  %6237 = vmatpush.bf16.msra.mxu2 %v8319_v28 }
 0x902   :  { %v11258_v59 = vadd.f32 %v5858_v48, %v5770_v42  ;;  %5906 = vmatmul.bf16.gmra.mxu2 %v10934_v46  ;;  %6084 = vmatmul.bf16.gmra.mxu0 %v12488_v25 }
 0x903   :  { %v5213_v19 = vmax.f32 %v5096_v49, 0.0  ;;  %6173 = vmatmul.bf16.gmra.mxu1 %v12489_v37 }
 0x905   :  { %5995 = vmatmul.bf16.gmra.mxu3 %v11166_v3  ;;  %v11264_v26 = vpack.c.bf16 %v5213_v19, %v5209_v20  ;;  %v5009_v57 = vpop.f32.mrf.mxu2 }
 0x906   :  { %v5010_v50 = vadd.f32 %v5009_v57, %v11026_v12 }
 0x907   :  { %12568 = vst [vmem:[#allocation82_spill] sm:$0xff] %v11264_v26  ;;  %v5771_v1 = vpop.f32.mrf.mxu0 }
 0x908   :  { %v5098_v33 = vpop.f32.mrf.mxu3  ;;  %v5772_v10 = vadd.f32 %v5771_v1, %v11086_v38  ;;  %v5860_v55 = vpop.f32.mrf.mxu1 }
 0x909   :  { %v5099_v25 = vadd.f32 %v5098_v33, %v5010_v50 }
 0x90a   :  { %v11268_v37 = vadd.f32 %v5860_v55, %v5772_v10 }
 0x90b   :  { %v5217_v12 = vmax.f32 %v5099_v25, 0.0 }
 0x90d   :  { %v5011_v49 = vpop.f32.mrf.mxu2 }
 0x90e   :  { %v5012_v42 = vadd.f32 %v5011_v49, %v11036_v56 }
 0x90f   :  { %v5774_v20 = vpop.f32.mrf.mxu0 }
 0x910   :  { %v5100_v48 = vpop.f32.mrf.mxu3  ;;  %v5775_v14 = vadd.f32 %v5774_v20, %v11086_v38  ;;  %v5863_v51 = vpop.f32.mrf.mxu1 }
 0x911   :  { %v5101_v19 = vadd.f32 %v5100_v48, %v5012_v42 }
 0x912   :  { %v11272_v28 = vadd.f32 %v5863_v51, %v5775_v14  ;;  %5911 = vmatmul.bf16.gmra.mxu2 %v10948_v16  ;;  %6089 = vmatmul.bf16.gmra.mxu0 %v12491_v47  ;;  %v12571_v51 = vld [vmem:[#allocation77_spill] sm:$0xff] }
 0x913   :  { %v5221_v36 = vmax.f32 %v5101_v19, 0.0  ;;  %6178 = vmatmul.bf16.gmra.mxu1 %v10721_v43 }
 0x915   :  { %6000 = vmatmul.bf16.gmra.mxu3 %v11180_v44  ;;  %v11278_v17 = vpack.c.bf16 %v5221_v36, %v5217_v12  ;;  %v5014_v56 = vpop.f32.mrf.mxu2  ;;  %v12572_v12 = vld [vmem:[#allocation39_spill] sm:$0xff]  ;;  %v12573_v36 = vld [vmem:[#allocation90_spill] sm:$0xff] }
 0x916   :  { %v5015_v57 = vadd.f32 %v5014_v56, %v11040_v39  ;;  %v8830_v56 = vld [vmem:[#allocation11 + $0x134] sm:$0xf] }
 0x917   :  { %12569 = vst [vmem:[#allocation73_spill] sm:$0xff] %v11278_v17  ;;  %v5776_v50 = vpop.f32.mrf.mxu0 }
 0x918   :  { %v5103_v60 = vpop.f32.mrf.mxu3  ;;  %v5777_v1 = vadd.f32 %v5776_v50, %v11086_v38  ;;  %v5865_v25 = vpop.f32.mrf.mxu1  ;;  %v8372_v50 = vld [vmem:[#allocation11 + $0x1b8] sm:$0xf0] }
 0x919   :  { %v5104_v33 = vadd.f32 %v5103_v60, %v5015_v57  ;;  %v8846_v57 = vld [vmem:[#allocation11 + $0x1b4] sm:$0xf] }
 0x91a   :  { %v11282_v10 = vadd.f32 %v5865_v25, %v5777_v1 }
 0x91b   :  { %v5225_v19 = vmax.f32 %v5104_v33, 0.0  ;;  %v8375_v33 = vor.u32 %v8846_v57, %v8372_v50 }
 0x91d   :  { %v5016_v55 = vpop.f32.mrf.mxu2  ;;  %6327 = vmatpush.bf16.msra.mxu3 %v8375_v33  ;;  %v12578_v33 = vld [vmem:[#allocation87_spill] sm:$0xff] }
 0x91e   :  { %v5017_v47 = vadd.f32 %v5016_v55, %v11050_v2  ;;  %v8308_v2 = vld [vmem:[#allocation11 + $0x138] sm:$0xf0]  ;;  %v12574_v55 = vld [vmem:[#allocation57_spill] sm:$0xff] }
 0x91f   :  { %v5779_v42 = vpop.f32.mrf.mxu0  ;;  %v8311_v60 = vor.u32 %v8830_v56, %v8308_v2 }
 0x920   :  { %v5105_v49 = vpop.f32.mrf.mxu3  ;;  %v5780_v43 = vadd.f32 %v5779_v42, %v11086_v38  ;;  %v5868_v20 = vpop.f32.mrf.mxu1 }
 0x921   :  { %v5106_v48 = vadd.f32 %v5105_v49, %v5017_v47  ;;  %6238 = vmatpush.bf16.msra.mxu2 %v8311_v60 }
 0x922   :  { %v11286_v39 = vadd.f32 %v5868_v20, %v5780_v43  ;;  %5916 = vmatmul.bf16.gmra.mxu2 %v12571_v51  ;;  %6094 = vmatmul.bf16.gmra.mxu0 %v12572_v12 }
 0x923   :  { %v5229_v14 = vmax.f32 %v5106_v48, 0.0  ;;  %6183 = vmatmul.bf16.gmra.mxu1 %v12573_v36 }
 0x924   :  { %12570 = vst [vmem:[#allocation95_spill] sm:$0xff] %v11286_v39  ;;  %v12576_v39 = vld [vmem:[#allocation89_spill] sm:$0xff] }
 0x925   :  { %6005 = vmatmul.bf16.gmra.mxu3 %v11194_v15  ;;  %v11292_v1 = vpack.c.bf16 %v5229_v14, %v5225_v19  ;;  %v5019_v25 = vpop.f32.mrf.mxu2 }
 0x926   :  { %v5020_v47 = vadd.f32 %v5019_v25, %v12574_v55 }
 0x927   :  { %v5781_v42 = vpop.f32.mrf.mxu0 }
 0x928   :  { %v5108_v49 = vpop.f32.mrf.mxu3  ;;  %v5782_v43 = vadd.f32 %v5781_v42, %v11086_v38  ;;  %v5870_v20 = vpop.f32.mrf.mxu1  ;;  %v8863_v42 = vld [vmem:[#allocation13 + $0x38] sm:$0xff] }
 0x929   :  { %v5109_v48 = vadd.f32 %v5108_v49, %v5020_v47  ;;  %v12579_v47 = vld [vmem:[#allocation65_spill] sm:$0xff]  ;;  %v12580_v49 = vld [vmem:[#allocation91_spill] sm:$0xff]  ;;  %6640 = vmatpush.bf16.msra.mxu0 %v8863_v42 }
 0x92a   :  { %v11296_v12 = vadd.f32 %v5870_v20, %v5782_v43  ;;  %v12581_v20 = vld [vmem:[#allocation41_spill] sm:$0xff] }
 0x92b   :  { %v5233_v25 = vmax.f32 %v5109_v48, 0.0 }
 0x92c   :  { %12575 = vst [vmem:[#allocation60_spill] sm:$0xff] %v11296_v12  ;;  %v12591_v12 = vld [vmem:[#allocation75_spill] sm:$0xff] }
 0x92d   :  { %v5021_v36 = vpop.f32.mrf.mxu2 }
 0x92e   :  { %v5022_v56 = vadd.f32 %v5021_v36, %v12576_v39 }
 0x92f   :  { %v5784_v19 = vpop.f32.mrf.mxu0 }
 0x930   :  { %v5110_v2 = vpop.f32.mrf.mxu3  ;;  %v5785_v57 = vadd.f32 %v5784_v19, %v11086_v38  ;;  %v5873_v50 = vpop.f32.mrf.mxu1 }
 0x931   :  { %v5111_v14 = vadd.f32 %v5110_v2, %v5022_v56 }
 0x932   :  { %v11300_v60 = vadd.f32 %v5873_v50, %v5785_v57  ;;  %5921 = vmatmul.bf16.gmra.mxu2 %v12578_v33  ;;  %6099 = vmatmul.bf16.gmra.mxu0 %v12579_v47  ;;  %v8871_v50 = vld [vmem:[#allocation13 + $0x78] sm:$0xff]  ;;  %v12583_v47 = vld [vmem:[#allocation70_spill] sm:$0xff] }
 0x933   :  { %v5237_v55 = vmax.f32 %v5111_v14, 0.0  ;;  %6188 = vmatmul.bf16.gmra.mxu1 %v12580_v49 }
 0x934   :  { %12577 = vst [vmem:[#allocation42_spill] sm:$0xff] %v11300_v60  ;;  %v11313_v60 = vperm.slane %v12583_v47, 1  ;;  %6729 = vmatpush.bf16.msra.mxu1 %v8871_v50  ;;  %v8828_v50 = vld [vmem:[#allocation11 + $0x124] sm:$0xf]  ;;  %v8300_v47 = vld [vmem:[#allocation11 + $0x128] sm:$0xf0] }
 0x935   :  { %6010 = vmatmul.bf16.gmra.mxu3 %v11208_v61  ;;  %v11306_v39 = vpack.c.bf16 %v5237_v55, %v5233_v25  ;;  %v5024_v43 = vpop.f32.mrf.mxu2  ;;  %v12584_v25 = vld [vmem:[#allocation52_spill] sm:$0xff] }
 0x936   :  { %v5025_v36 = vadd.f32 %v5024_v43, %v12581_v20 }
 0x937   :  { %v5786_v48 = vpop.f32.mrf.mxu0 }
 0x938   :  { %v5113_v56 = vpop.f32.mrf.mxu3  ;;  %v5787_v19 = vadd.f32 %v5786_v48, %v11086_v38  ;;  %v5875_v14 = vpop.f32.mrf.mxu1  ;;  %v12586_v48 = vld [vmem:[#allocation23_spill] sm:$0xff] }
 0x939   :  { %v5114_v2 = vadd.f32 %v5113_v56, %v5025_v36 }
 0x93a   :  { %v11310_v57 = vadd.f32 %v5875_v14, %v5787_v19  ;;  %v12587_v19 = vld [vmem:[#allocation27_spill] sm:$0xff]  ;;  %v12588_v14 = vld [vmem:[#allocation30_spill] sm:$0xff] }
 0x93b   :  { %v5241_v36 = vmax.f32 %v5114_v2, 0.0 }
 0x93c   :  { %12582 = vst [vmem:[#allocation68_spill] sm:$0xff] %v11310_v57 }
 0x93d   :  { %v5026_v49 = vpop.f32.mrf.mxu2 }
 0x93e   :  { %v5027_v55 = vadd.f32 %v5026_v49, %v12584_v25  ;;  %v8844_v49 = vld [vmem:[#allocation11 + $0x1a4] sm:$0xf]  ;;  %v8303_v25 = vor.u32 %v8828_v50, %v8300_v47 }
 0x93f   :  { %v6065_v33 = vpop.f32.mrf.mxu0 }
 0x940   :  { %v5115_v61 = vpop.f32.mrf.mxu3  ;;  %v6066_v42 = vadd.f32 %v6065_v33, %v11313_v60  ;;  %v6154_v20 = vpop.f32.mrf.mxu1  ;;  %6239 = vmatpush.bf16.msra.mxu2 %v8303_v25 }
 0x941   :  { %v5116_v43 = vadd.f32 %v5115_v61, %v5027_v55  ;;  %v8364_v61 = vld [vmem:[#allocation11 + $0x1a8] sm:$0xf0] }
 0x942   :  { %v11317_v38 = vadd.f32 %v6154_v20, %v6066_v42  ;;  %5926 = vmatmul.bf16.gmra.mxu2 %v12586_v48  ;;  %6104 = vmatmul.bf16.gmra.mxu0 %v12587_v19  ;;  %v8367_v2 = vor.u32 %v8844_v49, %v8364_v61 }
 0x943   :  { %v5245_v56 = vmax.f32 %v5116_v43, 0.0  ;;  %6193 = vmatmul.bf16.gmra.mxu1 %v12588_v14  ;;  %v12589_v43 = vld [vmem:[#allocation26_spill] sm:$0xff] }
 0x944   :  { %12585 = vst [vmem:[#allocation97_spill] sm:$0xff] %v11317_v38  ;;  %6328 = vmatpush.bf16.msra.mxu3 %v8367_v2  ;;  %v12593_v2 = vld [vmem:[#allocation51_spill] sm:$0xff] }
 0x945   :  { %6015 = vmatmul.bf16.gmra.mxu3 %v11222_v53  ;;  %v11323_v55 = vpack.c.bf16 %v5245_v56, %v5241_v36  ;;  %v5887_v33 = vpop.f32.mrf.mxu2 }
 0x946   :  { %v5888_v42 = vadd.f32 %v5887_v33, %v12589_v43 }
 0x947   :  { %v6067_v38 = vpop.f32.mrf.mxu0 }
 0x948   :  { %v5976_v20 = vpop.f32.mrf.mxu3  ;;  %v6068_v53 = vadd.f32 %v6067_v38, %v11313_v60  ;;  %v6156_v48 = vpop.f32.mrf.mxu1  ;;  %v8862_v38 = vld [vmem:[#allocation13 + $0x30] sm:$0xff] }
 0x949   :  { %v5977_v19 = vadd.f32 %v5976_v20, %v5888_v42  ;;  %v12594_v42 = vld [vmem:[#allocation31_spill] sm:$0xff]  ;;  %6641 = vmatpush.bf16.msra.mxu0 %v8862_v38 }
 0x94a   :  { %v11327_v14 = vadd.f32 %v6156_v48, %v6068_v53  ;;  %v12595_v53 = vld [vmem:[#allocation34_spill] sm:$0xff]  ;;  %v12596_v48 = vld [vmem:[#allocation76_spill] sm:$0xff] }
 0x94b   :  { %v6412_v33 = vmax.f32 %v5977_v19, 0.0 }
 0x94c   :  { %12590 = vst [vmem:[#allocation20_spill] sm:$0xff] %v11327_v14 }
 0x94d   :  { %v5889_v57 = vpop.f32.mrf.mxu2 }
 0x94e   :  { %v5890_v50 = vadd.f32 %v5889_v57, %v12591_v12 }
 0x94f   :  { %v6070_v36 = vpop.f32.mrf.mxu0 }
 0x950   :  { %v5978_v47 = vpop.f32.mrf.mxu3  ;;  %v6071_v49 = vadd.f32 %v6070_v36, %v11313_v60  ;;  %v6159_v61 = vpop.f32.mrf.mxu1 }
 0x951   :  { %v5979_v56 = vadd.f32 %v5978_v47, %v5890_v50 }
 0x952   :  { %v11331_v25 = vadd.f32 %v6159_v61, %v6071_v49  ;;  %5931 = vmatmul.bf16.gmra.mxu2 %v12593_v2  ;;  %6109 = vmatmul.bf16.gmra.mxu0 %v12594_v42  ;;  %v8870_v61 = vld [vmem:[#allocation13 + $0x70] sm:$0xff] }
 0x953   :  { %v6414_v43 = vmax.f32 %v5979_v56, 0.0  ;;  %6198 = vmatmul.bf16.gmra.mxu1 %v12595_v53 }
 0x954   :  { %12592 = vst [vmem:[#allocation54_spill] sm:$0xff] %v11331_v25  ;;  %6730 = vmatpush.bf16.msra.mxu1 %v8870_v61  ;;  %v12598_v25 = vld [vmem:[#allocation56_spill] sm:$0xff] }
 0x955   :  { %6020 = vmatmul.bf16.gmra.mxu3 %v11236_v63  ;;  %v11337_v12 = vpack.c.bf16 %v6414_v43, %v6412_v33  ;;  %v5892_v57 = vpop.f32.mrf.mxu2 }
 0x956   :  { %v5893_v20 = vadd.f32 %v5892_v57, %v12596_v48 }
 0x957   :  { %v6072_v19 = vpop.f32.mrf.mxu0 }
 0x958   :  { %v5981_v50 = vpop.f32.mrf.mxu3  ;;  %v6073_v36 = vadd.f32 %v6072_v19, %v11313_v60  ;;  %v6161_v56 = vpop.f32.mrf.mxu1  ;;  %v12602_v19 = vld [vmem:[#allocation35_spill] sm:$0xff] }
 0x959   :  { %v5982_v47 = vadd.f32 %v5981_v50, %v5893_v20  ;;  %v12600_v20 = vld [vmem:[#allocation55_spill] sm:$0xff]  ;;  %v12601_v50 = vld [vmem:[#allocation33_spill] sm:$0xff] }
 0x95a   :  { %v11341_v49 = vadd.f32 %v6161_v56, %v6073_v36  ;;  %v8826_v36 = vld [vmem:[#allocation11 + $0x114] sm:$0xf] }
 0x95b   :  { %v6416_v57 = vmax.f32 %v5982_v47, 0.0  ;;  %v8842_v56 = vld [vmem:[#allocation11 + $0x194] sm:$0xf] }
 0x95c   :  { %12597 = vst [vmem:[#allocation74_spill] sm:$0xff] %v11341_v49  ;;  %v12605_v49 = vld [vmem:[#allocation38_spill] sm:$0xff] }
 0x95d   :  { %v5894_v42 = vpop.f32.mrf.mxu2 }
 0x95e   :  { %v5895_v53 = vadd.f32 %v5894_v42, %v12598_v25  ;;  %v8292_v25 = vld [vmem:[#allocation11 + $0x118] sm:$0xf0] }
 0x95f   :  { %v6075_v33 = vpop.f32.mrf.mxu0  ;;  %v8295_v61 = vor.u32 %v8826_v36, %v8292_v25 }
 0x960   :  { %v5983_v63 = vpop.f32.mrf.mxu3  ;;  %v6076_v38 = vadd.f32 %v6075_v33, %v11313_v60  ;;  %v6164_v2 = vpop.f32.mrf.mxu1  ;;  %v12603_v33 = vld [vmem:[#allocation43_spill] sm:$0xff] }
 0x961   :  { %v5984_v43 = vadd.f32 %v5983_v63, %v5895_v53  ;;  %v8356_v63 = vld [vmem:[#allocation11 + $0x198] sm:$0xf0]  ;;  %6240 = vmatpush.bf16.msra.mxu2 %v8295_v61 }
 0x962   :  { %v11345_v14 = vadd.f32 %v6164_v2, %v6076_v38  ;;  %5936 = vmatmul.bf16.gmra.mxu2 %v12600_v20  ;;  %6114 = vmatmul.bf16.gmra.mxu0 %v12601_v50  ;;  %v8359_v47 = vor.u32 %v8842_v56, %v8356_v63 }
 0x963   :  { %v6418_v48 = vmax.f32 %v5984_v43, 0.0  ;;  %6203 = vmatmul.bf16.gmra.mxu1 %v12602_v19 }
 0x964   :  { %12599 = vst [vmem:[#allocation81_spill] sm:$0xff] %v11345_v14  ;;  %6329 = vmatpush.bf16.msra.mxu3 %v8359_v47  ;;  %v12607_v47 = vld [vmem:[#allocation88_spill] sm:$0xff] }
 0x965   :  { %6025 = vmatmul.bf16.gmra.mxu3 %v11250_v13  ;;  %v11351_v42 = vpack.c.bf16 %v6418_v48, %v6416_v57  ;;  %v5897_v53 = vpop.f32.mrf.mxu2 }
 0x966   :  { %v5898_v2 = vadd.f32 %v5897_v53, %v12603_v33 }
 0x967   :  { %v6077_v38 = vpop.f32.mrf.mxu0 }
 0x968   :  { %v5986_v43 = vpop.f32.mrf.mxu3  ;;  %v6078_v14 = vadd.f32 %v6077_v38, %v11313_v60  ;;  %v6166_v13 = vpop.f32.mrf.mxu1 }
 0x969   :  { %v5987_v50 = vadd.f32 %v5986_v43, %v5898_v2  ;;  %v12608_v2 = vld [vmem:[#allocation79_spill] sm:$0xff]  ;;  %v12610_v43 = vld [vmem:[#allocation45_spill] sm:$0xff] }
 0x96a   :  { %v11355_v19 = vadd.f32 %v6166_v13, %v6078_v14  ;;  %v12609_v13 = vld [vmem:[#allocation94_spill] sm:$0xff]  ;;  %v8861_v14 = vld [vmem:[#allocation13 + $0x28] sm:$0xff] }
 0x96b   :  { %v6420_v53 = vmax.f32 %v5987_v50, 0.0  ;;  %6642 = vmatpush.bf16.msra.mxu0 %v8861_v14 }
 0x96c   :  { %12604 = vst [vmem:[#allocation21_spill] sm:$0xff] %v11355_v19 }
 0x96d   :  { %v5899_v20 = vpop.f32.mrf.mxu2 }
 0x96e   :  { %v5900_v36 = vadd.f32 %v5899_v20, %v12605_v49 }
 0x96f   :  { %v6080_v57 = vpop.f32.mrf.mxu0 }
 0x970   :  { %v5988_v25 = vpop.f32.mrf.mxu3  ;;  %v6081_v56 = vadd.f32 %v6080_v57, %v11313_v60  ;;  %v6169_v63 = vpop.f32.mrf.mxu1 }
 0x971   :  { %v5989_v48 = vadd.f32 %v5988_v25, %v5900_v36 }
 0x972   :  { %v11359_v61 = vadd.f32 %v6169_v63, %v6081_v56  ;;  %5941 = vmatmul.bf16.gmra.mxu2 %v12607_v47  ;;  %6119 = vmatmul.bf16.gmra.mxu0 %v12608_v2  ;;  %v8869_v63 = vld [vmem:[#allocation13 + $0x68] sm:$0xff] }
 0x973   :  { %v6422_v33 = vmax.f32 %v5989_v48, 0.0  ;;  %6208 = vmatmul.bf16.gmra.mxu1 %v12609_v13 }
 0x974   :  { %12606 = vst [vmem:[#allocation28_spill] sm:$0xff] %v11359_v61  ;;  %6731 = vmatpush.bf16.msra.mxu1 %v8869_v63  ;;  %v12612_v61 = vld [vmem:[#allocation44_spill] sm:$0xff] }
 0x975   :  { %6030 = vmatmul.bf16.gmra.mxu3 %v11264_v26  ;;  %v11365_v49 = vpack.c.bf16 %v6422_v33, %v6420_v53  ;;  %v5902_v20 = vpop.f32.mrf.mxu2 }
 0x976   :  { %v5903_v38 = vadd.f32 %v5902_v20, %v12610_v43 }
 0x977   :  { %v6082_v50 = vpop.f32.mrf.mxu0 }
 0x978   :  { %v5991_v36 = vpop.f32.mrf.mxu3  ;;  %v6083_v57 = vadd.f32 %v6082_v50, %v11313_v60  ;;  %v6171_v48 = vpop.f32.mrf.mxu1  ;;  %v12616_v50 = vld [vmem:[#allocation64_spill] sm:$0xff] }
 0x979   :  { %v5992_v25 = vadd.f32 %v5991_v36, %v5903_v38  ;;  %v12614_v38 = vld [vmem:[#allocation40_spill] sm:$0xff]  ;;  %v12615_v36 = vld [vmem:[#allocation69_spill] sm:$0xff] }
 0x97a   :  { %v11369_v56 = vadd.f32 %v6171_v48, %v6083_v57  ;;  %v8824_v57 = vld [vmem:[#allocation11 + $0x104] sm:$0xf] }
 0x97b   :  { %v6424_v20 = vmax.f32 %v5992_v25, 0.0  ;;  %v8840_v48 = vld [vmem:[#allocation11 + $0x184] sm:$0xf] }
 0x97c   :  { %12611 = vst [vmem:[#allocation66_spill] sm:$0xff] %v11369_v56 }
 0x97d   :  { %v5904_v2 = vpop.f32.mrf.mxu2 }
 0x97e   :  { %v5905_v13 = vadd.f32 %v5904_v2, %v12612_v61  ;;  %v8284_v61 = vld [vmem:[#allocation11 + $0x108] sm:$0xf0] }
 0x97f   :  { %v6085_v53 = vpop.f32.mrf.mxu0  ;;  %v8287_v63 = vor.u32 %v8824_v57, %v8284_v61  ;;  %v8860_v57 = vld [vmem:[#allocation13 + $0x20] sm:$0xff] }
 0x980   :  { %v5993_v26 = vpop.f32.mrf.mxu3  ;;  %v6086_v14 = vadd.f32 %v6085_v53, %v11313_v60  ;;  %v6174_v47 = vpop.f32.mrf.mxu1  ;;  %v12617_v53 = vld [vmem:[#allocation53_spill] sm:$0xff]  ;;  %6643 = vmatpush.bf16.msra.mxu0 %v8860_v57 }
 0x981   :  { %v5994_v33 = vadd.f32 %v5993_v26, %v5905_v13  ;;  %v8348_v26 = vld [vmem:[#allocation11 + $0x188] sm:$0xf0]  ;;  %6241 = vmatpush.bf16.msra.mxu2 %v8287_v63 }
 0x982   :  { %v11373_v19 = vadd.f32 %v6174_v47, %v6086_v14  ;;  %5946 = vmatmul.bf16.gmra.mxu2 %v12614_v38  ;;  %6124 = vmatmul.bf16.gmra.mxu0 %v12615_v36  ;;  %v8351_v25 = vor.u32 %v8840_v48, %v8348_v26 }
 0x983   :  { %v6426_v43 = vmax.f32 %v5994_v33, 0.0  ;;  %6213 = vmatmul.bf16.gmra.mxu1 %v12616_v50 }
 0x984   :  { %12613 = vst [vmem:[#allocation83_spill] sm:$0xff] %v11373_v19  ;;  %6330 = vmatpush.bf16.msra.mxu3 %v8351_v25  ;;  %v8859_v25 = vld [vmem:[#allocation13 + $0x18] sm:$0xff] }
 0x985   :  { %6035 = vmatmul.bf16.gmra.mxu3 %v11278_v17  ;;  %v11379_v2 = vpack.c.bf16 %v6426_v43, %v6424_v20  ;;  %v5907_v13 = vpop.f32.mrf.mxu2  ;;  %v12618_v17 = vld [vmem:[#allocation93_spill] sm:$0xff]  ;;  %6644 = vmatpush.bf16.msra.mxu0 %v8859_v25 }
 0x986   :  { %v5908_v47 = vadd.f32 %v5907_v13, %v12617_v53  ;;  %v12620_v53 = vld [vmem:[#allocation61_spill] sm:$0xff] }
 0x987   :  { %v11382_v14 = vpop.f32.mrf.mxu0 }
 0x988   :  { %v5996_v33 = vpop.f32.mrf.mxu3  ;;  %v11384_v19 = vpop.f32.mrf.mxu1 }
 0x989   :  { %v5997_v36 = vadd.f32 %v5996_v33, %v5908_v47 }
 0x98b   :  { %v6428_v26 = vmax.f32 %v5997_v36, 0.0  ;;  %v8858_v36 = vld [vmem:[#allocation13 + $0x10] sm:$0xff] }
 0x98c   :  { %6645 = vmatpush.bf16.msra.mxu0 %v8858_v36  ;;  %v12623_v36 = vld [vmem:[#allocation48_spill] sm:$0xff] }
 0x98d   :  { %v5909_v50 = vpop.f32.mrf.mxu2 }
 0x98e   :  { %v5910_v38 = vadd.f32 %v5909_v50, %v12618_v17 }
 0x98f   :  { %v6090_v61 = vpop.f32.mrf.mxu0 }
 0x990   :  { %v5998_v56 = vpop.f32.mrf.mxu3  ;;  %v6091_v43 = vadd.f32 %v6090_v61, %v11313_v60  ;;  %v6179_v48 = vpop.f32.mrf.mxu1 }
 0x991   :  { %v5999_v20 = vadd.f32 %v5998_v56, %v5910_v38  ;;  %v12621_v38 = vld [vmem:[#allocation36_spill] sm:$0xff] }
 0x992   :  { %v11388_v63 = vadd.f32 %v6179_v48, %v6091_v43  ;;  %5951 = vmatmul.bf16.gmra.mxu2 %v12620_v53  ;;  %6129 = vmatmul.bf16.gmra.mxu0 %v12554_v62  ;;  %v8868_v62 = vld [vmem:[#allocation13 + $0x60] sm:$0xff] }
 0x993   :  { %v6430_v13 = vmax.f32 %v5999_v20, 0.0  ;;  %6218 = vmatmul.bf16.gmra.mxu1 %v12555_v4  ;;  %v8857_v20 = vld [vmem:[#allocation13 + $0x8] sm:$0xff] }
 0x994   :  { %12619 = vst [vmem:[#allocation63_spill] sm:$0xff] %v11388_v63  ;;  %6732 = vmatpush.bf16.msra.mxu1 %v8868_v62  ;;  %6646 = vmatpush.bf16.msra.mxu0 %v8857_v20 }
 0x995   :  { %6040 = vmatmul.bf16.gmra.mxu3 %v11292_v1  ;;  %v11394_v17 = vpack.c.bf16 %v6430_v13, %v6428_v26  ;;  %v5912_v56 = vpop.f32.mrf.mxu2  ;;  %v8856_v26 = vld [vmem:[#allocation13] sm:$0xff] }
 0x996   :  { %v5913_v47 = vadd.f32 %v5912_v56, %v12621_v38 }
 0x997   :  { %v11397_v50 = vpop.f32.mrf.mxu0 }
 0x998   :  { %v6001_v33 = vpop.f32.mrf.mxu3  ;;  %v11399_v61 = vpop.f32.mrf.mxu1  ;;  %6647 = vmatpush.bf16.msra.mxu0 %v8856_v26 }
 0x999   :  { %v6002_v57 = vadd.f32 %v6001_v33, %v5913_v47 }
 0x99b   :  { %v6432_v63 = vmax.f32 %v6002_v57, 0.0 }
 0x99d   :  { %v5914_v43 = vpop.f32.mrf.mxu2 }
 0x99e   :  { %v5915_v4 = vadd.f32 %v5914_v43, %v11170_v31 }
 0x99f   :  { %v6095_v13 = vpop.f32.mrf.mxu0 }
 0x9a0   :  { %v6003_v48 = vpop.f32.mrf.mxu3  ;;  %v6096_v56 = vadd.f32 %v6095_v13, %v11313_v60  ;;  %v6184_v38 = vpop.f32.mrf.mxu1 }
 0x9a1   :  { %v6004_v25 = vadd.f32 %v6003_v48, %v5915_v4 }
 0x9a2   :  { %v11403_v33 = vadd.f32 %v6184_v38, %v6096_v56  ;;  %5956 = vmatmul.bf16.gmra.mxu2 %v12623_v36  ;;  %6134 = vmatmul.bf16.gmra.mxu0 %v12556_v40 }
 0x9a3   :  { %v6434_v47 = vmax.f32 %v6004_v25, 0.0  ;;  %6223 = vmatmul.bf16.gmra.mxu1 %v12557_v52 }
 0x9a4   :  { %12622 = vst [vmem:[#allocation58_spill] sm:$0xff] %v11403_v33 }
 0x9a5   :  { %6045 = vmatmul.bf16.gmra.mxu3 %v11306_v39  ;;  %v11409_v31 = vpack.c.bf16 %v6434_v47, %v6432_v63  ;;  %v5917_v62 = vpop.f32.mrf.mxu2 }
 0x9a6   :  { %v5918_v20 = vadd.f32 %v5917_v62, %v11174_v34  ;;  %v12625_v34 = vld [vmem:[#allocation71_spill] sm:$0xff] }
 0x9a7   :  { %v11412_v4 = vpop.f32.mrf.mxu0 }
 0x9a8   :  { %v6006_v43 = vpop.f32.mrf.mxu3  ;;  %v11414_v48 = vpop.f32.mrf.mxu1 }
 0x9a9   :  { %v6007_v57 = vadd.f32 %v6006_v43, %v5918_v20 }
 0x9ab   :  { %v6436_v63 = vmax.f32 %v6007_v57, 0.0 }
 0x9ad   :  { %v5919_v26 = vpop.f32.mrf.mxu2 }
 0x9ae   :  { %v5920_v13 = vadd.f32 %v5919_v26, %v11184_v30 }
 0x9af   :  { %v6100_v40 = vpop.f32.mrf.mxu0 }
 0x9b0   :  { %v6008_v25 = vpop.f32.mrf.mxu3  ;;  %v6101_v38 = vadd.f32 %v6100_v40, %v11313_v60  ;;  %v6189_v52 = vpop.f32.mrf.mxu1 }
 0x9b1   :  { %v6009_v56 = vadd.f32 %v6008_v25, %v5920_v13  ;;  %v8867_v25 = vld [vmem:[#allocation13 + $0x58] sm:$0xff] }
 0x9b2   :  { %v11418_v33 = vadd.f32 %v6189_v52, %v6101_v38  ;;  %5961 = vmatmul.bf16.gmra.mxu2 %v12625_v34  ;;  %6139 = vmatmul.bf16.gmra.mxu0 %v12558_v5 }
 0x9b3   :  { %v6438_v47 = vmax.f32 %v6009_v56, 0.0  ;;  %6228 = vmatmul.bf16.gmra.mxu1 %v12559_v29 }
 0x9b4   :  { %12624 = vst [vmem:[#allocation98_spill] sm:$0xff] %v11418_v33  ;;  %6733 = vmatpush.bf16.msra.mxu1 %v8867_v25 }
 0x9b5   :  { %6050 = vmatmul.bf16.gmra.mxu3 %v11323_v55  ;;  %v11424_v62 = vpack.c.bf16 %v6438_v47, %v6436_v63  ;;  %v5922_v30 = vpop.f32.mrf.mxu2 }
 0x9b6   :  { %v5923_v20 = vadd.f32 %v5922_v30, %v11188_v9 }
 0x9b7   :  { %v11427_v26 = vpop.f32.mrf.mxu0 }
 0x9b8   :  { %v6011_v43 = vpop.f32.mrf.mxu3  ;;  %v11429_v13 = vpop.f32.mrf.mxu1 }
 0x9b9   :  { %v6012_v57 = vadd.f32 %v6011_v43, %v5923_v20 }
 0x9bb   :  { %v6440_v47 = vmax.f32 %v6012_v57, 0.0 }
 0x9bd   :  { %v5924_v40 = vpop.f32.mrf.mxu2 }
 0x9be   :  { %v5925_v5 = vadd.f32 %v5924_v40, %v11198_v41 }
 0x9bf   :  { %v6105_v38 = vpop.f32.mrf.mxu0 }
 0x9c0   :  { %v6013_v56 = vpop.f32.mrf.mxu3  ;;  %v6106_v29 = vadd.f32 %v6105_v38, %v11313_v60  ;;  %v6194_v63 = vpop.f32.mrf.mxu1 }
 0x9c1   :  { %v6014_v52 = vadd.f32 %v6013_v56, %v5925_v5 }
 0x9c2   :  { %v11433_v9 = vadd.f32 %v6194_v63, %v6106_v29  ;;  %6242 = vmatmul.bf16.vlgmr.msra.gmra.mxu2 %v12560_v35  ;;  %6648 = vmatmul.bf16.vlgmr.msra.gmra.mxu0 %v11337_v12 }
 0x9c3   :  { %v6442_v33 = vmax.f32 %v6014_v52, 0.0 }
 0x9c5   :  { %6331 = vmatmul.bf16.vlgmr.msra.gmra.mxu3 %v11110_v0  ;;  %v11438_v30 = vpack.c.bf16 %v6442_v33, %v6440_v47  ;;  %v5927_v20 = vpop.f32.mrf.mxu2 }
 0x9c6   :  { %v5928_v41 = vadd.f32 %v5927_v20, %v11202_v21 }
 0x9c7   :  { %v11441_v25 = vpop.f32.mrf.mxu0 }
 0x9c8   :  { %v6016_v43 = vpop.f32.mrf.mxu3  ;;  %v11443_v5 = vpop.f32.mrf.mxu1 }
 0x9c9   :  { %v6017_v40 = vadd.f32 %v6016_v43, %v5928_v41 }
 0x9cb   :  { %v6444_v33 = vmax.f32 %v6017_v40, 0.0  ;;  %v8866_v40 = vld [vmem:[#allocation13 + $0x50] sm:$0xff] }
 0x9cc   :  { %6734 = vmatpush.bf16.msra.mxu1 %v8866_v40 }
 0x9cd   :  { %v5929_v57 = vpop.f32.mrf.mxu2 }
 0x9ce   :  { %v5930_v56 = vadd.f32 %v5929_v57, %v11212_v7 }
 0x9cf   :  { %v6110_v35 = vpop.f32.mrf.mxu0 }
 0x9d0   :  { %v6018_v38 = vpop.f32.mrf.mxu3  ;;  %v6111_v12 = vadd.f32 %v6110_v35, %v11313_v60  ;;  %v6199_v0 = vpop.f32.mrf.mxu1 }
 0x9d1   :  { %v6019_v52 = vadd.f32 %v6018_v38, %v5930_v56 }
 0x9d2   :  { %v11447_v63 = vadd.f32 %v6199_v0, %v6111_v12  ;;  %6247 = vmatmul.bf16.gmra.mxu2 %v12562_v8  ;;  %6653 = vmatmul.bf16.gmra.mxu0 %v11351_v42 }
 0x9d3   :  { %v6446_v29 = vmax.f32 %v6019_v52, 0.0 }
 0x9d5   :  { %6336 = vmatmul.bf16.gmra.mxu3 %v11124_v24  ;;  %v11452_v21 = vpack.c.bf16 %v6446_v29, %v6444_v33  ;;  %v5932_v47 = vpop.f32.mrf.mxu2 }
 0x9d6   :  { %v5933_v7 = vadd.f32 %v5932_v47, %v11216_v27 }
 0x9d7   :  { %v11455_v41 = vpop.f32.mrf.mxu0 }
 0x9d8   :  { %v6021_v20 = vpop.f32.mrf.mxu3  ;;  %v11457_v57 = vpop.f32.mrf.mxu1 }
 0x9d9   :  { %v6022_v43 = vadd.f32 %v6021_v20, %v5933_v7 }
 0x9db   :  { %v6448_v12 = vmax.f32 %v6022_v43, 0.0 }
 0x9dd   :  { %v5934_v56 = vpop.f32.mrf.mxu2 }
 0x9de   :  { %v5935_v8 = vadd.f32 %v5934_v56, %v11226_v11 }
 0x9df   :  { %v6115_v42 = vpop.f32.mrf.mxu0 }
 0x9e0   :  { %v6023_v38 = vpop.f32.mrf.mxu3  ;;  %v6116_v24 = vadd.f32 %v6115_v42, %v11313_v60  ;;  %v6204_v52 = vpop.f32.mrf.mxu1 }
 0x9e1   :  { %v6024_v35 = vadd.f32 %v6023_v38, %v5935_v8 }
 0x9e2   :  { %v11461_v27 = vadd.f32 %v6204_v52, %v6116_v24  ;;  %6252 = vmatmul.bf16.gmra.mxu2 %v12564_v58  ;;  %6658 = vmatmul.bf16.gmra.mxu0 %v11365_v49 }
 0x9e3   :  { %v6450_v0 = vmax.f32 %v6024_v35, 0.0 }
 0x9e5   :  { %6341 = vmatmul.bf16.gmra.mxu3 %v11138_v23  ;;  %v11466_v33 = vpack.c.bf16 %v6450_v0, %v6448_v12  ;;  %v5937_v29 = vpop.f32.mrf.mxu2 }
 0x9e6   :  { %v5938_v11 = vadd.f32 %v5937_v29, %v11230_v45 }
 0x9e7   :  { %v11469_v7 = vpop.f32.mrf.mxu0 }
 0x9e8   :  { %v6026_v47 = vpop.f32.mrf.mxu3  ;;  %v11471_v40 = vpop.f32.mrf.mxu1 }
 0x9e9   :  { %v6027_v20 = vadd.f32 %v6026_v47, %v5938_v11  ;;  %v8865_v47 = vld [vmem:[#allocation13 + $0x48] sm:$0xff] }
 0x9ea   :  { %6735 = vmatpush.bf16.msra.mxu1 %v8865_v47 }
 0x9eb   :  { %v6452_v42 = vmax.f32 %v6027_v20, 0.0 }
 0x9ed   :  { %v5939_v43 = vpop.f32.mrf.mxu2 }
 0x9ee   :  { %v5940_v56 = vadd.f32 %v5939_v43, %v11240_v22 }
 0x9ef   :  { %v6120_v58 = vpop.f32.mrf.mxu0 }
 0x9f0   :  { %v6028_v8 = vpop.f32.mrf.mxu3  ;;  %v6121_v49 = vadd.f32 %v6120_v58, %v11313_v60  ;;  %v6209_v23 = vpop.f32.mrf.mxu1 }
 0x9f1   :  { %v6029_v38 = vadd.f32 %v6028_v8, %v5940_v56 }
 0x9f2   :  { %v11475_v24 = vadd.f32 %v6209_v23, %v6121_v49  ;;  %6257 = vmatmul.bf16.gmra.mxu2 %v12566_v18  ;;  %6663 = vmatmul.bf16.gmra.mxu0 %v11379_v2 }
 0x9f3   :  { %v6454_v35 = vmax.f32 %v6029_v38, 0.0 }
 0x9f5   :  { %6346 = vmatmul.bf16.gmra.mxu3 %v11152_v6  ;;  %v11480_v45 = vpack.c.bf16 %v6454_v35, %v6452_v42  ;;  %v5942_v52 = vpop.f32.mrf.mxu2 }
 0x9f6   :  { %v5943_v22 = vadd.f32 %v5942_v52, %v11244_v54 }
 0x9f7   :  { %v11483_v0 = vpop.f32.mrf.mxu0 }
 0x9f8   :  { %v6031_v12 = vpop.f32.mrf.mxu3  ;;  %v11485_v11 = vpop.f32.mrf.mxu1 }
 0x9f9   :  { %v6032_v29 = vadd.f32 %v6031_v12, %v5943_v22 }
 0x9fb   :  { %v6456_v58 = vmax.f32 %v6032_v29, 0.0 }
 0x9fd   :  { %v5944_v20 = vpop.f32.mrf.mxu2 }
 0x9fe   :  { %v5945_v18 = vadd.f32 %v5944_v20, %v11254_v32 }
 0x9ff   :  { %v6125_v2 = vpop.f32.mrf.mxu0 }
 0xa00   :  { %v6033_v43 = vpop.f32.mrf.mxu3  ;;  %v6126_v6 = vadd.f32 %v6125_v2, %v11313_v60  ;;  %v6214_v8 = vpop.f32.mrf.mxu1 }
 0xa01   :  { %v6034_v56 = vadd.f32 %v6033_v43, %v5945_v18 }
 0xa02   :  { %v11489_v54 = vadd.f32 %v6214_v8, %v6126_v6  ;;  %6262 = vmatmul.bf16.gmra.mxu2 %v10934_v46  ;;  %6668 = vmatmul.bf16.gmra.mxu0 %v11394_v17 }
 0xa03   :  { %v6458_v38 = vmax.f32 %v6034_v56, 0.0 }
 0xa05   :  { %6351 = vmatmul.bf16.gmra.mxu3 %v11166_v3  ;;  %v11494_v49 = vpack.c.bf16 %v6458_v38, %v6456_v58  ;;  %v5947_v23 = vpop.f32.mrf.mxu2 }
 0xa06   :  { %v5948_v32 = vadd.f32 %v5947_v23, %v11258_v59  ;;  %v8864_v23 = vld [vmem:[#allocation13 + $0x40] sm:$0xff] }
 0xa07   :  { %v11497_v35 = vpop.f32.mrf.mxu0  ;;  %6736 = vmatpush.bf16.msra.mxu1 %v8864_v23 }
 0xa08   :  { %v6036_v42 = vpop.f32.mrf.mxu3  ;;  %v11499_v22 = vpop.f32.mrf.mxu1 }
 0xa09   :  { %v6037_v52 = vadd.f32 %v6036_v42, %v5948_v32 }
 0xa0b   :  { %v6460_v18 = vmax.f32 %v6037_v52, 0.0 }
 0xa0d   :  { %v5949_v12 = vpop.f32.mrf.mxu2 }
 0xa0e   :  { %v5950_v29 = vadd.f32 %v5949_v12, %v11268_v37 }
 0xa0f   :  { %v6130_v46 = vpop.f32.mrf.mxu0 }
 0xa10   :  { %v6038_v47 = vpop.f32.mrf.mxu3  ;;  %v6131_v17 = vadd.f32 %v6130_v46, %v11313_v60  ;;  %v6219_v3 = vpop.f32.mrf.mxu1 }
 0xa11   :  { %v6039_v20 = vadd.f32 %v6038_v47, %v5950_v29 }
 0xa12   :  { %v11503_v2 = vadd.f32 %v6219_v3, %v6131_v17  ;;  %6267 = vmatmul.bf16.gmra.mxu2 %v10948_v16  ;;  %6673 = vmatmul.bf16.gmra.mxu0 %v11409_v31 }
 0xa13   :  { %v6462_v43 = vmax.f32 %v6039_v20, 0.0 }
 0xa15   :  { %6356 = vmatmul.bf16.gmra.mxu3 %v11180_v44  ;;  %v11508_v59 = vpack.c.bf16 %v6462_v43, %v6460_v18  ;;  %v5952_v56 = vpop.f32.mrf.mxu2 }
 0xa16   :  { %v5953_v37 = vadd.f32 %v5952_v56, %v11272_v28 }
 0xa17   :  { %v11511_v8 = vpop.f32.mrf.mxu0 }
 0xa18   :  { %v6041_v6 = vpop.f32.mrf.mxu3  ;;  %v11513_v38 = vpop.f32.mrf.mxu1 }
 0xa19   :  { %v6042_v58 = vadd.f32 %v6041_v6, %v5953_v37  ;;  %v12627_v6 = vld [vmem:[#allocation60_spill] sm:$0xff] }
 0xa1b   :  { %v6464_v29 = vmax.f32 %v6042_v58, 0.0 }
 0xa1d   :  { %v5954_v32 = vpop.f32.mrf.mxu2 }
 0xa1e   :  { %v5955_v16 = vadd.f32 %v5954_v32, %v11282_v10  ;;  %v12626_v10 = vld [vmem:[#allocation95_spill] sm:$0xff] }
 0xa1f   :  { %v6135_v31 = vpop.f32.mrf.mxu0 }
 0xa20   :  { %v6043_v42 = vpop.f32.mrf.mxu3  ;;  %v6136_v44 = vadd.f32 %v6135_v31, %v11313_v60  ;;  %v6224_v12 = vpop.f32.mrf.mxu1 }
 0xa21   :  { %v6044_v52 = vadd.f32 %v6043_v42, %v5955_v16 }
 0xa22   :  { %v11517_v28 = vadd.f32 %v6224_v12, %v6136_v44  ;;  %6272 = vmatmul.bf16.gmra.mxu2 %v12571_v51  ;;  %6678 = vmatmul.bf16.gmra.mxu0 %v11424_v62  ;;  %v12629_v44 = vld [vmem:[#allocation49_spill] sm:$0xff] }
 0xa23   :  { %v6466_v47 = vmax.f32 %v6044_v52, 0.0  ;;  %v12628_v52 = vld [vmem:[#allocation87_spill] sm:$0xff] }
 0xa25   :  { %6361 = vmatmul.bf16.gmra.mxu3 %v11194_v15  ;;  %v11522_v46 = vpack.c.bf16 %v6466_v47, %v6464_v29  ;;  %v5957_v20 = vpop.f32.mrf.mxu2  ;;  %v12630_v47 = vld [vmem:[#allocation42_spill] sm:$0xff] }
 0xa26   :  { %v5958_v17 = vadd.f32 %v5957_v20, %v12626_v10 }
 0xa27   :  { %v11525_v18 = vpop.f32.mrf.mxu0 }
 0xa28   :  { %v6046_v3 = vpop.f32.mrf.mxu3  ;;  %v11527_v56 = vpop.f32.mrf.mxu1 }
 0xa29   :  { %v6047_v43 = vadd.f32 %v6046_v3, %v5958_v17 }
 0xa2b   :  { %v6468_v16 = vmax.f32 %v6047_v43, 0.0 }
 0xa2d   :  { %v5959_v37 = vpop.f32.mrf.mxu2 }
 0xa2e   :  { %v5960_v58 = vadd.f32 %v5959_v37, %v12627_v6  ;;  %v12631_v37 = vld [vmem:[#allocation68_spill] sm:$0xff] }
 0xa2f   :  { %v6140_v51 = vpop.f32.mrf.mxu0 }
 0xa30   :  { %v6048_v23 = vpop.f32.mrf.mxu3  ;;  %v6141_v62 = vadd.f32 %v6140_v51, %v11313_v60  ;;  %v6229_v15 = vpop.f32.mrf.mxu1 }
 0xa31   :  { %v6049_v32 = vadd.f32 %v6048_v23, %v5960_v58 }
 0xa32   :  { %v11531_v31 = vadd.f32 %v6229_v15, %v6141_v62  ;;  %6277 = vmatmul.bf16.gmra.mxu2 %v12628_v52  ;;  %6683 = vmatmul.bf16.gmra.mxu0 %v11438_v30  ;;  %v12633_v30 = vld [vmem:[#allocation59_spill] sm:$0xff] }
 0xa33   :  { %v6470_v42 = vmax.f32 %v6049_v32, 0.0  ;;  %v12632_v32 = vld [vmem:[#allocation23_spill] sm:$0xff] }
 0xa35   :  { %6366 = vmatmul.bf16.gmra.mxu3 %v12629_v44  ;;  %v11536_v12 = vpack.c.bf16 %v6470_v42, %v6468_v16  ;;  %v5962_v29 = vpop.f32.mrf.mxu2  ;;  %v12634_v42 = vld [vmem:[#allocation97_spill] sm:$0xff] }
 0xa36   :  { %v5963_v20 = vadd.f32 %v5962_v29, %v12630_v47  ;;  %v12635_v47 = vld [vmem:[#allocation20_spill] sm:$0xff] }
 0xa38   :  { %v6051_v10 = vpop.f32.mrf.mxu3 }
 0xa39   :  { %v6052_v17 = vadd.f32 %v6051_v10, %v5963_v20 }
 0xa3b   :  { %v6472_v23 = vmax.f32 %v6052_v17, 0.0 }
 0xa3d   :  { %v5964_v3 = vpop.f32.mrf.mxu2 }
 0xa3e   :  { %v5965_v6 = vadd.f32 %v5964_v3, %v12631_v37 }
 0xa40   :  { %v6053_v43 = vpop.f32.mrf.mxu3 }
 0xa41   :  { %v6054_v58 = vadd.f32 %v6053_v43, %v5965_v6  ;;  %v12636_v6 = vld [vmem:[#allocation51_spill] sm:$0xff] }
 0xa42   :  { %6282 = vmatmul.bf16.gmra.mxu2 %v12632_v32  ;;  %6688 = vmatmul.bf16.gmra.mxu0 %v11452_v21  ;;  %v12637_v21 = vld [vmem:[#allocation37_spill] sm:$0xff] }
 0xa43   :  { %v6474_v51 = vmax.f32 %v6054_v58, 0.0 }
 0xa45   :  { %6371 = vmatmul.bf16.gmra.mxu3 %v12633_v30  ;;  %v11543_v62 = vpack.c.bf16 %v6474_v51, %v6472_v23  ;;  %v6243_v15 = vpop.f32.mrf.mxu2  ;;  %v12638_v51 = vld [vmem:[#allocation54_spill] sm:$0xff] }
 0xa46   :  { %v6244_v52 = vadd.f32 %v6243_v15, %v12634_v42 }
 0xa48   :  { %v6332_v16 = vpop.f32.mrf.mxu3 }
 0xa49   :  { %v6333_v29 = vadd.f32 %v6332_v16, %v6244_v52  ;;  %v12639_v16 = vld [vmem:[#allocation74_spill] sm:$0xff] }
 0xa4b   :  { %v6413_v17 = vmax.f32 %v6333_v29, 0.0  ;;  %v11552_v29 = vpop.f32.mrf.mxu0 }
 0xa4d   :  { %v6245_v44 = vpop.f32.mrf.mxu2 }
 0xa4e   :  { %v6246_v20 = vadd.f32 %v6245_v44, %v12635_v47 }
 0xa50   :  { %v6334_v10 = vpop.f32.mrf.mxu3 }
 0xa51   :  { %v6335_v3 = vadd.f32 %v6334_v10, %v6246_v20  ;;  %v12640_v10 = vld [vmem:[#allocation55_spill] sm:$0xff] }
 0xa52   :  { %6287 = vmatmul.bf16.gmra.mxu2 %v12636_v6  ;;  %6693 = vmatmul.bf16.gmra.mxu0 %v11466_v33  ;;  %v12641_v33 = vld [vmem:[#allocation92_spill] sm:$0xff]  ;;  %v12642_v6 = vld [vmem:[#allocation81_spill] sm:$0xff] }
 0xa53   :  { %v6415_v37 = vmax.f32 %v6335_v3, 0.0 }
 0xa55   :  { %6376 = vmatmul.bf16.gmra.mxu3 %v12637_v21  ;;  %v6477_v43 = vpack.c.bf16 %v6415_v37, %v6413_v17  ;;  %v6248_v58 = vpop.f32.mrf.mxu2 }
 0xa56   :  { %v6249_v32 = vadd.f32 %v6248_v58, %v12638_v51  ;;  %v12643_v51 = vld [vmem:[#allocation21_spill] sm:$0xff] }
 0xa57   :  { %6737 = vmatmul.bf16.vlgmr.msra.gmra.mxu1 %v6477_v43  ;;  %v11558_v43 = vpop.f32.mrf.mxu0 }
 0xa58   :  { %v6337_v23 = vpop.f32.mrf.mxu3 }
 0xa59   :  { %v6338_v15 = vadd.f32 %v6337_v23, %v6249_v32 }
 0xa5b   :  { %v6417_v47 = vmax.f32 %v6338_v15, 0.0 }
 0xa5d   :  { %v6250_v30 = vpop.f32.mrf.mxu2 }
 0xa5e   :  { %v6251_v42 = vadd.f32 %v6250_v30, %v12639_v16 }
 0xa60   :  { %v6339_v52 = vpop.f32.mrf.mxu3 }
 0xa61   :  { %v6340_v44 = vadd.f32 %v6339_v52, %v6251_v42  ;;  %v12644_v52 = vld [vmem:[#allocation88_spill] sm:$0xff] }
 0xa62   :  { %6292 = vmatmul.bf16.gmra.mxu2 %v12640_v10  ;;  %6698 = vmatmul.bf16.gmra.mxu0 %v11480_v45  ;;  %v12645_v45 = vld [vmem:[#allocation82_spill] sm:$0xff] }
 0xa63   :  { %v6419_v20 = vmax.f32 %v6340_v44, 0.0 }
 0xa65   :  { %6381 = vmatmul.bf16.gmra.mxu3 %v12641_v33  ;;  %v6479_v3 = vpack.c.bf16 %v6419_v20, %v6417_v47  ;;  %v6253_v17 = vpop.f32.mrf.mxu2  ;;  %v11564_v20 = vpop.f32.mrf.mxu0  ;;  %v12646_v33 = vld [vmem:[#allocation28_spill] sm:$0xff] }
 0xa66   :  { %v6254_v21 = vadd.f32 %v6253_v17, %v12642_v6  ;;  %v12647_v6 = vld [vmem:[#allocation66_spill] sm:$0xff] }
 0xa67   :  { %6742 = vmatmul.bf16.gmra.mxu1 %v6479_v3 }
 0xa68   :  { %v6342_v37 = vpop.f32.mrf.mxu3 }
 0xa69   :  { %v6343_v23 = vadd.f32 %v6342_v37, %v6254_v21 }
 0xa6b   :  { %v6421_v16 = vmax.f32 %v6343_v23, 0.0 }
 0xa6d   :  { %v6255_v58 = vpop.f32.mrf.mxu2  ;;  %v11568_v23 = vpop.f32.mrf.mxu0 }
 0xa6e   :  { %v6256_v32 = vadd.f32 %v6255_v58, %v12643_v51 }
 0xa70   :  { %v6344_v30 = vpop.f32.mrf.mxu3 }
 0xa71   :  { %v6345_v15 = vadd.f32 %v6344_v30, %v6256_v32  ;;  %v12648_v30 = vld [vmem:[#allocation40_spill] sm:$0xff] }
 0xa72   :  { %6297 = vmatmul.bf16.gmra.mxu2 %v12644_v52  ;;  %6703 = vmatmul.bf16.gmra.mxu0 %v11494_v49 }
 0xa73   :  { %v6423_v42 = vmax.f32 %v6345_v15, 0.0  ;;  %v12649_v15 = vld [vmem:[#allocation73_spill] sm:$0xff] }
 0xa75   :  { %6386 = vmatmul.bf16.gmra.mxu3 %v12645_v45  ;;  %v6481_v44 = vpack.c.bf16 %v6423_v42, %v6421_v16  ;;  %v6258_v47 = vpop.f32.mrf.mxu2  ;;  %v6088_v45 = vadd.f32 %v11382_v14, %v11313_v60 }
 0xa76   :  { %v6259_v3 = vadd.f32 %v6258_v47, %v12646_v33  ;;  %v12650_v47 = vld [vmem:[#allocation83_spill] sm:$0xff] }
 0xa77   :  { %6747 = vmatmul.bf16.gmra.mxu1 %v6481_v44  ;;  %v11575_v44 = vpop.f32.mrf.mxu0  ;;  %v6177_v33 = vadd.f32 %v11384_v19, %v6088_v45  ;;  %v6093_v19 = vadd.f32 %v11397_v50, %v11313_v60 }
 0xa78   :  { %v6347_v10 = vpop.f32.mrf.mxu3 }
 0xa79   :  { %v6348_v37 = vadd.f32 %v6347_v10, %v6259_v3 }
 0xa7b   :  { %v6425_v32 = vmax.f32 %v6348_v37, 0.0 }
 0xa7d   :  { %v6260_v17 = vpop.f32.mrf.mxu2 }
 0xa7e   :  { %v6261_v21 = vadd.f32 %v6260_v17, %v12647_v6 }
 0xa7f   :  { %v11582_v14 = vpop.f32.mrf.mxu0 }
 0xa80   :  { %v6349_v58 = vpop.f32.mrf.mxu3 }
 0xa81   :  { %v6350_v51 = vadd.f32 %v6349_v58, %v6261_v21 }
 0xa82   :  { %6302 = vmatmul.bf16.gmra.mxu2 %v12648_v30  ;;  %6708 = vmatmul.bf16.gmra.mxu0 %v11508_v59  ;;  %v12651_v30 = vld [vmem:[#allocation63_spill] sm:$0xff] }
 0xa83   :  { %v6427_v49 = vmax.f32 %v6350_v51, 0.0 }
 0xa85   :  { %6391 = vmatmul.bf16.gmra.mxu3 %v12649_v15  ;;  %v6483_v16 = vpack.c.bf16 %v6427_v49, %v6425_v32  ;;  %v6263_v42 = vpop.f32.mrf.mxu2 }
 0xa86   :  { %v6264_v10 = vadd.f32 %v6263_v42, %v12650_v47 }
 0xa87   :  { %6752 = vmatmul.bf16.gmra.mxu1 %v6483_v16  ;;  %v6182_v16 = vadd.f32 %v11399_v61, %v6093_v19  ;;  %v6098_v61 = vadd.f32 %v11412_v4, %v11313_v60 }
 0xa88   :  { %v6352_v52 = vpop.f32.mrf.mxu3 }
 0xa89   :  { %v6353_v17 = vadd.f32 %v6352_v52, %v6264_v10  ;;  %v11588_v52 = vpop.f32.mrf.mxu0 }
 0xa8b   :  { %v6429_v21 = vmax.f32 %v6353_v17, 0.0 }
 0xa8d   :  { %v6265_v3 = vpop.f32.mrf.mxu2 }
 0xa8e   :  { %v6266_v37 = vadd.f32 %v6265_v3, %v6177_v33 }
 0xa90   :  { %v6354_v6 = vpop.f32.mrf.mxu3 }
 0xa91   :  { %v6355_v59 = vadd.f32 %v6354_v6, %v6266_v37  ;;  %v11595_v17 = vpop.f32.mrf.mxu0  ;;  %v12652_v37 = vld [vmem:[#allocation58_spill] sm:$0xff] }
 0xa92   :  { %6307 = vmatmul.bf16.gmra.mxu2 %v12620_v53  ;;  %6713 = vmatmul.bf16.gmra.mxu0 %v11522_v46 }
 0xa93   :  { %v6431_v58 = vmax.f32 %v6355_v59, 0.0  ;;  %v6187_v59 = vadd.f32 %v11414_v48, %v6098_v61  ;;  %v6103_v48 = vadd.f32 %v11427_v26, %v11313_v60 }
 0xa95   :  { %6396 = vmatmul.bf16.gmra.mxu3 %v11292_v1  ;;  %v6485_v51 = vpack.c.bf16 %v6431_v58, %v6429_v21  ;;  %v6268_v32 = vpop.f32.mrf.mxu2 }
 0xa96   :  { %v6269_v15 = vadd.f32 %v6268_v32, %v12651_v30 }
 0xa97   :  { %6757 = vmatmul.bf16.gmra.mxu1 %v6485_v51 }
 0xa98   :  { %v6357_v49 = vpop.f32.mrf.mxu3 }
 0xa99   :  { %v6358_v53 = vadd.f32 %v6357_v49, %v6269_v15  ;;  %v11599_v32 = vpop.f32.mrf.mxu0  ;;  %v12653_v15 = vld [vmem:[#allocation98_spill] sm:$0xff] }
 0xa9b   :  { %v6433_v47 = vmax.f32 %v6358_v53, 0.0 }
 0xa9d   :  { %v6270_v42 = vpop.f32.mrf.mxu2 }
 0xa9e   :  { %v6271_v46 = vadd.f32 %v6270_v42, %v6182_v16  ;;  %v6192_v42 = vadd.f32 %v11429_v13, %v6103_v48 }
 0xaa0   :  { %v6359_v45 = vpop.f32.mrf.mxu3 }
 0xaa1   :  { %v6360_v1 = vadd.f32 %v6359_v45, %v6271_v46 }
 0xaa2   :  { %6312 = vmatmul.bf16.gmra.mxu2 %v12623_v36  ;;  %6718 = vmatmul.bf16.gmra.mxu0 %v11536_v12 }
 0xaa3   :  { %v6435_v10 = vmax.f32 %v6360_v1, 0.0 }
 0xaa5   :  { %6401 = vmatmul.bf16.gmra.mxu3 %v11306_v39  ;;  %v6487_v50 = vpack.c.bf16 %v6435_v10, %v6433_v47  ;;  %v6273_v33 = vpop.f32.mrf.mxu2 }
 0xaa6   :  { %v6274_v6 = vadd.f32 %v6273_v33, %v12652_v37  ;;  %v6108_v33 = vadd.f32 %v11441_v25, %v11313_v60  ;;  %v11617_v37 = vld [vmem:[%s11710_s8] ss:$0 sm:$0xff]  ;;  %s9120_s8 = smov [#allocation14]  }
 0xaa7   :  { %6762 = vmatmul.bf16.gmra.mxu1 %v6487_v50  ;;  %s6854_s24 = sshll.u32 %s9120_s8, 4  ;;  %s6855_s24 = int_to_ptr.vmem [resolvable:$true] %s6854_s24 }
 0xaa8   :  { %v6362_v3 = vpop.f32.mrf.mxu3  ;;  %v6197_v13 = vadd.f32 %v11443_v5, %v6108_v33 }
 0xaa9   :  { %v6363_v58 = vadd.f32 %v6362_v3, %v6274_v6  ;;  %v11611_v3 = vpop.f32.mrf.mxu1 }
 0xaab   :  { %v6437_v39 = vmax.f32 %v6363_v58, 0.0 }
 0xaad   :  { %v6275_v21 = vpop.f32.mrf.mxu2 }
 0xaae   :  { %v6276_v36 = vadd.f32 %v6275_v21, %v6187_v59 }
 0xab0   :  { %v6364_v51 = vpop.f32.mrf.mxu3 }
 0xab1   :  { %v6365_v12 = vadd.f32 %v6364_v51, %v6276_v36  ;;  %v6650_v36 = vadd.f32 %v11617_v37, %v11558_v43 }
 0xab2   :  { %6317 = vmatmul.bf16.gmra.mxu2 %v12625_v34  ;;  %6723 = vmatmul.bf16.gmra.mxu0 %v11543_v62 }
 0xab3   :  { %v6439_v49 = vmax.f32 %v6365_v12, 0.0 }
 0xab5   :  { %6406 = vmatmul.bf16.gmra.mxu3 %v11323_v55  ;;  %v6489_v4 = vpack.c.bf16 %v6439_v49, %v6437_v39  ;;  %v6278_v19 = vpop.f32.mrf.mxu2 }
 0xab6   :  { %v6279_v16 = vadd.f32 %v6278_v19, %v12653_v15  ;;  %v6652_v19 = vadd.f32 %v11617_v37, %v11564_v20 }
 0xab7   :  { %6767 = vmatmul.bf16.gmra.mxu1 %v6489_v4  ;;  %v6113_v4 = vadd.f32 %v11455_v41, %v11313_v60  ;;  %v6655_v41 = vadd.f32 %v11617_v37, %v11568_v23 }
 0xab8   :  { %v6367_v30 = vpop.f32.mrf.mxu3 }
 0xab9   :  { %v6368_v46 = vadd.f32 %v6367_v30, %v6279_v16  ;;  %v6202_v43 = vadd.f32 %v11457_v57, %v6113_v4 }
 0xabb   :  { %v6441_v47 = vmax.f32 %v6368_v46, 0.0 }
 0xabd   :  { %v6280_v53 = vpop.f32.mrf.mxu2 }
 0xabe   :  { %v6281_v45 = vadd.f32 %v6280_v53, %v6192_v42 }
 0xac0   :  { %v6369_v1 = vpop.f32.mrf.mxu3 }
 0xac1   :  { %v6370_v34 = vadd.f32 %v6369_v1, %v6281_v45  ;;  %v11627_v1 = vpop.f32.mrf.mxu0 }
 0xac3   :  { %v6443_v62 = vmax.f32 %v6370_v34, 0.0 }
 0xac5   :  { %v6491_v10 = vpack.c.bf16 %v6443_v62, %v6441_v47  ;;  %v6283_v55 = vpop.f32.mrf.mxu2 }
 0xac6   :  { %v6284_v26 = vadd.f32 %v6283_v55, %v11433_v9  ;;  %v6118_v55 = vadd.f32 %v11469_v7, %v11313_v60  ;;  %v6660_v7 = vadd.f32 %v11617_v37, %v11582_v14 }
 0xac7   :  { %6772 = vmatmul.bf16.gmra.mxu1 %v6491_v10 }
 0xac8   :  { %v6372_v50 = vpop.f32.mrf.mxu3 }
 0xac9   :  { %v6373_v6 = vadd.f32 %v6372_v50, %v6284_v26  ;;  %v6657_v50 = vadd.f32 %v11617_v37, %v11575_v44  ;;  %v11636_v26 = vpop.f32.mrf.mxu0 }
 0xacb   :  { %v6445_v25 = vmax.f32 %v6373_v6, 0.0 }
 0xacd   :  { %v6285_v61 = vpop.f32.mrf.mxu2 }
 0xace   :  { %v6286_v59 = vadd.f32 %v6285_v61, %v6197_v13  ;;  %v6207_v13 = vadd.f32 %v11471_v40, %v6118_v55 }
 0xad0   :  { %v6374_v21 = vpop.f32.mrf.mxu3 }
 0xad1   :  { %v6375_v58 = vadd.f32 %v6374_v21, %v6286_v59 }
 0xad3   :  { %v6447_v51 = vmax.f32 %v6375_v58, 0.0 }
 0xad4   :  { %v6738_v9 = vpop.f32.mrf.mxu1 }
 0xad5   :  { %v6493_v12 = vpack.c.bf16 %v6447_v51, %v6445_v25  ;;  %v6739_v39 = vadd.f32 %v6738_v9, %v6650_v36  ;;  %v6288_v49 = vpop.f32.mrf.mxu2 }
 0xad6   :  { %v6289_v30 = vadd.f32 %v6288_v49, %v11447_v63  ;;  %v6123_v49 = vadd.f32 %v11483_v0, %v11313_v60 }
 0xad7   :  { %6818 = vst [vmem:[#allocation14] sm:$0xff] %v6739_v39  ;;  %6777 = vmatmul.bf16.gmra.mxu1 %v6493_v12  ;;  %v11641_v12 = vpop.f32.mrf.mxu0 }
 0xad8   :  { %v6377_v5 = vpop.f32.mrf.mxu3 }
 0xad9   :  { %v6378_v42 = vadd.f32 %v6377_v5, %v6289_v30  ;;  %v6662_v5 = vadd.f32 %v11617_v37, %v11588_v52 }
 0xadb   :  { %v6449_v34 = vmax.f32 %v6378_v42, 0.0 }
 0xadc   :  { %v6740_v48 = vpop.f32.mrf.mxu1 }
 0xadd   :  { %v6741_v15 = vadd.f32 %v6740_v48, %v6652_v19  ;;  %v6290_v16 = vpop.f32.mrf.mxu2  ;;  %v6212_v19 = vadd.f32 %v11485_v11, %v6123_v49  ;;  %v6128_v11 = vadd.f32 %v11497_v35, %v11313_v60 }
 0xade   :  { %v6291_v53 = vadd.f32 %v6290_v16, %v6202_v43 }
 0xadf   :  { %6819 = vst [vmem:[#allocation14 + $0x8] sm:$0xff] %v6741_v15  ;;  %v6676_v42 = vpop.f32.mrf.mxu0 }
 0xae0   :  { %v6379_v46 = vpop.f32.mrf.mxu3 }
 0xae1   :  { %v6380_v45 = vadd.f32 %v6379_v46, %v6291_v53  ;;  %v6665_v46 = vadd.f32 %v11617_v37, %v11595_v17  ;;  %v6217_v17 = vadd.f32 %v11499_v22, %v6128_v11  ;;  %v6133_v22 = vadd.f32 %v11511_v8, %v11313_v60 }
 0xae3   :  { %v6451_v47 = vmax.f32 %v6380_v45, 0.0 }
 0xae4   :  { %v6743_v20 = vpop.f32.mrf.mxu1 }
 0xae5   :  { %v6495_v62 = vpack.c.bf16 %v6451_v47, %v6449_v34  ;;  %v6744_v63 = vadd.f32 %v6743_v20, %v6655_v41  ;;  %v6293_v10 = vpop.f32.mrf.mxu2 }
 0xae6   :  { %v6294_v33 = vadd.f32 %v6293_v10, %v11461_v27 }
 0xae7   :  { %6820 = vst [vmem:[#allocation14 + $0x10] sm:$0xff] %v6744_v63  ;;  %6782 = vmatmul.bf16.gmra.mxu1 %v6495_v62  ;;  %v6679_v20 = vpop.f32.mrf.mxu0  ;;  %v6667_v62 = vadd.f32 %v11617_v37, %v11599_v32 }
 0xae8   :  { %v6382_v57 = vpop.f32.mrf.mxu3 }
 0xae9   :  { %v6383_v59 = vadd.f32 %v6382_v57, %v6294_v33 }
 0xaeb   :  { %v6453_v25 = vmax.f32 %v6383_v59, 0.0 }
 0xaec   :  { %v6745_v23 = vpop.f32.mrf.mxu1 }
 0xaed   :  { %v6746_v61 = vadd.f32 %v6745_v23, %v6657_v50  ;;  %v6295_v6 = vpop.f32.mrf.mxu2 }
 0xaee   :  { %v6296_v21 = vadd.f32 %v6295_v6, %v6207_v13 }
 0xaef   :  { %6821 = vst [vmem:[#allocation14 + $0x18] sm:$0xff] %v6746_v61  ;;  %v6670_v61 = vadd.f32 %v11617_v37, %v11627_v1  ;;  %v6681_v59 = vpop.f32.mrf.mxu0  ;;  %v6222_v1 = vadd.f32 %v11513_v38, %v6133_v22 }
 0xaf0   :  { %v6384_v58 = vpop.f32.mrf.mxu3 }
 0xaf1   :  { %v6385_v36 = vadd.f32 %v6384_v58, %v6296_v21 }
 0xaf3   :  { %v6455_v51 = vmax.f32 %v6385_v36, 0.0 }
 0xaf4   :  { %v6748_v44 = vpop.f32.mrf.mxu1 }
 0xaf5   :  { %v6497_v9 = vpack.c.bf16 %v6455_v51, %v6453_v25  ;;  %v6749_v27 = vadd.f32 %v6748_v44, %v6660_v7  ;;  %v6298_v39 = vpop.f32.mrf.mxu2  ;;  %v6672_v7 = vadd.f32 %v11617_v37, %v11636_v26 }
 0xaf6   :  { %v6299_v4 = vadd.f32 %v6298_v39, %v11475_v24 }
 0xaf7   :  { %6822 = vst [vmem:[#allocation14 + $0x20] sm:$0xff] %v6749_v27  ;;  %6787 = vmatmul.bf16.gmra.mxu1 %v6497_v9  ;;  %v6684_v9 = vpop.f32.mrf.mxu0 }
 0xaf8   :  { %v6387_v40 = vpop.f32.mrf.mxu3 }
 0xaf9   :  { %v6388_v43 = vadd.f32 %v6387_v40, %v6299_v4  ;;  %v6675_v4 = vadd.f32 %v11617_v37, %v11641_v12 }
 0xafb   :  { %v6457_v0 = vmax.f32 %v6388_v43, 0.0  ;;  %v6138_v43 = vadd.f32 %v11525_v18, %v11313_v60 }
 0xafc   :  { %v6750_v14 = vpop.f32.mrf.mxu1 }
 0xafd   :  { %v6751_v30 = vadd.f32 %v6750_v14, %v6662_v5  ;;  %v6300_v48 = vpop.f32.mrf.mxu2  ;;  %v6227_v12 = vadd.f32 %v11527_v56, %v6138_v43  ;;  %v6143_v56 = vadd.f32 %v11552_v29, %v11313_v60 }
 0xafe   :  { %v6301_v15 = vadd.f32 %v6300_v48, %v6212_v19 }
 0xaff   :  { %6823 = vst [vmem:[#allocation14 + $0x28] sm:$0xff] %v6751_v30  ;;  %v6686_v38 = vpop.f32.mrf.mxu0 }
 0xb00   :  { %v6389_v16 = vpop.f32.mrf.mxu3 }
 0xb01   :  { %v6390_v53 = vadd.f32 %v6389_v16, %v6301_v15  ;;  %v6677_v15 = vadd.f32 %v11617_v37, %v6676_v42 }
 0xb03   :  { %v6459_v45 = vmax.f32 %v6390_v53, 0.0 }
 0xb04   :  { %v6753_v41 = vpop.f32.mrf.mxu1 }
 0xb05   :  { %v6499_v52 = vpack.c.bf16 %v6459_v45, %v6457_v0  ;;  %v6754_v34 = vadd.f32 %v6753_v41, %v6665_v46  ;;  %v6303_v24 = vpop.f32.mrf.mxu2 }
 0xb06   :  { %v6304_v63 = vadd.f32 %v6303_v24, %v11489_v54 }
 0xb07   :  { %6824 = vst [vmem:[#allocation14 + $0x30] sm:$0xff] %v6754_v34  ;;  %6792 = vmatmul.bf16.gmra.mxu1 %v6499_v52  ;;  %v6689_v24 = vpop.f32.mrf.mxu0 }
 0xb08   :  { %v6392_v47 = vpop.f32.mrf.mxu3 }
 0xb09   :  { %v6393_v50 = vadd.f32 %v6392_v47, %v6304_v63  ;;  %v6680_v47 = vadd.f32 %v11617_v37, %v6679_v20  ;;  %v6232_v20 = vadd.f32 %v11611_v3, %v6143_v56 }
 0xb0b   :  { %v6461_v35 = vmax.f32 %v6393_v50, 0.0 }
 0xb0c   :  { %v6755_v10 = vpop.f32.mrf.mxu1 }
 0xb0d   :  { %v6756_v57 = vadd.f32 %v6755_v10, %v6667_v62  ;;  %v6305_v55 = vpop.f32.mrf.mxu2 }
 0xb0e   :  { %v6306_v33 = vadd.f32 %v6305_v55, %v6217_v17  ;;  %v6682_v17 = vadd.f32 %v11617_v37, %v6681_v59 }
 0xb0f   :  { %6825 = vst [vmem:[#allocation14 + $0x38] sm:$0xff] %v6756_v57  ;;  %v6691_v55 = vpop.f32.mrf.mxu0 }
 0xb10   :  { %v6394_v23 = vpop.f32.mrf.mxu3 }
 0xb11   :  { %v6395_v13 = vadd.f32 %v6394_v23, %v6306_v33 }
 0xb13   :  { %v6463_v6 = vmax.f32 %v6395_v13, 0.0 }
 0xb14   :  { %v6758_v21 = vpop.f32.mrf.mxu1 }
 0xb15   :  { %v6501_v32 = vpack.c.bf16 %v6463_v6, %v6461_v35  ;;  %v6759_v58 = vadd.f32 %v6758_v21, %v6670_v61  ;;  %v6308_v54 = vpop.f32.mrf.mxu2  ;;  %v6685_v21 = vadd.f32 %v11617_v37, %v6684_v9 }
 0xb16   :  { %v6309_v25 = vadd.f32 %v6308_v54, %v11503_v2 }
 0xb17   :  { %6826 = vst [vmem:[#allocation14 + $0x40] sm:$0xff] %v6759_v58  ;;  %6797 = vmatmul.bf16.gmra.mxu1 %v6501_v32  ;;  %v6694_v54 = vpop.f32.mrf.mxu0 }
 0xb18   :  { %v6397_v36 = vpop.f32.mrf.mxu3 }
 0xb19   :  { %v6398_v39 = vadd.f32 %v6397_v36, %v6309_v25 }
 0xb1b   :  { %v6465_v8 = vmax.f32 %v6398_v39, 0.0  ;;  %v6695_v39 = vadd.f32 %v11617_v37, %v6694_v54 }
 0xb1c   :  { %v6760_v51 = vpop.f32.mrf.mxu1 }
 0xb1d   :  { %v6761_v44 = vadd.f32 %v6760_v51, %v6672_v7  ;;  %v6310_v27 = vpop.f32.mrf.mxu2  ;;  %v6690_v7 = vadd.f32 %v11617_v37, %v6689_v24 }
 0xb1e   :  { %v6311_v40 = vadd.f32 %v6310_v27, %v6222_v1 }
 0xb1f   :  { %6827 = vst [vmem:[#allocation14 + $0x48] sm:$0xff] %v6761_v44  ;;  %v6696_v22 = vpop.f32.mrf.mxu0  ;;  %v6692_v44 = vadd.f32 %v11617_v37, %v6691_v55 }
 0xb20   :  { %v6399_v49 = vpop.f32.mrf.mxu3 }
 0xb21   :  { %v6400_v5 = vadd.f32 %v6399_v49, %v6311_v40 }
 0xb23   :  { %v6467_v14 = vmax.f32 %v6400_v5, 0.0 }
 0xb24   :  { %v6763_v19 = vpop.f32.mrf.mxu1 }
 0xb25   :  { %v6503_v26 = vpack.c.bf16 %v6467_v14, %v6465_v8  ;;  %v6764_v30 = vadd.f32 %v6763_v19, %v6675_v4  ;;  %v6313_v2 = vpop.f32.mrf.mxu2  ;;  %v6697_v4 = vadd.f32 %v11617_v37, %v6696_v22 }
 0xb26   :  { %v6314_v16 = vadd.f32 %v6313_v2, %v11517_v28 }
 0xb27   :  { %6828 = vst [vmem:[#allocation14 + $0x50] sm:$0xff] %v6764_v30  ;;  %6802 = vmatmul.bf16.gmra.mxu1 %v6503_v26  ;;  %v6699_v1 = vpop.f32.mrf.mxu0 }
 0xb28   :  { %v6402_v48 = vpop.f32.mrf.mxu3  ;;  %v6700_v26 = vadd.f32 %v11617_v37, %v6699_v1 }
 0xb29   :  { %v6403_v45 = vadd.f32 %v6402_v48, %v6314_v16 }
 0xb2b   :  { %v6469_v11 = vmax.f32 %v6403_v45, 0.0 }
 0xb2c   :  { %v6765_v53 = vpop.f32.mrf.mxu1 }
 0xb2d   :  { %v6766_v46 = vadd.f32 %v6765_v53, %v6677_v15  ;;  %v6315_v0 = vpop.f32.mrf.mxu2 }
 0xb2e   :  { %v6316_v41 = vadd.f32 %v6315_v0, %v6227_v12 }
 0xb2f   :  { %6829 = vst [vmem:[#allocation14 + $0x58] sm:$0xff] %v6766_v46  ;;  %v6701_v40 = vpop.f32.mrf.mxu0 }
 0xb30   :  { %v6404_v52 = vpop.f32.mrf.mxu3 }
 0xb31   :  { %v6405_v34 = vadd.f32 %v6404_v52, %v6316_v41 }
 0xb33   :  { %v6471_v62 = vmax.f32 %v6405_v34, 0.0 }
 0xb34   :  { %v6768_v18 = vpop.f32.mrf.mxu1 }
 0xb35   :  { %v6505_v63 = vpack.c.bf16 %v6471_v62, %v6469_v11  ;;  %v6769_v42 = vadd.f32 %v6768_v18, %v6680_v47  ;;  %v6318_v10 = vpop.f32.mrf.mxu2 }
 0xb36   :  { %v6319_v57 = vadd.f32 %v6318_v10, %v11531_v31  ;;  %v6687_v31 = vadd.f32 %v11617_v37, %v6686_v38  ;;  %v6702_v38 = vadd.f32 %v11617_v37, %v6701_v40 }
 0xb37   :  { %6830 = vst [vmem:[#allocation14 + $0x60] sm:$0xff] %v6769_v42  ;;  %6807 = vmatmul.bf16.gmra.mxu1 %v6505_v63  ;;  %v6704_v19 = vpop.f32.mrf.mxu0 }
 0xb38   :  { %v6407_v28 = vpop.f32.mrf.mxu3  ;;  %v6705_v53 = vadd.f32 %v11617_v37, %v6704_v19 }
 0xb39   :  { %v6408_v13 = vadd.f32 %v6407_v28, %v6319_v57 }
 0xb3b   :  { %v6473_v32 = vmax.f32 %v6408_v13, 0.0 }
 0xb3c   :  { %v6770_v50 = vpop.f32.mrf.mxu1 }
 0xb3d   :  { %v6771_v33 = vadd.f32 %v6770_v50, %v6682_v17  ;;  %v6320_v23 = vpop.f32.mrf.mxu2 }
 0xb3e   :  { %v6321_v61 = vadd.f32 %v6320_v23, %v6232_v20 }
 0xb3f   :  { %6831 = vst [vmem:[#allocation14 + $0x68] sm:$0xff] %v6771_v33  ;;  %v6706_v48 = vpop.f32.mrf.mxu0 }
 0xb40   :  { %v6409_v35 = vpop.f32.mrf.mxu3  ;;  %v6707_v0 = vadd.f32 %v11617_v37, %v6706_v48 }
 0xb41   :  { %v6410_v6 = vadd.f32 %v6409_v35, %v6321_v61 }
 0xb43   :  { %v6475_v58 = vmax.f32 %v6410_v6, 0.0 }
 0xb44   :  { %v6773_v60 = vpop.f32.mrf.mxu1 }
 0xb45   :  { %v6507_v29 = vpack.c.bf16 %v6475_v58, %v6473_v32  ;;  %v6774_v59 = vadd.f32 %v6773_v60, %v6685_v21 }
 0xb47   :  { %6832 = vst [vmem:[#allocation14 + $0x70] sm:$0xff] %v6774_v59  ;;  %6812 = vmatmul.bf16.gmra.mxu1 %v6507_v29  ;;  %v6709_v16 = vpop.f32.mrf.mxu0 }
 0xb48   :  { %v6710_v34 = vadd.f32 %v11617_v37, %v6709_v16 }
 0xb4c   :  { %v6775_v3 = vpop.f32.mrf.mxu1 }
 0xb4d   :  { %v6776_v36 = vadd.f32 %v6775_v3, %v6687_v31 }
 0xb4f   :  { %6833 = vst [vmem:[#allocation14 + $0x78] sm:$0xff] %v6776_v36  ;;  %v6711_v45 = vpop.f32.mrf.mxu0 }
 0xb50   :  { %v6712_v62 = vadd.f32 %v11617_v37, %v6711_v45 }
 0xb54   :  { %v6778_v25 = vpop.f32.mrf.mxu1 }
 0xb55   :  { %v6779_v51 = vadd.f32 %v6778_v25, %v6690_v7 }
 0xb57   :  { %6834 = vst [vmem:[#allocation14 + $0x80] sm:$0xff] %v6779_v51  ;;  %v6714_v11 = vpop.f32.mrf.mxu0 }
 0xb58   :  { %v6715_v10 = vadd.f32 %v11617_v37, %v6714_v11 }
 0xb5c   :  { %v6780_v9 = vpop.f32.mrf.mxu1 }
 0xb5d   :  { %v6781_v27 = vadd.f32 %v6780_v9, %v6692_v44 }
 0xb5f   :  { %6835 = vst [vmem:[#allocation14 + $0x88] sm:$0xff] %v6781_v27  ;;  %v6716_v42 = vpop.f32.mrf.mxu0 }
 0xb60   :  { %v6717_v57 = vadd.f32 %v11617_v37, %v6716_v42 }
 0xb64   :  { %v6783_v49 = vpop.f32.mrf.mxu1 }
 0xb65   :  { %v6784_v5 = vadd.f32 %v6783_v49, %v6695_v39 }
 0xb67   :  { %6836 = vst [vmem:[#allocation14 + $0x90] sm:$0xff] %v6784_v5  ;;  %v6719_v17 = vpop.f32.mrf.mxu0 }
 0xb68   :  { %v6720_v20 = vadd.f32 %v11617_v37, %v6719_v17 }
 0xb6c   :  { %v6785_v8 = vpop.f32.mrf.mxu1 }
 0xb6d   :  { %v6786_v14 = vadd.f32 %v6785_v8, %v6697_v4 }
 0xb6f   :  { %6837 = vst [vmem:[#allocation14 + $0x98] sm:$0xff] %v6786_v14  ;;  %v6721_v33 = vpop.f32.mrf.mxu0 }
 0xb70   :  { %v6722_v61 = vadd.f32 %v11617_v37, %v6721_v33 }
 0xb74   :  { %v6788_v30 = vpop.f32.mrf.mxu1 }
 0xb75   :  { %v6789_v2 = vadd.f32 %v6788_v30, %v6700_v26 }
 0xb77   :  { %6838 = vst [vmem:[#allocation14 + $0xa0] sm:$0xff] %v6789_v2  ;;  %v6724_v21 = vpop.f32.mrf.mxu0 }
 0xb78   :  { %v6725_v32 = vadd.f32 %v11617_v37, %v6724_v21 }
 0xb7c   :  { %v6790_v43 = vpop.f32.mrf.mxu1 }
 0xb7d   :  { %v6791_v15 = vadd.f32 %v6790_v43, %v6702_v38 }
 0xb7f   :  { %6839 = vst [vmem:[#allocation14 + $0xa8] sm:$0xff] %v6791_v15  ;;  %v6726_v29 = vpop.f32.mrf.mxu0 }
 0xb80   :  { %v6727_v59 = vadd.f32 %v11617_v37, %v6726_v29 }
 0xb84   :  { %v6793_v12 = vpop.f32.mrf.mxu1 }
 0xb85   :  { %v6794_v46 = vadd.f32 %v6793_v12, %v6705_v53 }
 0xb87   :  { %6840 = vst [vmem:[#allocation14 + $0xb0] sm:$0xff] %v6794_v46 }
 0xb8c   :  { %v6795_v41 = vpop.f32.mrf.mxu1 }
 0xb8d   :  { %v6796_v52 = vadd.f32 %v6795_v41, %v6707_v0 }
 0xb8f   :  { %6841 = vst [vmem:[#allocation14 + $0xb8] sm:$0xff] %v6796_v52 }
 0xb94   :  { %v6798_v24 = vpop.f32.mrf.mxu1 }
 0xb95   :  { %v6799_v47 = vadd.f32 %v6798_v24, %v6710_v34 }
 0xb97   :  { %6842 = vst [vmem:[#allocation14 + $0xc0] sm:$0xff] %v6799_v47 }
 0xb9c   :  { %v6800_v18 = vpop.f32.mrf.mxu1 }
 0xb9d   :  { %v6801_v63 = vadd.f32 %v6800_v18, %v6712_v62 }
 0xb9f   :  { %6843 = vst [vmem:[#allocation14 + $0xc8] sm:$0xff] %v6801_v63 }
 0xba4   :  { %v6803_v28 = vpop.f32.mrf.mxu1 }
 0xba5   :  { %v6804_v56 = vadd.f32 %v6803_v28, %v6715_v10 }
 0xba7   :  { %6844 = vst [vmem:[#allocation14 + $0xd0] sm:$0xff] %v6804_v56 }
 0xbac   :  { %v6805_v55 = vpop.f32.mrf.mxu1 }
 0xbad   :  { %v6806_v50 = vadd.f32 %v6805_v55, %v6717_v57 }
 0xbaf   :  { %6845 = vst [vmem:[#allocation14 + $0xd8] sm:$0xff] %v6806_v50 }
 0xbb4   :  { %v6808_v23 = vpop.f32.mrf.mxu1 }
 0xbb5   :  { %v6809_v13 = vadd.f32 %v6808_v23, %v6720_v20 }
 0xbb7   :  { %6846 = vst [vmem:[#allocation14 + $0xe0] sm:$0xff] %v6809_v13 }
 0xbbc   :  { %v6810_v35 = vpop.f32.mrf.mxu1 }
 0xbbd   :  { %v6811_v6 = vadd.f32 %v6810_v35, %v6722_v61 }
 0xbbf   :  { %6847 = vst [vmem:[#allocation14 + $0xe8] sm:$0xff] %v6811_v6 }
 0xbc4   :  { %v6813_v58 = vpop.f32.mrf.mxu1 }
 0xbc5   :  { %v6814_v60 = vadd.f32 %v6813_v58, %v6725_v32 }
 0xbc7   :  { %6848 = vst [vmem:[#allocation14 + $0xf0] sm:$0xff] %v6814_v60 }
 0xbcc   :  { %v6815_v54 = vpop.f32.mrf.mxu1 }
 0xbcd   :  { %v6816_v31 = vadd.f32 %v6815_v54, %v6727_v59 }
 0xbcf   :  { %6849 = vst [vmem:[#allocation14 + $0xf8] sm:$0xff] %v6816_v31 }
 0xbd0   :  { %6862 = dma.vmem_to_hbm [thread:$0]  %s6855_s24, 4096, %s6857_s3, [#allocation4], %s9112_s27, %s9112_s27, %s9113_s28  }
 0xbd1   :  { %9105 = dma.done.wait [#allocation4], 4096  }
 0xbd2   :  { %9106 = vsyncadd [#allocation4], 4294963200 }
 0xbd3   :  { %6867 = vsyncpa [#allocation3], 1 }
 0xbd4   :  { %6868 = vsyncpa [#allocation6], 1 }
 0xbd5   :  { %6869 = vsyncpa [#allocation9], 1 }
 0xbd6   :  { %6870 = vsyncpa [#allocation12], 1 }
 0xbd7   :  { %6871 = vsyncpa [#allocation4], 1 }

</bundles_post_ra>
